<compile_context>
chip_gen: v5e
topology: v5e:2x2
jax: 0.10.0
libtpu: 0.0.40
codegen_flags: <defaults>
</compile_context>

<pallas_src>
import functools

import numpy as np

import jax
import jax.numpy as jnp
from jax.experimental import pallas as pl
from jax.experimental.pallas import tpu as pltpu

EPS = 1e-5
CIN_PAD = 8          # stem input channels zero-padded to one full f32 sublane tile


# ----------------------------------------------------------------------------
# Host-side constant matrices (entries 0/1, 1/4, 1/16 -> exact in bf16).
# In the (C, M) lane-dense layout every spatial rearrangement is a right-matmul.
# ----------------------------------------------------------------------------
def _one_hot_mat(rows, cols, pairs, val=1.0):
    m = np.zeros((rows, cols), np.float32)
    for r, c in pairs:
        m[r, c] += val
    return m


def _valid_select_mat(n, hin, win, hout, wout):
    """Select the top-left (hout, wout) block of every (hin, win) image."""
    pairs = [(i * hin * win + h * win + w, i * hout * wout + h * wout + w)
             for i in range(n) for h in range(hout) for w in range(wout)]
    return _one_hot_mat(n * hin * win, n * hout * wout, pairs)


def _stride_select_mat(n, hin, win, hout, wout, s):
    """Select positions (s*h, s*w) of every (hin, win) image."""
    pairs = [(i * hin * win + s * h * win + s * w,
              i * hout * wout + h * wout + w)
             for i in range(n) for h in range(hout) for w in range(wout)]
    return _one_hot_mat(n * hin * win, n * hout * wout, pairs)


def _pad_embed_mat(n, h, w, pad, ext):
    """Embed (h, w) images into zero-padded (h+2p, w+2p) images (+ext zero lanes)."""
    hp, wp = h + 2 * pad, w + 2 * pad
    pairs = [(i * h * w + r * w + c, i * hp * wp + (r + pad) * wp + (c + pad))
             for i in range(n) for r in range(h) for c in range(w)]
    return _one_hot_mat(n * h * w, n * hp * wp + ext, pairs)


def _avgpool_mat(n, h, w, k, s, p):
    """AvgPool2d (count_include_pad=True) as an exact (N*H*W, N*Ho*Wo) matrix."""
    ho, wo = (h + 2 * p - k) // s + 1, (w + 2 * p - k) // s + 1
    pairs = []
    for i in range(n):
        for a in range(ho):
            for b in range(wo):
                for dh in range(k):
                    for dw in range(k):
                        r, c = a * s + dh - p, b * s + dw - p
                        if 0 <= r < h and 0 <= c < w:
                            pairs.append((i * h * w + r * w + c,
                                          i * ho * wo + a * wo + b))
    return _one_hot_mat(n * h * w, n * ho * wo, pairs, 1.0 / (k * k)), ho, wo


def _global_avgpool_mat(n, h, w):
    pairs = [(i * h * w + r * w + c, i)
             for i in range(n) for r in range(h) for c in range(w)]
    return _one_hot_mat(n * h * w, n, pairs, 1.0 / (h * w))


# ----------------------------------------------------------------------------
# In-kernel helpers ((C, M) layout: channels on sublanes, batch*spatial on lanes)
# ----------------------------------------------------------------------------
def _bn(x, g, b):
    """Training-mode BatchNorm2d with batch statistics (biased, two-pass var)."""
    m = x.shape[1]
    mu = jnp.sum(x, axis=1, keepdims=True) * (1.0 / m)
    xc = x - mu
    var = jnp.sum(xc * xc, axis=1, keepdims=True) * (1.0 / m)
    return xc * jax.lax.rsqrt(var + EPS) * g + b


def _dot(a, b):
    """bf16 x bf16 MXU matmul with f32 accumulation."""
    return jnp.dot(a.astype(jnp.bfloat16), b.astype(jnp.bfloat16),
                   preferred_element_type=jnp.float32)


# ----------------------------------------------------------------------------
# DenseNet forward: one fused Pallas kernel
# ----------------------------------------------------------------------------
def densenet_forward(x_nchw, params, cfg):
    N, cin_img, H, W = x_nchw.shape
    c0 = cfg["input_param"][1]
    gr, bn_size = cfg["growth_rate"], cfg["bn_size"]
    bneck = bn_size * gr
    nc = cfg["num_classes"]
    pk, ps, pp = cfg["transition_pool_param"]
    bf16 = jnp.bfloat16

    # ----------------- stem geometry (conv0 7x7/s2/p3, maxpool 3x3/s2/p1)
    K0, P0 = 7, 3
    Hc = (H + 2 * P0 - K0) // 2 + 1
    Wc = (W + 2 * P0 - K0) // 2 + 1
    Hm = (Hc + 2 - 3) // 2 + 1
    Wm = (Wc + 2 - 3) // 2 + 1
    Hp0 = H + 2 * P0 + (H % 2)              # padded extent, rounded up to even
    Wp0 = W + 2 * P0 + (W % 2)
    Hph, Wph = Hp0 // 2, Wp0 // 2           # 2x2 phase-split grid
    Mph = N * Hph * Wph
    ext0 = (K0 // 2) * Wph + (K0 // 2)      # max in-phase tap shift (lane extension)

    # Phase-split the zero-padded input so the stride-2 conv0 is evaluated only
    # on its own output grid (no discarded padded-grid centers).
    x = jnp.transpose(x_nchw, (0, 2, 3, 1)).astype(jnp.float32)       # NCHW -> NHWC
    xp = jnp.pad(x, ((0, 0),
                     (P0, Hp0 - H - P0),
                     (P0, Wp0 - W - P0),
                     (0, CIN_PAD - cin_img)))
    phases = [jnp.transpose(xp[:, py::2, px::2, :], (3, 0, 1, 2)).reshape(CIN_PAD, Mph)
              for py in range(2) for px in range(2)]
    xph = jnp.pad(jnp.concatenate(phases, axis=0), ((0, 0), (0, ext0)))

    w0 = jnp.pad(params["conv0"], ((0, 0), (0, CIN_PAD - cin_img), (0, 0), (0, 0)))
    w0 = jnp.transpose(w0, (0, 2, 3, 1)).reshape(c0, K0 * K0 * CIN_PAD).astype(bf16)

    Hcp, Wcp = Hc + 2, Wc + 2                          # maxpool zero-padded grid
    Mcp = N * Hcp * Wcp
    ext1 = 2 * Wcp + 2

    inputs = [
        xph, w0,
        jnp.asarray(_valid_select_mat(N, Hph, Wph, Hc, Wc), bf16),
        params["norm0_g"].reshape(c0, 1), params["norm0_b"].reshape(c0, 1),
        jnp.asarray(_pad_embed_mat(N, Hc, Wc, 1, ext1), bf16),
        jnp.asarray(_stride_select_mat(N, Hcp, Wcp, Hm, Wm, 2), bf16),
    ]

    # ----------------- dense blocks / transitions / tail
    block_static = []
    hb, wb = Hm, Wm
    c = c0
    for bi, num_layers in enumerate(cfg["block_layers"]):
        hbp, wbp = hb + 2, wb + 2
        mbp = N * hbp * wbp
        block_static.append(dict(wp=wbp, mp=mbp))
        inputs.append(jnp.asarray(_pad_embed_mat(N, hb, wb, 1, 2 * wbp + 2), bf16))
        inputs.append(jnp.asarray(_valid_select_mat(N, hbp, wbp, hb, wb), bf16))
        for li in range(num_layers):
            cin = c + gr * li
            p = params[f"block{bi}_layer{li}"]
            inputs += [
                p["n1_g"].reshape(cin, 1), p["n1_b"].reshape(cin, 1),
                p["c1"][:, :, 0, 0].astype(bf16),
                p["n2_g"].reshape(bneck, 1), p["n2_b"].reshape(bneck, 1),
                jnp.transpose(p["c2"], (0, 2, 3, 1)).reshape(gr, 9 * bneck).astype(bf16),
            ]
        c += gr * num_layers
        if bi != len(cfg["block_layers"]) - 1:
            tp = params[f"trans{bi}"]
            amat, hb, wb = _avgpool_mat(N, hb, wb, pk, ps, pp)
            inputs += [
                tp["n_g"].reshape(c, 1), tp["n_b"].reshape(c, 1),
                tp["c"][:, :, 0, 0].astype(bf16),
                jnp.asarray(amat, bf16),
            ]
            c = c // 2
    inputs += [
        params["norm5_g"].reshape(c, 1), params["norm5_b"].reshape(c, 1),
        jnp.asarray(_global_avgpool_mat(N, hb, wb), bf16),
        params["fc_w"].astype(bf16),
        params["fc_b"].reshape(nc, 1),
    ]
    n_in = len(inputs)

    # ----------------- the single fused kernel
    # grid=(1,): the whole (tiny) network is one sequential VMEM-resident
    # program.
    # TODO(synk): no dual-TensorCore (v7x) grid split -- BatchNorm batch
    # statistics couple all rows and at these sizes launch overhead dominates.
    def kernel(*refs):
        it = iter(refs[:n_in])
        o_ref = refs[n_in]
        cols0_s, colsd_s = refs[n_in + 1], refs[n_in + 2]

        def nxt():
            return next(it)[...]

        # ---- stem: conv0 as ONE K = k*k*Cin matmul on the stride-2 phase grid
        xph_ref = next(it)                       # keep as ref; slice directly
        w0_v, sel0_v = nxt(), nxt()
        g0_v, b0_v = nxt(), nxt()
        pad1_v, sel1_v = nxt(), nxt()

        t = 0
        for dh in range(K0):
            for dw in range(K0):
                ph = (dh % 2) * 2 + (dw % 2)
                off = (dh // 2) * Wph + (dw // 2)
                cols0_s[CIN_PAD * t:CIN_PAD * (t + 1), :] = (
                    xph_ref[CIN_PAD * ph:CIN_PAD * (ph + 1), off:off + Mph])
                t += 1
        y = _dot(w0_v, cols0_s[...])             # (c0, Mph): conv on phase grid
        y = _dot(y, sel0_v)                      # (c0, N*Hc*Wc): valid centers
        h = jnp.maximum(_bn(y, g0_v, b0_v), 0.0)          # norm0 + relu0
        slab = _dot(h, pad1_v)                   # zero-padded slab for the maxpool
        mx = slab[:, 0:Mcp]
        for dh in range(3):
            for dw in range(3):
                if dh or dw:
                    off = dh * Wcp + dw
                    mx = jnp.maximum(mx, slab[:, off:off + Mcp])
        x = _dot(mx, sel1_v)                     # stride-2 pool centers

        # ---- dense blocks (+ transitions)
        for bi, num_layers in enumerate(cfg["block_layers"]):
            wbp, mbp = block_static[bi]["wp"], block_static[bi]["mp"]
            pmat_v, smat_v = nxt(), nxt()
            for _ in range(num_layers):
                g1_v, b1_v, w1_v = nxt(), nxt(), nxt()
                g2_v, b2_v, w2_v = nxt(), nxt(), nxt()
                h1 = jnp.maximum(_bn(x, g1_v, b1_v), 0.0)         # norm.1 + relu.1
                y1 = _dot(w1_v, h1)                               # conv.1 (1x1)
                h2 = jnp.maximum(_bn(y1, g2_v, b2_v), 0.0)        # norm.2 + relu.2
                slab = _dot(h2, pmat_v)                           # zero-pad embed
                t = 0
                for dh in range(3):
                    for dw in range(3):
                        off = dh * wbp + dw
                        colsd_s[bneck * t:bneck * (t + 1), 0:mbp] = (
                            slab[:, off:off + mbp])
                        t += 1
                y2 = _dot(w2_v, colsd_s[:, 0:mbp])                # conv.2 (3x3), K=72
                new = _dot(y2, smat_v)                            # valid centers
                # TODO(synk): training-mode F.dropout2d not implemented (rate=0.0)
                x = jnp.concatenate([x, new], axis=0)             # channel concat
            if bi != len(cfg["block_layers"]) - 1:
                tg_v, tb_v, tw_v, amat_v = nxt(), nxt(), nxt(), nxt()
                y = _dot(tw_v, _bn(x, tg_v, tb_v))                # norm -> conv
                x = _dot(jnp.maximum(y, 0.0), amat_v)             # relu -> avgpool

        # ---- tail: norm5 -> relu -> global avg pool -> Linear
        g5_v, b5_v, gmat_v, wfc_v, bfc_v = nxt(), nxt(), nxt(), nxt(), nxt()
        h = jnp.maximum(_bn(x, g5_v, b5_v), 0.0)
        feat = _dot(h, gmat_v)                                    # (C, N)
        o_ref[...] = _dot(wfc_v, feat) + bfc_v                    # (num_classes, N)

    out = pl.pallas_call(
        kernel,
        out_shape=jax.ShapeDtypeStruct((nc, N), jnp.float32),
        grid=(1,),
        in_specs=[pl.BlockSpec(a.shape, lambda i: (0, 0)) for a in inputs],
        out_specs=pl.BlockSpec((nc, N), lambda i: (0, 0)),
        scratch_shapes=[
            pltpu.VMEM((K0 * K0 * CIN_PAD, Mph), jnp.float32),            # stem im2col
            pltpu.VMEM((9 * bneck, max(b["mp"] for b in block_static)),
                       jnp.float32),                                      # 3x3 im2col
        ],
        compiler_params=pltpu.CompilerParams(
            dimension_semantics=("arbitrary",),
            vmem_limit_bytes=32 * 1024 * 1024),
    )(*inputs)
    return out.T                                                  # (N, num_classes)


# ----------------------------------------------------------------------------
# DenseNet parameters (same structure as the PyTorch module)
# ----------------------------------------------------------------------------
CONFIG = dict(
    input_param=(3, 16),     # (num_input_features, num_out_features)
    block_layers=(2, 2),
    num_classes=10,
    growth_rate=4,
    bn_size=2,
    dropout_rate=0.0,        # TODO(synk): training-mode F.dropout2d not implemented
    transition_pool_param=(2, 2, 0),
)


def init_params(key, cfg):
    c_in, c0 = cfg["input_param"]
    gr, bn_size = cfg["growth_rate"], cfg["bn_size"]
    keys = iter(jax.random.split(key, 512))

    def nrm(shape, scale=0.1):
        return scale * jax.random.normal(next(keys), shape, jnp.float32)

    def bn_params(c):
        g = 1.0 + 0.1 * jax.random.normal(next(keys), (c,), jnp.float32)
        b = 0.1 * jax.random.normal(next(keys), (c,), jnp.float32)
        return g, b

    params = {}
    params["conv0"] = nrm((c0, c_in, 7, 7))
    params["norm0_g"], params["norm0_b"] = bn_params(c0)

    c = c0
    for bi, num_layers in enumerate(cfg["block_layers"]):
        for li in range(num_layers):
            cin = c + gr * li
            p = {}
            p["n1_g"], p["n1_b"] = bn_params(cin)
            p["c1"] = nrm((bn_size * gr, cin, 1, 1))
            p["n2_g"], p["n2_b"] = bn_params(bn_size * gr)
            p["c2"] = nrm((gr, bn_size * gr, 3, 3))
            params[f"block{bi}_layer{li}"] = p
        c += gr * num_layers
        if bi != len(cfg["block_layers"]) - 1:
            t = {}
            t["n_g"], t["n_b"] = bn_params(c)
            t["c"] = nrm((c // 2, c, 1, 1))
            params[f"trans{bi}"] = t
            c = c // 2

    params["norm5_g"], params["norm5_b"] = bn_params(c)
    params["fc_w"] = nrm((cfg["num_classes"], c))
    params["fc_b"] = nrm((cfg["num_classes"],))
    return params


# ----------------------------------------------------------------------------
if __name__ == "__main__":
    key = jax.random.PRNGKey(0)
    k_param, k_input = jax.random.split(key)

    params = init_params(k_param, CONFIG)
    x = jax.random.normal(k_input, (2, 3, 32, 32), jnp.float32)   # NCHW like PyTorch

    fwd = jax.jit(functools.partial(densenet_forward, cfg=CONFIG))
    out = jax.block_until_ready(fwd(x, params))

    assert out.shape == (2, CONFIG["num_classes"]), out.shape
    assert bool(jnp.all(jnp.isfinite(out)))
    print("KERNEL_OK")
</pallas_src>

<mosaic_0001>
module attributes {stable_mosaic.version = 11 : i64} {
  func.func @kernel(%arg0: i32, %arg1: memref<32x782xf32, #tpu.memory_space<vmem>>, %arg2: memref<16x392xbf16, #tpu.memory_space<vmem>>, %arg3: memref<722x512xbf16, #tpu.memory_space<vmem>>, %arg4: memref<16x1xf32, #tpu.memory_space<vmem>>, %arg5: memref<16x1xf32, #tpu.memory_space<vmem>>, %arg6: memref<512x686xbf16, #tpu.memory_space<vmem>>, %arg7: memref<648x128xbf16, #tpu.memory_space<vmem>>, %arg8: memref<128x222xbf16, #tpu.memory_space<vmem>>, %arg9: memref<200x128xbf16, #tpu.memory_space<vmem>>, %arg10: memref<16x1xf32, #tpu.memory_space<vmem>>, %arg11: memref<16x1xf32, #tpu.memory_space<vmem>>, %arg12: memref<8x16xbf16, #tpu.memory_space<vmem>>, %arg13: memref<8x1xf32, #tpu.memory_space<vmem>>, %arg14: memref<8x1xf32, #tpu.memory_space<vmem>>, %arg15: memref<4x72xbf16, #tpu.memory_space<vmem>>, %arg16: memref<20x1xf32, #tpu.memory_space<vmem>>, %arg17: memref<20x1xf32, #tpu.memory_space<vmem>>, %arg18: memref<8x20xbf16, #tpu.memory_space<vmem>>, %arg19: memref<8x1xf32, #tpu.memory_space<vmem>>, %arg20: memref<8x1xf32, #tpu.memory_space<vmem>>, %arg21: memref<4x72xbf16, #tpu.memory_space<vmem>>, %arg22: memref<24x1xf32, #tpu.memory_space<vmem>>, %arg23: memref<24x1xf32, #tpu.memory_space<vmem>>, %arg24: memref<12x24xbf16, #tpu.memory_space<vmem>>, %arg25: memref<128x32xbf16, #tpu.memory_space<vmem>>, %arg26: memref<32x86xbf16, #tpu.memory_space<vmem>>, %arg27: memref<72x32xbf16, #tpu.memory_space<vmem>>, %arg28: memref<12x1xf32, #tpu.memory_space<vmem>>, %arg29: memref<12x1xf32, #tpu.memory_space<vmem>>, %arg30: memref<8x12xbf16, #tpu.memory_space<vmem>>, %arg31: memref<8x1xf32, #tpu.memory_space<vmem>>, %arg32: memref<8x1xf32, #tpu.memory_space<vmem>>, %arg33: memref<4x72xbf16, #tpu.memory_space<vmem>>, %arg34: memref<16x1xf32, #tpu.memory_space<vmem>>, %arg35: memref<16x1xf32, #tpu.memory_space<vmem>>, %arg36: memref<8x16xbf16, #tpu.memory_space<vmem>>, %arg37: memref<8x1xf32, #tpu.memory_space<vmem>>, %arg38: memref<8x1xf32, #tpu.memory_space<vmem>>, %arg39: memref<4x72xbf16, #tpu.memory_space<vmem>>, %arg40: memref<20x1xf32, #tpu.memory_space<vmem>>, %arg41: memref<20x1xf32, #tpu.memory_space<vmem>>, %arg42: memref<32x2xbf16, #tpu.memory_space<vmem>>, %arg43: memref<10x20xbf16, #tpu.memory_space<vmem>>, %arg44: memref<10x1xf32, #tpu.memory_space<vmem>>, %arg45: memref<10x2xf32, #tpu.memory_space<vmem>>, %arg46: memref<392x722xf32, #tpu.memory_space<vmem>>, %arg47: memref<72x200xf32, #tpu.memory_space<vmem>>) attributes {dimension_semantics = [#tpu.dimension_semantics<arbitrary>], iteration_bounds = array<i64: 1>, scalar_prefetch = 0 : i64, scratch_operands = 2 : i64, tpu.core_type = #tpu.core_type<tc>, window_params = [{pipeline_mode = #tpu.pipeline_mode<synchronous>, transform_indices = @transform_0, window_bounds = array<i64: 32, 782>}, {pipeline_mode = #tpu.pipeline_mode<synchronous>, transform_indices = @transform_1, window_bounds = array<i64: 16, 392>}, {pipeline_mode = #tpu.pipeline_mode<synchronous>, transform_indices = @transform_2, window_bounds = array<i64: 722, 512>}, {pipeline_mode = #tpu.pipeline_mode<synchronous>, transform_indices = @transform_3, window_bounds = array<i64: 16, 1>}, {pipeline_mode = #tpu.pipeline_mode<synchronous>, transform_indices = @transform_4, window_bounds = array<i64: 16, 1>}, {pipeline_mode = #tpu.pipeline_mode<synchronous>, transform_indices = @transform_5, window_bounds = array<i64: 512, 686>}, {pipeline_mode = #tpu.pipeline_mode<synchronous>, transform_indices = @transform_6, window_bounds = array<i64: 648, 128>}, {pipeline_mode = #tpu.pipeline_mode<synchronous>, transform_indices = @transform_7, window_bounds = array<i64: 128, 222>}, {pipeline_mode = #tpu.pipeline_mode<synchronous>, transform_indices = @transform_8, window_bounds = array<i64: 200, 128>}, {pipeline_mode = #tpu.pipeline_mode<synchronous>, transform_indices = @transform_9, window_bounds = array<i64: 16, 1>}, {pipeline_mode = #tpu.pipeline_mode<synchronous>, transform_indices = @transform_10, window_bounds = array<i64: 16, 1>}, {pipeline_mode = #tpu.pipeline_mode<synchronous>, transform_indices = @transform_11, window_bounds = array<i64: 8, 16>}, {pipeline_mode = #tpu.pipeline_mode<synchronous>, transform_indices = @transform_12, window_bounds = array<i64: 8, 1>}, {pipeline_mode = #tpu.pipeline_mode<synchronous>, transform_indices = @transform_13, window_bounds = array<i64: 8, 1>}, {pipeline_mode = #tpu.pipeline_mode<synchronous>, transform_indices = @transform_14, window_bounds = array<i64: 4, 72>}, {pipeline_mode = #tpu.pipeline_mode<synchronous>, transform_indices = @transform_15, window_bounds = array<i64: 20, 1>}, {pipeline_mode = #tpu.pipeline_mode<synchronous>, transform_indices = @transform_16, window_bounds = array<i64: 20, 1>}, {pipeline_mode = #tpu.pipeline_mode<synchronous>, transform_indices = @transform_17, window_bounds = array<i64: 8, 20>}, {pipeline_mode = #tpu.pipeline_mode<synchronous>, transform_indices = @transform_18, window_bounds = array<i64: 8, 1>}, {pipeline_mode = #tpu.pipeline_mode<synchronous>, transform_indices = @transform_19, window_bounds = array<i64: 8, 1>}, {pipeline_mode = #tpu.pipeline_mode<synchronous>, transform_indices = @transform_20, window_bounds = array<i64: 4, 72>}, {pipeline_mode = #tpu.pipeline_mode<synchronous>, transform_indices = @transform_21, window_bounds = array<i64: 24, 1>}, {pipeline_mode = #tpu.pipeline_mode<synchronous>, transform_indices = @transform_22, window_bounds = array<i64: 24, 1>}, {pipeline_mode = #tpu.pipeline_mode<synchronous>, transform_indices = @transform_23, window_bounds = array<i64: 12, 24>}, {pipeline_mode = #tpu.pipeline_mode<synchronous>, transform_indices = @transform_24, window_bounds = array<i64: 128, 32>}, {pipeline_mode = #tpu.pipeline_mode<synchronous>, transform_indices = @transform_25, window_bounds = array<i64: 32, 86>}, {pipeline_mode = #tpu.pipeline_mode<synchronous>, transform_indices = @transform_26, window_bounds = array<i64: 72, 32>}, {pipeline_mode = #tpu.pipeline_mode<synchronous>, transform_indices = @transform_27, window_bounds = array<i64: 12, 1>}, {pipeline_mode = #tpu.pipeline_mode<synchronous>, transform_indices = @transform_28, window_bounds = array<i64: 12, 1>}, {pipeline_mode = #tpu.pipeline_mode<synchronous>, transform_indices = @transform_29, window_bounds = array<i64: 8, 12>}, {pipeline_mode = #tpu.pipeline_mode<synchronous>, transform_indices = @transform_30, window_bounds = array<i64: 8, 1>}, {pipeline_mode = #tpu.pipeline_mode<synchronous>, transform_indices = @transform_31, window_bounds = array<i64: 8, 1>}, {pipeline_mode = #tpu.pipeline_mode<synchronous>, transform_indices = @transform_32, window_bounds = array<i64: 4, 72>}, {pipeline_mode = #tpu.pipeline_mode<synchronous>, transform_indices = @transform_33, window_bounds = array<i64: 16, 1>}, {pipeline_mode = #tpu.pipeline_mode<synchronous>, transform_indices = @transform_34, window_bounds = array<i64: 16, 1>}, {pipeline_mode = #tpu.pipeline_mode<synchronous>, transform_indices = @transform_35, window_bounds = array<i64: 8, 16>}, {pipeline_mode = #tpu.pipeline_mode<synchronous>, transform_indices = @transform_36, window_bounds = array<i64: 8, 1>}, {pipeline_mode = #tpu.pipeline_mode<synchronous>, transform_indices = @transform_37, window_bounds = array<i64: 8, 1>}, {pipeline_mode = #tpu.pipeline_mode<synchronous>, transform_indices = @transform_38, window_bounds = array<i64: 4, 72>}, {pipeline_mode = #tpu.pipeline_mode<synchronous>, transform_indices = @transform_39, window_bounds = array<i64: 20, 1>}, {pipeline_mode = #tpu.pipeline_mode<synchronous>, transform_indices = @transform_40, window_bounds = array<i64: 20, 1>}, {pipeline_mode = #tpu.pipeline_mode<synchronous>, transform_indices = @transform_41, window_bounds = array<i64: 32, 2>}, {pipeline_mode = #tpu.pipeline_mode<synchronous>, transform_indices = @transform_42, window_bounds = array<i64: 10, 20>}, {pipeline_mode = #tpu.pipeline_mode<synchronous>, transform_indices = @transform_43, window_bounds = array<i64: 10, 1>}, {pipeline_mode = #tpu.pipeline_mode<synchronous>, transform_indices = @transform_44, window_bounds = array<i64: 10, 2>}]} {
    %c0 = arith.constant 0 : index
    %c0_0 = arith.constant 0 : index
    %0 = vector.load %arg2[%c0, %c0_0] : memref<16x392xbf16, #tpu.memory_space<vmem>>, vector<16x392xbf16>
    %c0_1 = arith.constant 0 : index
    %c0_2 = arith.constant 0 : index
    %1 = vector.load %arg3[%c0_1, %c0_2] : memref<722x512xbf16, #tpu.memory_space<vmem>>, vector<722x512xbf16>
    %c0_3 = arith.constant 0 : index
    %c0_4 = arith.constant 0 : index
    %2 = vector.load %arg4[%c0_3, %c0_4] : memref<16x1xf32, #tpu.memory_space<vmem>>, vector<16x1xf32>
    %c0_5 = arith.constant 0 : index
    %c0_6 = arith.constant 0 : index
    %3 = vector.load %arg5[%c0_5, %c0_6] : memref<16x1xf32, #tpu.memory_space<vmem>>, vector<16x1xf32>
    %c0_7 = arith.constant 0 : index
    %c0_8 = arith.constant 0 : index
    %4 = vector.load %arg6[%c0_7, %c0_8] : memref<512x686xbf16, #tpu.memory_space<vmem>>, vector<512x686xbf16>
    %c0_9 = arith.constant 0 : index
    %c0_10 = arith.constant 0 : index
    %5 = vector.load %arg7[%c0_9, %c0_10] : memref<648x128xbf16, #tpu.memory_space<vmem>>, vector<648x128xbf16>
    %c0_11 = arith.constant 0 : index
    %c0_12 = arith.constant 0 : index
    %6 = vector.load %arg1[%c0_11, %c0_12] : memref<32x782xf32, #tpu.memory_space<vmem>>, vector<8x722xf32>
    %c0_13 = arith.constant 0 : index
    %c0_14 = arith.constant 0 : index
    %7 = vector.load %arg46[%c0_13, %c0_14] : memref<392x722xf32, #tpu.memory_space<vmem>>, vector<8x722xf32>
    tpu.vector_store %arg46[%c0_13, %c0_14], %6 {strides = array<i32>} : memref<392x722xf32, #tpu.memory_space<vmem>>, vector<8x722xf32>,
    %c8 = arith.constant 8 : index
    %c0_15 = arith.constant 0 : index
    %8 = vector.load %arg1[%c8, %c0_15] : memref<32x782xf32, #tpu.memory_space<vmem>>, vector<8x722xf32>
    %c8_16 = arith.constant 8 : index
    %c0_17 = arith.constant 0 : index
    %9 = vector.load %arg46[%c8_16, %c0_17] : memref<392x722xf32, #tpu.memory_space<vmem>>, vector<8x722xf32>
    tpu.vector_store %arg46[%c8_16, %c0_17], %8 {strides = array<i32>} : memref<392x722xf32, #tpu.memory_space<vmem>>, vector<8x722xf32>,
    %c0_18 = arith.constant 0 : index
    %c1 = arith.constant 1 : index
    %10 = vector.load %arg1[%c0_18, %c1] : memref<32x782xf32, #tpu.memory_space<vmem>>, vector<8x722xf32>
    %c16 = arith.constant 16 : index
    %c0_19 = arith.constant 0 : index
    %11 = vector.load %arg46[%c16, %c0_19] : memref<392x722xf32, #tpu.memory_space<vmem>>, vector<8x722xf32>
    tpu.vector_store %arg46[%c16, %c0_19], %10 {strides = array<i32>} : memref<392x722xf32, #tpu.memory_space<vmem>>, vector<8x722xf32>,
    %c8_20 = arith.constant 8 : index
    %c1_21 = arith.constant 1 : index
    %12 = vector.load %arg1[%c8_20, %c1_21] : memref<32x782xf32, #tpu.memory_space<vmem>>, vector<8x722xf32>
    %c24 = arith.constant 24 : index
    %c0_22 = arith.constant 0 : index
    %13 = vector.load %arg46[%c24, %c0_22] : memref<392x722xf32, #tpu.memory_space<vmem>>, vector<8x722xf32>
    tpu.vector_store %arg46[%c24, %c0_22], %12 {strides = array<i32>} : memref<392x722xf32, #tpu.memory_space<vmem>>, vector<8x722xf32>,
    %c0_23 = arith.constant 0 : index
    %c2 = arith.constant 2 : index
    %14 = vector.load %arg1[%c0_23, %c2] : memref<32x782xf32, #tpu.memory_space<vmem>>, vector<8x722xf32>
    %c32 = arith.constant 32 : index
    %c0_24 = arith.constant 0 : index
    %15 = vector.load %arg46[%c32, %c0_24] : memref<392x722xf32, #tpu.memory_space<vmem>>, vector<8x722xf32>
    tpu.vector_store %arg46[%c32, %c0_24], %14 {strides = array<i32>} : memref<392x722xf32, #tpu.memory_space<vmem>>, vector<8x722xf32>,
    %c8_25 = arith.constant 8 : index
    %c2_26 = arith.constant 2 : index
    %16 = vector.load %arg1[%c8_25, %c2_26] : memref<32x782xf32, #tpu.memory_space<vmem>>, vector<8x722xf32>
    %c40 = arith.constant 40 : index
    %c0_27 = arith.constant 0 : index
    %17 = vector.load %arg46[%c40, %c0_27] : memref<392x722xf32, #tpu.memory_space<vmem>>, vector<8x722xf32>
    tpu.vector_store %arg46[%c40, %c0_27], %16 {strides = array<i32>} : memref<392x722xf32, #tpu.memory_space<vmem>>, vector<8x722xf32>,
    %c0_28 = arith.constant 0 : index
    %c3 = arith.constant 3 : index
    %18 = vector.load %arg1[%c0_28, %c3] : memref<32x782xf32, #tpu.memory_space<vmem>>, vector<8x722xf32>
    %c48 = arith.constant 48 : index
    %c0_29 = arith.constant 0 : index
    %19 = vector.load %arg46[%c48, %c0_29] : memref<392x722xf32, #tpu.memory_space<vmem>>, vector<8x722xf32>
    tpu.vector_store %arg46[%c48, %c0_29], %18 {strides = array<i32>} : memref<392x722xf32, #tpu.memory_space<vmem>>, vector<8x722xf32>,
    %c16_30 = arith.constant 16 : index
    %c0_31 = arith.constant 0 : index
    %20 = vector.load %arg1[%c16_30, %c0_31] : memref<32x782xf32, #tpu.memory_space<vmem>>, vector<8x722xf32>
    %c56 = arith.constant 56 : index
    %c0_32 = arith.constant 0 : index
    %21 = vector.load %arg46[%c56, %c0_32] : memref<392x722xf32, #tpu.memory_space<vmem>>, vector<8x722xf32>
    tpu.vector_store %arg46[%c56, %c0_32], %20 {strides = array<i32>} : memref<392x722xf32, #tpu.memory_space<vmem>>, vector<8x722xf32>,
    %c24_33 = arith.constant 24 : index
    %c0_34 = arith.constant 0 : index
    %22 = vector.load %arg1[%c24_33, %c0_34] : memref<32x782xf32, #tpu.memory_space<vmem>>, vector<8x722xf32>
    %c64 = arith.constant 64 : index
    %c0_35 = arith.constant 0 : index
    %23 = vector.load %arg46[%c64, %c0_35] : memref<392x722xf32, #tpu.memory_space<vmem>>, vector<8x722xf32>
    tpu.vector_store %arg46[%c64, %c0_35], %22 {strides = array<i32>} : memref<392x722xf32, #tpu.memory_space<vmem>>, vector<8x722xf32>,
    %c16_36 = arith.constant 16 : index
    %c1_37 = arith.constant 1 : index
    %24 = vector.load %arg1[%c16_36, %c1_37] : memref<32x782xf32, #tpu.memory_space<vmem>>, vector<8x722xf32>
    %c72 = arith.constant 72 : index
    %c0_38 = arith.constant 0 : index
    %25 = vector.load %arg46[%c72, %c0_38] : memref<392x722xf32, #tpu.memory_space<vmem>>, vector<8x722xf32>
    tpu.vector_store %arg46[%c72, %c0_38], %24 {strides = array<i32>} : memref<392x722xf32, #tpu.memory_space<vmem>>, vector<8x722xf32>,
    %c24_39 = arith.constant 24 : index
    %c1_40 = arith.constant 1 : index
    %26 = vector.load %arg1[%c24_39, %c1_40] : memref<32x782xf32, #tpu.memory_space<vmem>>, vector<8x722xf32>
    %c80 = arith.constant 80 : index
    %c0_41 = arith.constant 0 : index
    %27 = vector.load %arg46[%c80, %c0_41] : memref<392x722xf32, #tpu.memory_space<vmem>>, vector<8x722xf32>
    tpu.vector_store %arg46[%c80, %c0_41], %26 {strides = array<i32>} : memref<392x722xf32, #tpu.memory_space<vmem>>, vector<8x722xf32>,
    %c16_42 = arith.constant 16 : index
    %c2_43 = arith.constant 2 : index
    %28 = vector.load %arg1[%c16_42, %c2_43] : memref<32x782xf32, #tpu.memory_space<vmem>>, vector<8x722xf32>
    %c88 = arith.constant 88 : index
    %c0_44 = arith.constant 0 : index
    %29 = vector.load %arg46[%c88, %c0_44] : memref<392x722xf32, #tpu.memory_space<vmem>>, vector<8x722xf32>
    tpu.vector_store %arg46[%c88, %c0_44], %28 {strides = array<i32>} : memref<392x722xf32, #tpu.memory_space<vmem>>, vector<8x722xf32>,
    %c24_45 = arith.constant 24 : index
    %c2_46 = arith.constant 2 : index
    %30 = vector.load %arg1[%c24_45, %c2_46] : memref<32x782xf32, #tpu.memory_space<vmem>>, vector<8x722xf32>
    %c96 = arith.constant 96 : index
    %c0_47 = arith.constant 0 : index
    %31 = vector.load %arg46[%c96, %c0_47] : memref<392x722xf32, #tpu.memory_space<vmem>>, vector<8x722xf32>
    tpu.vector_store %arg46[%c96, %c0_47], %30 {strides = array<i32>} : memref<392x722xf32, #tpu.memory_space<vmem>>, vector<8x722xf32>,
    %c16_48 = arith.constant 16 : index
    %c3_49 = arith.constant 3 : index
    %32 = vector.load %arg1[%c16_48, %c3_49] : memref<32x782xf32, #tpu.memory_space<vmem>>, vector<8x722xf32>
    %c104 = arith.constant 104 : index
    %c0_50 = arith.constant 0 : index
    %33 = vector.load %arg46[%c104, %c0_50] : memref<392x722xf32, #tpu.memory_space<vmem>>, vector<8x722xf32>
    tpu.vector_store %arg46[%c104, %c0_50], %32 {strides = array<i32>} : memref<392x722xf32, #tpu.memory_space<vmem>>, vector<8x722xf32>,
    %c0_51 = arith.constant 0 : index
    %c19 = arith.constant 19 : index
    %34 = vector.load %arg1[%c0_51, %c19] : memref<32x782xf32, #tpu.memory_space<vmem>>, vector<8x722xf32>
    %c112 = arith.constant 112 : index
    %c0_52 = arith.constant 0 : index
    %35 = vector.load %arg46[%c112, %c0_52] : memref<392x722xf32, #tpu.memory_space<vmem>>, vector<8x722xf32>
    tpu.vector_store %arg46[%c112, %c0_52], %34 {strides = array<i32>} : memref<392x722xf32, #tpu.memory_space<vmem>>, vector<8x722xf32>,
    %c8_53 = arith.constant 8 : index
    %c19_54 = arith.constant 19 : index
    %36 = vector.load %arg1[%c8_53, %c19_54] : memref<32x782xf32, #tpu.memory_space<vmem>>, vector<8x722xf32>
    %c120 = arith.constant 120 : index
    %c0_55 = arith.constant 0 : index
    %37 = vector.load %arg46[%c120, %c0_55] : memref<392x722xf32, #tpu.memory_space<vmem>>, vector<8x722xf32>
    tpu.vector_store %arg46[%c120, %c0_55], %36 {strides = array<i32>} : memref<392x722xf32, #tpu.memory_space<vmem>>, vector<8x722xf32>,
    %c0_56 = arith.constant 0 : index
    %c20 = arith.constant 20 : index
    %38 = vector.load %arg1[%c0_56, %c20] : memref<32x782xf32, #tpu.memory_space<vmem>>, vector<8x722xf32>
    %c128 = arith.constant 128 : index
    %c0_57 = arith.constant 0 : index
    %39 = vector.load %arg46[%c128, %c0_57] : memref<392x722xf32, #tpu.memory_space<vmem>>, vector<8x722xf32>
    tpu.vector_store %arg46[%c128, %c0_57], %38 {strides = array<i32>} : memref<392x722xf32, #tpu.memory_space<vmem>>, vector<8x722xf32>,
    %c8_58 = arith.constant 8 : index
    %c20_59 = arith.constant 20 : index
    %40 = vector.load %arg1[%c8_58, %c20_59] : memref<32x782xf32, #tpu.memory_space<vmem>>, vector<8x722xf32>
    %c136 = arith.constant 136 : index
    %c0_60 = arith.constant 0 : index
    %41 = vector.load %arg46[%c136, %c0_60] : memref<392x722xf32, #tpu.memory_space<vmem>>, vector<8x722xf32>
    tpu.vector_store %arg46[%c136, %c0_60], %40 {strides = array<i32>} : memref<392x722xf32, #tpu.memory_space<vmem>>, vector<8x722xf32>,
    %c0_61 = arith.constant 0 : index
    %c21 = arith.constant 21 : index
    %42 = vector.load %arg1[%c0_61, %c21] : memref<32x782xf32, #tpu.memory_space<vmem>>, vector<8x722xf32>
    %c144 = arith.constant 144 : index
    %c0_62 = arith.constant 0 : index
    %43 = vector.load %arg46[%c144, %c0_62] : memref<392x722xf32, #tpu.memory_space<vmem>>, vector<8x722xf32>
    tpu.vector_store %arg46[%c144, %c0_62], %42 {strides = array<i32>} : memref<392x722xf32, #tpu.memory_space<vmem>>, vector<8x722xf32>,
    %c8_63 = arith.constant 8 : index
    %c21_64 = arith.constant 21 : index
    %44 = vector.load %arg1[%c8_63, %c21_64] : memref<32x782xf32, #tpu.memory_space<vmem>>, vector<8x722xf32>
    %c152 = arith.constant 152 : index
    %c0_65 = arith.constant 0 : index
    %45 = vector.load %arg46[%c152, %c0_65] : memref<392x722xf32, #tpu.memory_space<vmem>>, vector<8x722xf32>
    tpu.vector_store %arg46[%c152, %c0_65], %44 {strides = array<i32>} : memref<392x722xf32, #tpu.memory_space<vmem>>, vector<8x722xf32>,
    %c0_66 = arith.constant 0 : index
    %c22 = arith.constant 22 : index
    %46 = vector.load %arg1[%c0_66, %c22] : memref<32x782xf32, #tpu.memory_space<vmem>>, vector<8x722xf32>
    %c160 = arith.constant 160 : index
    %c0_67 = arith.constant 0 : index
    %47 = vector.load %arg46[%c160, %c0_67] : memref<392x722xf32, #tpu.memory_space<vmem>>, vector<8x722xf32>
    tpu.vector_store %arg46[%c160, %c0_67], %46 {strides = array<i32>} : memref<392x722xf32, #tpu.memory_space<vmem>>, vector<8x722xf32>,
    %c16_68 = arith.constant 16 : index
    %c19_69 = arith.constant 19 : index
    %48 = vector.load %arg1[%c16_68, %c19_69] : memref<32x782xf32, #tpu.memory_space<vmem>>, vector<8x722xf32>
    %c168 = arith.constant 168 : index
    %c0_70 = arith.constant 0 : index
    %49 = vector.load %arg46[%c168, %c0_70] : memref<392x722xf32, #tpu.memory_space<vmem>>, vector<8x722xf32>
    tpu.vector_store %arg46[%c168, %c0_70], %48 {strides = array<i32>} : memref<392x722xf32, #tpu.memory_space<vmem>>, vector<8x722xf32>,
    %c24_71 = arith.constant 24 : index
    %c19_72 = arith.constant 19 : index
    %50 = vector.load %arg1[%c24_71, %c19_72] : memref<32x782xf32, #tpu.memory_space<vmem>>, vector<8x722xf32>
    %c176 = arith.constant 176 : index
    %c0_73 = arith.constant 0 : index
    %51 = vector.load %arg46[%c176, %c0_73] : memref<392x722xf32, #tpu.memory_space<vmem>>, vector<8x722xf32>
    tpu.vector_store %arg46[%c176, %c0_73], %50 {strides = array<i32>} : memref<392x722xf32, #tpu.memory_space<vmem>>, vector<8x722xf32>,
    %c16_74 = arith.constant 16 : index
    %c20_75 = arith.constant 20 : index
    %52 = vector.load %arg1[%c16_74, %c20_75] : memref<32x782xf32, #tpu.memory_space<vmem>>, vector<8x722xf32>
    %c184 = arith.constant 184 : index
    %c0_76 = arith.constant 0 : index
    %53 = vector.load %arg46[%c184, %c0_76] : memref<392x722xf32, #tpu.memory_space<vmem>>, vector<8x722xf32>
    tpu.vector_store %arg46[%c184, %c0_76], %52 {strides = array<i32>} : memref<392x722xf32, #tpu.memory_space<vmem>>, vector<8x722xf32>,
    %c24_77 = arith.constant 24 : index
    %c20_78 = arith.constant 20 : index
    %54 = vector.load %arg1[%c24_77, %c20_78] : memref<32x782xf32, #tpu.memory_space<vmem>>, vector<8x722xf32>
    %c192 = arith.constant 192 : index
    %c0_79 = arith.constant 0 : index
    %55 = vector.load %arg46[%c192, %c0_79] : memref<392x722xf32, #tpu.memory_space<vmem>>, vector<8x722xf32>
    tpu.vector_store %arg46[%c192, %c0_79], %54 {strides = array<i32>} : memref<392x722xf32, #tpu.memory_space<vmem>>, vector<8x722xf32>,
    %c16_80 = arith.constant 16 : index
    %c21_81 = arith.constant 21 : index
    %56 = vector.load %arg1[%c16_80, %c21_81] : memref<32x782xf32, #tpu.memory_space<vmem>>, vector<8x722xf32>
    %c200 = arith.constant 200 : index
    %c0_82 = arith.constant 0 : index
    %57 = vector.load %arg46[%c200, %c0_82] : memref<392x722xf32, #tpu.memory_space<vmem>>, vector<8x722xf32>
    tpu.vector_store %arg46[%c200, %c0_82], %56 {strides = array<i32>} : memref<392x722xf32, #tpu.memory_space<vmem>>, vector<8x722xf32>,
    %c24_83 = arith.constant 24 : index
    %c21_84 = arith.constant 21 : index
    %58 = vector.load %arg1[%c24_83, %c21_84] : memref<32x782xf32, #tpu.memory_space<vmem>>, vector<8x722xf32>
    %c208 = arith.constant 208 : index
    %c0_85 = arith.constant 0 : index
    %59 = vector.load %arg46[%c208, %c0_85] : memref<392x722xf32, #tpu.memory_space<vmem>>, vector<8x722xf32>
    tpu.vector_store %arg46[%c208, %c0_85], %58 {strides = array<i32>} : memref<392x722xf32, #tpu.memory_space<vmem>>, vector<8x722xf32>,
    %c16_86 = arith.constant 16 : index
    %c22_87 = arith.constant 22 : index
    %60 = vector.load %arg1[%c16_86, %c22_87] : memref<32x782xf32, #tpu.memory_space<vmem>>, vector<8x722xf32>
    %c216 = arith.constant 216 : index
    %c0_88 = arith.constant 0 : index
    %61 = vector.load %arg46[%c216, %c0_88] : memref<392x722xf32, #tpu.memory_space<vmem>>, vector<8x722xf32>
    tpu.vector_store %arg46[%c216, %c0_88], %60 {strides = array<i32>} : memref<392x722xf32, #tpu.memory_space<vmem>>, vector<8x722xf32>,
    %c0_89 = arith.constant 0 : index
    %c38 = arith.constant 38 : index
    %62 = vector.load %arg1[%c0_89, %c38] : memref<32x782xf32, #tpu.memory_space<vmem>>, vector<8x722xf32>
    %c224 = arith.constant 224 : index
    %c0_90 = arith.constant 0 : index
    %63 = vector.load %arg46[%c224, %c0_90] : memref<392x722xf32, #tpu.memory_space<vmem>>, vector<8x722xf32>
    tpu.vector_store %arg46[%c224, %c0_90], %62 {strides = array<i32>} : memref<392x722xf32, #tpu.memory_space<vmem>>, vector<8x722xf32>,
    %c8_91 = arith.constant 8 : index
    %c38_92 = arith.constant 38 : index
    %64 = vector.load %arg1[%c8_91, %c38_92] : memref<32x782xf32, #tpu.memory_space<vmem>>, vector<8x722xf32>
    %c232 = arith.constant 232 : index
    %c0_93 = arith.constant 0 : index
    %65 = vector.load %arg46[%c232, %c0_93] : memref<392x722xf32, #tpu.memory_space<vmem>>, vector<8x722xf32>
    tpu.vector_store %arg46[%c232, %c0_93], %64 {strides = array<i32>} : memref<392x722xf32, #tpu.memory_space<vmem>>, vector<8x722xf32>,
    %c0_94 = arith.constant 0 : index
    %c39 = arith.constant 39 : index
    %66 = vector.load %arg1[%c0_94, %c39] : memref<32x782xf32, #tpu.memory_space<vmem>>, vector<8x722xf32>
    %c240 = arith.constant 240 : index
    %c0_95 = arith.constant 0 : index
    %67 = vector.load %arg46[%c240, %c0_95] : memref<392x722xf32, #tpu.memory_space<vmem>>, vector<8x722xf32>
    tpu.vector_store %arg46[%c240, %c0_95], %66 {strides = array<i32>} : memref<392x722xf32, #tpu.memory_space<vmem>>, vector<8x722xf32>,
    %c8_96 = arith.constant 8 : index
    %c39_97 = arith.constant 39 : index
    %68 = vector.load %arg1[%c8_96, %c39_97] : memref<32x782xf32, #tpu.memory_space<vmem>>, vector<8x722xf32>
    %c248 = arith.constant 248 : index
    %c0_98 = arith.constant 0 : index
    %69 = vector.load %arg46[%c248, %c0_98] : memref<392x722xf32, #tpu.memory_space<vmem>>, vector<8x722xf32>
    tpu.vector_store %arg46[%c248, %c0_98], %68 {strides = array<i32>} : memref<392x722xf32, #tpu.memory_space<vmem>>, vector<8x722xf32>,
    %c0_99 = arith.constant 0 : index
    %c40_100 = arith.constant 40 : index
    %70 = vector.load %arg1[%c0_99, %c40_100] : memref<32x782xf32, #tpu.memory_space<vmem>>, vector<8x722xf32>
    %c256 = arith.constant 256 : index
    %c0_101 = arith.constant 0 : index
    %71 = vector.load %arg46[%c256, %c0_101] : memref<392x722xf32, #tpu.memory_space<vmem>>, vector<8x722xf32>
    tpu.vector_store %arg46[%c256, %c0_101], %70 {strides = array<i32>} : memref<392x722xf32, #tpu.memory_space<vmem>>, vector<8x722xf32>,
    %c8_102 = arith.constant 8 : index
    %c40_103 = arith.constant 40 : index
    %72 = vector.load %arg1[%c8_102, %c40_103] : memref<32x782xf32, #tpu.memory_space<vmem>>, vector<8x722xf32>
    %c264 = arith.constant 264 : index
    %c0_104 = arith.constant 0 : index
    %73 = vector.load %arg46[%c264, %c0_104] : memref<392x722xf32, #tpu.memory_space<vmem>>, vector<8x722xf32>
    tpu.vector_store %arg46[%c264, %c0_104], %72 {strides = array<i32>} : memref<392x722xf32, #tpu.memory_space<vmem>>, vector<8x722xf32>,
    %c0_105 = arith.constant 0 : index
    %c41 = arith.constant 41 : index
    %74 = vector.load %arg1[%c0_105, %c41] : memref<32x782xf32, #tpu.memory_space<vmem>>, vector<8x722xf32>
    %c272 = arith.constant 272 : index
    %c0_106 = arith.constant 0 : index
    %75 = vector.load %arg46[%c272, %c0_106] : memref<392x722xf32, #tpu.memory_space<vmem>>, vector<8x722xf32>
    tpu.vector_store %arg46[%c272, %c0_106], %74 {strides = array<i32>} : memref<392x722xf32, #tpu.memory_space<vmem>>, vector<8x722xf32>,
    %c16_107 = arith.constant 16 : index
    %c38_108 = arith.constant 38 : index
    %76 = vector.load %arg1[%c16_107, %c38_108] : memref<32x782xf32, #tpu.memory_space<vmem>>, vector<8x722xf32>
    %c280 = arith.constant 280 : index
    %c0_109 = arith.constant 0 : index
    %77 = vector.load %arg46[%c280, %c0_109] : memref<392x722xf32, #tpu.memory_space<vmem>>, vector<8x722xf32>
    tpu.vector_store %arg46[%c280, %c0_109], %76 {strides = array<i32>} : memref<392x722xf32, #tpu.memory_space<vmem>>, vector<8x722xf32>,
    %c24_110 = arith.constant 24 : index
    %c38_111 = arith.constant 38 : index
    %78 = vector.load %arg1[%c24_110, %c38_111] : memref<32x782xf32, #tpu.memory_space<vmem>>, vector<8x722xf32>
    %c288 = arith.constant 288 : index
    %c0_112 = arith.constant 0 : index
    %79 = vector.load %arg46[%c288, %c0_112] : memref<392x722xf32, #tpu.memory_space<vmem>>, vector<8x722xf32>
    tpu.vector_store %arg46[%c288, %c0_112], %78 {strides = array<i32>} : memref<392x722xf32, #tpu.memory_space<vmem>>, vector<8x722xf32>,
    %c16_113 = arith.constant 16 : index
    %c39_114 = arith.constant 39 : index
    %80 = vector.load %arg1[%c16_113, %c39_114] : memref<32x782xf32, #tpu.memory_space<vmem>>, vector<8x722xf32>
    %c296 = arith.constant 296 : index
    %c0_115 = arith.constant 0 : index
    %81 = vector.load %arg46[%c296, %c0_115] : memref<392x722xf32, #tpu.memory_space<vmem>>, vector<8x722xf32>
    tpu.vector_store %arg46[%c296, %c0_115], %80 {strides = array<i32>} : memref<392x722xf32, #tpu.memory_space<vmem>>, vector<8x722xf32>,
    %c24_116 = arith.constant 24 : index
    %c39_117 = arith.constant 39 : index
    %82 = vector.load %arg1[%c24_116, %c39_117] : memref<32x782xf32, #tpu.memory_space<vmem>>, vector<8x722xf32>
    %c304 = arith.constant 304 : index
    %c0_118 = arith.constant 0 : index
    %83 = vector.load %arg46[%c304, %c0_118] : memref<392x722xf32, #tpu.memory_space<vmem>>, vector<8x722xf32>
    tpu.vector_store %arg46[%c304, %c0_118], %82 {strides = array<i32>} : memref<392x722xf32, #tpu.memory_space<vmem>>, vector<8x722xf32>,
    %c16_119 = arith.constant 16 : index
    %c40_120 = arith.constant 40 : index
    %84 = vector.load %arg1[%c16_119, %c40_120] : memref<32x782xf32, #tpu.memory_space<vmem>>, vector<8x722xf32>
    %c312 = arith.constant 312 : index
    %c0_121 = arith.constant 0 : index
    %85 = vector.load %arg46[%c312, %c0_121] : memref<392x722xf32, #tpu.memory_space<vmem>>, vector<8x722xf32>
    tpu.vector_store %arg46[%c312, %c0_121], %84 {strides = array<i32>} : memref<392x722xf32, #tpu.memory_space<vmem>>, vector<8x722xf32>,
    %c24_122 = arith.constant 24 : index
    %c40_123 = arith.constant 40 : index
    %86 = vector.load %arg1[%c24_122, %c40_123] : memref<32x782xf32, #tpu.memory_space<vmem>>, vector<8x722xf32>
    %c320 = arith.constant 320 : index
    %c0_124 = arith.constant 0 : index
    %87 = vector.load %arg46[%c320, %c0_124] : memref<392x722xf32, #tpu.memory_space<vmem>>, vector<8x722xf32>
    tpu.vector_store %arg46[%c320, %c0_124], %86 {strides = array<i32>} : memref<392x722xf32, #tpu.memory_space<vmem>>, vector<8x722xf32>,
    %c16_125 = arith.constant 16 : index
    %c41_126 = arith.constant 41 : index
    %88 = vector.load %arg1[%c16_125, %c41_126] : memref<32x782xf32, #tpu.memory_space<vmem>>, vector<8x722xf32>
    %c328 = arith.constant 328 : index
    %c0_127 = arith.constant 0 : index
    %89 = vector.load %arg46[%c328, %c0_127] : memref<392x722xf32, #tpu.memory_space<vmem>>, vector<8x722xf32>
    tpu.vector_store %arg46[%c328, %c0_127], %88 {strides = array<i32>} : memref<392x722xf32, #tpu.memory_space<vmem>>, vector<8x722xf32>,
    %c0_128 = arith.constant 0 : index
    %c57 = arith.constant 57 : index
    %90 = vector.load %arg1[%c0_128, %c57] : memref<32x782xf32, #tpu.memory_space<vmem>>, vector<8x722xf32>
    %c336 = arith.constant 336 : index
    %c0_129 = arith.constant 0 : index
    %91 = vector.load %arg46[%c336, %c0_129] : memref<392x722xf32, #tpu.memory_space<vmem>>, vector<8x722xf32>
    tpu.vector_store %arg46[%c336, %c0_129], %90 {strides = array<i32>} : memref<392x722xf32, #tpu.memory_space<vmem>>, vector<8x722xf32>,
    %c8_130 = arith.constant 8 : index
    %c57_131 = arith.constant 57 : index
    %92 = vector.load %arg1[%c8_130, %c57_131] : memref<32x782xf32, #tpu.memory_space<vmem>>, vector<8x722xf32>
    %c344 = arith.constant 344 : index
    %c0_132 = arith.constant 0 : index
    %93 = vector.load %arg46[%c344, %c0_132] : memref<392x722xf32, #tpu.memory_space<vmem>>, vector<8x722xf32>
    tpu.vector_store %arg46[%c344, %c0_132], %92 {strides = array<i32>} : memref<392x722xf32, #tpu.memory_space<vmem>>, vector<8x722xf32>,
    %c0_133 = arith.constant 0 : index
    %c58 = arith.constant 58 : index
    %94 = vector.load %arg1[%c0_133, %c58] : memref<32x782xf32, #tpu.memory_space<vmem>>, vector<8x722xf32>
    %c352 = arith.constant 352 : index
    %c0_134 = arith.constant 0 : index
    %95 = vector.load %arg46[%c352, %c0_134] : memref<392x722xf32, #tpu.memory_space<vmem>>, vector<8x722xf32>
    tpu.vector_store %arg46[%c352, %c0_134], %94 {strides = array<i32>} : memref<392x722xf32, #tpu.memory_space<vmem>>, vector<8x722xf32>,
    %c8_135 = arith.constant 8 : index
    %c58_136 = arith.constant 58 : index
    %96 = vector.load %arg1[%c8_135, %c58_136] : memref<32x782xf32, #tpu.memory_space<vmem>>, vector<8x722xf32>
    %c360 = arith.constant 360 : index
    %c0_137 = arith.constant 0 : index
    %97 = vector.load %arg46[%c360, %c0_137] : memref<392x722xf32, #tpu.memory_space<vmem>>, vector<8x722xf32>
    tpu.vector_store %arg46[%c360, %c0_137], %96 {strides = array<i32>} : memref<392x722xf32, #tpu.memory_space<vmem>>, vector<8x722xf32>,
    %c0_138 = arith.constant 0 : index
    %c59 = arith.constant 59 : index
    %98 = vector.load %arg1[%c0_138, %c59] : memref<32x782xf32, #tpu.memory_space<vmem>>, vector<8x722xf32>
    %c368 = arith.constant 368 : index
    %c0_139 = arith.constant 0 : index
    %99 = vector.load %arg46[%c368, %c0_139] : memref<392x722xf32, #tpu.memory_space<vmem>>, vector<8x722xf32>
    tpu.vector_store %arg46[%c368, %c0_139], %98 {strides = array<i32>} : memref<392x722xf32, #tpu.memory_space<vmem>>, vector<8x722xf32>,
    %c8_140 = arith.constant 8 : index
    %c59_141 = arith.constant 59 : index
    %100 = vector.load %arg1[%c8_140, %c59_141] : memref<32x782xf32, #tpu.memory_space<vmem>>, vector<8x722xf32>
    %c376 = arith.constant 376 : index
    %c0_142 = arith.constant 0 : index
    %101 = vector.load %arg46[%c376, %c0_142] : memref<392x722xf32, #tpu.memory_space<vmem>>, vector<8x722xf32>
    tpu.vector_store %arg46[%c376, %c0_142], %100 {strides = array<i32>} : memref<392x722xf32, #tpu.memory_space<vmem>>, vector<8x722xf32>,
    %c0_143 = arith.constant 0 : index
    %c60 = arith.constant 60 : index
    %102 = vector.load %arg1[%c0_143, %c60] : memref<32x782xf32, #tpu.memory_space<vmem>>, vector<8x722xf32>
    %c384 = arith.constant 384 : index
    %c0_144 = arith.constant 0 : index
    %103 = vector.load %arg46[%c384, %c0_144] : memref<392x722xf32, #tpu.memory_space<vmem>>, vector<8x722xf32>
    tpu.vector_store %arg46[%c384, %c0_144], %102 {strides = array<i32>} : memref<392x722xf32, #tpu.memory_space<vmem>>, vector<8x722xf32>,
    %c0_145 = arith.constant 0 : index
    %c0_146 = arith.constant 0 : index
    %104 = vector.load %arg46[%c0_145, %c0_146] : memref<392x722xf32, #tpu.memory_space<vmem>>, vector<392x722xf32>
    %105 = arith.truncf %104 : vector<392x722xf32> to vector<392x722xbf16>
    %cst = arith.constant dense<0.000000e+00> : vector<16x722xf32>
    %106 = tpu.matmul %0, %105, %cst {dimension_numbers = #tpu.dot_dimension_numbers<[1], [0], [0], [1], [0, 0, 1, 1], [], []>} : vector<16x392xbf16>, vector<392x722xbf16>, vector<16x722xf32> -> vector<16x722xf32>
    %107 = arith.truncf %106 : vector<16x722xf32> to vector<16x722xbf16>
    %cst_147 = arith.constant dense<0.000000e+00> : vector<16x512xf32>
    %108 = tpu.matmul %107, %1, %cst_147 {dimension_numbers = #tpu.dot_dimension_numbers<[1], [0], [0], [1], [0, 0, 1, 1], [], []>} : vector<16x722xbf16>, vector<722x512xbf16>, vector<16x512xf32> -> vector<16x512xf32>
    %cst_148 = arith.constant dense<0.000000e+00> : vector<16xf32>
    %109 = vector.multi_reduction <add>, %108, %cst_148 [1] : vector<16x512xf32> to vector<16xf32>
    %110 = vector.shape_cast %109 : vector<16xf32> to vector<16x1xf32>
    %cst_149 = arith.constant 0.001953125 : f32
    %111 = vector.broadcast %cst_149 : f32 to vector<16x1xf32>
    %112 = arith.mulf %110, %111 : vector<16x1xf32>
    %113 = vector.broadcast %112 : vector<16x1xf32> to vector<16x512xf32>
    %114 = arith.subf %108, %113 : vector<16x512xf32>
    %115 = arith.mulf %114, %114 : vector<16x512xf32>
    %cst_150 = arith.constant dense<0.000000e+00> : vector<16xf32>
    %116 = vector.multi_reduction <add>, %115, %cst_150 [1] : vector<16x512xf32> to vector<16xf32>
    %117 = vector.shape_cast %116 : vector<16xf32> to vector<16x1xf32>
    %cst_151 = arith.constant 0.001953125 : f32
    %118 = vector.broadcast %cst_151 : f32 to vector<16x1xf32>
    %119 = arith.mulf %117, %118 : vector<16x1xf32>
    %cst_152 = arith.constant 9.99999974E-6 : f32
    %120 = vector.broadcast %cst_152 : f32 to vector<16x1xf32>
    %121 = arith.addf %119, %120 : vector<16x1xf32>
    %122 = math.rsqrt %121 : vector<16x1xf32>
    %123 = vector.broadcast %122 : vector<16x1xf32> to vector<16x512xf32>
    %124 = arith.mulf %114, %123 : vector<16x512xf32>
    %125 = vector.broadcast %2 : vector<16x1xf32> to vector<16x512xf32>
    %126 = arith.mulf %124, %125 : vector<16x512xf32>
    %127 = vector.broadcast %3 : vector<16x1xf32> to vector<16x512xf32>
    %128 = arith.addf %126, %127 : vector<16x512xf32>
    %cst_153 = arith.constant 0.000000e+00 : f32
    %129 = vector.broadcast %cst_153 : f32 to vector<16x512xf32>
    %130 = arith.maximumf %128, %129 : vector<16x512xf32>
    %131 = arith.truncf %130 : vector<16x512xf32> to vector<16x512xbf16>
    %cst_154 = arith.constant dense<0.000000e+00> : vector<16x686xf32>
    %132 = tpu.matmul %131, %4, %cst_154 {dimension_numbers = #tpu.dot_dimension_numbers<[1], [0], [0], [1], [0, 0, 1, 1], [], []>} : vector<16x512xbf16>, vector<512x686xbf16>, vector<16x686xf32> -> vector<16x686xf32>
    %133 = vector.extract_strided_slice %132 {offsets = [0, 0], sizes = [16, 648], strides = [1, 1]} : vector<16x686xf32> to vector<16x648xf32>
    %134 = vector.extract_strided_slice %132 {offsets = [0, 1], sizes = [16, 648], strides = [1, 1]} : vector<16x686xf32> to vector<16x648xf32>
    %135 = arith.maximumf %133, %134 : vector<16x648xf32>
    %136 = vector.extract_strided_slice %132 {offsets = [0, 2], sizes = [16, 648], strides = [1, 1]} : vector<16x686xf32> to vector<16x648xf32>
    %137 = arith.maximumf %135, %136 : vector<16x648xf32>
    %138 = vector.extract_strided_slice %132 {offsets = [0, 18], sizes = [16, 648], strides = [1, 1]} : vector<16x686xf32> to vector<16x648xf32>
    %139 = arith.maximumf %137, %138 : vector<16x648xf32>
    %140 = vector.extract_strided_slice %132 {offsets = [0, 19], sizes = [16, 648], strides = [1, 1]} : vector<16x686xf32> to vector<16x648xf32>
    %141 = arith.maximumf %139, %140 : vector<16x648xf32>
    %142 = vector.extract_strided_slice %132 {offsets = [0, 20], sizes = [16, 648], strides = [1, 1]} : vector<16x686xf32> to vector<16x648xf32>
    %143 = arith.maximumf %141, %142 : vector<16x648xf32>
    %144 = vector.extract_strided_slice %132 {offsets = [0, 36], sizes = [16, 648], strides = [1, 1]} : vector<16x686xf32> to vector<16x648xf32>
    %145 = arith.maximumf %143, %144 : vector<16x648xf32>
    %146 = vector.extract_strided_slice %132 {offsets = [0, 37], sizes = [16, 648], strides = [1, 1]} : vector<16x686xf32> to vector<16x648xf32>
    %147 = arith.maximumf %145, %146 : vector<16x648xf32>
    %148 = vector.extract_strided_slice %132 {offsets = [0, 38], sizes = [16, 648], strides = [1, 1]} : vector<16x686xf32> to vector<16x648xf32>
    %149 = arith.maximumf %147, %148 : vector<16x648xf32>
    %150 = arith.truncf %149 : vector<16x648xf32> to vector<16x648xbf16>
    %cst_155 = arith.constant dense<0.000000e+00> : vector<16x128xf32>
    %151 = tpu.matmul %150, %5, %cst_155 {dimension_numbers = #tpu.dot_dimension_numbers<[1], [0], [0], [1], [0, 0, 1, 1], [], []>} : vector<16x648xbf16>, vector<648x128xbf16>, vector<16x128xf32> -> vector<16x128xf32>
    %c0_156 = arith.constant 0 : index
    %c0_157 = arith.constant 0 : index
    %152 = vector.load %arg8[%c0_156, %c0_157] : memref<128x222xbf16, #tpu.memory_space<vmem>>, vector<128x222xbf16>
    %c0_158 = arith.constant 0 : index
    %c0_159 = arith.constant 0 : index
    %153 = vector.load %arg9[%c0_158, %c0_159] : memref<200x128xbf16, #tpu.memory_space<vmem>>, vector<200x128xbf16>
    %c0_160 = arith.constant 0 : index
    %c0_161 = arith.constant 0 : index
    %154 = vector.load %arg10[%c0_160, %c0_161] : memref<16x1xf32, #tpu.memory_space<vmem>>, vector<16x1xf32>
    %c0_162 = arith.constant 0 : index
    %c0_163 = arith.constant 0 : index
    %155 = vector.load %arg11[%c0_162, %c0_163] : memref<16x1xf32, #tpu.memory_space<vmem>>, vector<16x1xf32>
    %c0_164 = arith.constant 0 : index
    %c0_165 = arith.constant 0 : index
    %156 = vector.load %arg12[%c0_164, %c0_165] : memref<8x16xbf16, #tpu.memory_space<vmem>>, vector<8x16xbf16>
    %c0_166 = arith.constant 0 : index
    %c0_167 = arith.constant 0 : index
    %157 = vector.load %arg13[%c0_166, %c0_167] : memref<8x1xf32, #tpu.memory_space<vmem>>, vector<8x1xf32>
    %c0_168 = arith.constant 0 : index
    %c0_169 = arith.constant 0 : index
    %158 = vector.load %arg14[%c0_168, %c0_169] : memref<8x1xf32, #tpu.memory_space<vmem>>, vector<8x1xf32>
    %c0_170 = arith.constant 0 : index
    %c0_171 = arith.constant 0 : index
    %159 = vector.load %arg15[%c0_170, %c0_171] : memref<4x72xbf16, #tpu.memory_space<vmem>>, vector<4x72xbf16>
    %cst_172 = arith.constant dense<0.000000e+00> : vector<16xf32>
    %160 = vector.multi_reduction <add>, %151, %cst_172 [1] : vector<16x128xf32> to vector<16xf32>
    %161 = vector.shape_cast %160 : vector<16xf32> to vector<16x1xf32>
    %cst_173 = arith.constant 7.812500e-03 : f32
    %162 = vector.broadcast %cst_173 : f32 to vector<16x1xf32>
    %163 = arith.mulf %161, %162 : vector<16x1xf32>
    %164 = vector.broadcast %163 : vector<16x1xf32> to vector<16x128xf32>
    %165 = arith.subf %151, %164 : vector<16x128xf32>
    %166 = arith.mulf %165, %165 : vector<16x128xf32>
    %cst_174 = arith.constant dense<0.000000e+00> : vector<16xf32>
    %167 = vector.multi_reduction <add>, %166, %cst_174 [1] : vector<16x128xf32> to vector<16xf32>
    %168 = vector.shape_cast %167 : vector<16xf32> to vector<16x1xf32>
    %cst_175 = arith.constant 7.812500e-03 : f32
    %169 = vector.broadcast %cst_175 : f32 to vector<16x1xf32>
    %170 = arith.mulf %168, %169 : vector<16x1xf32>
    %cst_176 = arith.constant 9.99999974E-6 : f32
    %171 = vector.broadcast %cst_176 : f32 to vector<16x1xf32>
    %172 = arith.addf %170, %171 : vector<16x1xf32>
    %173 = math.rsqrt %172 : vector<16x1xf32>
    %174 = vector.broadcast %173 : vector<16x1xf32> to vector<16x128xf32>
    %175 = arith.mulf %165, %174 : vector<16x128xf32>
    %176 = vector.broadcast %154 : vector<16x1xf32> to vector<16x128xf32>
    %177 = arith.mulf %175, %176 : vector<16x128xf32>
    %178 = vector.broadcast %155 : vector<16x1xf32> to vector<16x128xf32>
    %179 = arith.addf %177, %178 : vector<16x128xf32>
    %cst_177 = arith.constant 0.000000e+00 : f32
    %180 = vector.broadcast %cst_177 : f32 to vector<16x128xf32>
    %181 = arith.maximumf %179, %180 : vector<16x128xf32>
    %182 = arith.truncf %181 : vector<16x128xf32> to vector<16x128xbf16>
    %cst_178 = arith.constant dense<0.000000e+00> : vector<8x128xf32>
    %183 = tpu.matmul %156, %182, %cst_178 {dimension_numbers = #tpu.dot_dimension_numbers<[1], [0], [0], [1], [0, 0, 1, 1], [], []>} : vector<8x16xbf16>, vector<16x128xbf16>, vector<8x128xf32> -> vector<8x128xf32>
    %cst_179 = arith.constant dense<0.000000e+00> : vector<8xf32>
    %184 = vector.multi_reduction <add>, %183, %cst_179 [1] : vector<8x128xf32> to vector<8xf32>
    %185 = vector.shape_cast %184 : vector<8xf32> to vector<8x1xf32>
    %cst_180 = arith.constant 7.812500e-03 : f32
    %186 = vector.broadcast %cst_180 : f32 to vector<8x1xf32>
    %187 = arith.mulf %185, %186 : vector<8x1xf32>
    %188 = vector.broadcast %187 : vector<8x1xf32> to vector<8x128xf32>
    %189 = arith.subf %183, %188 : vector<8x128xf32>
    %190 = arith.mulf %189, %189 : vector<8x128xf32>
    %cst_181 = arith.constant dense<0.000000e+00> : vector<8xf32>
    %191 = vector.multi_reduction <add>, %190, %cst_181 [1] : vector<8x128xf32> to vector<8xf32>
    %192 = vector.shape_cast %191 : vector<8xf32> to vector<8x1xf32>
    %cst_182 = arith.constant 7.812500e-03 : f32
    %193 = vector.broadcast %cst_182 : f32 to vector<8x1xf32>
    %194 = arith.mulf %192, %193 : vector<8x1xf32>
    %cst_183 = arith.constant 9.99999974E-6 : f32
    %195 = vector.broadcast %cst_183 : f32 to vector<8x1xf32>
    %196 = arith.addf %194, %195 : vector<8x1xf32>
    %197 = math.rsqrt %196 : vector<8x1xf32>
    %198 = vector.broadcast %197 : vector<8x1xf32> to vector<8x128xf32>
    %199 = arith.mulf %189, %198 : vector<8x128xf32>
    %200 = vector.broadcast %157 : vector<8x1xf32> to vector<8x128xf32>
    %201 = arith.mulf %199, %200 : vector<8x128xf32>
    %202 = vector.broadcast %158 : vector<8x1xf32> to vector<8x128xf32>
    %203 = arith.addf %201, %202 : vector<8x128xf32>
    %cst_184 = arith.constant 0.000000e+00 : f32
    %204 = vector.broadcast %cst_184 : f32 to vector<8x128xf32>
    %205 = arith.maximumf %203, %204 : vector<8x128xf32>
    %206 = arith.truncf %205 : vector<8x128xf32> to vector<8x128xbf16>
    %cst_185 = arith.constant dense<0.000000e+00> : vector<8x222xf32>
    %207 = tpu.matmul %206, %152, %cst_185 {dimension_numbers = #tpu.dot_dimension_numbers<[1], [0], [0], [1], [0, 0, 1, 1], [], []>} : vector<8x128xbf16>, vector<128x222xbf16>, vector<8x222xf32> -> vector<8x222xf32>
    %208 = vector.extract_strided_slice %207 {offsets = [0, 0], sizes = [8, 200], strides = [1, 1]} : vector<8x222xf32> to vector<8x200xf32>
    %c0_186 = arith.constant 0 : index
    %c0_187 = arith.constant 0 : index
    %209 = vector.load %arg47[%c0_186, %c0_187] : memref<72x200xf32, #tpu.memory_space<vmem>>, vector<8x200xf32>
    tpu.vector_store %arg47[%c0_186, %c0_187], %208 {strides = array<i32>} : memref<72x200xf32, #tpu.memory_space<vmem>>, vector<8x200xf32>,
    %210 = vector.extract_strided_slice %207 {offsets = [0, 1], sizes = [8, 200], strides = [1, 1]} : vector<8x222xf32> to vector<8x200xf32>
    %c8_188 = arith.constant 8 : index
    %c0_189 = arith.constant 0 : index
    %211 = vector.load %arg47[%c8_188, %c0_189] : memref<72x200xf32, #tpu.memory_space<vmem>>, vector<8x200xf32>
    tpu.vector_store %arg47[%c8_188, %c0_189], %210 {strides = array<i32>} : memref<72x200xf32, #tpu.memory_space<vmem>>, vector<8x200xf32>,
    %212 = vector.extract_strided_slice %207 {offsets = [0, 2], sizes = [8, 200], strides = [1, 1]} : vector<8x222xf32> to vector<8x200xf32>
    %c16_190 = arith.constant 16 : index
    %c0_191 = arith.constant 0 : index
    %213 = vector.load %arg47[%c16_190, %c0_191] : memref<72x200xf32, #tpu.memory_space<vmem>>, vector<8x200xf32>
    tpu.vector_store %arg47[%c16_190, %c0_191], %212 {strides = array<i32>} : memref<72x200xf32, #tpu.memory_space<vmem>>, vector<8x200xf32>,
    %214 = vector.extract_strided_slice %207 {offsets = [0, 10], sizes = [8, 200], strides = [1, 1]} : vector<8x222xf32> to vector<8x200xf32>
    %c24_192 = arith.constant 24 : index
    %c0_193 = arith.constant 0 : index
    %215 = vector.load %arg47[%c24_192, %c0_193] : memref<72x200xf32, #tpu.memory_space<vmem>>, vector<8x200xf32>
    tpu.vector_store %arg47[%c24_192, %c0_193], %214 {strides = array<i32>} : memref<72x200xf32, #tpu.memory_space<vmem>>, vector<8x200xf32>,
    %216 = vector.extract_strided_slice %207 {offsets = [0, 11], sizes = [8, 200], strides = [1, 1]} : vector<8x222xf32> to vector<8x200xf32>
    %c32_194 = arith.constant 32 : index
    %c0_195 = arith.constant 0 : index
    %217 = vector.load %arg47[%c32_194, %c0_195] : memref<72x200xf32, #tpu.memory_space<vmem>>, vector<8x200xf32>
    tpu.vector_store %arg47[%c32_194, %c0_195], %216 {strides = array<i32>} : memref<72x200xf32, #tpu.memory_space<vmem>>, vector<8x200xf32>,
    %218 = vector.extract_strided_slice %207 {offsets = [0, 12], sizes = [8, 200], strides = [1, 1]} : vector<8x222xf32> to vector<8x200xf32>
    %c40_196 = arith.constant 40 : index
    %c0_197 = arith.constant 0 : index
    %219 = vector.load %arg47[%c40_196, %c0_197] : memref<72x200xf32, #tpu.memory_space<vmem>>, vector<8x200xf32>
    tpu.vector_store %arg47[%c40_196, %c0_197], %218 {strides = array<i32>} : memref<72x200xf32, #tpu.memory_space<vmem>>, vector<8x200xf32>,
    %220 = vector.extract_strided_slice %207 {offsets = [0, 20], sizes = [8, 200], strides = [1, 1]} : vector<8x222xf32> to vector<8x200xf32>
    %c48_198 = arith.constant 48 : index
    %c0_199 = arith.constant 0 : index
    %221 = vector.load %arg47[%c48_198, %c0_199] : memref<72x200xf32, #tpu.memory_space<vmem>>, vector<8x200xf32>
    tpu.vector_store %arg47[%c48_198, %c0_199], %220 {strides = array<i32>} : memref<72x200xf32, #tpu.memory_space<vmem>>, vector<8x200xf32>,
    %222 = vector.extract_strided_slice %207 {offsets = [0, 21], sizes = [8, 200], strides = [1, 1]} : vector<8x222xf32> to vector<8x200xf32>
    %c56_200 = arith.constant 56 : index
    %c0_201 = arith.constant 0 : index
    %223 = vector.load %arg47[%c56_200, %c0_201] : memref<72x200xf32, #tpu.memory_space<vmem>>, vector<8x200xf32>
    tpu.vector_store %arg47[%c56_200, %c0_201], %222 {strides = array<i32>} : memref<72x200xf32, #tpu.memory_space<vmem>>, vector<8x200xf32>,
    %224 = vector.extract_strided_slice %207 {offsets = [0, 22], sizes = [8, 200], strides = [1, 1]} : vector<8x222xf32> to vector<8x200xf32>
    %c64_202 = arith.constant 64 : index
    %c0_203 = arith.constant 0 : index
    %225 = vector.load %arg47[%c64_202, %c0_203] : memref<72x200xf32, #tpu.memory_space<vmem>>, vector<8x200xf32>
    tpu.vector_store %arg47[%c64_202, %c0_203], %224 {strides = array<i32>} : memref<72x200xf32, #tpu.memory_space<vmem>>, vector<8x200xf32>,
    %c0_204 = arith.constant 0 : index
    %c0_205 = arith.constant 0 : index
    %226 = vector.load %arg47[%c0_204, %c0_205] : memref<72x200xf32, #tpu.memory_space<vmem>>, vector<72x200xf32>
    %227 = arith.truncf %226 : vector<72x200xf32> to vector<72x200xbf16>
    %cst_206 = arith.constant dense<0.000000e+00> : vector<4x200xf32>
    %228 = tpu.matmul %159, %227, %cst_206 {dimension_numbers = #tpu.dot_dimension_numbers<[1], [0], [0], [1], [0, 0, 1, 1], [], []>} : vector<4x72xbf16>, vector<72x200xbf16>, vector<4x200xf32> -> vector<4x200xf32>
    %229 = arith.truncf %228 : vector<4x200xf32> to vector<4x200xbf16>
    %cst_207 = arith.constant dense<0.000000e+00> : vector<4x128xf32>
    %230 = tpu.matmul %229, %153, %cst_207 {dimension_numbers = #tpu.dot_dimension_numbers<[1], [0], [0], [1], [0, 0, 1, 1], [], []>} : vector<4x200xbf16>, vector<200x128xbf16>, vector<4x128xf32> -> vector<4x128xf32>
    %231 = tpu.concatenate %151, %230 in 0 : vector<16x128xf32>, vector<4x128xf32> -> vector<20x128xf32>
    %c0_208 = arith.constant 0 : index
    %c0_209 = arith.constant 0 : index
    %232 = vector.load %arg16[%c0_208, %c0_209] : memref<20x1xf32, #tpu.memory_space<vmem>>, vector<20x1xf32>
    %c0_210 = arith.constant 0 : index
    %c0_211 = arith.constant 0 : index
    %233 = vector.load %arg17[%c0_210, %c0_211] : memref<20x1xf32, #tpu.memory_space<vmem>>, vector<20x1xf32>
    %c0_212 = arith.constant 0 : index
    %c0_213 = arith.constant 0 : index
    %234 = vector.load %arg18[%c0_212, %c0_213] : memref<8x20xbf16, #tpu.memory_space<vmem>>, vector<8x20xbf16>
    %c0_214 = arith.constant 0 : index
    %c0_215 = arith.constant 0 : index
    %235 = vector.load %arg19[%c0_214, %c0_215] : memref<8x1xf32, #tpu.memory_space<vmem>>, vector<8x1xf32>
    %c0_216 = arith.constant 0 : index
    %c0_217 = arith.constant 0 : index
    %236 = vector.load %arg20[%c0_216, %c0_217] : memref<8x1xf32, #tpu.memory_space<vmem>>, vector<8x1xf32>
    %c0_218 = arith.constant 0 : index
    %c0_219 = arith.constant 0 : index
    %237 = vector.load %arg21[%c0_218, %c0_219] : memref<4x72xbf16, #tpu.memory_space<vmem>>, vector<4x72xbf16>
    %cst_220 = arith.constant dense<0.000000e+00> : vector<20xf32>
    %238 = vector.multi_reduction <add>, %231, %cst_220 [1] : vector<20x128xf32> to vector<20xf32>
    %239 = vector.shape_cast %238 : vector<20xf32> to vector<20x1xf32>
    %cst_221 = arith.constant 7.812500e-03 : f32
    %240 = vector.broadcast %cst_221 : f32 to vector<20x1xf32>
    %241 = arith.mulf %239, %240 : vector<20x1xf32>
    %242 = vector.broadcast %241 : vector<20x1xf32> to vector<20x128xf32>
    %243 = arith.subf %231, %242 : vector<20x128xf32>
    %244 = arith.mulf %243, %243 : vector<20x128xf32>
    %cst_222 = arith.constant dense<0.000000e+00> : vector<20xf32>
    %245 = vector.multi_reduction <add>, %244, %cst_222 [1] : vector<20x128xf32> to vector<20xf32>
    %246 = vector.shape_cast %245 : vector<20xf32> to vector<20x1xf32>
    %cst_223 = arith.constant 7.812500e-03 : f32
    %247 = vector.broadcast %cst_223 : f32 to vector<20x1xf32>
    %248 = arith.mulf %246, %247 : vector<20x1xf32>
    %cst_224 = arith.constant 9.99999974E-6 : f32
    %249 = vector.broadcast %cst_224 : f32 to vector<20x1xf32>
    %250 = arith.addf %248, %249 : vector<20x1xf32>
    %251 = math.rsqrt %250 : vector<20x1xf32>
    %252 = vector.broadcast %251 : vector<20x1xf32> to vector<20x128xf32>
    %253 = arith.mulf %243, %252 : vector<20x128xf32>
    %254 = vector.broadcast %232 : vector<20x1xf32> to vector<20x128xf32>
    %255 = arith.mulf %253, %254 : vector<20x128xf32>
    %256 = vector.broadcast %233 : vector<20x1xf32> to vector<20x128xf32>
    %257 = arith.addf %255, %256 : vector<20x128xf32>
    %cst_225 = arith.constant 0.000000e+00 : f32
    %258 = vector.broadcast %cst_225 : f32 to vector<20x128xf32>
    %259 = arith.maximumf %257, %258 : vector<20x128xf32>
    %260 = arith.truncf %259 : vector<20x128xf32> to vector<20x128xbf16>
    %cst_226 = arith.constant dense<0.000000e+00> : vector<8x128xf32>
    %261 = tpu.matmul %234, %260, %cst_226 {dimension_numbers = #tpu.dot_dimension_numbers<[1], [0], [0], [1], [0, 0, 1, 1], [], []>} : vector<8x20xbf16>, vector<20x128xbf16>, vector<8x128xf32> -> vector<8x128xf32>
    %cst_227 = arith.constant dense<0.000000e+00> : vector<8xf32>
    %262 = vector.multi_reduction <add>, %261, %cst_227 [1] : vector<8x128xf32> to vector<8xf32>
    %263 = vector.shape_cast %262 : vector<8xf32> to vector<8x1xf32>
    %cst_228 = arith.constant 7.812500e-03 : f32
    %264 = vector.broadcast %cst_228 : f32 to vector<8x1xf32>
    %265 = arith.mulf %263, %264 : vector<8x1xf32>
    %266 = vector.broadcast %265 : vector<8x1xf32> to vector<8x128xf32>
    %267 = arith.subf %261, %266 : vector<8x128xf32>
    %268 = arith.mulf %267, %267 : vector<8x128xf32>
    %cst_229 = arith.constant dense<0.000000e+00> : vector<8xf32>
    %269 = vector.multi_reduction <add>, %268, %cst_229 [1] : vector<8x128xf32> to vector<8xf32>
    %270 = vector.shape_cast %269 : vector<8xf32> to vector<8x1xf32>
    %cst_230 = arith.constant 7.812500e-03 : f32
    %271 = vector.broadcast %cst_230 : f32 to vector<8x1xf32>
    %272 = arith.mulf %270, %271 : vector<8x1xf32>
    %cst_231 = arith.constant 9.99999974E-6 : f32
    %273 = vector.broadcast %cst_231 : f32 to vector<8x1xf32>
    %274 = arith.addf %272, %273 : vector<8x1xf32>
    %275 = math.rsqrt %274 : vector<8x1xf32>
    %276 = vector.broadcast %275 : vector<8x1xf32> to vector<8x128xf32>
    %277 = arith.mulf %267, %276 : vector<8x128xf32>
    %278 = vector.broadcast %235 : vector<8x1xf32> to vector<8x128xf32>
    %279 = arith.mulf %277, %278 : vector<8x128xf32>
    %280 = vector.broadcast %236 : vector<8x1xf32> to vector<8x128xf32>
    %281 = arith.addf %279, %280 : vector<8x128xf32>
    %cst_232 = arith.constant 0.000000e+00 : f32
    %282 = vector.broadcast %cst_232 : f32 to vector<8x128xf32>
    %283 = arith.maximumf %281, %282 : vector<8x128xf32>
    %284 = arith.truncf %283 : vector<8x128xf32> to vector<8x128xbf16>
    %cst_233 = arith.constant dense<0.000000e+00> : vector<8x222xf32>
    %285 = tpu.matmul %284, %152, %cst_233 {dimension_numbers = #tpu.dot_dimension_numbers<[1], [0], [0], [1], [0, 0, 1, 1], [], []>} : vector<8x128xbf16>, vector<128x222xbf16>, vector<8x222xf32> -> vector<8x222xf32>
    %286 = vector.extract_strided_slice %285 {offsets = [0, 0], sizes = [8, 200], strides = [1, 1]} : vector<8x222xf32> to vector<8x200xf32>
    %c0_234 = arith.constant 0 : index
    %c0_235 = arith.constant 0 : index
    %287 = vector.load %arg47[%c0_234, %c0_235] : memref<72x200xf32, #tpu.memory_space<vmem>>, vector<8x200xf32>
    tpu.vector_store %arg47[%c0_234, %c0_235], %286 {strides = array<i32>} : memref<72x200xf32, #tpu.memory_space<vmem>>, vector<8x200xf32>,
    %288 = vector.extract_strided_slice %285 {offsets = [0, 1], sizes = [8, 200], strides = [1, 1]} : vector<8x222xf32> to vector<8x200xf32>
    %c8_236 = arith.constant 8 : index
    %c0_237 = arith.constant 0 : index
    %289 = vector.load %arg47[%c8_236, %c0_237] : memref<72x200xf32, #tpu.memory_space<vmem>>, vector<8x200xf32>
    tpu.vector_store %arg47[%c8_236, %c0_237], %288 {strides = array<i32>} : memref<72x200xf32, #tpu.memory_space<vmem>>, vector<8x200xf32>,
    %290 = vector.extract_strided_slice %285 {offsets = [0, 2], sizes = [8, 200], strides = [1, 1]} : vector<8x222xf32> to vector<8x200xf32>
    %c16_238 = arith.constant 16 : index
    %c0_239 = arith.constant 0 : index
    %291 = vector.load %arg47[%c16_238, %c0_239] : memref<72x200xf32, #tpu.memory_space<vmem>>, vector<8x200xf32>
    tpu.vector_store %arg47[%c16_238, %c0_239], %290 {strides = array<i32>} : memref<72x200xf32, #tpu.memory_space<vmem>>, vector<8x200xf32>,
    %292 = vector.extract_strided_slice %285 {offsets = [0, 10], sizes = [8, 200], strides = [1, 1]} : vector<8x222xf32> to vector<8x200xf32>
    %c24_240 = arith.constant 24 : index
    %c0_241 = arith.constant 0 : index
    %293 = vector.load %arg47[%c24_240, %c0_241] : memref<72x200xf32, #tpu.memory_space<vmem>>, vector<8x200xf32>
    tpu.vector_store %arg47[%c24_240, %c0_241], %292 {strides = array<i32>} : memref<72x200xf32, #tpu.memory_space<vmem>>, vector<8x200xf32>,
    %294 = vector.extract_strided_slice %285 {offsets = [0, 11], sizes = [8, 200], strides = [1, 1]} : vector<8x222xf32> to vector<8x200xf32>
    %c32_242 = arith.constant 32 : index
    %c0_243 = arith.constant 0 : index
    %295 = vector.load %arg47[%c32_242, %c0_243] : memref<72x200xf32, #tpu.memory_space<vmem>>, vector<8x200xf32>
    tpu.vector_store %arg47[%c32_242, %c0_243], %294 {strides = array<i32>} : memref<72x200xf32, #tpu.memory_space<vmem>>, vector<8x200xf32>,
    %296 = vector.extract_strided_slice %285 {offsets = [0, 12], sizes = [8, 200], strides = [1, 1]} : vector<8x222xf32> to vector<8x200xf32>
    %c40_244 = arith.constant 40 : index
    %c0_245 = arith.constant 0 : index
    %297 = vector.load %arg47[%c40_244, %c0_245] : memref<72x200xf32, #tpu.memory_space<vmem>>, vector<8x200xf32>
    tpu.vector_store %arg47[%c40_244, %c0_245], %296 {strides = array<i32>} : memref<72x200xf32, #tpu.memory_space<vmem>>, vector<8x200xf32>,
    %298 = vector.extract_strided_slice %285 {offsets = [0, 20], sizes = [8, 200], strides = [1, 1]} : vector<8x222xf32> to vector<8x200xf32>
    %c48_246 = arith.constant 48 : index
    %c0_247 = arith.constant 0 : index
    %299 = vector.load %arg47[%c48_246, %c0_247] : memref<72x200xf32, #tpu.memory_space<vmem>>, vector<8x200xf32>
    tpu.vector_store %arg47[%c48_246, %c0_247], %298 {strides = array<i32>} : memref<72x200xf32, #tpu.memory_space<vmem>>, vector<8x200xf32>,
    %300 = vector.extract_strided_slice %285 {offsets = [0, 21], sizes = [8, 200], strides = [1, 1]} : vector<8x222xf32> to vector<8x200xf32>
    %c56_248 = arith.constant 56 : index
    %c0_249 = arith.constant 0 : index
    %301 = vector.load %arg47[%c56_248, %c0_249] : memref<72x200xf32, #tpu.memory_space<vmem>>, vector<8x200xf32>
    tpu.vector_store %arg47[%c56_248, %c0_249], %300 {strides = array<i32>} : memref<72x200xf32, #tpu.memory_space<vmem>>, vector<8x200xf32>,
    %302 = vector.extract_strided_slice %285 {offsets = [0, 22], sizes = [8, 200], strides = [1, 1]} : vector<8x222xf32> to vector<8x200xf32>
    %c64_250 = arith.constant 64 : index
    %c0_251 = arith.constant 0 : index
    %303 = vector.load %arg47[%c64_250, %c0_251] : memref<72x200xf32, #tpu.memory_space<vmem>>, vector<8x200xf32>
    tpu.vector_store %arg47[%c64_250, %c0_251], %302 {strides = array<i32>} : memref<72x200xf32, #tpu.memory_space<vmem>>, vector<8x200xf32>,
    %c0_252 = arith.constant 0 : index
    %c0_253 = arith.constant 0 : index
    %304 = vector.load %arg47[%c0_252, %c0_253] : memref<72x200xf32, #tpu.memory_space<vmem>>, vector<72x200xf32>
    %305 = arith.truncf %304 : vector<72x200xf32> to vector<72x200xbf16>
    %cst_254 = arith.constant dense<0.000000e+00> : vector<4x200xf32>
    %306 = tpu.matmul %237, %305, %cst_254 {dimension_numbers = #tpu.dot_dimension_numbers<[1], [0], [0], [1], [0, 0, 1, 1], [], []>} : vector<4x72xbf16>, vector<72x200xbf16>, vector<4x200xf32> -> vector<4x200xf32>
    %307 = arith.truncf %306 : vector<4x200xf32> to vector<4x200xbf16>
    %cst_255 = arith.constant dense<0.000000e+00> : vector<4x128xf32>
    %308 = tpu.matmul %307, %153, %cst_255 {dimension_numbers = #tpu.dot_dimension_numbers<[1], [0], [0], [1], [0, 0, 1, 1], [], []>} : vector<4x200xbf16>, vector<200x128xbf16>, vector<4x128xf32> -> vector<4x128xf32>
    %309 = tpu.concatenate %231, %308 in 0 : vector<20x128xf32>, vector<4x128xf32> -> vector<24x128xf32>
    %c0_256 = arith.constant 0 : index
    %c0_257 = arith.constant 0 : index
    %310 = vector.load %arg22[%c0_256, %c0_257] : memref<24x1xf32, #tpu.memory_space<vmem>>, vector<24x1xf32>
    %c0_258 = arith.constant 0 : index
    %c0_259 = arith.constant 0 : index
    %311 = vector.load %arg23[%c0_258, %c0_259] : memref<24x1xf32, #tpu.memory_space<vmem>>, vector<24x1xf32>
    %c0_260 = arith.constant 0 : index
    %c0_261 = arith.constant 0 : index
    %312 = vector.load %arg24[%c0_260, %c0_261] : memref<12x24xbf16, #tpu.memory_space<vmem>>, vector<12x24xbf16>
    %c0_262 = arith.constant 0 : index
    %c0_263 = arith.constant 0 : index
    %313 = vector.load %arg25[%c0_262, %c0_263] : memref<128x32xbf16, #tpu.memory_space<vmem>>, vector<128x32xbf16>
    %cst_264 = arith.constant dense<0.000000e+00> : vector<24xf32>
    %314 = vector.multi_reduction <add>, %309, %cst_264 [1] : vector<24x128xf32> to vector<24xf32>
    %315 = vector.shape_cast %314 : vector<24xf32> to vector<24x1xf32>
    %cst_265 = arith.constant 7.812500e-03 : f32
    %316 = vector.broadcast %cst_265 : f32 to vector<24x1xf32>
    %317 = arith.mulf %315, %316 : vector<24x1xf32>
    %318 = vector.broadcast %317 : vector<24x1xf32> to vector<24x128xf32>
    %319 = arith.subf %309, %318 : vector<24x128xf32>
    %320 = arith.mulf %319, %319 : vector<24x128xf32>
    %cst_266 = arith.constant dense<0.000000e+00> : vector<24xf32>
    %321 = vector.multi_reduction <add>, %320, %cst_266 [1] : vector<24x128xf32> to vector<24xf32>
    %322 = vector.shape_cast %321 : vector<24xf32> to vector<24x1xf32>
    %cst_267 = arith.constant 7.812500e-03 : f32
    %323 = vector.broadcast %cst_267 : f32 to vector<24x1xf32>
    %324 = arith.mulf %322, %323 : vector<24x1xf32>
    %cst_268 = arith.constant 9.99999974E-6 : f32
    %325 = vector.broadcast %cst_268 : f32 to vector<24x1xf32>
    %326 = arith.addf %324, %325 : vector<24x1xf32>
    %327 = math.rsqrt %326 : vector<24x1xf32>
    %328 = vector.broadcast %327 : vector<24x1xf32> to vector<24x128xf32>
    %329 = arith.mulf %319, %328 : vector<24x128xf32>
    %330 = vector.broadcast %310 : vector<24x1xf32> to vector<24x128xf32>
    %331 = arith.mulf %329, %330 : vector<24x128xf32>
    %332 = vector.broadcast %311 : vector<24x1xf32> to vector<24x128xf32>
    %333 = arith.addf %331, %332 : vector<24x128xf32>
    %334 = arith.truncf %333 : vector<24x128xf32> to vector<24x128xbf16>
    %cst_269 = arith.constant dense<0.000000e+00> : vector<12x128xf32>
    %335 = tpu.matmul %312, %334, %cst_269 {dimension_numbers = #tpu.dot_dimension_numbers<[1], [0], [0], [1], [0, 0, 1, 1], [], []>} : vector<12x24xbf16>, vector<24x128xbf16>, vector<12x128xf32> -> vector<12x128xf32>
    %cst_270 = arith.constant 0.000000e+00 : f32
    %336 = vector.broadcast %cst_270 : f32 to vector<12x128xf32>
    %337 = arith.maximumf %335, %336 : vector<12x128xf32>
    %338 = arith.truncf %337 : vector<12x128xf32> to vector<12x128xbf16>
    %cst_271 = arith.constant dense<0.000000e+00> : vector<12x32xf32>
    %339 = tpu.matmul %338, %313, %cst_271 {dimension_numbers = #tpu.dot_dimension_numbers<[1], [0], [0], [1], [0, 0, 1, 1], [], []>} : vector<12x128xbf16>, vector<128x32xbf16>, vector<12x32xf32> -> vector<12x32xf32>
    %c0_272 = arith.constant 0 : index
    %c0_273 = arith.constant 0 : index
    %340 = vector.load %arg26[%c0_272, %c0_273] : memref<32x86xbf16, #tpu.memory_space<vmem>>, vector<32x86xbf16>
    %c0_274 = arith.constant 0 : index
    %c0_275 = arith.constant 0 : index
    %341 = vector.load %arg27[%c0_274, %c0_275] : memref<72x32xbf16, #tpu.memory_space<vmem>>, vector<72x32xbf16>
    %c0_276 = arith.constant 0 : index
    %c0_277 = arith.constant 0 : index
    %342 = vector.load %arg28[%c0_276, %c0_277] : memref<12x1xf32, #tpu.memory_space<vmem>>, vector<12x1xf32>
    %c0_278 = arith.constant 0 : index
    %c0_279 = arith.constant 0 : index
    %343 = vector.load %arg29[%c0_278, %c0_279] : memref<12x1xf32, #tpu.memory_space<vmem>>, vector<12x1xf32>
    %c0_280 = arith.constant 0 : index
    %c0_281 = arith.constant 0 : index
    %344 = vector.load %arg30[%c0_280, %c0_281] : memref<8x12xbf16, #tpu.memory_space<vmem>>, vector<8x12xbf16>
    %c0_282 = arith.constant 0 : index
    %c0_283 = arith.constant 0 : index
    %345 = vector.load %arg31[%c0_282, %c0_283] : memref<8x1xf32, #tpu.memory_space<vmem>>, vector<8x1xf32>
    %c0_284 = arith.constant 0 : index
    %c0_285 = arith.constant 0 : index
    %346 = vector.load %arg32[%c0_284, %c0_285] : memref<8x1xf32, #tpu.memory_space<vmem>>, vector<8x1xf32>
    %c0_286 = arith.constant 0 : index
    %c0_287 = arith.constant 0 : index
    %347 = vector.load %arg33[%c0_286, %c0_287] : memref<4x72xbf16, #tpu.memory_space<vmem>>, vector<4x72xbf16>
    %cst_288 = arith.constant dense<0.000000e+00> : vector<12xf32>
    %348 = vector.multi_reduction <add>, %339, %cst_288 [1] : vector<12x32xf32> to vector<12xf32>
    %349 = vector.shape_cast %348 : vector<12xf32> to vector<12x1xf32>
    %cst_289 = arith.constant 3.125000e-02 : f32
    %350 = vector.broadcast %cst_289 : f32 to vector<12x1xf32>
    %351 = arith.mulf %349, %350 : vector<12x1xf32>
    %352 = vector.broadcast %351 : vector<12x1xf32> to vector<12x32xf32>
    %353 = arith.subf %339, %352 : vector<12x32xf32>
    %354 = arith.mulf %353, %353 : vector<12x32xf32>
    %cst_290 = arith.constant dense<0.000000e+00> : vector<12xf32>
    %355 = vector.multi_reduction <add>, %354, %cst_290 [1] : vector<12x32xf32> to vector<12xf32>
    %356 = vector.shape_cast %355 : vector<12xf32> to vector<12x1xf32>
    %cst_291 = arith.constant 3.125000e-02 : f32
    %357 = vector.broadcast %cst_291 : f32 to vector<12x1xf32>
    %358 = arith.mulf %356, %357 : vector<12x1xf32>
    %cst_292 = arith.constant 9.99999974E-6 : f32
    %359 = vector.broadcast %cst_292 : f32 to vector<12x1xf32>
    %360 = arith.addf %358, %359 : vector<12x1xf32>
    %361 = math.rsqrt %360 : vector<12x1xf32>
    %362 = vector.broadcast %361 : vector<12x1xf32> to vector<12x32xf32>
    %363 = arith.mulf %353, %362 : vector<12x32xf32>
    %364 = vector.broadcast %342 : vector<12x1xf32> to vector<12x32xf32>
    %365 = arith.mulf %363, %364 : vector<12x32xf32>
    %366 = vector.broadcast %343 : vector<12x1xf32> to vector<12x32xf32>
    %367 = arith.addf %365, %366 : vector<12x32xf32>
    %cst_293 = arith.constant 0.000000e+00 : f32
    %368 = vector.broadcast %cst_293 : f32 to vector<12x32xf32>
    %369 = arith.maximumf %367, %368 : vector<12x32xf32>
    %370 = arith.truncf %369 : vector<12x32xf32> to vector<12x32xbf16>
    %cst_294 = arith.constant dense<0.000000e+00> : vector<8x32xf32>
    %371 = tpu.matmul %344, %370, %cst_294 {dimension_numbers = #tpu.dot_dimension_numbers<[1], [0], [0], [1], [0, 0, 1, 1], [], []>} : vector<8x12xbf16>, vector<12x32xbf16>, vector<8x32xf32> -> vector<8x32xf32>
    %cst_295 = arith.constant dense<0.000000e+00> : vector<8xf32>
    %372 = vector.multi_reduction <add>, %371, %cst_295 [1] : vector<8x32xf32> to vector<8xf32>
    %373 = vector.shape_cast %372 : vector<8xf32> to vector<8x1xf32>
    %cst_296 = arith.constant 3.125000e-02 : f32
    %374 = vector.broadcast %cst_296 : f32 to vector<8x1xf32>
    %375 = arith.mulf %373, %374 : vector<8x1xf32>
    %376 = vector.broadcast %375 : vector<8x1xf32> to vector<8x32xf32>
    %377 = arith.subf %371, %376 : vector<8x32xf32>
    %378 = arith.mulf %377, %377 : vector<8x32xf32>
    %cst_297 = arith.constant dense<0.000000e+00> : vector<8xf32>
    %379 = vector.multi_reduction <add>, %378, %cst_297 [1] : vector<8x32xf32> to vector<8xf32>
    %380 = vector.shape_cast %379 : vector<8xf32> to vector<8x1xf32>
    %cst_298 = arith.constant 3.125000e-02 : f32
    %381 = vector.broadcast %cst_298 : f32 to vector<8x1xf32>
    %382 = arith.mulf %380, %381 : vector<8x1xf32>
    %cst_299 = arith.constant 9.99999974E-6 : f32
    %383 = vector.broadcast %cst_299 : f32 to vector<8x1xf32>
    %384 = arith.addf %382, %383 : vector<8x1xf32>
    %385 = math.rsqrt %384 : vector<8x1xf32>
    %386 = vector.broadcast %385 : vector<8x1xf32> to vector<8x32xf32>
    %387 = arith.mulf %377, %386 : vector<8x32xf32>
    %388 = vector.broadcast %345 : vector<8x1xf32> to vector<8x32xf32>
    %389 = arith.mulf %387, %388 : vector<8x32xf32>
    %390 = vector.broadcast %346 : vector<8x1xf32> to vector<8x32xf32>
    %391 = arith.addf %389, %390 : vector<8x32xf32>
    %cst_300 = arith.constant 0.000000e+00 : f32
    %392 = vector.broadcast %cst_300 : f32 to vector<8x32xf32>
    %393 = arith.maximumf %391, %392 : vector<8x32xf32>
    %394 = arith.truncf %393 : vector<8x32xf32> to vector<8x32xbf16>
    %cst_301 = arith.constant dense<0.000000e+00> : vector<8x86xf32>
    %395 = tpu.matmul %394, %340, %cst_301 {dimension_numbers = #tpu.dot_dimension_numbers<[1], [0], [0], [1], [0, 0, 1, 1], [], []>} : vector<8x32xbf16>, vector<32x86xbf16>, vector<8x86xf32> -> vector<8x86xf32>
    %396 = vector.extract_strided_slice %395 {offsets = [0, 0], sizes = [8, 72], strides = [1, 1]} : vector<8x86xf32> to vector<8x72xf32>
    %c0_302 = arith.constant 0 : index
    %c0_303 = arith.constant 0 : index
    %397 = vector.load %arg47[%c0_302, %c0_303] : memref<72x200xf32, #tpu.memory_space<vmem>>, vector<8x72xf32>
    tpu.vector_store %arg47[%c0_302, %c0_303], %396 {strides = array<i32>} : memref<72x200xf32, #tpu.memory_space<vmem>>, vector<8x72xf32>,
    %398 = vector.extract_strided_slice %395 {offsets = [0, 1], sizes = [8, 72], strides = [1, 1]} : vector<8x86xf32> to vector<8x72xf32>
    %c8_304 = arith.constant 8 : index
    %c0_305 = arith.constant 0 : index
    %399 = vector.load %arg47[%c8_304, %c0_305] : memref<72x200xf32, #tpu.memory_space<vmem>>, vector<8x72xf32>
    tpu.vector_store %arg47[%c8_304, %c0_305], %398 {strides = array<i32>} : memref<72x200xf32, #tpu.memory_space<vmem>>, vector<8x72xf32>,
    %400 = vector.extract_strided_slice %395 {offsets = [0, 2], sizes = [8, 72], strides = [1, 1]} : vector<8x86xf32> to vector<8x72xf32>
    %c16_306 = arith.constant 16 : index
    %c0_307 = arith.constant 0 : index
    %401 = vector.load %arg47[%c16_306, %c0_307] : memref<72x200xf32, #tpu.memory_space<vmem>>, vector<8x72xf32>
    tpu.vector_store %arg47[%c16_306, %c0_307], %400 {strides = array<i32>} : memref<72x200xf32, #tpu.memory_space<vmem>>, vector<8x72xf32>,
    %402 = vector.extract_strided_slice %395 {offsets = [0, 6], sizes = [8, 72], strides = [1, 1]} : vector<8x86xf32> to vector<8x72xf32>
    %c24_308 = arith.constant 24 : index
    %c0_309 = arith.constant 0 : index
    %403 = vector.load %arg47[%c24_308, %c0_309] : memref<72x200xf32, #tpu.memory_space<vmem>>, vector<8x72xf32>
    tpu.vector_store %arg47[%c24_308, %c0_309], %402 {strides = array<i32>} : memref<72x200xf32, #tpu.memory_space<vmem>>, vector<8x72xf32>,
    %404 = vector.extract_strided_slice %395 {offsets = [0, 7], sizes = [8, 72], strides = [1, 1]} : vector<8x86xf32> to vector<8x72xf32>
    %c32_310 = arith.constant 32 : index
    %c0_311 = arith.constant 0 : index
    %405 = vector.load %arg47[%c32_310, %c0_311] : memref<72x200xf32, #tpu.memory_space<vmem>>, vector<8x72xf32>
    tpu.vector_store %arg47[%c32_310, %c0_311], %404 {strides = array<i32>} : memref<72x200xf32, #tpu.memory_space<vmem>>, vector<8x72xf32>,
    %406 = vector.extract_strided_slice %395 {offsets = [0, 8], sizes = [8, 72], strides = [1, 1]} : vector<8x86xf32> to vector<8x72xf32>
    %c40_312 = arith.constant 40 : index
    %c0_313 = arith.constant 0 : index
    %407 = vector.load %arg47[%c40_312, %c0_313] : memref<72x200xf32, #tpu.memory_space<vmem>>, vector<8x72xf32>
    tpu.vector_store %arg47[%c40_312, %c0_313], %406 {strides = array<i32>} : memref<72x200xf32, #tpu.memory_space<vmem>>, vector<8x72xf32>,
    %408 = vector.extract_strided_slice %395 {offsets = [0, 12], sizes = [8, 72], strides = [1, 1]} : vector<8x86xf32> to vector<8x72xf32>
    %c48_314 = arith.constant 48 : index
    %c0_315 = arith.constant 0 : index
    %409 = vector.load %arg47[%c48_314, %c0_315] : memref<72x200xf32, #tpu.memory_space<vmem>>, vector<8x72xf32>
    tpu.vector_store %arg47[%c48_314, %c0_315], %408 {strides = array<i32>} : memref<72x200xf32, #tpu.memory_space<vmem>>, vector<8x72xf32>,
    %410 = vector.extract_strided_slice %395 {offsets = [0, 13], sizes = [8, 72], strides = [1, 1]} : vector<8x86xf32> to vector<8x72xf32>
    %c56_316 = arith.constant 56 : index
    %c0_317 = arith.constant 0 : index
    %411 = vector.load %arg47[%c56_316, %c0_317] : memref<72x200xf32, #tpu.memory_space<vmem>>, vector<8x72xf32>
    tpu.vector_store %arg47[%c56_316, %c0_317], %410 {strides = array<i32>} : memref<72x200xf32, #tpu.memory_space<vmem>>, vector<8x72xf32>,
    %412 = vector.extract_strided_slice %395 {offsets = [0, 14], sizes = [8, 72], strides = [1, 1]} : vector<8x86xf32> to vector<8x72xf32>
    %c64_318 = arith.constant 64 : index
    %c0_319 = arith.constant 0 : index
    %413 = vector.load %arg47[%c64_318, %c0_319] : memref<72x200xf32, #tpu.memory_space<vmem>>, vector<8x72xf32>
    tpu.vector_store %arg47[%c64_318, %c0_319], %412 {strides = array<i32>} : memref<72x200xf32, #tpu.memory_space<vmem>>, vector<8x72xf32>,
    %c0_320 = arith.constant 0 : index
    %c0_321 = arith.constant 0 : index
    %414 = vector.load %arg47[%c0_320, %c0_321] : memref<72x200xf32, #tpu.memory_space<vmem>>, vector<72x72xf32>
    %415 = arith.truncf %414 : vector<72x72xf32> to vector<72x72xbf16>
    %cst_322 = arith.constant dense<0.000000e+00> : vector<4x72xf32>
    %416 = tpu.matmul %347, %415, %cst_322 {dimension_numbers = #tpu.dot_dimension_numbers<[1], [0], [0], [1], [0, 0, 1, 1], [], []>} : vector<4x72xbf16>, vector<72x72xbf16>, vector<4x72xf32> -> vector<4x72xf32>
    %417 = arith.truncf %416 : vector<4x72xf32> to vector<4x72xbf16>
    %cst_323 = arith.constant dense<0.000000e+00> : vector<4x32xf32>
    %418 = tpu.matmul %417, %341, %cst_323 {dimension_numbers = #tpu.dot_dimension_numbers<[1], [0], [0], [1], [0, 0, 1, 1], [], []>} : vector<4x72xbf16>, vector<72x32xbf16>, vector<4x32xf32> -> vector<4x32xf32>
    %419 = tpu.concatenate %339, %418 in 0 : vector<12x32xf32>, vector<4x32xf32> -> vector<16x32xf32>
    %c0_324 = arith.constant 0 : index
    %c0_325 = arith.constant 0 : index
    %420 = vector.load %arg34[%c0_324, %c0_325] : memref<16x1xf32, #tpu.memory_space<vmem>>, vector<16x1xf32>
    %c0_326 = arith.constant 0 : index
    %c0_327 = arith.constant 0 : index
    %421 = vector.load %arg35[%c0_326, %c0_327] : memref<16x1xf32, #tpu.memory_space<vmem>>, vector<16x1xf32>
    %c0_328 = arith.constant 0 : index
    %c0_329 = arith.constant 0 : index
    %422 = vector.load %arg36[%c0_328, %c0_329] : memref<8x16xbf16, #tpu.memory_space<vmem>>, vector<8x16xbf16>
    %c0_330 = arith.constant 0 : index
    %c0_331 = arith.constant 0 : index
    %423 = vector.load %arg37[%c0_330, %c0_331] : memref<8x1xf32, #tpu.memory_space<vmem>>, vector<8x1xf32>
    %c0_332 = arith.constant 0 : index
    %c0_333 = arith.constant 0 : index
    %424 = vector.load %arg38[%c0_332, %c0_333] : memref<8x1xf32, #tpu.memory_space<vmem>>, vector<8x1xf32>
    %c0_334 = arith.constant 0 : index
    %c0_335 = arith.constant 0 : index
    %425 = vector.load %arg39[%c0_334, %c0_335] : memref<4x72xbf16, #tpu.memory_space<vmem>>, vector<4x72xbf16>
    %cst_336 = arith.constant dense<0.000000e+00> : vector<16xf32>
    %426 = vector.multi_reduction <add>, %419, %cst_336 [1] : vector<16x32xf32> to vector<16xf32>
    %427 = vector.shape_cast %426 : vector<16xf32> to vector<16x1xf32>
    %cst_337 = arith.constant 3.125000e-02 : f32
    %428 = vector.broadcast %cst_337 : f32 to vector<16x1xf32>
    %429 = arith.mulf %427, %428 : vector<16x1xf32>
    %430 = vector.broadcast %429 : vector<16x1xf32> to vector<16x32xf32>
    %431 = arith.subf %419, %430 : vector<16x32xf32>
    %432 = arith.mulf %431, %431 : vector<16x32xf32>
    %cst_338 = arith.constant dense<0.000000e+00> : vector<16xf32>
    %433 = vector.multi_reduction <add>, %432, %cst_338 [1] : vector<16x32xf32> to vector<16xf32>
    %434 = vector.shape_cast %433 : vector<16xf32> to vector<16x1xf32>
    %cst_339 = arith.constant 3.125000e-02 : f32
    %435 = vector.broadcast %cst_339 : f32 to vector<16x1xf32>
    %436 = arith.mulf %434, %435 : vector<16x1xf32>
    %cst_340 = arith.constant 9.99999974E-6 : f32
    %437 = vector.broadcast %cst_340 : f32 to vector<16x1xf32>
    %438 = arith.addf %436, %437 : vector<16x1xf32>
    %439 = math.rsqrt %438 : vector<16x1xf32>
    %440 = vector.broadcast %439 : vector<16x1xf32> to vector<16x32xf32>
    %441 = arith.mulf %431, %440 : vector<16x32xf32>
    %442 = vector.broadcast %420 : vector<16x1xf32> to vector<16x32xf32>
    %443 = arith.mulf %441, %442 : vector<16x32xf32>
    %444 = vector.broadcast %421 : vector<16x1xf32> to vector<16x32xf32>
    %445 = arith.addf %443, %444 : vector<16x32xf32>
    %cst_341 = arith.constant 0.000000e+00 : f32
    %446 = vector.broadcast %cst_341 : f32 to vector<16x32xf32>
    %447 = arith.maximumf %445, %446 : vector<16x32xf32>
    %448 = arith.truncf %447 : vector<16x32xf32> to vector<16x32xbf16>
    %cst_342 = arith.constant dense<0.000000e+00> : vector<8x32xf32>
    %449 = tpu.matmul %422, %448, %cst_342 {dimension_numbers = #tpu.dot_dimension_numbers<[1], [0], [0], [1], [0, 0, 1, 1], [], []>} : vector<8x16xbf16>, vector<16x32xbf16>, vector<8x32xf32> -> vector<8x32xf32>
    %cst_343 = arith.constant dense<0.000000e+00> : vector<8xf32>
    %450 = vector.multi_reduction <add>, %449, %cst_343 [1] : vector<8x32xf32> to vector<8xf32>
    %451 = vector.shape_cast %450 : vector<8xf32> to vector<8x1xf32>
    %cst_344 = arith.constant 3.125000e-02 : f32
    %452 = vector.broadcast %cst_344 : f32 to vector<8x1xf32>
    %453 = arith.mulf %451, %452 : vector<8x1xf32>
    %454 = vector.broadcast %453 : vector<8x1xf32> to vector<8x32xf32>
    %455 = arith.subf %449, %454 : vector<8x32xf32>
    %456 = arith.mulf %455, %455 : vector<8x32xf32>
    %cst_345 = arith.constant dense<0.000000e+00> : vector<8xf32>
    %457 = vector.multi_reduction <add>, %456, %cst_345 [1] : vector<8x32xf32> to vector<8xf32>
    %458 = vector.shape_cast %457 : vector<8xf32> to vector<8x1xf32>
    %cst_346 = arith.constant 3.125000e-02 : f32
    %459 = vector.broadcast %cst_346 : f32 to vector<8x1xf32>
    %460 = arith.mulf %458, %459 : vector<8x1xf32>
    %cst_347 = arith.constant 9.99999974E-6 : f32
    %461 = vector.broadcast %cst_347 : f32 to vector<8x1xf32>
    %462 = arith.addf %460, %461 : vector<8x1xf32>
    %463 = math.rsqrt %462 : vector<8x1xf32>
    %464 = vector.broadcast %463 : vector<8x1xf32> to vector<8x32xf32>
    %465 = arith.mulf %455, %464 : vector<8x32xf32>
    %466 = vector.broadcast %423 : vector<8x1xf32> to vector<8x32xf32>
    %467 = arith.mulf %465, %466 : vector<8x32xf32>
    %468 = vector.broadcast %424 : vector<8x1xf32> to vector<8x32xf32>
    %469 = arith.addf %467, %468 : vector<8x32xf32>
    %cst_348 = arith.constant 0.000000e+00 : f32
    %470 = vector.broadcast %cst_348 : f32 to vector<8x32xf32>
    %471 = arith.maximumf %469, %470 : vector<8x32xf32>
    %472 = arith.truncf %471 : vector<8x32xf32> to vector<8x32xbf16>
    %cst_349 = arith.constant dense<0.000000e+00> : vector<8x86xf32>
    %473 = tpu.matmul %472, %340, %cst_349 {dimension_numbers = #tpu.dot_dimension_numbers<[1], [0], [0], [1], [0, 0, 1, 1], [], []>} : vector<8x32xbf16>, vector<32x86xbf16>, vector<8x86xf32> -> vector<8x86xf32>
    %474 = vector.extract_strided_slice %473 {offsets = [0, 0], sizes = [8, 72], strides = [1, 1]} : vector<8x86xf32> to vector<8x72xf32>
    %c0_350 = arith.constant 0 : index
    %c0_351 = arith.constant 0 : index
    %475 = vector.load %arg47[%c0_350, %c0_351] : memref<72x200xf32, #tpu.memory_space<vmem>>, vector<8x72xf32>
    tpu.vector_store %arg47[%c0_350, %c0_351], %474 {strides = array<i32>} : memref<72x200xf32, #tpu.memory_space<vmem>>, vector<8x72xf32>,
    %476 = vector.extract_strided_slice %473 {offsets = [0, 1], sizes = [8, 72], strides = [1, 1]} : vector<8x86xf32> to vector<8x72xf32>
    %c8_352 = arith.constant 8 : index
    %c0_353 = arith.constant 0 : index
    %477 = vector.load %arg47[%c8_352, %c0_353] : memref<72x200xf32, #tpu.memory_space<vmem>>, vector<8x72xf32>
    tpu.vector_store %arg47[%c8_352, %c0_353], %476 {strides = array<i32>} : memref<72x200xf32, #tpu.memory_space<vmem>>, vector<8x72xf32>,
    %478 = vector.extract_strided_slice %473 {offsets = [0, 2], sizes = [8, 72], strides = [1, 1]} : vector<8x86xf32> to vector<8x72xf32>
    %c16_354 = arith.constant 16 : index
    %c0_355 = arith.constant 0 : index
    %479 = vector.load %arg47[%c16_354, %c0_355] : memref<72x200xf32, #tpu.memory_space<vmem>>, vector<8x72xf32>
    tpu.vector_store %arg47[%c16_354, %c0_355], %478 {strides = array<i32>} : memref<72x200xf32, #tpu.memory_space<vmem>>, vector<8x72xf32>,
    %480 = vector.extract_strided_slice %473 {offsets = [0, 6], sizes = [8, 72], strides = [1, 1]} : vector<8x86xf32> to vector<8x72xf32>
    %c24_356 = arith.constant 24 : index
    %c0_357 = arith.constant 0 : index
    %481 = vector.load %arg47[%c24_356, %c0_357] : memref<72x200xf32, #tpu.memory_space<vmem>>, vector<8x72xf32>
    tpu.vector_store %arg47[%c24_356, %c0_357], %480 {strides = array<i32>} : memref<72x200xf32, #tpu.memory_space<vmem>>, vector<8x72xf32>,
    %482 = vector.extract_strided_slice %473 {offsets = [0, 7], sizes = [8, 72], strides = [1, 1]} : vector<8x86xf32> to vector<8x72xf32>
    %c32_358 = arith.constant 32 : index
    %c0_359 = arith.constant 0 : index
    %483 = vector.load %arg47[%c32_358, %c0_359] : memref<72x200xf32, #tpu.memory_space<vmem>>, vector<8x72xf32>
    tpu.vector_store %arg47[%c32_358, %c0_359], %482 {strides = array<i32>} : memref<72x200xf32, #tpu.memory_space<vmem>>, vector<8x72xf32>,
    %484 = vector.extract_strided_slice %473 {offsets = [0, 8], sizes = [8, 72], strides = [1, 1]} : vector<8x86xf32> to vector<8x72xf32>
    %c40_360 = arith.constant 40 : index
    %c0_361 = arith.constant 0 : index
    %485 = vector.load %arg47[%c40_360, %c0_361] : memref<72x200xf32, #tpu.memory_space<vmem>>, vector<8x72xf32>
    tpu.vector_store %arg47[%c40_360, %c0_361], %484 {strides = array<i32>} : memref<72x200xf32, #tpu.memory_space<vmem>>, vector<8x72xf32>,
    %486 = vector.extract_strided_slice %473 {offsets = [0, 12], sizes = [8, 72], strides = [1, 1]} : vector<8x86xf32> to vector<8x72xf32>
    %c48_362 = arith.constant 48 : index
    %c0_363 = arith.constant 0 : index
    %487 = vector.load %arg47[%c48_362, %c0_363] : memref<72x200xf32, #tpu.memory_space<vmem>>, vector<8x72xf32>
    tpu.vector_store %arg47[%c48_362, %c0_363], %486 {strides = array<i32>} : memref<72x200xf32, #tpu.memory_space<vmem>>, vector<8x72xf32>,
    %488 = vector.extract_strided_slice %473 {offsets = [0, 13], sizes = [8, 72], strides = [1, 1]} : vector<8x86xf32> to vector<8x72xf32>
    %c56_364 = arith.constant 56 : index
    %c0_365 = arith.constant 0 : index
    %489 = vector.load %arg47[%c56_364, %c0_365] : memref<72x200xf32, #tpu.memory_space<vmem>>, vector<8x72xf32>
    tpu.vector_store %arg47[%c56_364, %c0_365], %488 {strides = array<i32>} : memref<72x200xf32, #tpu.memory_space<vmem>>, vector<8x72xf32>,
    %490 = vector.extract_strided_slice %473 {offsets = [0, 14], sizes = [8, 72], strides = [1, 1]} : vector<8x86xf32> to vector<8x72xf32>
    %c64_366 = arith.constant 64 : index
    %c0_367 = arith.constant 0 : index
    %491 = vector.load %arg47[%c64_366, %c0_367] : memref<72x200xf32, #tpu.memory_space<vmem>>, vector<8x72xf32>
    tpu.vector_store %arg47[%c64_366, %c0_367], %490 {strides = array<i32>} : memref<72x200xf32, #tpu.memory_space<vmem>>, vector<8x72xf32>,
    %c0_368 = arith.constant 0 : index
    %c0_369 = arith.constant 0 : index
    %492 = vector.load %arg47[%c0_368, %c0_369] : memref<72x200xf32, #tpu.memory_space<vmem>>, vector<72x72xf32>
    %493 = arith.truncf %492 : vector<72x72xf32> to vector<72x72xbf16>
    %cst_370 = arith.constant dense<0.000000e+00> : vector<4x72xf32>
    %494 = tpu.matmul %425, %493, %cst_370 {dimension_numbers = #tpu.dot_dimension_numbers<[1], [0], [0], [1], [0, 0, 1, 1], [], []>} : vector<4x72xbf16>, vector<72x72xbf16>, vector<4x72xf32> -> vector<4x72xf32>
    %495 = arith.truncf %494 : vector<4x72xf32> to vector<4x72xbf16>
    %cst_371 = arith.constant dense<0.000000e+00> : vector<4x32xf32>
    %496 = tpu.matmul %495, %341, %cst_371 {dimension_numbers = #tpu.dot_dimension_numbers<[1], [0], [0], [1], [0, 0, 1, 1], [], []>} : vector<4x72xbf16>, vector<72x32xbf16>, vector<4x32xf32> -> vector<4x32xf32>
    %497 = tpu.concatenate %419, %496 in 0 : vector<16x32xf32>, vector<4x32xf32> -> vector<20x32xf32>
    %c0_372 = arith.constant 0 : index
    %c0_373 = arith.constant 0 : index
    %498 = vector.load %arg40[%c0_372, %c0_373] : memref<20x1xf32, #tpu.memory_space<vmem>>, vector<20x1xf32>
    %c0_374 = arith.constant 0 : index
    %c0_375 = arith.constant 0 : index
    %499 = vector.load %arg41[%c0_374, %c0_375] : memref<20x1xf32, #tpu.memory_space<vmem>>, vector<20x1xf32>
    %c0_376 = arith.constant 0 : index
    %c0_377 = arith.constant 0 : index
    %500 = vector.load %arg42[%c0_376, %c0_377] : memref<32x2xbf16, #tpu.memory_space<vmem>>, vector<32x2xbf16>
    %c0_378 = arith.constant 0 : index
    %c0_379 = arith.constant 0 : index
    %501 = vector.load %arg43[%c0_378, %c0_379] : memref<10x20xbf16, #tpu.memory_space<vmem>>, vector<10x20xbf16>
    %c0_380 = arith.constant 0 : index
    %c0_381 = arith.constant 0 : index
    %502 = vector.load %arg44[%c0_380, %c0_381] : memref<10x1xf32, #tpu.memory_space<vmem>>, vector<10x1xf32>
    %cst_382 = arith.constant dense<0.000000e+00> : vector<20xf32>
    %503 = vector.multi_reduction <add>, %497, %cst_382 [1] : vector<20x32xf32> to vector<20xf32>
    %504 = vector.shape_cast %503 : vector<20xf32> to vector<20x1xf32>
    %cst_383 = arith.constant 3.125000e-02 : f32
    %505 = vector.broadcast %cst_383 : f32 to vector<20x1xf32>
    %506 = arith.mulf %504, %505 : vector<20x1xf32>
    %507 = vector.broadcast %506 : vector<20x1xf32> to vector<20x32xf32>
    %508 = arith.subf %497, %507 : vector<20x32xf32>
    %509 = arith.mulf %508, %508 : vector<20x32xf32>
    %cst_384 = arith.constant dense<0.000000e+00> : vector<20xf32>
    %510 = vector.multi_reduction <add>, %509, %cst_384 [1] : vector<20x32xf32> to vector<20xf32>
    %511 = vector.shape_cast %510 : vector<20xf32> to vector<20x1xf32>
    %cst_385 = arith.constant 3.125000e-02 : f32
    %512 = vector.broadcast %cst_385 : f32 to vector<20x1xf32>
    %513 = arith.mulf %511, %512 : vector<20x1xf32>
    %cst_386 = arith.constant 9.99999974E-6 : f32
    %514 = vector.broadcast %cst_386 : f32 to vector<20x1xf32>
    %515 = arith.addf %513, %514 : vector<20x1xf32>
    %516 = math.rsqrt %515 : vector<20x1xf32>
    %517 = vector.broadcast %516 : vector<20x1xf32> to vector<20x32xf32>
    %518 = arith.mulf %508, %517 : vector<20x32xf32>
    %519 = vector.broadcast %498 : vector<20x1xf32> to vector<20x32xf32>
    %520 = arith.mulf %518, %519 : vector<20x32xf32>
    %521 = vector.broadcast %499 : vector<20x1xf32> to vector<20x32xf32>
    %522 = arith.addf %520, %521 : vector<20x32xf32>
    %cst_387 = arith.constant 0.000000e+00 : f32
    %523 = vector.broadcast %cst_387 : f32 to vector<20x32xf32>
    %524 = arith.maximumf %522, %523 : vector<20x32xf32>
    %525 = arith.truncf %524 : vector<20x32xf32> to vector<20x32xbf16>
    %cst_388 = arith.constant dense<0.000000e+00> : vector<20x2xf32>
    %526 = tpu.matmul %525, %500, %cst_388 {dimension_numbers = #tpu.dot_dimension_numbers<[1], [0], [0], [1], [0, 0, 1, 1], [], []>} : vector<20x32xbf16>, vector<32x2xbf16>, vector<20x2xf32> -> vector<20x2xf32>
    %527 = arith.truncf %526 : vector<20x2xf32> to vector<20x2xbf16>
    %cst_389 = arith.constant dense<0.000000e+00> : vector<10x2xf32>
    %528 = tpu.matmul %501, %527, %cst_389 {dimension_numbers = #tpu.dot_dimension_numbers<[1], [0], [0], [1], [0, 0, 1, 1], [], []>} : vector<10x20xbf16>, vector<20x2xbf16>, vector<10x2xf32> -> vector<10x2xf32>
    %529 = vector.broadcast %502 : vector<10x1xf32> to vector<10x2xf32>
    %530 = arith.addf %528, %529 : vector<10x2xf32>
    %c0_390 = arith.constant 0 : index
    %c0_391 = arith.constant 0 : index
    %531 = vector.load %arg45[%c0_390, %c0_391] : memref<10x2xf32, #tpu.memory_space<vmem>>, vector<10x2xf32>
    tpu.vector_store %arg45[%c0_390, %c0_391], %530 {strides = array<i32>} : memref<10x2xf32, #tpu.memory_space<vmem>>, vector<10x2xf32>,
    return
  }
  func.func @transform_0(%arg0: i32) -> (i32, i32) {
    %c0_i32 = arith.constant 0 : i32
    %c0_i32_0 = arith.constant 0 : i32
    %c0_i32_1 = arith.constant 0 : i32
    return %c0_i32, %c0_i32_0 : i32, i32
  }
  func.func @transform_1(%arg0: i32) -> (i32, i32) {
    %c0_i32 = arith.constant 0 : i32
    %c0_i32_0 = arith.constant 0 : i32
    %c0_i32_1 = arith.constant 0 : i32
    return %c0_i32, %c0_i32_0 : i32, i32
  }
  func.func @transform_2(%arg0: i32) -> (i32, i32) {
    %c0_i32 = arith.constant 0 : i32
    %c0_i32_0 = arith.constant 0 : i32
    %c0_i32_1 = arith.constant 0 : i32
    return %c0_i32, %c0_i32_0 : i32, i32
  }
  func.func @transform_3(%arg0: i32) -> (i32, i32) {
    %c0_i32 = arith.constant 0 : i32
    %c0_i32_0 = arith.constant 0 : i32
    %c0_i32_1 = arith.constant 0 : i32
    return %c0_i32, %c0_i32_0 : i32, i32
  }
  func.func @transform_4(%arg0: i32) -> (i32, i32) {
    %c0_i32 = arith.constant 0 : i32
    %c0_i32_0 = arith.constant 0 : i32
    %c0_i32_1 = arith.constant 0 : i32
    return %c0_i32, %c0_i32_0 : i32, i32
  }
  func.func @transform_5(%arg0: i32) -> (i32, i32) {
    %c0_i32 = arith.constant 0 : i32
    %c0_i32_0 = arith.constant 0 : i32
    %c0_i32_1 = arith.constant 0 : i32
    return %c0_i32, %c0_i32_0 : i32, i32
  }
  func.func @transform_6(%arg0: i32) -> (i32, i32) {
    %c0_i32 = arith.constant 0 : i32
    %c0_i32_0 = arith.constant 0 : i32
    %c0_i32_1 = arith.constant 0 : i32
    return %c0_i32, %c0_i32_0 : i32, i32
  }
  func.func @transform_7(%arg0: i32) -> (i32, i32) {
    %c0_i32 = arith.constant 0 : i32
    %c0_i32_0 = arith.constant 0 : i32
    %c0_i32_1 = arith.constant 0 : i32
    return %c0_i32, %c0_i32_0 : i32, i32
  }
  func.func @transform_8(%arg0: i32) -> (i32, i32) {
    %c0_i32 = arith.constant 0 : i32
    %c0_i32_0 = arith.constant 0 : i32
    %c0_i32_1 = arith.constant 0 : i32
    return %c0_i32, %c0_i32_0 : i32, i32
  }
  func.func @transform_9(%arg0: i32) -> (i32, i32) {
    %c0_i32 = arith.constant 0 : i32
    %c0_i32_0 = arith.constant 0 : i32
    %c0_i32_1 = arith.constant 0 : i32
    return %c0_i32, %c0_i32_0 : i32, i32
  }
  func.func @transform_10(%arg0: i32) -> (i32, i32) {
    %c0_i32 = arith.constant 0 : i32
    %c0_i32_0 = arith.constant 0 : i32
    %c0_i32_1 = arith.constant 0 : i32
    return %c0_i32, %c0_i32_0 : i32, i32
  }
  func.func @transform_11(%arg0: i32) -> (i32, i32) {
    %c0_i32 = arith.constant 0 : i32
    %c0_i32_0 = arith.constant 0 : i32
    %c0_i32_1 = arith.constant 0 : i32
    return %c0_i32, %c0_i32_0 : i32, i32
  }
  func.func @transform_12(%arg0: i32) -> (i32, i32) {
    %c0_i32 = arith.constant 0 : i32
    %c0_i32_0 = arith.constant 0 : i32
    %c0_i32_1 = arith.constant 0 : i32
    return %c0_i32, %c0_i32_0 : i32, i32
  }
  func.func @transform_13(%arg0: i32) -> (i32, i32) {
    %c0_i32 = arith.constant 0 : i32
    %c0_i32_0 = arith.constant 0 : i32
    %c0_i32_1 = arith.constant 0 : i32
    return %c0_i32, %c0_i32_0 : i32, i32
  }
  func.func @transform_14(%arg0: i32) -> (i32, i32) {
    %c0_i32 = arith.constant 0 : i32
    %c0_i32_0 = arith.constant 0 : i32
    %c0_i32_1 = arith.constant 0 : i32
    return %c0_i32, %c0_i32_0 : i32, i32
  }
  func.func @transform_15(%arg0: i32) -> (i32, i32) {
    %c0_i32 = arith.constant 0 : i32
    %c0_i32_0 = arith.constant 0 : i32
    %c0_i32_1 = arith.constant 0 : i32
    return %c0_i32, %c0_i32_0 : i32, i32
  }
  func.func @transform_16(%arg0: i32) -> (i32, i32) {
    %c0_i32 = arith.constant 0 : i32
    %c0_i32_0 = arith.constant 0 : i32
    %c0_i32_1 = arith.constant 0 : i32
    return %c0_i32, %c0_i32_0 : i32, i32
  }
  func.func @transform_17(%arg0: i32) -> (i32, i32) {
    %c0_i32 = arith.constant 0 : i32
    %c0_i32_0 = arith.constant 0 : i32
    %c0_i32_1 = arith.constant 0 : i32
    return %c0_i32, %c0_i32_0 : i32, i32
  }
  func.func @transform_18(%arg0: i32) -> (i32, i32) {
    %c0_i32 = arith.constant 0 : i32
    %c0_i32_0 = arith.constant 0 : i32
    %c0_i32_1 = arith.constant 0 : i32
    return %c0_i32, %c0_i32_0 : i32, i32
  }
  func.func @transform_19(%arg0: i32) -> (i32, i32) {
    %c0_i32 = arith.constant 0 : i32
    %c0_i32_0 = arith.constant 0 : i32
    %c0_i32_1 = arith.constant 0 : i32
    return %c0_i32, %c0_i32_0 : i32, i32
  }
  func.func @transform_20(%arg0: i32) -> (i32, i32) {
    %c0_i32 = arith.constant 0 : i32
    %c0_i32_0 = arith.constant 0 : i32
    %c0_i32_1 = arith.constant 0 : i32
    return %c0_i32, %c0_i32_0 : i32, i32
  }
  func.func @transform_21(%arg0: i32) -> (i32, i32) {
    %c0_i32 = arith.constant 0 : i32
    %c0_i32_0 = arith.constant 0 : i32
    %c0_i32_1 = arith.constant 0 : i32
    return %c0_i32, %c0_i32_0 : i32, i32
  }
  func.func @transform_22(%arg0: i32) -> (i32, i32) {
    %c0_i32 = arith.constant 0 : i32
    %c0_i32_0 = arith.constant 0 : i32
    %c0_i32_1 = arith.constant 0 : i32
    return %c0_i32, %c0_i32_0 : i32, i32
  }
  func.func @transform_23(%arg0: i32) -> (i32, i32) {
    %c0_i32 = arith.constant 0 : i32
    %c0_i32_0 = arith.constant 0 : i32
    %c0_i32_1 = arith.constant 0 : i32
    return %c0_i32, %c0_i32_0 : i32, i32
  }
  func.func @transform_24(%arg0: i32) -> (i32, i32) {
    %c0_i32 = arith.constant 0 : i32
    %c0_i32_0 = arith.constant 0 : i32
    %c0_i32_1 = arith.constant 0 : i32
    return %c0_i32, %c0_i32_0 : i32, i32
  }
  func.func @transform_25(%arg0: i32) -> (i32, i32) {
    %c0_i32 = arith.constant 0 : i32
    %c0_i32_0 = arith.constant 0 : i32
    %c0_i32_1 = arith.constant 0 : i32
    return %c0_i32, %c0_i32_0 : i32, i32
  }
  func.func @transform_26(%arg0: i32) -> (i32, i32) {
    %c0_i32 = arith.constant 0 : i32
    %c0_i32_0 = arith.constant 0 : i32
    %c0_i32_1 = arith.constant 0 : i32
    return %c0_i32, %c0_i32_0 : i32, i32
  }
  func.func @transform_27(%arg0: i32) -> (i32, i32) {
    %c0_i32 = arith.constant 0 : i32
    %c0_i32_0 = arith.constant 0 : i32
    %c0_i32_1 = arith.constant 0 : i32
    return %c0_i32, %c0_i32_0 : i32, i32
  }
  func.func @transform_28(%arg0: i32) -> (i32, i32) {
    %c0_i32 = arith.constant 0 : i32
    %c0_i32_0 = arith.constant 0 : i32
    %c0_i32_1 = arith.constant 0 : i32
    return %c0_i32, %c0_i32_0 : i32, i32
  }
  func.func @transform_29(%arg0: i32) -> (i32, i32) {
    %c0_i32 = arith.constant 0 : i32
    %c0_i32_0 = arith.constant 0 : i32
    %c0_i32_1 = arith.constant 0 : i32
    return %c0_i32, %c0_i32_0 : i32, i32
  }
  func.func @transform_30(%arg0: i32) -> (i32, i32) {
    %c0_i32 = arith.constant 0 : i32
    %c0_i32_0 = arith.constant 0 : i32
    %c0_i32_1 = arith.constant 0 : i32
    return %c0_i32, %c0_i32_0 : i32, i32
  }
  func.func @transform_31(%arg0: i32) -> (i32, i32) {
    %c0_i32 = arith.constant 0 : i32
    %c0_i32_0 = arith.constant 0 : i32
    %c0_i32_1 = arith.constant 0 : i32
    return %c0_i32, %c0_i32_0 : i32, i32
  }
  func.func @transform_32(%arg0: i32) -> (i32, i32) {
    %c0_i32 = arith.constant 0 : i32
    %c0_i32_0 = arith.constant 0 : i32
    %c0_i32_1 = arith.constant 0 : i32
    return %c0_i32, %c0_i32_0 : i32, i32
  }
  func.func @transform_33(%arg0: i32) -> (i32, i32) {
    %c0_i32 = arith.constant 0 : i32
    %c0_i32_0 = arith.constant 0 : i32
    %c0_i32_1 = arith.constant 0 : i32
    return %c0_i32, %c0_i32_0 : i32, i32
  }
  func.func @transform_34(%arg0: i32) -> (i32, i32) {
    %c0_i32 = arith.constant 0 : i32
    %c0_i32_0 = arith.constant 0 : i32
    %c0_i32_1 = arith.constant 0 : i32
    return %c0_i32, %c0_i32_0 : i32, i32
  }
  func.func @transform_35(%arg0: i32) -> (i32, i32) {
    %c0_i32 = arith.constant 0 : i32
    %c0_i32_0 = arith.constant 0 : i32
    %c0_i32_1 = arith.constant 0 : i32
    return %c0_i32, %c0_i32_0 : i32, i32
  }
  func.func @transform_36(%arg0: i32) -> (i32, i32) {
    %c0_i32 = arith.constant 0 : i32
    %c0_i32_0 = arith.constant 0 : i32
    %c0_i32_1 = arith.constant 0 : i32
    return %c0_i32, %c0_i32_0 : i32, i32
  }
  func.func @transform_37(%arg0: i32) -> (i32, i32) {
    %c0_i32 = arith.constant 0 : i32
    %c0_i32_0 = arith.constant 0 : i32
    %c0_i32_1 = arith.constant 0 : i32
    return %c0_i32, %c0_i32_0 : i32, i32
  }
  func.func @transform_38(%arg0: i32) -> (i32, i32) {
    %c0_i32 = arith.constant 0 : i32
    %c0_i32_0 = arith.constant 0 : i32
    %c0_i32_1 = arith.constant 0 : i32
    return %c0_i32, %c0_i32_0 : i32, i32
  }
  func.func @transform_39(%arg0: i32) -> (i32, i32) {
    %c0_i32 = arith.constant 0 : i32
    %c0_i32_0 = arith.constant 0 : i32
    %c0_i32_1 = arith.constant 0 : i32
    return %c0_i32, %c0_i32_0 : i32, i32
  }
  func.func @transform_40(%arg0: i32) -> (i32, i32) {
    %c0_i32 = arith.constant 0 : i32
    %c0_i32_0 = arith.constant 0 : i32
    %c0_i32_1 = arith.constant 0 : i32
    return %c0_i32, %c0_i32_0 : i32, i32
  }
  func.func @transform_41(%arg0: i32) -> (i32, i32) {
    %c0_i32 = arith.constant 0 : i32
    %c0_i32_0 = arith.constant 0 : i32
    %c0_i32_1 = arith.constant 0 : i32
    return %c0_i32, %c0_i32_0 : i32, i32
  }
  func.func @transform_42(%arg0: i32) -> (i32, i32) {
    %c0_i32 = arith.constant 0 : i32
    %c0_i32_0 = arith.constant 0 : i32
    %c0_i32_1 = arith.constant 0 : i32
    return %c0_i32, %c0_i32_0 : i32, i32
  }
  func.func @transform_43(%arg0: i32) -> (i32, i32) {
    %c0_i32 = arith.constant 0 : i32
    %c0_i32_0 = arith.constant 0 : i32
    %c0_i32_1 = arith.constant 0 : i32
    return %c0_i32, %c0_i32_0 : i32, i32
  }
  func.func @transform_44(%arg0: i32) -> (i32, i32) {
    %c0_i32 = arith.constant 0 : i32
    %c0_i32_0 = arith.constant 0 : i32
    %c0_i32_1 = arith.constant 0 : i32
    return %c0_i32, %c0_i32_0 : i32, i32
  }
}

</mosaic_0001>

<bundles_post_ra>
// kernel: densenet_forward.1
= control target key start
LH: loop header
LB: loop body
LE: loop exit
PB: predicated region body
PF: predicated region fallthrough
CT: control target
= control target key end

     0   :  { %s11329_s6 = smov 89   ;;  %s11330_s7 = smov 90   ;;  %vm1710_vm0 = vcmask 736256   ;;  %vm1793_vm1 = vcmask 728064   ;;  %vm2478_vm2 = vcmask 564224   ;;  %vm1298_vm3 = vcmask 875520   ;;  %s15267_s0 = inlined_call_operand.smem [shape: u32[45], index: -1, kind: input, shape index: {}] }
   0x1   :  { %s11408_s5 = sld [smem:[%s15267_s0]]   ;;  %s11331_s8 = smov 69   ;;  %vm2385_vm4 = vcmask 572416   ;;  %vm15306_vm5 = vcmask 867328   ;;  %vm1215_vm6 = vcmask 883712   ;;  %vm2292_vm7 = vcmask 580608  }
   0x2   :  { %s11332_s9 = smov 107   ;;  %s11333_s10 = smov 106   ;;  %vm1132_vm8 = vcmask 891904   ;;  %vm1876_vm9 = vcmask 719872   ;;  %vm15286_vm10 = vcmask 711680   ;;  %vm778_vm11 = vcmask 1031168  }
   0x3   :  { %s11334_s11 = smov 70   ;;  %s11335_s12 = smov 108   ;;  %vm861_vm12 = vcmask 1022976   ;;  %vm695_vm13 = vcmask 1039360   ;;  %vm2571_vm14 = vcmask 556032   ;;  %vm15307_vm15 = vcmask 1043456  }
   0x4   :  { %s11336_s13 = smov 71   ;;  %s11337_s14 = smov 109  }
   0x5   :  { %s11338_s15 = smov 88   ;;  %s11339_s16 = smov 87  }
   0x6   :  { %s11340_s17 = smov 126   ;;  %s11341_s18 = smov 125  }
   0x7   :  { %v11411_v0 = vld [vmem:[%s11408_s5 + $0x38] sm:$0xff]  ;;  %v11414_v1 = vld [vmem:[%s11408_s5] sm:$0xff]  ;;  %v11426_v3 = vld [vmem:[%s11408_s5 + $0x8] sm:$0xff]  ;;  %s11342_s19 = smov 127   ;;  %s11343_s20 = smov 68  }
   0x8   :  { %1823 = vrot.lane.b32.xlu1 %v11411_v0, %s11329_s6  ;;  %1781 = vrot.lane.b32.xlu0 %v11414_v1, %s11329_s6  ;;  %v11423_v2 = vld [vmem:[%s11408_s5 + $0x40] sm:$0xff]  ;;  %v11447_v4 = vld [vmem:[%s11408_s5 + $0xb0] sm:$0xff]  ;;  %s11344_s21 = smov 1   ;;  %s11345_s25 = smov 2  }
   0x9   :  { %1698 = vrot.lane.b32.xlu2 %v11414_v1, %s11330_s7  ;;  %v11450_v5 = vld [vmem:[%s11408_s5 + $0xa8] sm:$0xff]  ;;  %v11453_v6 = vld [vmem:[%s11408_s5 + $0x70] sm:$0xff]  ;;  %v11462_v7 = vld [vmem:[%s11408_s5 + $0x78] sm:$0xff]  ;;  %s12172_s24 = sld [smem:[%s15267_s0 + %s11344_s21]]   ;;  %s11346_s29 = smov 3  }
   0xa   :  { %v11495_v8 = vld [vmem:[%s11408_s5 + $0x10] sm:$0xff]  ;;  %v11504_v9 = vld [vmem:[%s11408_s5 + $0x48] sm:$0xff]  ;;  %v11584_v38 = vld [vmem:[%s11408_s5 + $0xb8] sm:$0xff]  ;;  %s13285_s28 = sld [smem:[%s15267_s0 + %s11345_s25]]   ;;  %s11347_s3 = smov 4  }
   0xb   :  { %v11599_v45 = vld [vmem:[%s11408_s5 + $0x80] sm:$0xff]  ;;  %s13773_s2 = sld [smem:[%s15267_s0 + %s11346_s29]]   ;;  %s11353_s21 = smov 6  }
   0xc   :  { %s11354_s25 = smov 9   ;;  %s11356_s1 = smov 12  }
   0xd   :  { %s8613_s4 = sld [smem:[%s15267_s0 + %s11356_s1]]   ;;  %s11362_s26 = smov 118  }
   0xe   :  { %s11363_s27 = smov 15   ;;  %s11364_s29 = smov 16  }
   0xf   :  { %s11368_s22 = smov 17   ;;  %s11370_s1 = smov 21  }
  0x10   :  { %1825 = vrot.lane.b32.xlu1 %v11423_v2, %s11329_s6  ;;  %1783 = vrot.lane.b32.xlu0 %v11426_v3, %s11329_s6 }
  0x11   :  { %1700 = vrot.lane.b32.xlu2 %v11426_v3, %s11330_s7 }
  0x18   :  { %1742 = vrot.lane.b32.xlu1 %v11423_v2, %s11330_s7  ;;  %1740 = vrot.lane.b32.xlu0 %v11411_v0, %s11330_s7 }
  0x19   :  { %2464 = vrot.lane.b32.xlu2 %v11414_v1, %s11331_s8 }
  0x20   :  { %2511 = vrot.lane.b32.xlu1 %v11411_v0, %s11331_s8  ;;  %2466 = vrot.lane.b32.xlu0 %v11426_v3, %s11331_s8 }
  0x21   :  { %2513 = vrot.lane.b32.xlu2 %v11423_v2, %s11331_s8 }
  0x28   :  { %1618 = vrot.lane.b32.xlu1 %v11447_v4, %s11332_s9  ;;  %1616 = vrot.lane.b32.xlu0 %v11450_v5, %s11332_s9 }
  0x29   :  { %1657 = vrot.lane.b32.xlu2 %v11453_v6, %s11333_s10 }
  0x30   :  { %2371 = vrot.lane.b32.xlu1 %v11414_v1, %s11334_s11  ;;  %1659 = vrot.lane.b32.xlu0 %v11462_v7, %s11333_s10 }
  0x31   :  { %2373 = vrot.lane.b32.xlu2 %v11426_v3, %s11334_s11 }
  0x38   :  { %2420 = vrot.lane.b32.xlu1 %v11423_v2, %s11334_s11  ;;  %2418 = vrot.lane.b32.xlu0 %v11411_v0, %s11334_s11 }
  0x39   :  { %1534 = vrot.lane.b32.xlu2 %v11450_v5, %s11335_s12 }
  0x40   :  { %1575 = vrot.lane.b32.xlu1 %v11453_v6, %s11332_s9  ;;  %1536 = vrot.lane.b32.xlu0 %v11447_v4, %s11335_s12 }
  0x41   :  { %1577 = vrot.lane.b32.xlu2 %v11462_v7, %s11332_s9 }
  0x48   :  { %2280 = vrot.lane.b32.xlu1 %v11426_v3, %s11336_s13  ;;  %2278 = vrot.lane.b32.xlu0 %v11414_v1, %s11336_s13 }
  0x49   :  { %2325 = vrot.lane.b32.xlu2 %v11411_v0, %s11336_s13 }
  0x50   :  { %2327 = vrot.lane.b32.xlu0 %v11423_v2, %s11336_s13  ;;  %1452 = vrot.lane.b32.xlu1 %v11450_v5, %s11337_s14 }
  0x51   :  { %1454 = vrot.lane.b32.xlu2 %v11447_v4, %s11337_s14 }
  0x58   :  { %1493 = vrot.lane.b32.xlu0 %v11453_v6, %s11335_s12  ;;  %1495 = vrot.lane.b32.xlu1 %v11462_v7, %s11335_s12 }
  0x59   :  { %2468 = vrot.lane.b32.xlu2 %v11495_v8, %s11331_s8 }
  0x60   :  { %2515 = vrot.lane.b32.xlu0 %v11504_v9, %s11331_s8  ;;  %2194 = vrot.lane.b32.xlu1 %v11450_v5, %s11338_s15 }
  0x61   :  { %2196 = vrot.lane.b32.xlu2 %v11447_v4, %s11338_s15 }
  0x63   :  { %v1699_v10 = vpop.permute.xlu2 %1698 }
  0x68   :  { %2235 = vrot.lane.b32.xlu0 %v11453_v6, %s11339_s16  ;;  %2237 = vrot.lane.b32.xlu1 %v11462_v7, %s11339_s16 }
  0x69   :  { %1369 = vrot.lane.b32.xlu2 %v11414_v1, %s11333_s10 }
  0x6b   :  { %v11518_v11 = vpop.permute.xlu2 %1700 }
  0x6c   :  { %v1711_v12 = vsel %vm1710_vm0, %v1699_v10, %v11518_v11 }
  0x70   :  { %1411 = vrot.lane.b32.xlu1 %v11453_v6, %s11337_s14  ;;  %1371 = vrot.lane.b32.xlu0 %v11426_v3, %s11333_s10 }
  0x71   :  { %1413 = vrot.lane.b32.xlu2 %v11462_v7, %s11337_s14 }
  0x73   :  { %v2465_v13 = vpop.permute.xlu2 %2464 }
  0x78   :  { %2422 = vrot.lane.b32.xlu1 %v11504_v9, %s11334_s11  ;;  %2375 = vrot.lane.b32.xlu0 %v11495_v8, %s11334_s11 }
  0x79   :  { %1122 = vrot.lane.b32.xlu2 %v11426_v3, %s11337_s14 }
  0x7a   :  { %v1824_v14 = vpop.permute.xlu1 %1823  ;;  %v1782_v15 = vpop.permute.xlu0 %1781 }
  0x7b   :  { %v11534_v16 = vpop.permute.xlu2 %2513 }
  0x80   :  { %1164 = vrot.lane.b32.xlu1 %v11423_v2, %s11337_s14  ;;  %1124 = vrot.lane.b32.xlu0 %v11495_v8, %s11337_s14 }
  0x81   :  { %1166 = vrot.lane.b32.xlu2 %v11504_v9, %s11337_s14 }
  0x82   :  { %v11542_v17 = vpop.permute.xlu1 %1825  ;;  %v11544_v18 = vpop.permute.xlu0 %1783 }
  0x83   :  { %v1835_v19 = vsel %vm1793_vm1, %v1824_v14, %v11542_v17  ;;  %v1794_v20 = vsel %vm1793_vm1, %v1782_v15, %v11544_v18  ;;  %v1658_v21 = vpop.permute.xlu2 %1657 }
  0x84   :  { %v2974_v22 = vpack.c.bf16 %v1835_v19, %v1794_v20 }
  0x86   :  { %3090 = vmatpush.bf16.msra.mxu1 %v2974_v22 }
  0x88   :  { %2114 = vrot.lane.b32.xlu1 %v11447_v4, %s11329_s6  ;;  %2112 = vrot.lane.b32.xlu0 %v11450_v5, %s11329_s6 }
  0x89   :  { %2153 = vrot.lane.b32.xlu2 %v11453_v6, %s11338_s15 }
  0x8a   :  { %v11556_v23 = vpop.permute.xlu1 %1742  ;;  %v1741_v24 = vpop.permute.xlu0 %1740 }
  0x8b   :  { %v1752_v25 = vsel %vm1710_vm0, %v1741_v24, %v11556_v23  ;;  %v11560_v26 = vpop.permute.xlu2 %2373 }
  0x8c   :  { %v2968_v27 = vpack.c.bf16 %v1752_v25, %v1711_v12 }
  0x8e   :  { %3091 = vmatpush.bf16.msra.mxu1 %v2968_v27 }
  0x90   :  { %1286 = vrot.lane.b32.xlu1 %v11414_v1, %s11332_s9  ;;  %2155 = vrot.lane.b32.xlu0 %v11462_v7, %s11338_s15 }
  0x91   :  { %1288 = vrot.lane.b32.xlu2 %v11426_v3, %s11332_s9 }
  0x92   :  { %v2512_v28 = vpop.permute.xlu1 %2511  ;;  %v2467_v29 = vpop.permute.xlu0 %2466 }
  0x93   :  { %v2525_v30 = vsel %vm2478_vm2, %v2512_v28, %v11534_v16  ;;  %v2479_v31 = vsel %vm2478_vm2, %v2465_v13, %v2467_v29  ;;  %v1535_v32 = vpop.permute.xlu2 %1534 }
  0x94   :  { %v3022_v33 = vpack.c.bf16 %v2525_v30, %v2479_v31 }
  0x96   :  { %3104 = vmatpush.bf16.msra.mxu2 %v3022_v33 }
  0x98   :  { %1330 = vrot.lane.b32.xlu1 %v11423_v2, %s11332_s9  ;;  %1328 = vrot.lane.b32.xlu0 %v11411_v0, %s11332_s9 }
  0x99   :  { %2282 = vrot.lane.b32.xlu2 %v11495_v8, %s11336_s13 }
  0x9a   :  { %v11577_v34 = vpop.permute.xlu1 %1618  ;;  %v1617_v35 = vpop.permute.xlu0 %1616 }
  0x9b   :  { %v1628_v36 = vsel %vm1298_vm3, %v1617_v35, %v11577_v34  ;;  %v11581_v37 = vpop.permute.xlu2 %1577 }
  0xa0   :  { %2329 = vrot.lane.b32.xlu0 %v11504_v9, %s11336_s13  ;;  %1040 = vrot.lane.b32.xlu1 %v11447_v4, %s11340_s17 }
  0xa1   :  { %1042 = vrot.lane.b32.xlu2 %v11584_v38, %s11340_s17 }
  0xa2   :  { %v2372_v39 = vpop.permute.xlu1 %2371  ;;  %v11592_v40 = vpop.permute.xlu0 %1659 }
  0xa3   :  { %v2386_v41 = vsel %vm2385_vm4, %v2372_v39, %v11560_v26  ;;  %v1669_v42 = vsel %vm15306_vm5, %v1658_v21, %v11592_v40  ;;  %v2326_v43 = vpop.permute.xlu2 %2325 }
  0xa4   :  { %v2962_v44 = vpack.c.bf16 %v1669_v42, %v1628_v36 }
  0xa6   :  { %3092 = vmatpush.bf16.msra.mxu1 %v2962_v44 }
  0xa8   :  { %1081 = vrot.lane.b32.xlu0 %v11462_v7, %s11341_s18  ;;  %1083 = vrot.lane.b32.xlu1 %v11599_v45, %s11341_s18 }
  0xa9   :  { %2030 = vrot.lane.b32.xlu2 %v11450_v5, %s11330_s7 }
  0xaa   :  { %v11607_v46 = vpop.permute.xlu1 %2420  ;;  %v2419_v47 = vpop.permute.xlu0 %2418 }
  0xab   :  { %v2432_v48 = vsel %vm2385_vm4, %v2419_v47, %v11607_v46  ;;  %v11611_v49 = vpop.permute.xlu2 %1454 }
  0xac   :  { %v3016_v50 = vpack.c.bf16 %v2432_v48, %v2386_v41 }
  0xae   :  { %3105 = vmatpush.bf16.msra.mxu2 %v3016_v50 }
  0xb0   :  { %2032 = vrot.lane.b32.xlu0 %v11447_v4, %s11330_s7  ;;  %2071 = vrot.lane.b32.xlu1 %v11453_v6, %s11329_s6 }
  0xb1   :  { %2073 = vrot.lane.b32.xlu2 %v11462_v7, %s11329_s6 }
  0xb2   :  { %v1576_v51 = vpop.permute.xlu1 %1575  ;;  %v11619_v52 = vpop.permute.xlu0 %1536 }
  0xb3   :  { %v1587_v53 = vsel %vm1298_vm3, %v1576_v51, %v11581_v37  ;;  %v1546_v54 = vsel %vm1215_vm6, %v1535_v32, %v11619_v52  ;;  %v11625_v55 = vpop.permute.xlu2 %2468 }
  0xb4   :  { %v11629_v56 = vsel %vm2478_vm2, %v2467_v29, %v11625_v55  ;;  %v2956_v57 = vpack.c.bf16 %v1587_v53, %v1546_v54 }
  0xb6   :  { %3093 = vmatpush.bf16.msra.mxu1 %v2956_v57 }
  0xb8   :  { %1203 = vrot.lane.b32.xlu0 %v11414_v1, %s11335_s12  ;;  %1205 = vrot.lane.b32.xlu1 %v11426_v3, %s11335_s12 }
  0xb9   :  { %1245 = vrot.lane.b32.xlu2 %v11411_v0, %s11335_s12 }
  0xba   :  { %v11637_v58 = vpop.permute.xlu1 %2280  ;;  %v2279_v59 = vpop.permute.xlu0 %2278 }
  0xbb   :  { %v2293_v60 = vsel %vm2292_vm7, %v2279_v59, %v11637_v58  ;;  %v11641_v61 = vpop.permute.xlu2 %2196 }
  0xc0   :  { %1247 = vrot.lane.b32.xlu0 %v11423_v2, %s11335_s12  ;;  %2198 = vrot.lane.b32.xlu1 %v11584_v38, %s11338_s15 }
  0xc1   :  { %2239 = vrot.lane.b32.xlu2 %v11599_v45, %s11339_s16 }
  0xc2   :  { %v11649_v62 = vpop.permute.xlu0 %2327  ;;  %v1453_v63 = vpop.permute.xlu1 %1452 }
  0xc3   :  { %v2339_v10 = vsel %vm2292_vm7, %v2326_v43, %v11649_v62  ;;  %v1464_v12 = vsel %vm1132_vm8, %v1453_v63, %v11611_v49  ;;  %v1370_v13 = vpop.permute.xlu2 %1369 }
  0xc4   :  { %v3010_v14 = vpack.c.bf16 %v2339_v10, %v2293_v60 }
  0xc6   :  { %3106 = vmatpush.bf16.msra.mxu2 %v3010_v14 }
  0xc8   :  { %960 = vrot.lane.b32.xlu1 %v11584_v38, %s11342_s19  ;;  %958 = vrot.lane.b32.xlu0 %v11447_v4, %s11342_s19 }
  0xc9   :  { %999 = vrot.lane.b32.xlu2 %v11462_v7, %s11340_s17 }
  0xca   :  { %v1494_v15 = vpop.permute.xlu0 %1493  ;;  %v11661_v19 = vpop.permute.xlu1 %1495 }
  0xcb   :  { %v1505_v20 = vsel %vm1215_vm6, %v1494_v15, %v11661_v19  ;;  %v11665_v21 = vpop.permute.xlu2 %1413 }
  0xcc   :  { %15321 = vst [vmem:[#allocation4_spill] sm:$0xff] %v11665_v21  ;;  %v2950_v22 = vpack.c.bf16 %v1505_v20, %v1464_v12 }
  0xce   :  { %3094 = vmatpush.bf16.msra.mxu1 %v2950_v22 }
  0xd0   :  { %1120 = vrot.lane.b32.xlu1 %v11414_v1, %s11337_s14  ;;  %1001 = vrot.lane.b32.xlu0 %v11599_v45, %s11340_s17 }
  0xd1   :  { %1162 = vrot.lane.b32.xlu2 %v11411_v0, %s11337_s14 }
  0xd2   :  { %v11673_v4 = vpop.permute.xlu0 %2515  ;;  %v2195_v24 = vpop.permute.xlu1 %2194 }
  0xd3   :  { %v11678_v25 = vsel %vm2478_vm2, %v11534_v16, %v11673_v4  ;;  %v2206_v27 = vsel %vm1876_vm9, %v2195_v24, %v11641_v61  ;;  %v11682_v28 = vpop.permute.xlu2 %1122 }
  0xd8   :  { %1949 = vrot.lane.b32.xlu1 %v11426_v3, %s11339_s16  ;;  %1947 = vrot.lane.b32.xlu0 %v11414_v1, %s11339_s16 }
  0xd9   :  { %1989 = vrot.lane.b32.xlu2 %v11453_v6, %s11330_s7 }
  0xda   :  { %v2236_v16 = vpop.permute.xlu0 %2235  ;;  %v11692_v30 = vpop.permute.xlu1 %2237 }
  0xdb   :  { %v2247_v31 = vsel %vm15286_vm10, %v2236_v16, %v11692_v30  ;;  %v11696_v32 = vpop.permute.xlu2 %1166 }
  0xdc   :  { %v3004_v33 = vpack.c.bf16 %v2247_v31, %v2206_v27 }
  0xde   :  { %3107 = vmatpush.bf16.msra.mxu2 %v3004_v33  ;;  %v11800_v33 = vld [vmem:[%s11408_s5 + $0x18] sm:$0xff] }
  0xe0   :  { %2116 = vrot.lane.b32.xlu1 %v11584_v38, %s11329_s6  ;;  %1991 = vrot.lane.b32.xlu0 %v11462_v7, %s11330_s7 }
  0xe1   :  { %2157 = vrot.lane.b32.xlu2 %v11599_v45, %s11338_s15 }
  0xe2   :  { %v1412_v35 = vpop.permute.xlu1 %1411  ;;  %v11704_v36 = vpop.permute.xlu0 %1371 }
  0xe3   :  { %15322 = vst [vmem:[#allocation5_spill] sm:$0xff] %v11704_v36  ;;  %v1423_v39 = vsel %vm1132_vm8, %v1412_v35, %v11665_v21  ;;  %v1382_v41 = vsel %vm15306_vm5, %v1370_v13, %v11704_v36  ;;  %v2154_v42 = vpop.permute.xlu2 %2153  ;;  %v11803_v35 = vld [vmem:[%s11408_s5 + $0x50] sm:$0xff] }
  0xe4   :  { %v2944_v43 = vpack.c.bf16 %v1423_v39, %v1382_v41 }
  0xe6   :  { %3095 = vmatpush.bf16.msra.mxu1 %v2944_v43 }
  0xe8   :  { %2559 = vrot.lane.b32.xlu1 %v11426_v3, %s11343_s20  ;;  %2557 = vrot.lane.b32.xlu0 %v11414_v1, %s11343_s20 }
  0xe9   :  { %917 = vrot.lane.b32.xlu2 %v11462_v7, %s11342_s19 }
  0xea   :  { %v11716_v44 = vpop.permute.xlu1 %2422  ;;  %v11718_v47 = vpop.permute.xlu0 %2375 }
  0xeb   :  { %15323 = vst [vmem:[#allocation6_spill] sm:$0xff] %v11716_v44  ;;  %v11723_v48 = vsel %vm2385_vm4, %v11607_v46, %v11716_v44  ;;  %v11728_v50 = vsel %vm2385_vm4, %v11560_v26, %v11718_v47  ;;  %v11730_v51 = vpop.permute.xlu2 %1288 }
  0xec   :  { %15324 = vst [vmem:[#allocation7_spill] sm:$0xff] %v11730_v51 }
  0xf0   :  { %1038 = vrot.lane.b32.xlu1 %v11450_v5, %s11340_s17  ;;  %919 = vrot.lane.b32.xlu0 %v11599_v45, %s11342_s19 }
  0xf1   :  { %1079 = vrot.lane.b32.xlu2 %v11453_v6, %s11341_s18 }
  0xf2   :  { %v11740_v7 = vpop.permute.xlu1 %1164  ;;  %v11742_v46 = vpop.permute.xlu0 %1124 }
  0xf3   :  { %v11747_v26 = vsel %vm1132_vm8, %v11740_v7, %v11696_v32  ;;  %v11752_v54 = vsel %vm1132_vm8, %v11682_v28, %v11742_v46  ;;  %v11754_v57 = vpop.permute.xlu2 %2282 }
  0xf4   :  { %15325 = vst [vmem:[#allocation8_spill] sm:$0xff] %v11754_v57  ;;  %v11759_v59 = vsel %vm2292_vm7, %v11637_v58, %v11754_v57 }
  0xf8   :  { %1866 = vrot.lane.b32.xlu1 %v11426_v3, %s11338_s15  ;;  %1864 = vrot.lane.b32.xlu0 %v11414_v1, %s11338_s15 }
  0xf9   :  { %1906 = vrot.lane.b32.xlu2 %v11411_v0, %s11338_s15 }
  0xfa   :  { %v11769_v63 = vpop.permute.xlu1 %2114  ;;  %v2113_v10 = vpop.permute.xlu0 %2112 }
  0xfb   :  { %v2124_v12 = vsel %vm1793_vm1, %v2113_v10, %v11769_v63  ;;  %v11773_v58 = vpop.permute.xlu2 %1042 }
 0x100   :  { %2034 = vrot.lane.b32.xlu1 %v11584_v38, %s11330_s7  ;;  %1908 = vrot.lane.b32.xlu0 %v11423_v2, %s11338_s15 }
 0x101   :  { %2075 = vrot.lane.b32.xlu2 %v11599_v45, %s11329_s6 }
 0x102   :  { %v1287_v1 = vpop.permute.xlu1 %1286  ;;  %v11781_v0 = vpop.permute.xlu0 %2155 }
 0x103   :  { %v1299_v13 = vsel %vm1298_vm3, %v1287_v1, %v11730_v51  ;;  %v2165_v14 = vsel %vm1876_vm9, %v2154_v42, %v11781_v0  ;;  %v2031_v15 = vpop.permute.xlu2 %2030  ;;  %v12189_v51 = vld [vmem:[%s11408_s5 + $0x90] sm:$0xff] }
 0x104   :  { %v2998_v20 = vpack.c.bf16 %v2165_v14, %v2124_v12 }
 0x106   :  { %3108 = vmatpush.bf16.msra.mxu2 %v2998_v20 }
 0x108   :  { %853 = vrot.lane.b32.xlu1 %v11495_v8, %s11341_s18  ;;  %851 = vrot.lane.b32.xlu0 %v11426_v3, %s11341_s18 }
 0x109   :  { %956 = vrot.lane.b32.xlu2 %v11450_v5, %s11342_s19 }
 0x10a   :  { %v11793_v22 = vpop.permute.xlu1 %1330  ;;  %v1329_v24 = vpop.permute.xlu0 %1328 }
 0x10b   :  { %15326 = vst [vmem:[#allocation9_spill] sm:$0xff] %v11793_v22  ;;  %v1340_v27 = vsel %vm1298_vm3, %v1329_v24, %v11793_v22  ;;  %v11797_v16 = vpop.permute.xlu2 %2073  ;;  %v12186_v22 = vld [vmem:[%s11408_s5 + $0xc8] sm:$0xff] }
 0x10c   :  { %v2938_v31 = vpack.c.bf16 %v1340_v27, %v1299_v13 }
 0x10e   :  { %3096 = vmatpush.bf16.msra.mxu1 %v2938_v31 }
 0x110   :  { %1126 = vrot.lane.b32.xlu1 %v11800_v33, %s11337_s14  ;;  %997 = vrot.lane.b32.xlu0 %v11453_v6, %s11340_s17 }
 0x111   :  { %1168 = vrot.lane.b32.xlu2 %v11803_v35, %s11337_s14 }
 0x112   :  { %v11811_v5 = vpop.permute.xlu0 %2329  ;;  %v11813_v39 = vpop.permute.xlu1 %1040 }
 0x113   :  { %15327 = vst [vmem:[#allocation10_spill] sm:$0xff] %v11811_v5  ;;  %v2340_v41 = vsel %vm2292_vm7, %v11649_v62, %v11811_v5  ;;  %v1246_v42 = vpop.permute.xlu2 %1245  ;;  %v11821_v43 = vsel %vm778_vm11, %v11813_v39, %v11773_v58  ;;  %v15332_v5 = vpack.c.bf16 %v11678_v25, %v11629_v56  ;;  %v15334_v25 = vpack.c.bf16 %v11723_v48, %v11728_v50 }
 0x118   :  { %1787 = vrot.lane.b32.xlu1 %v11800_v33, %s11329_s6  ;;  %1785 = vrot.lane.b32.xlu0 %v11495_v8, %s11329_s6 }
 0x119   :  { %1827 = vrot.lane.b32.xlu2 %v11504_v9, %s11329_s6 }
 0x11a   :  { %v11829_v10 = vpop.permute.xlu0 %1081  ;;  %v11831_v12 = vpop.permute.xlu1 %1083 }
 0x11b   :  { %v11833_v62 = vpop.permute.xlu2 %2239  ;;  %v11838_v1 = vsel %vm861_vm12, %v11829_v10, %v11831_v12 }
 0x11c   :  { %15328 = vst [vmem:[#allocation11_spill] sm:$0xff] %v11833_v62  ;;  %v2248_v13 = vsel %vm15286_vm10, %v11692_v30, %v11833_v62 }
 0x120   :  { %1951 = vrot.lane.b32.xlu1 %v11495_v8, %s11339_s16  ;;  %1829 = vrot.lane.b32.xlu0 %v11803_v35, %s11329_s6 }
 0x121   :  { %1993 = vrot.lane.b32.xlu2 %v11599_v45, %s11330_s7 }
 0x122   :  { %v11851_v20 = vpop.permute.xlu0 %2032  ;;  %v2072_v24 = vpop.permute.xlu1 %2071 }
 0x123   :  { %v2042_v30 = vsel %vm1710_vm0, %v2031_v15, %v11851_v20  ;;  %v2083_v27 = vsel %vm1793_vm1, %v2072_v24, %v11797_v16  ;;  %v11857_v31 = vpop.permute.xlu2 %999 }
 0x124   :  { %v2992_v14 = vpack.c.bf16 %v2083_v27, %v2042_v30  ;;  %v11872_v30 = vld [vmem:[%s11408_s5 + $0x40] sm:$0xff] }
 0x125   :  { %v11875_v27 = vld [vmem:[%s11408_s5 + $0xc0] sm:$0xff] }
 0x126   :  { %3109 = vmatpush.bf16.msra.mxu2 %v2992_v14 }
 0x128   :  { %770 = vrot.lane.b32.xlu1 %v11495_v8, %s11340_s17  ;;  %768 = vrot.lane.b32.xlu0 %v11426_v3, %s11340_s17 }
 0x129   :  { %810 = vrot.lane.b32.xlu2 %v11423_v2, %s11340_s17  ;;  %v11882_v2 = vld [vmem:[%s11408_s5] sm:$0xff] }
 0x12a   :  { %v1204_v60 = vpop.permute.xlu0 %1203  ;;  %v11865_v53 = vpop.permute.xlu1 %1205 }
 0x12b   :  { %15329 = vst [vmem:[#allocation12_spill] sm:$0xff] %v11865_v53  ;;  %v1216_v15 = vsel %vm1215_vm6, %v1204_v60, %v11865_v53  ;;  %v1163_v24 = vpop.permute.xlu2 %1162  ;;  %v11896_v53 = vld [vmem:[%s11408_s5 + $0x88] sm:$0xff] }
 0x12c   :  { %v1174_v14 = vsel %vm1132_vm8, %v1163_v24, %v11740_v7 }
 0x130   :  { %915 = vrot.lane.b32.xlu1 %v11453_v6, %s11342_s19  ;;  %812 = vrot.lane.b32.xlu0 %v11504_v9, %s11340_s17 }
 0x131   :  { %1044 = vrot.lane.b32.xlu2 %v11875_v27, %s11340_s17 }
 0x132   :  { %v11886_v60 = vpop.permute.xlu0 %1247  ;;  %v11888_v29 = vpop.permute.xlu1 %2198 }
 0x133   :  { %15330 = vst [vmem:[#allocation13_spill] sm:$0xff] %v11886_v60  ;;  %v1257_v7 = vsel %vm1215_vm6, %v1246_v42, %v11886_v60  ;;  %v2207_v24 = vsel %vm1876_vm9, %v11641_v61, %v11888_v29  ;;  %v1990_v6 = vpop.permute.xlu2 %1989 }
 0x134   :  { %15331 = vst [vmem:[#allocation14_spill] sm:$0xff] %v11888_v29  ;;  %v2932_v62 = vpack.c.bf16 %v1257_v7, %v1216_v15  ;;  %v3005_v7 = vpack.c.bf16 %v2248_v13, %v2207_v24  ;;  %v12012_v29 = vld [vmem:[%s11408_s5 + $0x58] sm:$0xff] }
 0x136   :  { %3097 = vmatpush.bf16.msra.mxu1 %v2932_v62  ;;  %v3011_v62 = vpack.c.bf16 %v2340_v41, %v11759_v59 }
 0x138   :  { %1702 = vrot.lane.b32.xlu1 %v11495_v8, %s11330_s7  ;;  %1085 = vrot.lane.b32.xlu0 %v11896_v53, %s11341_s18 }
 0x139   :  { %1704 = vrot.lane.b32.xlu2 %v11800_v33, %s11330_s7 }
 0x13a   :  { %3160 = vmatpush.bf16.msrb.mxu1 %v15332_v5  ;;  %v11907_v61 = vpop.permute.xlu1 %960  ;;  %v11909_v42 = vpop.permute.xlu0 %958 }
 0x13b   :  { %v11911_v15 = vpop.permute.xlu2 %2157  ;;  %v11916_v56 = vsel %vm695_vm13, %v11909_v42, %v11907_v61 }
 0x13c   :  { %15333 = vst [vmem:[#allocation15_spill] sm:$0xff] %v11911_v15  ;;  %v2166_v5 = vsel %vm1876_vm9, %v11781_v0, %v11911_v15 }
 0x13e   :  { %3161 = vmatpush.bf16.msrb.mxu1 %v15334_v25 }
 0x140   :  { %1746 = vrot.lane.b32.xlu1 %v11803_v35, %s11330_s7  ;;  %1744 = vrot.lane.b32.xlu0 %v11504_v9, %s11330_s7 }
 0x141   :  { %1868 = vrot.lane.b32.xlu2 %v11495_v8, %s11338_s15 }
 0x142   :  { %3162 = vmatpush.bf16.msrb.mxu1 %v3011_v62  ;;  %v1121_v48 = vpop.permute.xlu1 %1120  ;;  %v11931_v50 = vpop.permute.xlu0 %1001  ;;  %v11941_v62 = vld [vmem:[%s11408_s5 + $0xb0] sm:$0xff] }
 0x143   :  { %v1133_v25 = vsel %vm1132_vm8, %v1121_v48, %v11682_v28  ;;  %v1010_v59 = vsel %vm778_vm11, %v11857_v31, %v11931_v50  ;;  %v11938_v0 = vpop.permute.xlu2 %917 }
 0x144   :  { %v2926_v41 = vpack.c.bf16 %v1174_v14, %v1133_v25 }
 0x146   :  { %3163 = vmatpush.bf16.msrb.mxu1 %v3005_v7  ;;  %3076 = vmatpush.bf16.msra.mxu0 %v2926_v41 }
 0x148   :  { %1910 = vrot.lane.b32.xlu0 %v11504_v9, %s11338_s15  ;;  %685 = vrot.lane.b32.xlu1 %v11426_v3, %s11342_s19  ;;  %v11962_v3 = vld [vmem:[%s11408_s5 + $0x38] sm:$0xff] }
 0x149   :  { %687 = vrot.lane.b32.xlu2 %v11495_v8, %s11342_s19 }
 0x14a   :  { %v11949_v28 = vpop.permute.xlu1 %1949  ;;  %v1948_v13 = vpop.permute.xlu0 %1947 }
 0x14b   :  { %v1960_v24 = vsel %vm15286_vm10, %v1948_v13, %v11949_v28  ;;  %v1080_v7 = vpop.permute.xlu2 %1079 }
 0x14c   :  { %v1091_v14 = vsel %vm861_vm12, %v1080_v7, %v11829_v10 }
 0x150   :  { %727 = vrot.lane.b32.xlu0 %v11872_v30, %s11342_s19  ;;  %729 = vrot.lane.b32.xlu1 %v11504_v9, %s11342_s19 }
 0x151   :  { %849 = vrot.lane.b32.xlu2 %v11882_v2, %s11341_s18 }
 0x152   :  { %v11964_v8 = vpop.permute.xlu1 %2116  ;;  %v11966_v48 = vpop.permute.xlu0 %1991 }
 0x153   :  { %15335 = vst [vmem:[#allocation16_spill] sm:$0xff] %v11964_v8  ;;  %v2125_v25 = vsel %vm1793_vm1, %v11769_v63, %v11964_v8  ;;  %v2001_v10 = vsel %vm1710_vm0, %v1990_v6, %v11966_v48  ;;  %v1907_v41 = vpop.permute.xlu2 %1906  ;;  %v12009_v8 = vld [vmem:[%s11408_s5 + $0x20] sm:$0xff] }
 0x154   :  { %v2986_v13 = vpack.c.bf16 %v2001_v10, %v1960_v24  ;;  %v2999_v9 = vpack.c.bf16 %v2166_v5, %v2125_v25  ;;  %v880_v10 = vld [vmem:[%s11408_s5 + $0x78] sm:$0xff] }
 0x156   :  { %3110 = vmatpush.bf16.msra.mxu2 %v2986_v13  ;;  %3164 = vmatpush.bf16.msrb.mxu1 %v2999_v9 }
 0x158   :  { %962 = vrot.lane.b32.xlu0 %v11875_v27, %s11342_s19  ;;  %1003 = vrot.lane.b32.xlu1 %v11896_v53, %s11340_s17 }
 0x159   :  { %1620 = vrot.lane.b32.xlu2 %v11584_v38, %s11332_s9 }
 0x15a   :  { %v11979_v63 = vpop.permute.xlu1 %2559  ;;  %v2558_v7 = vpop.permute.xlu0 %2557 }
 0x15b   :  { %v2572_v6 = vsel %vm2571_vm14, %v2558_v7, %v11979_v63  ;;  %v11983_v24 = vpop.permute.xlu2 %2075 }
 0x15c   :  { %15336 = vst [vmem:[#allocation17_spill] sm:$0xff] %v11983_v24  ;;  %v2084_v5 = vsel %vm1793_vm1, %v11797_v16, %v11983_v24  ;;  %v3028_v25 = vpack.c.bf16 %v2572_v6, %v2572_v6  ;;  %v15337_v16 = vpack.c.bf16 %v11747_v26, %v11752_v54  ;;  %v15338_v26 = vpack.c.bf16 %v11838_v1, %v11821_v43  ;;  %v12018_v54 = vld [vmem:[%s11408_s5 + $0x10] sm:$0xff] }
 0x15e   :  { %v3059_v13 = vsel %vm15307_vm15, %v3028_v25, 0 }
 0x15f   :  { %3125 = vmatpush.bf16.msra.mxu3 %v3059_v13 }
 0x160   :  { %1622 = vrot.lane.b32.xlu0 %v11875_v27, %s11332_s9  ;;  %1661 = vrot.lane.b32.xlu1 %v11599_v45, %s11333_s10 }
 0x161   :  { %1663 = vrot.lane.b32.xlu2 %v11896_v53, %s11333_s10 }
 0x162   :  { %v1039_v9 = vpop.permute.xlu1 %1038  ;;  %v11999_v7 = vpop.permute.xlu0 %919 }
 0x163   :  { %3132 = vmatpush.bf16.msrb.mxu3 %v15337_v16  ;;  %v1050_v6 = vsel %vm778_vm11, %v1039_v9, %v11813_v39  ;;  %v928_v25 = vsel %vm695_vm13, %v11938_v0, %v11999_v7  ;;  %v957_v13 = vpop.permute.xlu2 %956  ;;  %v2915_v39 = vpack.c.bf16 %v1010_v59, %v11916_v56  ;;  %v12040_v59 = vld [vmem:[%s11408_s5 + $0xb8] sm:$0xff] }
 0x164   :  { %v968_v24 = vsel %vm695_vm13, %v957_v13, %v11909_v42  ;;  %v2920_v15 = vpack.c.bf16 %v1091_v14, %v1050_v6 }
 0x166   :  { %3077 = vmatpush.bf16.msra.mxu0 %v2920_v15  ;;  %v2909_v15 = vpack.c.bf16 %v928_v25, %v11941_v62 }
 0x167   :  { %3133 = vmatpush.bf16.msrb.mxu3 %v15338_v26 }
 0x168   :  { %1789 = vrot.lane.b32.xlu0 %v12009_v8, %s11329_s6  ;;  %1831 = vrot.lane.b32.xlu1 %v12012_v29, %s11329_s6 }
 0x169   :  { %2561 = vrot.lane.b32.xlu2 %v12018_v54, %s11343_s20 }
 0x16a   :  { %v12027_v42 = vpop.permute.xlu1 %1866  ;;  %v1865_v43 = vpop.permute.xlu0 %1864 }
 0x16b   :  { %3134 = vmatpush.bf16.msrb.mxu3 %v2915_v39  ;;  %v1877_v1 = vsel %vm1876_vm9, %v1865_v43, %v12027_v42  ;;  %v12031_v14 = vpop.permute.xlu2 %1168 }
 0x16c   :  { %v12037_v56 = vsel %vm1132_vm8, %v11696_v32, %v12031_v14 }
 0x16f   :  { %3135 = vmatpush.bf16.msrb.mxu3 %v2909_v15 }
 0x170   :  { %766 = vrot.lane.b32.xlu0 %v11882_v2, %s11340_s17  ;;  %808 = vrot.lane.b32.xlu1 %v11962_v3, %s11340_s17 }
 0x171   :  { %921 = vrot.lane.b32.xlu2 %v11896_v53, %s11342_s19 }
 0x172   :  { %v12048_v16 = vpop.permute.xlu1 %2034  ;;  %v12050_v62 = vpop.permute.xlu0 %1908 }
 0x173   :  { %15339 = vst [vmem:[#allocation18_spill] sm:$0xff] %v12048_v16  ;;  %v2043_v32 = vsel %vm1710_vm0, %v11851_v20, %v12048_v16  ;;  %v1918_v9 = vsel %vm1876_vm9, %v1907_v41, %v12050_v62  ;;  %v1828_v6 = vpop.permute.xlu2 %1827  ;;  %v12068_v20 = vld [vmem:[%s11408_s5 + $0x80] sm:$0xff] }
 0x174   :  { %v12059_v25 = vsel %vm1793_vm1, %v11542_v17, %v1828_v6  ;;  %v2980_v13 = vpack.c.bf16 %v1918_v9, %v1877_v1  ;;  %v2993_v26 = vpack.c.bf16 %v2084_v5, %v2043_v32 }
 0x176   :  { %3111 = vmatpush.bf16.msra.mxu2 %v2980_v13  ;;  %3165 = vmatpush.bf16.msrb.mxu1 %v2993_v26  ;;  %v891_v13 = vld [vmem:[%s11408_s5 + $0xa8] sm:$0xff] }
 0x178   :  { %1538 = vrot.lane.b32.xlu0 %v11584_v38, %s11335_s12  ;;  %1540 = vrot.lane.b32.xlu1 %v11875_v27, %s11335_s12 }
 0x179   :  { %1579 = vrot.lane.b32.xlu2 %v11599_v45, %s11332_s9 }
 0x17a   :  { %v12070_v41 = vpop.permute.xlu1 %853  ;;  %v12072_v39 = vpop.permute.xlu0 %851 }
 0x17b   :  { %v12074_v17 = vpop.permute.xlu2 %1993  ;;  %v863_v5 = vsel %vm861_vm12, %v12072_v39, %v12070_v41 }
 0x17c   :  { %15340 = vst [vmem:[#allocation19_spill] sm:$0xff] %v12074_v17  ;;  %v2002_v38 = vsel %vm1710_vm0, %v11966_v48, %v12074_v17  ;;  %v2903_v43 = vpack.c.bf16 %v880_v10, %v863_v5 }
 0x17e   :  { %3136 = vmatpush.bf16.msrb.mxu3 %v2903_v43 }
 0x180   :  { %1581 = vrot.lane.b32.xlu0 %v11896_v53, %s11332_s9  ;;  %1706 = vrot.lane.b32.xlu1 %v12009_v8, %s11330_s7 }
 0x181   :  { %1748 = vrot.lane.b32.xlu2 %v12012_v29, %s11330_s7 }
 0x182   :  { %v12088_v45 = vpop.permute.xlu1 %1126  ;;  %v998_v1 = vpop.permute.xlu0 %997 }
 0x183   :  { %v12093_v15 = vsel %vm1132_vm8, %v11742_v46, %v12088_v45  ;;  %v1009_v48 = vsel %vm778_vm11, %v998_v1, %v11857_v31  ;;  %v12097_v10 = vpop.permute.xlu2 %810 }
 0x184   :  { %v2914_v32 = vpack.c.bf16 %v1009_v48, %v968_v24  ;;  %v879_v48 = vld [vmem:[%s11408_s5 + $0x70] sm:$0xff] }
 0x186   :  { %3078 = vmatpush.bf16.msra.mxu0 %v2914_v32 }
 0x188   :  { %725 = vrot.lane.b32.xlu1 %v11962_v3, %s11342_s19  ;;  %683 = vrot.lane.b32.xlu0 %v11882_v2, %s11342_s19 }
 0x189   :  { %855 = vrot.lane.b32.xlu2 %v11800_v33, %s11341_s18 }
 0x18a   :  { %v12108_v46 = vpop.permute.xlu1 %1787  ;;  %v1786_v31 = vpop.permute.xlu0 %1785 }
 0x18b   :  { %v12112_v24 = vsel %vm1793_vm1, %v11544_v18, %v1786_v31  ;;  %v12116_v26 = vsel %vm1793_vm1, %v1786_v31, %v12108_v46  ;;  %v12118_v5 = vpop.permute.xlu2 %1044 }
 0x18c   :  { %v12123_v43 = vsel %vm778_vm11, %v11773_v58, %v12118_v5 }
 0x190   :  { %1170 = vrot.lane.b32.xlu1 %v12012_v29, %s11337_s14  ;;  %1128 = vrot.lane.b32.xlu0 %v12009_v8, %s11337_s14 }
 0x191   :  { %1456 = vrot.lane.b32.xlu2 %v12040_v59, %s11337_s14 }
 0x192   :  { %v12134_v18 = vpop.permute.xlu1 %1951  ;;  %v12136_v32 = vpop.permute.xlu0 %1829 }
 0x193   :  { %15341 = vst [vmem:[#allocation20_spill] sm:$0xff] %v12134_v18  ;;  %v1961_v58 = vsel %vm15286_vm10, %v11949_v28, %v12134_v18  ;;  %v12143_v31 = vsel %vm1793_vm1, %v1828_v6, %v12136_v32  ;;  %v12145_v1 = vpop.permute.xlu2 %1704  ;;  %vm15305_vm10 = vcmask 64512  }
 0x194   :  { %v2987_v9 = vpack.c.bf16 %v2002_v38, %v1961_v58 }
 0x196   :  { %3166 = vmatpush.bf16.msrb.mxu1 %v2987_v9 }
 0x198   :  { %1497 = vrot.lane.b32.xlu1 %v12068_v20, %s11335_s12  ;;  %1458 = vrot.lane.b32.xlu0 %v11875_v27, %s11337_s14 }
 0x199   :  { %1499 = vrot.lane.b32.xlu2 %v11896_v53, %s11335_s12 }
 0x19a   :  { %v12153_v17 = vpop.permute.xlu1 %770  ;;  %v12155_v28 = vpop.permute.xlu0 %768 }
 0x19b   :  { %v12157_v6 = vpop.permute.xlu2 %1868  ;;  %v780_v38 = vsel %vm778_vm11, %v12155_v28, %v12153_v17 }
 0x19c   :  { %15342 = vst [vmem:[#allocation21_spill] sm:$0xff] %v12157_v6  ;;  %v1878_v9 = vsel %vm1876_vm9, %v12027_v42, %v12157_v6 }
 0x1a0   :  { %2472 = vrot.lane.b32.xlu1 %v12009_v8, %s11331_s8  ;;  %2470 = vrot.lane.b32.xlu0 %v11800_v33, %s11331_s8 }
 0x1a1   :  { %2517 = vrot.lane.b32.xlu2 %v11803_v35, %s11331_s8 }
 0x1a2   :  { %v916_v27 = vpop.permute.xlu1 %915  ;;  %v12176_v58 = vpop.permute.xlu0 %812 }
 0x1a3   :  { %v927_v42 = vsel %vm695_vm13, %v916_v27, %v11938_v0  ;;  %v821_v6 = vsel %vm778_vm11, %v12097_v10, %v12176_v58  ;;  %v12183_v18 = vpop.permute.xlu2 %687  ;;  %v8656_v0 = vld [vmem:[%s12172_s24 + $0x8] sm:$0xf]  ;;  %v10528_v27 = vld [vmem:[%s12172_s24 + $0x14] sm:$0xf0] }
 0x1a4   :  { %15343 = vst [vmem:[#allocation22_spill] sm:$0xff] %v12183_v18  ;;  %v2908_v16 = vpack.c.bf16 %v927_v42, %v891_v13  ;;  %v2897_v60 = vpack.c.bf16 %v821_v6, %v780_v38  ;;  %v12199_v13 = vor.u32 %v10528_v27, %v8656_v0  ;;  %v10526_v0 = vld [vmem:[%s12172_s24 + $0xc] sm:$0xf]  ;;  %v8658_v27 = vld [vmem:[%s12172_s24 + $0x18] sm:$0xf0] }
 0x1a5   :  { %v12222_v36 = vor.u32 %v10526_v0, %v8658_v27 }
 0x1a6   :  { %3079 = vmatpush.bf16.msra.mxu0 %v2908_v16  ;;  %3137 = vmatpush.bf16.msrb.mxu3 %v2897_v60  ;;  %15344 = vst [vmem:[#allocation23_spill] sm:$0xff] %v12199_v13  ;;  %v647_v16 = vld [vmem:[%s11408_s5 + $0x8] sm:$0xff] }
 0x1a7   :  { %3112 = vmatmul.bf16.vlgmr.msra.gmra.mxu2 %v12199_v13  ;;  %8662 = vmatmul.msk.bf16.vlgmr.msra.gmra.mxu3 %vm15305_vm10, %v12222_v36 }
 0x1a8   :  { %1624 = vrot.lane.b32.xlu1 %v12186_v22, %s11332_s9  ;;  %2519 = vrot.lane.b32.xlu0 %v12012_v29, %s11331_s8 }
 0x1a9   :  { %1665 = vrot.lane.b32.xlu2 %v12189_v51, %s11333_s10 }
 0x1aa   :  { %v1703_v6 = vpop.permute.xlu1 %1702  ;;  %v12201_v38 = vpop.permute.xlu0 %1085 }
 0x1ab   :  { %15345 = vst [vmem:[#allocation24_spill] sm:$0xff] %v12201_v38  ;;  %v12206_v60 = vsel %vm1710_vm0, %v11518_v11, %v1703_v6  ;;  %v12210_v42 = vsel %vm1710_vm0, %v1703_v6, %v12145_v1  ;;  %v12215_v57 = vsel %vm861_vm12, %v11831_v12, %v12201_v38  ;;  %v850_v44 = vpop.permute.xlu2 %849 }
 0x1ac   :  { %v862_v21 = vsel %vm861_vm12, %v850_v44, %v12072_v39 }
 0x1ad   :  { %v2902_v11 = vpack.c.bf16 %v879_v48, %v862_v21 }
 0x1af   :  { %3080 = vmatpush.bf16.msra.mxu0 %v2902_v11 }
 0x1b0   :  { %814 = vrot.lane.b32.xlu1 %v11803_v35, %s11340_s17  ;;  %772 = vrot.lane.b32.xlu0 %v11800_v33, %s11340_s17 }
 0x1b1   :  { %1046 = vrot.lane.b32.xlu2 %v12186_v22, %s11340_s17 }
 0x1b2   :  { %v12232_v12 = vpop.permute.xlu1 %1746  ;;  %v1745_v44 = vpop.permute.xlu0 %1744 }
 0x1b3   :  { %v12236_v21 = vsel %vm1710_vm0, %v11556_v23, %v1745_v44  ;;  %v1754_v39 = vsel %vm1710_vm0, %v1745_v44, %v12232_v12  ;;  %v1621_v48 = vpop.permute.xlu2 %1620 }
 0x1b4   :  { %v12242_v6 = vsel %vm1298_vm3, %v11577_v34, %v1621_v48 }
 0x1b8   :  { %1373 = vrot.lane.b32.xlu1 %v12018_v54, %s11333_s10  ;;  %1087 = vrot.lane.b32.xlu0 %v12189_v51, %s11341_s18 }
 0x1b9   :  { %1375 = vrot.lane.b32.xlu2 %v11800_v33, %s11333_s10 }
 0x1ba   :  { %v12252_v23 = vpop.permute.xlu0 %1910  ;;  %v12254_v27 = vpop.permute.xlu1 %685 }
 0x1bb   :  { %15346 = vst [vmem:[#allocation25_spill] sm:$0xff] %v12252_v23  ;;  %v1919_v34 = vsel %vm1876_vm9, %v12050_v62, %v12252_v23  ;;  %v12259_v11 = vpop.permute.xlu2 %1663  ;;  %v697_v44 = vsel %vm695_vm13, %v12254_v27, %v12183_v18  ;;  %v2885_v18 = vpack.c.bf16 %v11872_v30, %v647_v16 }
 0x1bc   :  { %v2981_v0 = vpack.c.bf16 %v1919_v34, %v1878_v9 }
 0x1be   :  { %3167 = vmatpush.bf16.msrb.mxu1 %v2981_v0 }
 0x1c0   :  { %1417 = vrot.lane.b32.xlu1 %v11896_v53, %s11337_s14  ;;  %1415 = vrot.lane.b32.xlu0 %v12068_v20, %s11337_s14 }
 0x1c1   :  { %2377 = vrot.lane.b32.xlu2 %v11800_v33, %s11334_s11 }
 0x1c2   :  { %v12270_v38 = vpop.permute.xlu0 %727  ;;  %v12272_v62 = vpop.permute.xlu1 %729 }
 0x1c3   :  { %15347 = vst [vmem:[#allocation26_spill] sm:$0xff] %v12272_v62  ;;  %v12274_v23 = vpop.permute.xlu2 %2561  ;;  %v738_v9 = vsel %vm695_vm13, %v12270_v38, %v12272_v62  ;;  %v2976_v62 = vpack.c.bf16 %v12143_v31, %v12116_v26  ;;  %v15348_v31 = vpack.c.bf16 %v12037_v56, %v12093_v15 }
 0x1c4   :  { %v2573_v53 = vsel %vm2571_vm14, %v11979_v63, %v12274_v23  ;;  %v2891_v0 = vpack.c.bf16 %v738_v9, %v697_v44  ;;  %v12293_v63 = vld [vmem:[%s11408_s5 + $0x48] sm:$0xff] }
 0x1c5   :  { %v3029_v34 = vpack.c.bf16 %v2573_v53, %v2573_v53 }
 0x1c6   :  { %3138 = vmatpush.bf16.msrb.mxu3 %v2891_v0 }
 0x1c7   :  { %v3062_v13 = vsel %vm15307_vm15, %v3029_v34, 0  ;;  %v12369_v34 = vld [vmem:[%s11408_s5 + $0x18] sm:$0xff] }
 0x1c8   :  { %2424 = vrot.lane.b32.xlu1 %v11803_v35, %s11334_s11  ;;  %2379 = vrot.lane.b32.xlu0 %v12009_v8, %s11334_s11 }
 0x1c9   :  { %2426 = vrot.lane.b32.xlu2 %v12012_v29, %s11334_s11  ;;  %3181 = vmatpush.bf16.msrb.mxu2 %v3062_v13 }
 0x1ca   :  { %v12295_v44 = vpop.permute.xlu0 %962  ;;  %v12297_v30 = vpop.permute.xlu1 %1003  ;;  %3139 = vmatpush.bf16.msrb.mxu3 %v2885_v18  ;;  %v2970_v18 = vpack.c.bf16 %v1754_v39, %v12210_v42 }
 0x1cb   :  { %v970_v16 = vsel %vm695_vm13, %v11907_v61, %v12295_v44  ;;  %v12302_v9 = vpop.permute.xlu2 %921  ;;  %v1011_v26 = vsel %vm778_vm11, %v11931_v50, %v12297_v30  ;;  %v2922_v61 = vpack.c.bf16 %v12215_v57, %v12123_v43 }
 0x1cc   :  { %v929_v13 = vsel %vm695_vm13, %v11999_v7, %v12302_v9  ;;  %8663 = vmatmul.msk.bf16.vlgmr.msrb.gmra.mxu2 %vm15305_vm10, %v12222_v36  ;;  %v2916_v50 = vpack.c.bf16 %v1011_v26, %v970_v16 }
 0x1cd   :  { %3202 = vmatpush.bf16.msra.mxu2 %v2976_v62  ;;  %v2910_v53 = vpack.c.bf16 %v929_v13, %v12040_v59 }
 0x1ce   :  { %3188 = vmatpush.bf16.msra.mxu3 %v15348_v31 }
 0x1d0   :  { %1542 = vrot.lane.b32.xlu1 %v12186_v22, %s11335_s12  ;;  %2563 = vrot.lane.b32.xlu0 %v11800_v33, %s11343_s20 }
 0x1d1   :  { %3203 = vmatpush.bf16.msra.mxu2 %v2970_v18  ;;  %1583 = vrot.lane.b32.xlu2 %v12189_v51, %s11332_s9  ;;  %v12387_v18 = vld [vmem:[%s11408_s5 + $0x50] sm:$0xff] }
 0x1d2   :  { %3189 = vmatpush.bf16.msra.mxu3 %v2922_v61  ;;  %v12324_v7 = vpop.permute.xlu0 %1622  ;;  %v1662_v56 = vpop.permute.xlu1 %1661 }
 0x1d3   :  { %v1630_v15 = vsel %vm1298_vm3, %v1621_v48, %v12324_v7  ;;  %v1580_v42 = vpop.permute.xlu2 %1579  ;;  %v12330_v57 = vsel %vm15306_vm5, %v11592_v40, %v1662_v56  ;;  %v1671_v43 = vsel %vm15306_vm5, %v1662_v56, %v12259_v11 }
 0x1d4   :  { %v12336_v39 = vsel %vm1298_vm3, %v11581_v37, %v1580_v42  ;;  %v2964_v62 = vpack.c.bf16 %v1671_v43, %v1630_v15  ;;  %v12416_v43 = vld [vmem:[%s11408_s5 + $0x88] sm:$0xff] }
 0x1d6   :  { %3190 = vmatpush.bf16.msra.mxu3 %v2916_v50  ;;  %3204 = vmatpush.bf16.msra.mxu2 %v2964_v62 }
 0x1d8   :  { %731 = vrot.lane.b32.xlu1 %v11803_v35, %s11342_s19  ;;  %689 = vrot.lane.b32.xlu0 %v11800_v33, %s11342_s19 }
 0x1d9   :  { %964 = vrot.lane.b32.xlu2 %v12186_v22, %s11342_s19 }
 0x1da   :  { %3191 = vmatpush.bf16.msra.mxu3 %v2910_v53  ;;  %v12345_v40 = vpop.permute.xlu0 %1789  ;;  %v12347_v48 = vpop.permute.xlu1 %1831 }
 0x1db   :  { %15349 = vst [vmem:[#allocation27_spill] sm:$0xff] %v12345_v40  ;;  %v12352_v37 = vsel %vm1793_vm1, %v12108_v46, %v12345_v40  ;;  %v12354_v59 = vpop.permute.xlu2 %1748  ;;  %v12359_v35 = vsel %vm1793_vm1, %v12136_v32, %v12347_v48  ;;  %v12642_v40 = vld [vmem:[%s11408_s5 + $0xd0] sm:$0xff] }
 0x1dc   :  { %15350 = vst [vmem:[#allocation28_spill] sm:$0xff] %v12354_v59  ;;  %v12364_v33 = vsel %vm1710_vm0, %v12232_v12, %v12354_v59 }
 0x1e0   :  { %1290 = vrot.lane.b32.xlu1 %v12018_v54, %s11332_s9  ;;  %1005 = vrot.lane.b32.xlu0 %v12189_v51, %s11340_s17 }
 0x1e1   :  { %1292 = vrot.lane.b32.xlu2 %v12369_v34, %s11332_s9 }
 0x1e2   :  { %v767_v46 = vpop.permute.xlu0 %766  ;;  %v809_v32 = vpop.permute.xlu1 %808 }
 0x1e3   :  { %v779_v12 = vsel %vm778_vm11, %v767_v46, %v12155_v28  ;;  %v12379_v16 = vpop.permute.xlu2 %855  ;;  %v820_v26 = vsel %vm778_vm11, %v809_v32, %v12097_v10  ;;  %v12397_v10 = vld [vmem:[%s11408_s5 + $0xc0] sm:$0xff] }
 0x1e4   :  { %v864_v31 = vsel %vm861_vm12, %v12070_v41, %v12379_v16  ;;  %v2896_v13 = vpack.c.bf16 %v820_v26, %v779_v12 }
 0x1e5   :  { %v2904_v61 = vpack.c.bf16 %v12068_v20, %v864_v31 }
 0x1e6   :  { %3081 = vmatpush.bf16.msra.mxu0 %v2896_v13 }
 0x1e7   :  { %3192 = vmatpush.bf16.msra.mxu3 %v2904_v61 }
 0x1e8   :  { %1334 = vrot.lane.b32.xlu1 %v12387_v18, %s11332_s9  ;;  %1332 = vrot.lane.b32.xlu0 %v12293_v63, %s11332_s9 }
 0x1e9   :  { %2284 = vrot.lane.b32.xlu2 %v12369_v34, %s11336_s13 }
 0x1ea   :  { %v1539_v41 = vpop.permute.xlu0 %1538  ;;  %v12399_v28 = vpop.permute.xlu1 %1540 }
 0x1eb   :  { %v1547_v20 = vsel %vm1215_vm6, %v11619_v52, %v1539_v41  ;;  %v1457_v50 = vpop.permute.xlu2 %1456  ;;  %v1548_v56 = vsel %vm1215_vm6, %v1539_v41, %v12399_v28  ;;  %v2884_v41 = vpack.c.bf16 %v11962_v3, %v11882_v2 }
 0x1ec   :  { %v12407_v15 = vsel %vm1132_vm8, %v11611_v49, %v1457_v50 }
 0x1f0   :  { %2331 = vrot.lane.b32.xlu1 %v12387_v18, %s11336_s13  ;;  %2286 = vrot.lane.b32.xlu0 %v12009_v8, %s11336_s13 }
 0x1f1   :  { %2333 = vrot.lane.b32.xlu2 %v12012_v29, %s11336_s13  ;;  %v15363_v29 = vld [vmem:[#allocation4_spill] sm:$0xff] }
 0x1f2   :  { %v12418_v52 = vpop.permute.xlu0 %1581  ;;  %v12420_v62 = vpop.permute.xlu1 %1706 }
 0x1f3   :  { %15351 = vst [vmem:[#allocation29_spill] sm:$0xff] %v12420_v62  ;;  %v1589_v53 = vsel %vm1298_vm3, %v1580_v42, %v12418_v52  ;;  %v12424_v49 = vpop.permute.xlu2 %1499  ;;  %v12429_v46 = vsel %vm1710_vm0, %v12145_v1, %v12420_v62 }
 0x1f4   :  { %v2958_v32 = vpack.c.bf16 %v1589_v53, %v1548_v56 }
 0x1f6   :  { %3205 = vmatpush.bf16.msra.mxu2 %v2958_v32 }
 0x1f8   :  { %1501 = vrot.lane.b32.xlu1 %v12189_v51, %s11335_s12  ;;  %1460 = vrot.lane.b32.xlu0 %v12186_v22, %s11337_s14 }
 0x1f9   :  { %923 = vrot.lane.b32.xlu2 %v12189_v51, %s11342_s19 }
 0x1fa   :  { %v726_v42 = vpop.permute.xlu1 %725  ;;  %v684_v12 = vpop.permute.xlu0 %683 }
 0x1fb   :  { %v2518_v26 = vpop.permute.xlu2 %2517  ;;  %v737_v1 = vsel %vm695_vm13, %v726_v42, %v12270_v38  ;;  %v696_v31 = vsel %vm695_vm13, %v684_v12, %v12254_v27 }
 0x1fc   :  { %v12445_v13 = vsel %vm2478_vm2, %v11673_v4, %v2518_v26  ;;  %v2890_v61 = vpack.c.bf16 %v737_v1, %v696_v31  ;;  %v12530_v31 = vld [vmem:[%s11408_s5 + $0x28] sm:$0xff]  ;;  %v12609_v1 = vld [vmem:[%s11408_s5 + $0x58] sm:$0xff] }
 0x1fe   :  { %3082 = vmatpush.bf16.msra.mxu0 %v2890_v61 }
 0x200   :  { %1209 = vrot.lane.b32.xlu1 %v12369_v34, %s11335_s12  ;;  %1207 = vrot.lane.b32.xlu0 %v12018_v54, %s11335_s12  ;;  %v15353_v54 = vpack.c.bf16 %v12059_v25, %v12112_v24  ;;  %v2963_v25 = vpack.c.bf16 %v12330_v57, %v12242_v6  ;;  %v2957_v57 = vpack.c.bf16 %v12336_v39, %v1547_v20 }
 0x201   :  { %1249 = vrot.lane.b32.xlu2 %v12293_v63, %s11335_s12 }
 0x202   :  { %v12455_v38 = vpop.permute.xlu1 %1170  ;;  %v12457_v27 = vpop.permute.xlu0 %1128  ;;  %3083 = vmatpush.bf16.msra.mxu0 %v2884_v41 }
 0x203   :  { %v12459_v4 = vpop.permute.xlu2 %1665  ;;  %v12464_v2 = vsel %vm1132_vm8, %v12031_v14, %v12455_v38  ;;  %v12469_v3 = vsel %vm1132_vm8, %v12088_v45, %v12457_v27  ;;  %v15354_v14 = vpack.c.bf16 %v12236_v21, %v12206_v60 }
 0x204   :  { %15352 = vst [vmem:[#allocation30_spill] sm:$0xff] %v12459_v4  ;;  %v12477_v56 = vsel %vm15306_vm5, %v12259_v11, %v12459_v4  ;;  %v10527_v4 = vld [vmem:[%s12172_s24 + $0xc] sm:$0xf0] }
 0x206   :  { %3146 = vmatpush.bf16.msrb.mxu0 %v15353_v54 }
 0x208   :  { %2200 = vrot.lane.b32.xlu1 %v12397_v10, %s11338_s15  ;;  %1251 = vrot.lane.b32.xlu0 %v12387_v18, %s11335_s12 }
 0x209   :  { %2202 = vrot.lane.b32.xlu2 %v12186_v22, %s11338_s15 }
 0x20a   :  { %3147 = vmatpush.bf16.msrb.mxu0 %v15354_v14  ;;  %v1498_v45 = vpop.permute.xlu1 %1497  ;;  %v12492_v24 = vpop.permute.xlu0 %1458 }
 0x20b   :  { %v12494_v11 = vpop.permute.xlu2 %1046  ;;  %v1506_v60 = vsel %vm1215_vm6, %v11661_v19, %v1498_v45  ;;  %v1507_v21 = vsel %vm1215_vm6, %v1498_v45, %v12424_v49  ;;  %v1466_v32 = vsel %vm1132_vm8, %v1457_v50, %v12492_v24 }
 0x20c   :  { %v12505_v42 = vsel %vm778_vm11, %v12118_v5, %v12494_v11  ;;  %v2952_v6 = vpack.c.bf16 %v1507_v21, %v1466_v32  ;;  %v2951_v19 = vpack.c.bf16 %v1506_v60, %v12407_v15  ;;  %v10525_v15 = vld [vmem:[%s12172_s24 + $0x4] sm:$0xf] }
 0x20d   :  { %v12563_v32 = vld [vmem:[%s11408_s5 + $0x60] sm:$0xff] }
 0x20e   :  { %3148 = vmatpush.bf16.msrb.mxu0 %v2963_v25  ;;  %3206 = vmatpush.bf16.msra.mxu2 %v2952_v6 }
 0x210   :  { %2243 = vrot.lane.b32.xlu1 %v12189_v51, %s11339_s16  ;;  %2241 = vrot.lane.b32.xlu0 %v12416_v43, %s11339_s16 }
 0x211   :  { %1377 = vrot.lane.b32.xlu2 %v12009_v8, %s11333_s10 }
 0x212   :  { %3149 = vmatpush.bf16.msrb.mxu0 %v2957_v57  ;;  %v12515_v5 = vpop.permute.xlu1 %2472  ;;  %v2471_v50 = vpop.permute.xlu0 %2470 }
 0x213   :  { %15355 = vst [vmem:[#allocation31_spill] sm:$0xff] %v12515_v5  ;;  %v12517_v12 = vpop.permute.xlu2 %1375  ;;  %v12521_v39 = vsel %vm2478_vm2, %v11625_v55, %v2471_v50  ;;  %v12525_v20 = vsel %vm2478_vm2, %v2471_v50, %v12515_v5  ;;  %v8650_v55 = vld [vmem:[%s12172_s24 + $0x10] sm:$0xf0] }
 0x214   :  { %v12540_v61 = vor.u32 %v10525_v15, %v8650_v55  ;;  %v15360_v55 = vld [vmem:[#allocation5_spill] sm:$0xff] }
 0x216   :  { %3150 = vmatpush.bf16.msrb.mxu0 %v2951_v19  ;;  %3098 = vmatmul.bf16.vlgmr.msra.gmra.mxu1 %v12540_v61 }
 0x218   :  { %857 = vrot.lane.b32.xlu1 %v12009_v8, %s11341_s18  ;;  %1419 = vrot.lane.b32.xlu0 %v12189_v51, %s11337_s14 }
 0x219   :  { %1130 = vrot.lane.b32.xlu2 %v12530_v31, %s11337_s14 }
 0x21a   :  { %v12542_v41 = vpop.permute.xlu1 %1624  ;;  %v12544_v54 = vpop.permute.xlu0 %2519 }
 0x21b   :  { %15356 = vst [vmem:[#allocation32_spill] sm:$0xff] %v12542_v41  ;;  %v2378_v14 = vpop.permute.xlu2 %2377  ;;  %v12549_v25 = vsel %vm1298_vm3, %v12324_v7, %v12542_v41  ;;  %v12553_v45 = vsel %vm2478_vm2, %v2518_v26, %v12544_v54  ;;  %v8648_v41 = vld [vmem:[%s12172_s24] sm:$0xf]  ;;  %s14338_s24 = sld [smem:[%s15267_s0 + %s11353_s21]]  }
 0x21c   :  { %15357 = vst [vmem:[#allocation33_spill] sm:$0xff] %v12544_v54  ;;  %v12558_v60 = vsel %vm2385_vm4, %v11718_v47, %v2378_v14  ;;  %v12636_v5 = vor.u32 %v10527_v4, %v8648_v41  ;;  %v12639_v54 = vld [vmem:[%s11408_s5 + $0x98] sm:$0xff] }
 0x21e   :  { %3140 = vmatmul.bf16.vlgmr.msrb.gmra.mxu3 %v12636_v5  ;;  %3084 = vmatmul.bf16.vlgmr.msra.gmra.mxu0 %v12636_v5 }
 0x220   :  { %2118 = vrot.lane.b32.xlu1 %v12397_v10, %s11329_s6  ;;  %1172 = vrot.lane.b32.xlu0 %v12563_v32, %s11337_s14 }
 0x221   :  { %2120 = vrot.lane.b32.xlu2 %v12186_v22, %s11329_s6 }
 0x222   :  { %v12571_v7 = vpop.permute.xlu1 %814  ;;  %v12573_v26 = vpop.permute.xlu0 %772 }
 0x223   :  { %v12575_v47 = vpop.permute.xlu2 %2426  ;;  %v822_v6 = vsel %vm778_vm11, %v12176_v58, %v12571_v7  ;;  %v781_v57 = vsel %vm778_vm11, %v12153_v17, %v12573_v26 }
 0x224   :  { %15358 = vst [vmem:[#allocation34_spill] sm:$0xff] %v12575_v47  ;;  %v2898_v19 = vpack.c.bf16 %v822_v6, %v781_v57  ;;  %v15361_v57 = vld [vmem:[#allocation23_spill] sm:$0xff] }
 0x226   :  { %3193 = vmatpush.bf16.msra.mxu3 %v2898_v19  ;;  %3168 = vmatmul.bf16.vlgmr.msrb.gmra.mxu1 %v15361_v57  ;;  %v15362_v19 = vld [vmem:[#allocation24_spill] sm:$0xff] }
 0x228   :  { %2161 = vrot.lane.b32.xlu1 %v12189_v51, %s11338_s15  ;;  %2159 = vrot.lane.b32.xlu0 %v12416_v43, %s11338_s15 }
 0x229   :  { %1294 = vrot.lane.b32.xlu2 %v12009_v8, %s11332_s9 }
 0x22a   :  { %v1374_v50 = vpop.permute.xlu1 %1373  ;;  %v12589_v15 = vpop.permute.xlu0 %1087 }
 0x22b   :  { %v12591_v58 = vpop.permute.xlu2 %1583  ;;  %v1383_v17 = vsel %vm15306_vm5, %v15360_v55, %v1374_v50  ;;  %v1384_v6 = vsel %vm15306_vm5, %v1374_v50, %v12517_v12  ;;  %v12606_v21 = vsel %vm861_vm12, %v15362_v19, %v12589_v15  ;;  %v12612_v55 = vld [vmem:[%s11408_s5 + $0x20] sm:$0xff]  ;;  %v648_v19 = vld [vmem:[%s11408_s5 + $0x10] sm:$0xff] }
 0x22c   :  { %15359 = vst [vmem:[#allocation35_spill] sm:$0xff] %v12591_v58  ;;  %v12601_v8 = vsel %vm1298_vm3, %v12418_v52, %v12591_v58 }
 0x230   :  { %774 = vrot.lane.b32.xlu1 %v12612_v55, %s11340_s17  ;;  %1336 = vrot.lane.b32.xlu0 %v12609_v1, %s11332_s9 }
 0x231   :  { %816 = vrot.lane.b32.xlu2 %v12609_v1, %s11340_s17 }
 0x232   :  { %v12620_v52 = vpop.permute.xlu1 %1417  ;;  %v1416_v50 = vpop.permute.xlu0 %1415 }
 0x233   :  { %v12623_v53 = vpop.permute.xlu2 %964  ;;  %v1424_v0 = vsel %vm1132_vm8, %v15363_v29, %v1416_v50  ;;  %v1425_v58 = vsel %vm1132_vm8, %v1416_v50, %v12620_v52 }
 0x234   :  { %v12634_v57 = vsel %vm695_vm13, %v12295_v44, %v12623_v53  ;;  %v2945_v62 = vpack.c.bf16 %v1424_v0, %v1383_v17  ;;  %v2946_v59 = vpack.c.bf16 %v1425_v58, %v1384_v6  ;;  %v12671_v17 = vld [vmem:[%s11408_s5 + $0x90] sm:$0xff]  ;;  %v15368_v58 = vld [vmem:[#allocation8_spill] sm:$0xff] }
 0x236   :  { %3151 = vmatpush.bf16.msrb.mxu0 %v2945_v62  ;;  %3207 = vmatpush.bf16.msra.mxu2 %v2946_v59  ;;  %v15365_v62 = vld [vmem:[#allocation6_spill] sm:$0xff] }
 0x238   :  { %1089 = vrot.lane.b32.xlu1 %v12639_v54, %s11341_s18  ;;  %1048 = vrot.lane.b32.xlu0 %v12642_v40, %s11340_s17 }
 0x239   :  { %2036 = vrot.lane.b32.xlu2 %v12397_v10, %s11330_s7 }
 0x23a   :  { %v2425_v44 = vpop.permute.xlu1 %2424  ;;  %v12652_v0 = vpop.permute.xlu0 %2379 }
 0x23b   :  { %15364 = vst [vmem:[#allocation5_spill] sm:$0xff] %v12652_v0  ;;  %v12654_v29 = vpop.permute.xlu2 %1292  ;;  %v12658_v59 = vsel %vm2385_vm4, %v15365_v62, %v2425_v44  ;;  %v12662_v4 = vsel %vm2385_vm4, %v2425_v44, %v12575_v47  ;;  %v12666_v41 = vsel %vm2385_vm4, %v2378_v14, %v12652_v0 }
 0x240   :  { %2077 = vrot.lane.b32.xlu1 %v12416_v43, %s11329_s6  ;;  %2038 = vrot.lane.b32.xlu0 %v12186_v22, %s11330_s7 }
 0x241   :  { %2079 = vrot.lane.b32.xlu2 %v12189_v51, %s11329_s6 }
 0x242   :  { %v12679_v6 = vpop.permute.xlu1 %1542  ;;  %v12681_v50 = vpop.permute.xlu0 %2563 }
 0x243   :  { %15366 = vst [vmem:[#allocation24_spill] sm:$0xff] %v12679_v6  ;;  %v12683_v14 = vpop.permute.xlu2 %2284  ;;  %v1549_v44 = vsel %vm1215_vm6, %v12399_v28, %v12679_v6  ;;  %v2574_v62 = vsel %vm2571_vm14, %v12274_v23, %v12681_v50  ;;  %v15369_v23 = vpack.c.bf16 %v12359_v35, %v12352_v37  ;;  %v15371_v6 = vld [vmem:[#allocation22_spill] sm:$0xff]  ;;  %v15372_v37 = vpack.c.bf16 %v12364_v33, %v12429_v46 }
 0x244   :  { %15367 = vst [vmem:[#allocation4_spill] sm:$0xff] %v12681_v50  ;;  %v12694_v22 = vsel %vm2292_vm7, %v15368_v58, %v12683_v14  ;;  %v3030_v51 = vpack.c.bf16 %v2574_v62, %v2574_v62  ;;  %v15370_v62 = vld [vmem:[#allocation26_spill] sm:$0xff]  ;;  %v2886_v35 = vpack.c.bf16 %v12293_v63, %v648_v19  ;;  %v15373_v63 = vld [vmem:[#allocation7_spill] sm:$0xff] }
 0x246   :  { %v3065_v0 = vsel %vm15307_vm15, %v3030_v51, 0 }
 0x247   :  { %3237 = vmatpush.bf16.msra.mxu1 %v3065_v0 }
 0x248   :  { %1253 = vrot.lane.b32.xlu1 %v12609_v1, %s11335_s12  ;;  %1211 = vrot.lane.b32.xlu0 %v12612_v55, %s11335_s12 }
 0x249   :  { %691 = vrot.lane.b32.xlu2 %v12612_v55, %s11342_s19 }
 0x24a   :  { %v12706_v28 = vpop.permute.xlu1 %731  ;;  %v12708_v58 = vpop.permute.xlu0 %689  ;;  %8664 = vmatmul.msk.bf16.vlgmr.msra.gmra.mxu1 %vm15305_vm10, %v12222_v36  ;;  %vm657_vm10 = vcmask 670720  }
 0x24b   :  { %3258 = vmatpush.bf16.msrb.mxu1 %v15369_v23  ;;  %v12712_v0 = vpop.permute.xlu2 %2333  ;;  %v739_v51 = vsel %vm695_vm13, %v15370_v62, %v12706_v28  ;;  %v698_v50 = vsel %vm695_vm13, %v15371_v6, %v12708_v58  ;;  %v2965_v23 = vpack.c.bf16 %v12477_v56, %v12549_v25  ;;  %v15374_v25 = vpack.c.bf16 %v12464_v2, %v12469_v3 }
 0x24c   :  { %v2892_v47 = vpack.c.bf16 %v739_v51, %v698_v50  ;;  %v2923_v51 = vpack.c.bf16 %v12606_v21, %v12505_v42 }
 0x24e   :  { %3194 = vmatpush.bf16.msra.mxu3 %v2892_v47  ;;  %v2959_v47 = vpack.c.bf16 %v12601_v8, %v1549_v44  ;;  %v15375_v8 = vld [vmem:[#allocation9_spill] sm:$0xff] }
 0x24f   :  { %3259 = vmatpush.bf16.msrb.mxu1 %v15372_v37  ;;  %v15376_v44 = vld [vmem:[#allocation13_spill] sm:$0xff] }
 0x250   :  { %966 = vrot.lane.b32.xlu1 %v12642_v40, %s11342_s19  ;;  %733 = vrot.lane.b32.xlu0 %v12609_v1, %s11342_s19 }
 0x251   :  { %1007 = vrot.lane.b32.xlu2 %v12639_v54, %s11340_s17 }
 0x252   :  { %v1291_v6 = vpop.permute.xlu1 %1290  ;;  %v12732_v50 = vpop.permute.xlu0 %1005  ;;  %3195 = vmatpush.bf16.msra.mxu3 %v2886_v35 }
 0x253   :  { %3260 = vmatpush.bf16.msrb.mxu1 %v2965_v23  ;;  %v12734_v33 = vpop.permute.xlu2 %923  ;;  %v1300_v46 = vsel %vm1298_vm3, %v15373_v63, %v1291_v6  ;;  %v1301_v56 = vsel %vm1298_vm3, %v1291_v6, %v12654_v29  ;;  %v1012_v62 = vsel %vm778_vm11, %v12297_v30, %v12732_v50 }
 0x254   :  { %v930_v19 = vsel %vm695_vm13, %v12302_v9, %v12734_v33  ;;  %v2917_v9 = vpack.c.bf16 %v1012_v62, %v12634_v57 }
 0x255   :  { %3196 = vmatmul.bf16.vlgmr.msra.gmra.mxu3 %v12636_v5  ;;  %v2911_v6 = vpack.c.bf16 %v930_v19, %v12397_v10 }
 0x256   :  { %3244 = vmatpush.bf16.msrb.mxu3 %v15374_v25 }
 0x257   :  { %3261 = vmatpush.bf16.msrb.mxu1 %v2959_v47 }
 0x258   :  { %1833 = vrot.lane.b32.xlu1 %v12563_v32, %s11329_s6  ;;  %1791 = vrot.lane.b32.xlu0 %v12530_v31, %s11329_s6 }
 0x259   :  { %1953 = vrot.lane.b32.xlu2 %v12369_v34, %s11339_s16 }
 0x25a   :  { %3245 = vmatpush.bf16.msrb.mxu3 %v2923_v51  ;;  %v12760_v2 = vpop.permute.xlu1 %1334  ;;  %v1333_v30 = vpop.permute.xlu0 %1332 }
 0x25b   :  { %v1250_v3 = vpop.permute.xlu2 %1249  ;;  %v1341_v42 = vsel %vm1298_vm3, %v15375_v8, %v1333_v30  ;;  %v1342_v21 = vsel %vm1298_vm3, %v1333_v30, %v12760_v2 }
 0x25c   :  { %v1258_v37 = vsel %vm1215_vm6, %v15376_v44, %v1250_v3  ;;  %v2939_v35 = vpack.c.bf16 %v1341_v42, %v1300_v46  ;;  %v2940_v23 = vpack.c.bf16 %v1342_v21, %v1301_v56  ;;  %v15377_v46 = vld [vmem:[#allocation10_spill] sm:$0xff]  ;;  %v15378_v21 = vld [vmem:[#allocation12_spill] sm:$0xff] }
 0x25e   :  { %3246 = vmatpush.bf16.msrb.mxu3 %v2917_v9  ;;  %3152 = vmatpush.bf16.msrb.mxu0 %v2939_v35 }
 0x25f   :  { %3208 = vmatpush.bf16.msra.mxu2 %v2940_v23 }
 0x260   :  { %1995 = vrot.lane.b32.xlu1 %v12416_v43, %s11330_s7  ;;  %1955 = vrot.lane.b32.xlu0 %v12612_v55, %s11339_s16 }
 0x261   :  { %1997 = vrot.lane.b32.xlu2 %v12671_v17, %s11330_s7 }
 0x262   :  { %3247 = vmatpush.bf16.msrb.mxu3 %v2911_v6  ;;  %v2332_v57 = vpop.permute.xlu1 %2331  ;;  %v12775_v63 = vpop.permute.xlu0 %2286 }
 0x263   :  { %v12777_v25 = vpop.permute.xlu2 %2202  ;;  %v2341_v10 = vsel %vm2292_vm7, %v15377_v46, %v2332_v57  ;;  %v2296_v56 = vsel %vm2292_vm7, %v12683_v14, %v12775_v63  ;;  %v2342_v47 = vsel %vm2292_vm7, %v2332_v57, %v12712_v0 }
 0x268   :  { %2521 = vrot.lane.b32.xlu1 %v12563_v32, %s11331_s8  ;;  %2474 = vrot.lane.b32.xlu0 %v12530_v31, %s11331_s8 }
 0x269   :  { %925 = vrot.lane.b32.xlu2 %v12639_v54, %s11342_s19 }
 0x26a   :  { %v12792_v19 = vpop.permute.xlu1 %1501  ;;  %v12794_v62 = vpop.permute.xlu0 %1460 }
 0x26b   :  { %v12796_v51 = vpop.permute.xlu2 %1377  ;;  %v1508_v14 = vsel %vm1215_vm6, %v12424_v49, %v12792_v19  ;;  %v1467_v9 = vsel %vm1132_vm8, %v12492_v24, %v12794_v62 }
 0x26c   :  { %v12807_v30 = vsel %vm15306_vm5, %v12517_v12, %v12796_v51  ;;  %v2953_v8 = vpack.c.bf16 %v1508_v14, %v1467_v9  ;;  %v15382_v14 = vld [vmem:[#allocation11_spill] sm:$0xff]  ;;  %vm15383_vm5 = vcmask 711680   ;;  %v15385_v9 = vpack.c.bf16 %v12662_v4, %v12666_v41 }
 0x26d   :  { %vm15384_vm15 = vmmov %vm15383_vm5 }
 0x26e   :  { %3262 = vmatpush.bf16.msrb.mxu1 %v2953_v8 }
 0x270   :  { %1750 = vrot.lane.b32.xlu1 %v12563_v32, %s11330_s7  ;;  %1708 = vrot.lane.b32.xlu0 %v12530_v31, %s11330_s7 }
 0x271   :  { %1870 = vrot.lane.b32.xlu2 %v12369_v34, %s11338_s15  ;;  %v15379_v34 = vpack.c.bf16 %v12445_v13, %v12521_v39  ;;  %v15380_v13 = vld [vmem:[#allocation14_spill] sm:$0xff] }
 0x272   :  { %v12815_v49 = vpop.permute.xlu1 %1209  ;;  %v1208_v24 = vpop.permute.xlu0 %1207 }
 0x273   :  { %v1131_v42 = vpop.permute.xlu2 %1130  ;;  %v1217_v12 = vsel %vm1215_vm6, %v15378_v21, %v1208_v24  ;;  %v1218_v35 = vsel %vm1215_vm6, %v1208_v24, %v12815_v49 }
 0x274   :  { %v12821_v44 = vsel %vm1132_vm8, %v12457_v27, %v1131_v42  ;;  %1149 = vst.msk [vmem:[#allocation2 + $0x2c8] sm:$0xff] %vm657_vm10, %v1131_v42  ;;  %v2933_v23 = vpack.c.bf16 %v1258_v37, %v1217_v12  ;;  %v3018_v27 = vpack.c.bf16 %v12658_v59, %v12558_v60  ;;  %v3012_v60 = vpack.c.bf16 %v2341_v10, %v12694_v22 }
 0x275   :  { %v15381_v59 = vpack.c.bf16 %v12553_v45, %v12525_v20  ;;  %v3013_v42 = vpack.c.bf16 %v2342_v47, %v2296_v56 }
 0x276   :  { %3153 = vmatpush.bf16.msrb.mxu0 %v2933_v23 }
 0x278   :  { %1912 = vrot.lane.b32.xlu1 %v12387_v18, %s11338_s15  ;;  %1872 = vrot.lane.b32.xlu0 %v12612_v55, %s11338_s15 }
 0x279   :  { %1914 = vrot.lane.b32.xlu2 %v12609_v1, %s11338_s15  ;;  %3154 = vmatmul.bf16.vlgmr.msrb.gmra.mxu0 %v12540_v61 }
 0x27a   :  { %3216 = vmatpush.bf16.msra.mxu0 %v15379_v34  ;;  %v2201_v37 = vpop.permute.xlu1 %2200  ;;  %v12838_v6 = vpop.permute.xlu0 %1251 }
 0x27b   :  { %v12840_v57 = vpop.permute.xlu2 %2120  ;;  %v2208_v39 = vsel %vm1876_vm9, %v15380_v13, %v2201_v37  ;;  %v2209_v18 = vsel %vm1876_vm9, %v2201_v37, %v12777_v25  ;;  %v1259_v46 = vsel %vm1215_vm6, %v1250_v3, %v12838_v6 }
 0x27c   :  { %v2934_v1 = vpack.c.bf16 %v1259_v46, %v1218_v35 }
 0x27e   :  { %3217 = vmatpush.bf16.msra.mxu0 %v3018_v27  ;;  %3209 = vmatpush.bf16.msra.mxu2 %v2934_v1  ;;  %v15386_v27 = vld [vmem:[#allocation16_spill] sm:$0xff]  ;;  %v15388_v1 = vld [vmem:[#allocation15_spill] sm:$0xff] }
 0x280   :  { %2428 = vrot.lane.b32.xlu1 %v12563_v32, %s11334_s11  ;;  %2381 = vrot.lane.b32.xlu0 %v12530_v31, %s11334_s11 }
 0x281   :  { %859 = vrot.lane.b32.xlu2 %v12530_v31, %s11341_s18  ;;  %3210 = vmatmul.bf16.vlgmr.msra.gmra.mxu2 %v12540_v61  ;;  %s11351_s18 = smov 110  }
 0x282   :  { %3218 = vmatpush.bf16.msra.mxu0 %v3012_v60  ;;  %3272 = vmatpush.bf16.msrb.mxu2 %v15381_v59  ;;  %v12859_v3 = vpop.permute.xlu1 %2243  ;;  %v2242_v22 = vpop.permute.xlu0 %2241 }
 0x283   :  { %v12861_v10 = vpop.permute.xlu2 %1294  ;;  %v2249_v20 = vsel %vm15383_vm5, %v15382_v14, %v2242_v22  ;;  %v2250_v45 = vsel %vm15384_vm15, %v2242_v22, %v12859_v3  ;;  %vm15394_vm15 = vmmov %vm15383_vm5 }
 0x284   :  { %v1302_v8 = vsel %vm1298_vm3, %v12654_v29, %v12861_v10  ;;  %v3006_v24 = vpack.c.bf16 %v2249_v20, %v2208_v39  ;;  %v3007_v21 = vpack.c.bf16 %v2250_v45, %v2209_v18 }
 0x286   :  { %3273 = vmatpush.bf16.msrb.mxu2 %v15385_v9  ;;  %3219 = vmatpush.bf16.msra.mxu0 %v3006_v24 }
 0x288   :  { %1667 = vrot.lane.b32.xlu1 %v12639_v54, %s11333_s10  ;;  %1626 = vrot.lane.b32.xlu0 %v12642_v40, %s11332_s9 }
 0x289   :  { %2288 = vrot.lane.b32.xlu2 %v12530_v31, %s11336_s13 }
 0x28a   :  { %3274 = vmatpush.bf16.msrb.mxu2 %v3013_v42  ;;  %v12879_v4 = vpop.permute.xlu1 %857  ;;  %v12881_v41 = vpop.permute.xlu0 %1419 }
 0x28b   :  { %v12883_v12 = vpop.permute.xlu2 %816  ;;  %v865_v29 = vsel %vm861_vm12, %v12379_v16, %v12879_v4  ;;  %v1426_v56 = vsel %vm1132_vm8, %v12620_v52, %v12881_v41 }
 0x28c   :  { %v823_v47 = vsel %vm778_vm11, %v12571_v7, %v12883_v12  ;;  %v2905_v35 = vpack.c.bf16 %v12416_v43, %v865_v29  ;;  %v2947_v23 = vpack.c.bf16 %v1426_v56, %v12807_v30  ;;  %v15387_v30 = vld [vmem:[#allocation18_spill] sm:$0xff] }
 0x28e   :  { %3275 = vmatpush.bf16.msrb.mxu2 %v3007_v21  ;;  %3248 = vmatpush.bf16.msrb.mxu3 %v2905_v35  ;;  %v12974_v35 = vld [vmem:[%s11408_s5 + $0x68] sm:$0xff] }
 0x28f   :  { %3263 = vmatpush.bf16.msrb.mxu1 %v2947_v23  ;;  %v12977_v23 = vld [vmem:[%s11408_s5 + $0x30] sm:$0xff] }
 0x290   :  { %776 = vrot.lane.b32.xlu1 %v12530_v31, %s11340_s17  ;;  %2335 = vrot.lane.b32.xlu0 %v12563_v32, %s11336_s13 }
 0x291   :  { %818 = vrot.lane.b32.xlu2 %v12563_v32, %s11340_s17 }
 0x292   :  { %v2119_v16 = vpop.permute.xlu1 %2118  ;;  %v1173_v52 = vpop.permute.xlu0 %1172 }
 0x293   :  { %v2037_v34 = vpop.permute.xlu2 %2036  ;;  %v2126_v7 = vsel %vm1793_vm1, %v15386_v27, %v2119_v16  ;;  %v2127_v43 = vsel %vm1793_vm1, %v2119_v16, %v12840_v57  ;;  %1190 = vst.msk [vmem:[#allocation2 + $0x2f8] sm:$0xff] %vm657_vm10, %v1173_v52  ;;  %v12911_v13 = vsel %vm1132_vm8, %v12455_v38, %v1173_v52  ;;  %v15389_v27 = vld [vmem:[#allocation17_spill] sm:$0xff] }
 0x294   :  { %v2044_v37 = vsel %vm1710_vm0, %v15387_v30, %v2037_v34 }
 0x298   :  { %1585 = vrot.lane.b32.xlu1 %v12639_v54, %s11332_s9  ;;  %1544 = vrot.lane.b32.xlu0 %v12642_v40, %s11335_s12 }
 0x299   :  { %2565 = vrot.lane.b32.xlu2 %v12612_v55, %s11343_s20 }
 0x29a   :  { %v12919_v39 = vpop.permute.xlu1 %2161  ;;  %v2160_v18 = vpop.permute.xlu0 %2159 }
 0x29b   :  { %v12921_v46 = vpop.permute.xlu2 %2079  ;;  %v2167_v60 = vsel %vm1876_vm9, %v15388_v1, %v2160_v18  ;;  %v2168_v38 = vsel %vm1876_vm9, %v2160_v18, %v12919_v39  ;;  %v15390_v18 = vld [vmem:[#allocation20_spill] sm:$0xff] }
 0x29c   :  { %v3000_v59 = vpack.c.bf16 %v2167_v60, %v2126_v7  ;;  %v3001_v22 = vpack.c.bf16 %v2168_v38, %v2127_v43 }
 0x29e   :  { %3220 = vmatpush.bf16.msra.mxu0 %v3000_v59  ;;  %3276 = vmatpush.bf16.msrb.mxu2 %v3001_v22  ;;  %v13004_v59 = vld [vmem:[%s11408_s5 + $0x28] sm:$0xff] }
 0x29f   :  { %658 = vst.msk [vmem:[#allocation2 + $0x28] sm:$0xff] %vm657_vm10, %v13004_v59 }
 0x2a0   :  { %2245 = vrot.lane.b32.xlu1 %v12639_v54, %s11339_s16  ;;  %2204 = vrot.lane.b32.xlu0 %v12642_v40, %s11338_s15 }
 0x2a1   :  { %693 = vrot.lane.b32.xlu2 %v12530_v31, %s11342_s19 }
 0x2a2   :  { %v12933_v55 = vpop.permute.xlu1 %774  ;;  %v12935_v14 = vpop.permute.xlu0 %1336 }
 0x2a3   :  { %v12937_v20 = vpop.permute.xlu2 %691  ;;  %v782_v45 = vsel %vm778_vm11, %v12573_v26, %v12933_v55  ;;  %v1343_v9 = vsel %vm1298_vm3, %v12760_v2, %v12935_v14  ;;  %v12955_v26 = vld [vmem:[%s11408_s5 + $0xc8] sm:$0xff] }
 0x2a4   :  { %v12948_v24 = vsel %vm695_vm13, %v12708_v58, %v12937_v20  ;;  %v2899_v42 = vpack.c.bf16 %v823_v47, %v782_v45  ;;  %v2941_v21 = vpack.c.bf16 %v1343_v9, %v1302_v8 }
 0x2a6   :  { %3249 = vmatpush.bf16.msrb.mxu3 %v2899_v42  ;;  %3264 = vmatpush.bf16.msrb.mxu1 %v2941_v21  ;;  %v13027_v21 = vld [vmem:[%s11408_s5 + $0x60] sm:$0xff] }
 0x2a7   :  { %670 = vst.msk [vmem:[#allocation2 + $0x58] sm:$0xff] %vm657_vm10, %v13027_v21 }
 0x2a8   :  { %1462 = vrot.lane.b32.xlu1 %v12642_v40, %s11337_s14  ;;  %735 = vrot.lane.b32.xlu0 %v12563_v32, %s11342_s19 }
 0x2a9   :  { %1503 = vrot.lane.b32.xlu2 %v12639_v54, %s11335_s12 }
 0x2aa   :  { %v1090_v58 = vpop.permute.xlu1 %1089  ;;  %v1049_v2 = vpop.permute.xlu0 %1048 }
 0x2ab   :  { %v1008_v29 = vpop.permute.xlu2 %1007  ;;  %v12961_v8 = vsel %vm861_vm12, %v12589_v15, %v1090_v58  ;;  %1107 = vst.msk [vmem:[#allocation2 + $0x298] sm:$0xff] %vm657_vm10, %v1090_v58  ;;  %v12971_v47 = vsel %vm778_vm11, %v12494_v11, %v1049_v2  ;;  %v649_v15 = vld [vmem:[%s11408_s5 + $0x18] sm:$0xff] }
 0x2ac   :  { %v12966_v56 = vsel %vm778_vm11, %v12732_v50, %v1008_v29  ;;  %1025 = vst.msk [vmem:[#allocation2 + $0x238] sm:$0xff] %vm657_vm10, %v1008_v29  ;;  %v662_v50 = vld [vmem:[%s11408_s5 + $0x50] sm:$0xff] }
 0x2ad   :  { %1066 = vst.msk [vmem:[#allocation2 + $0x268] sm:$0xff] %vm657_vm10, %v1049_v2 }
 0x2b0   :  { %2523 = vrot.lane.b32.xlu1 %v12974_v35, %s11331_s8  ;;  %2476 = vrot.lane.b32.xlu0 %v12977_v23, %s11331_s8  ;;  %s11349_s8 = smov 5  }
 0x2b1   :  { %2122 = vrot.lane.b32.xlu2 %v12642_v40, %s11329_s6 }
 0x2b2   :  { %v2078_v11 = vpop.permute.xlu1 %2077  ;;  %v12988_v16 = vpop.permute.xlu0 %2038 }
 0x2b3   :  { %v12990_v52 = vpop.permute.xlu2 %1953  ;;  %v2085_v7 = vsel %vm1793_vm1, %v15389_v27, %v2078_v11  ;;  %v2086_v43 = vsel %vm1793_vm1, %v2078_v11, %v12921_v46  ;;  %v2045_v30 = vsel %vm1710_vm0, %v2037_v34, %v12988_v16 }
 0x2b4   :  { %v13001_v1 = vsel %vm15383_vm5, %v15390_v18, %v12990_v52  ;;  %v2994_v60 = vpack.c.bf16 %v2085_v7, %v2044_v37  ;;  %v2995_v38 = vpack.c.bf16 %v2086_v43, %v2045_v30  ;;  %v2887_v7 = vpack.c.bf16 %v662_v50, %v649_v15  ;;  %v896_v43 = vld [vmem:[%s11408_s5 + $0xd0] sm:$0xff]  ;;  %v15391_v50 = vld [vmem:[#allocation27_spill] sm:$0xff]  ;;  %v15392_v30 = vld [vmem:[#allocation21_spill] sm:$0xff] }
 0x2b5   :  { %902 = vst.msk [vmem:[#allocation2 + $0x1a8] sm:$0xff] %vm657_vm10, %v896_v43  ;;  %v15398_v43 = vld [vmem:[#allocation29_spill] sm:$0xff]  ;;  %vm15406_vm5 = vcmask 867328  }
 0x2b6   :  { %3221 = vmatpush.bf16.msra.mxu0 %v2994_v60  ;;  %3277 = vmatpush.bf16.msrb.mxu2 %v2995_v38 }
 0x2b8   :  { %2567 = vrot.lane.b32.xlu1 %v12530_v31, %s11343_s20  ;;  %2163 = vrot.lane.b32.xlu0 %v12639_v54, %s11338_s15 }
 0x2b9   :  { %1379 = vrot.lane.b32.xlu2 %v12530_v31, %s11333_s10 }
 0x2ba   :  { %v13014_v34 = vpop.permute.xlu1 %1253  ;;  %v13016_v37 = vpop.permute.xlu0 %1211 }
 0x2bb   :  { %v13018_v22 = vpop.permute.xlu2 %1997  ;;  %v1260_v45 = vsel %vm1215_vm6, %v12838_v6, %v13014_v34  ;;  %v1219_v9 = vsel %vm1215_vm6, %v12815_v49, %v13016_v37 }
 0x2bc   :  { %v2935_v42 = vpack.c.bf16 %v1260_v45, %v1219_v9 }
 0x2be   :  { %3265 = vmatpush.bf16.msrb.mxu1 %v2935_v42 }
 0x2c0   :  { %2383 = vrot.lane.b32.xlu1 %v12977_v23, %s11334_s11  ;;  %1421 = vrot.lane.b32.xlu0 %v12639_v54, %s11337_s14 }
 0x2c1   :  { %2430 = vrot.lane.b32.xlu2 %v12974_v35, %s11334_s11  ;;  %3266 = vmatmul.bf16.vlgmr.msrb.gmra.mxu1 %v12540_v61 }
 0x2c2   :  { %v967_v49 = vpop.permute.xlu1 %966  ;;  %v13038_v6 = vpop.permute.xlu0 %733 }
 0x2c3   :  { %v926_v58 = vpop.permute.xlu2 %925  ;;  %v972_v2 = vsel %vm695_vm13, %v12623_v53, %v967_v49  ;;  %984 = vst.msk [vmem:[#allocation2 + $0x208] sm:$0xff] %vm657_vm10, %v967_v49  ;;  %v740_v29 = vsel %vm695_vm13, %v12706_v28, %v13038_v6  ;;  %v2930_v53 = vpack.c.bf16 %v12911_v13, %v12821_v44  ;;  %v2924_v44 = vpack.c.bf16 %v12961_v8, %v12971_v47  ;;  %v15393_v47 = vld [vmem:[#allocation19_spill] sm:$0xff] }
 0x2c4   :  { %v931_v11 = vsel %vm695_vm13, %v12734_v33, %v926_v58  ;;  %943 = vst.msk [vmem:[#allocation2 + $0x1d8] sm:$0xff] %vm657_vm10, %v926_v58  ;;  %v2893_v27 = vpack.c.bf16 %v740_v29, %v12948_v24  ;;  %v884_v29 = vld [vmem:[%s11408_s5 + $0x98] sm:$0xff] }
 0x2c5   :  { %890 = vst.msk [vmem:[#allocation2 + $0x178] sm:$0xff] %vm657_vm10, %v884_v29 }
 0x2c6   :  { %3250 = vmatpush.bf16.msrb.mxu3 %v2893_v27 }
 0x2c8   :  { %2081 = vrot.lane.b32.xlu1 %v12639_v54, %s11329_s6  ;;  %2040 = vrot.lane.b32.xlu0 %v12642_v40, %s11330_s7  ;;  %s13778_s6 = sld [smem:[%s15267_s0 + %s11347_s3]]   ;;  %s11365_s3 = smov 14  }
 0x2c9   :  { %1296 = vrot.lane.b32.xlu2 %v12530_v31, %s11332_s9 }
 0x2ca   :  { %v1834_v28 = vpop.permute.xlu1 %1833  ;;  %v1792_v33 = vpop.permute.xlu0 %1791  ;;  %3251 = vmatpush.bf16.msrb.mxu3 %v2887_v7  ;;  %v15397_v7 = vld [vmem:[#allocation28_spill] sm:$0xff] }
 0x2cb   :  { %v1871_v24 = vpop.permute.xlu2 %1870  ;;  %v13062_v15 = vsel %vm1793_vm1, %v12347_v48, %v1834_v28  ;;  %1851 = vst.msk [vmem:[#allocation2 + $0x5f8] sm:$0xff] %vm657_vm10, %v1834_v28  ;;  %v13067_v40 = vsel %vm1793_vm1, %v15391_v50, %v1792_v33  ;;  %v2918_v48 = vpack.c.bf16 %v12966_v56, %v972_v2  ;;  %v2912_v56 = vpack.c.bf16 %v931_v11, %v12955_v26  ;;  %v15395_v26 = vld [vmem:[#allocation33_spill] sm:$0xff] }
 0x2cc   :  { %v1879_v31 = vsel %vm1876_vm9, %v15392_v30, %v1871_v24  ;;  %1810 = vst.msk [vmem:[#allocation2 + $0x5c8] sm:$0xff] %vm657_vm10, %v1792_v33  ;;  %v15399_v50 = vld [vmem:[#allocation25_spill] sm:$0xff] }
 0x2cd   :  { %3252 = vmatmul.bf16.vlgmr.msrb.gmra.mxu3 %v12636_v5 }
 0x2ce   :  { %3300 = vmatpush.bf16.msra.mxu3 %v2930_v53 }
 0x2d0   :  { %2290 = vrot.lane.b32.xlu1 %v12977_v23, %s11336_s13  ;;  %1338 = vrot.lane.b32.xlu0 %v12563_v32, %s11332_s9 }
 0x2d1   :  { %2337 = vrot.lane.b32.xlu2 %v12974_v35, %s11336_s13  ;;  %s11358_s13 = smov 11  }
 0x2d2   :  { %3301 = vmatpush.bf16.msra.mxu3 %v2924_v44  ;;  %v1996_v13 = vpop.permute.xlu1 %1995  ;;  %v13082_v18 = vpop.permute.xlu0 %1955 }
 0x2d3   :  { %v13084_v8 = vpop.permute.xlu2 %1914  ;;  %v2003_v60 = vsel %vm1710_vm0, %v15393_v47, %v1996_v13  ;;  %v2004_v38 = vsel %vm1710_vm0, %v1996_v13, %v13018_v22  ;;  %v1963_v32 = vsel %vm15394_vm15, %v12990_v52, %v13082_v18  ;;  %v2978_v47 = vpack.c.bf16 %v13062_v15, %v13067_v40  ;;  %v15402_v15 = vld [vmem:[#allocation5_spill] sm:$0xff] }
 0x2d4   :  { %v2988_v35 = vpack.c.bf16 %v2003_v60, %v13001_v1  ;;  %v2989_v45 = vpack.c.bf16 %v2004_v38, %v1963_v32  ;;  %v15400_v60 = vld [vmem:[#allocation23_spill] sm:$0xff]  ;;  %vm15408_vm15 = vcmask 64512  }
 0x2d6   :  { %3302 = vmatpush.bf16.msra.mxu3 %v2918_v48  ;;  %3222 = vmatpush.bf16.msra.mxu0 %v2988_v35 }
 0x2d7   :  { %3278 = vmatpush.bf16.msrb.mxu2 %v2989_v45  ;;  %v15403_v45 = vld [vmem:[#allocation4_spill] sm:$0xff] }
 0x2d8   :  { %1999 = vrot.lane.b32.xlu1 %v12639_v54, %s11330_s7  ;;  %1957 = vrot.lane.b32.xlu0 %v13004_v59, %s11339_s16  ;;  %v15396_v54 = vld [vmem:[#allocation31_spill] sm:$0xff]  ;;  %s11350_s16 = smov 92  }
 0x2d9   :  { %1213 = vrot.lane.b32.xlu2 %v13004_v59, %s11335_s12 }
 0x2da   :  { %3303 = vmatpush.bf16.msra.mxu3 %v2912_v56  ;;  %v13101_v52 = vpop.permute.xlu1 %2521  ;;  %v13103_v9 = vpop.permute.xlu0 %2474 }
 0x2db   :  { %v860_v1 = vpop.permute.xlu2 %859  ;;  %v2529_v42 = vsel %vm2478_vm2, %v15395_v26, %v13101_v52  ;;  %v2483_v58 = vsel %vm2478_vm2, %v15396_v54, %v13103_v9 }
 0x2dc   :  { %v866_v49 = vsel %vm861_vm12, %v12879_v4, %v860_v1  ;;  %878 = vst.msk [vmem:[#allocation2 + $0x148] sm:$0xff] %vm657_vm10, %v860_v1  ;;  %vm15404_vm12 = vcmask 1043456  }
 0x2dd   :  { %v2906_v2 = vpack.c.bf16 %v12671_v17, %v866_v49  ;;  %v3026_v49 = vpack.c.bf16 %v2529_v42, %v2483_v58 }
 0x2df   :  { %3304 = vmatpush.bf16.msra.mxu3 %v2906_v2 }
 0x2e0   :  { %1874 = vrot.lane.b32.xlu1 %v13004_v59, %s11338_s15  ;;  %1255 = vrot.lane.b32.xlu0 %v13027_v21, %s11335_s12 }
 0x2e1   :  { %1916 = vrot.lane.b32.xlu2 %v13027_v21, %s11338_s15  ;;  %s13798_s15 = sld [smem:[%s15267_s0 + %s11349_s8]]   ;;  %s11366_s8 = smov 8  }
 0x2e2   :  { %v1751_v4 = vpop.permute.xlu1 %1750  ;;  %v1709_v11 = vpop.permute.xlu0 %1708 }
 0x2e3   :  { %v13123_v27 = vpop.permute.xlu2 %2288  ;;  %v1756_v17 = vsel %vm1710_vm0, %v15397_v7, %v1751_v4  ;;  %1768 = vst.msk [vmem:[#allocation2 + $0x598] sm:$0xff] %vm657_vm10, %v1751_v4  ;;  %v1715_v59 = vsel %vm1710_vm0, %v15398_v43, %v1709_v11  ;;  %v15405_v4 = vld [vmem:[#allocation30_spill] sm:$0xff]  ;;  %v15407_v7 = vld [vmem:[#allocation32_spill] sm:$0xff] }
 0x2e4   :  { %v2297_v53 = vsel %vm2292_vm7, %v12775_v63, %v13123_v27  ;;  %1727 = vst.msk [vmem:[#allocation2 + $0x568] sm:$0xff] %vm657_vm10, %v1709_v11  ;;  %v2972_v38 = vpack.c.bf16 %v1756_v17, %v1715_v59 }
 0x2e8   :  { %2569 = vrot.lane.b32.xlu0 %v12977_v23, %s11343_s20  ;;  %s11352_s20 = smov 91  }
 0x2ea   :  { %v1913_v21 = vpop.permute.xlu1 %1912  ;;  %v13136_v28 = vpop.permute.xlu0 %1872 }
 0x2eb   :  { %v819_v33 = vpop.permute.xlu2 %818  ;;  %v1920_v30 = vsel %vm1876_vm9, %v15399_v50, %v1913_v21  ;;  %v1921_v44 = vsel %vm1876_vm9, %v1913_v21, %v13084_v8  ;;  %v1880_v48 = vsel %vm1876_vm9, %v1871_v24, %v13136_v28 }
 0x2ec   :  { %v824_v63 = vsel %vm778_vm11, %v12883_v12, %v819_v33  ;;  %836 = vst.msk [vmem:[#allocation2 + $0x118] sm:$0xff] %vm657_vm10, %v819_v33  ;;  %v2982_v13 = vpack.c.bf16 %v1920_v30, %v1879_v31  ;;  %v2983_v23 = vpack.c.bf16 %v1921_v44, %v1880_v48  ;;  %v15401_v31 = vld [vmem:[#allocation34_spill] sm:$0xff] }
 0x2ee   :  { %3223 = vmatpush.bf16.msra.mxu0 %v2982_v13  ;;  %3279 = vmatpush.bf16.msrb.mxu2 %v2983_v23  ;;  %v650_v13 = vld [vmem:[%s11408_s5 + $0x20] sm:$0xff]  ;;  %v663_v23 = vld [vmem:[%s11408_s5 + $0x58] sm:$0xff]  ;;  %s11357_s5 = smov 13  }
 0x2ef   :  { %s8614_s11 = sld [smem:[%s15267_s0 + %s11357_s5]]   ;;  %s11371_s5 = smov 22  }
 0x2f1   :  { %3224 = vmatmul.bf16.vlgmr.msra.gmra.mxu0 %v15400_v60  ;;  %3280 = vmatmul.bf16.vlgmr.msrb.gmra.mxu2 %v15400_v60 }
 0x2f2   :  { %3314 = vmatpush.bf16.msrb.mxu0 %v2978_v47  ;;  %v13151_v32 = vpop.permute.xlu1 %2428  ;;  %v13153_v24 = vpop.permute.xlu0 %2381 }
 0x2f3   :  { %v13155_v12 = vpop.permute.xlu2 %2565  ;;  %v2436_v35 = vsel %vm2385_vm4, %v15401_v31, %v13151_v32  ;;  %v2390_v40 = vsel %vm2385_vm4, %v15402_v15, %v13153_v24  ;;  %v15409_v31 = vld [vmem:[#allocation35_spill] sm:$0xff] }
 0x2f4   :  { %v2575_v56 = vsel %vm2571_vm14, %v15403_v45, %v13155_v12  ;;  %v3020_v43 = vpack.c.bf16 %v2436_v35, %v2390_v40 }
 0x2f5   :  { %v3031_v1 = vpack.c.bf16 %v2575_v56, %v2575_v56 }
 0x2f6   :  { %3315 = vmatpush.bf16.msrb.mxu0 %v2972_v38 }
 0x2f7   :  { %v3068_v26 = vsel %vm15404_vm12, %v3031_v1, 0  ;;  %vm15411_vm12 = vcmask 711680  }
 0x2f8   :  { %3293 = vmatpush.bf16.msra.mxu1 %v3068_v26 }
 0x2fa   :  { %v1668_v54 = vpop.permute.xlu1 %1667  ;;  %v1627_v2 = vpop.permute.xlu0 %1626 }
 0x2fb   :  { %v694_v29 = vpop.permute.xlu2 %693  ;;  %v1673_v11 = vsel %vm15406_vm5, %v15405_v4, %v1668_v54  ;;  %1685 = vst.msk [vmem:[#allocation2 + $0x538] sm:$0xff] %vm657_vm10, %v1668_v54  ;;  %v1632_v17 = vsel %vm1298_vm3, %v15407_v7, %v1627_v2  ;;  %8665 = vmatmul.msk.bf16.vlgmr.msra.gmra.mxu1 %vm15408_vm15, %v12222_v36  ;;  %v2775_v7 = vld [vmem:[#allocation2 + $0x5c8] sm:$0xff] }
 0x2fc   :  { %3328 = vmatpush.bf16.msrb.mxu1 %v3026_v49  ;;  %v700_v42 = vsel %vm695_vm13, %v12937_v20, %v694_v29  ;;  %712 = vst.msk [vmem:[#allocation2 + $0x88] sm:$0xff] %vm657_vm10, %v694_v29  ;;  %v2966_v58 = vpack.c.bf16 %v1673_v11, %v1632_v17  ;;  %v2888_v11 = vpack.c.bf16 %v663_v23, %v650_v13  ;;  %v2781_v17 = vld [vmem:[#allocation2 + $0x5f8] sm:$0xff] }
 0x2fd   :  { %1644 = vst.msk [vmem:[#allocation2 + $0x508] sm:$0xff] %vm657_vm10, %v1627_v2 }
 0x2fe   :  { %3316 = vmatpush.bf16.msrb.mxu0 %v2966_v58 }
 0x300   :  { %3329 = vmatpush.bf16.msrb.mxu1 %v3020_v43 }
 0x302   :  { %v777_v59 = vpop.permute.xlu1 %776  ;;  %v13178_v21 = vpop.permute.xlu0 %2335 }
 0x303   :  { %v1504_v33 = vpop.permute.xlu2 %1503  ;;  %v783_v50 = vsel %vm778_vm11, %v12933_v55, %v777_v59  ;;  %795 = vst.msk [vmem:[#allocation2 + $0xe8] sm:$0xff] %vm657_vm10, %v777_v59  ;;  %v2343_v20 = vsel %vm2292_vm7, %v12712_v0, %v13178_v21  ;;  %v15410_v0 = vld [vmem:[#allocation24_spill] sm:$0xff]  ;;  %v2763_v59 = vld [vmem:[#allocation2 + $0x568] sm:$0xff] }
 0x304   :  { %v1509_v30 = vsel %vm1215_vm6, %v12792_v19, %v1504_v33  ;;  %1521 = vst.msk [vmem:[#allocation2 + $0x478] sm:$0xff] %vm657_vm10, %v1504_v33  ;;  %v2900_v44 = vpack.c.bf16 %v824_v63, %v783_v50  ;;  %v3014_v48 = vpack.c.bf16 %v2343_v20, %v2297_v53 }
 0x306   :  { %3305 = vmatpush.bf16.msra.mxu3 %v2900_v44  ;;  %3330 = vmatpush.bf16.msrb.mxu1 %v3014_v48  ;;  %v2757_v44 = vld [vmem:[#allocation2 + $0x538] sm:$0xff] }
 0x30a   :  { %v1586_v47 = vpop.permute.xlu1 %1585  ;;  %v1545_v38 = vpop.permute.xlu0 %1544 }
 0x30b   :  { %v2123_v55 = vpop.permute.xlu2 %2122  ;;  %v1591_v35 = vsel %vm1298_vm3, %v15409_v31, %v1586_v47  ;;  %1603 = vst.msk [vmem:[#allocation2 + $0x4d8] sm:$0xff] %vm657_vm10, %v1586_v47  ;;  %v1550_v15 = vsel %vm1215_vm6, %v15410_v0, %v1545_v38  ;;  %v2685_v31 = vld [vmem:[#allocation2 + $0x2f8] sm:$0xff] }
 0x30c   :  { %v13198_v19 = vsel %vm1793_vm1, %v12840_v57, %v2123_v55  ;;  %2140 = vst.msk [vmem:[#allocation2 + $0x748] sm:$0xff] %vm657_vm10, %v2123_v55  ;;  %v2960_v53 = vpack.c.bf16 %v1591_v35, %v1550_v15  ;;  %v2679_v55 = vld [vmem:[#allocation2 + $0x2c8] sm:$0xff] }
 0x30d   :  { %1562 = vst.msk [vmem:[#allocation2 + $0x4a8] sm:$0xff] %vm657_vm10, %v1545_v38 }
 0x30e   :  { %3317 = vmatpush.bf16.msrb.mxu0 %v2960_v53 }
 0x312   :  { %v2246_v63 = vpop.permute.xlu1 %2245  ;;  %v2205_v40 = vpop.permute.xlu0 %2204  ;;  %v2745_v23 = vld [vmem:[#allocation2 + $0x4d8] sm:$0xff] }
 0x313   :  { %v1380_v45 = vpop.permute.xlu2 %1379  ;;  %v2251_v56 = vsel %vm15411_vm12, %v12859_v3, %v2246_v63  ;;  %2263 = vst.msk [vmem:[#allocation2 + $0x7d8] sm:$0xff] %vm657_vm10, %v2246_v63  ;;  %v2210_v1 = vsel %vm1876_vm9, %v12777_v25, %v2205_v40  ;;  %v2931_v63 = vpack.c.bf16 %v2685_v31, %v2679_v55  ;;  %v2607_v55 = vld [vmem:[#allocation2 + $0x88] sm:$0xff] }
 0x314   :  { %v13209_v57 = vsel %vm15406_vm5, %v12796_v51, %v1380_v45  ;;  %1398 = vst.msk [vmem:[#allocation2 + $0x3e8] sm:$0xff] %vm657_vm10, %v1380_v45  ;;  %v3008_v26 = vpack.c.bf16 %v2251_v56, %v2210_v1  ;;  %v2739_v13 = vld [vmem:[#allocation2 + $0x4a8] sm:$0xff]  ;;  %v2673_v56 = vld [vmem:[#allocation2 + $0x298] sm:$0xff]  ;;  %v13247_v1 = vpop.f32.mrf.mxu1 }
 0x315   :  { %2222 = vst.msk [vmem:[#allocation2 + $0x7a8] sm:$0xff] %vm657_vm10, %v2205_v40  ;;  %v2961_v53 = vpack.c.bf16 %v2745_v23, %v2739_v13  ;;  %v2667_v45 = vld [vmem:[#allocation2 + $0x268] sm:$0xff]  ;;  %v2625_v13 = vld [vmem:[#allocation2 + $0x118] sm:$0xff] }
 0x316   :  { %3331 = vmatpush.bf16.msrb.mxu1 %v3008_v26 }
 0x31a   :  { %v1463_v49 = vpop.permute.xlu1 %1462  ;;  %v736_v54 = vpop.permute.xlu0 %735 }
 0x31b   :  { %v2431_v2 = vpop.permute.xlu2 %2430  ;;  %v1468_v3 = vsel %vm1132_vm8, %v12794_v62, %v1463_v49  ;;  %1480 = vst.msk [vmem:[#allocation2 + $0x448] sm:$0xff] %vm657_vm10, %v1463_v49  ;;  %v741_v25 = vsel %vm695_vm13, %v13038_v6, %v736_v54  ;;  %v2979_v62 = vpack.c.bf16 %v2781_v17, %v2775_v7  ;;  %v2769_v6 = vld [vmem:[#allocation2 + $0x598] sm:$0xff]  ;;  %v2925_v49 = vpack.c.bf16 %v2673_v56, %v2667_v45  ;;  %v2715_v7 = vld [vmem:[#allocation2 + $0x3e8] sm:$0xff] }
 0x31c   :  { %v2437_v51 = vsel %vm2385_vm4, %v13151_v32, %v2431_v2  ;;  %v2894_v29 = vpack.c.bf16 %v741_v25, %v700_v42  ;;  %v2954_v4 = vpack.c.bf16 %v1509_v30, %v1468_v3  ;;  %753 = vst.msk [vmem:[#allocation2 + $0xb8] sm:$0xff] %vm657_vm10, %v736_v54  ;;  %v2973_v20 = vpack.c.bf16 %v2769_v6, %v2763_v59  ;;  %v2751_v30 = vld [vmem:[#allocation2 + $0x508] sm:$0xff]  ;;  %v13263_v17 = vpop.f32.mrf.mxu1 }
 0x31d   :  { %2449 = vst.msk [vmem:[#allocation2 + $0x898] sm:$0xff] %vm657_vm10, %v2437_v51  ;;  %v2655_v25 = vld [vmem:[#allocation2 + $0x208] sm:$0xff]  ;;  %v2661_v51 = vld [vmem:[#allocation2 + $0x238] sm:$0xff] }
 0x31e   :  { %3306 = vmatpush.bf16.msra.mxu3 %v2894_v29  ;;  %3318 = vmatpush.bf16.msrb.mxu0 %v2954_v4 }
 0x322   :  { %v2524_v43 = vpop.permute.xlu1 %2523  ;;  %v2477_v58 = vpop.permute.xlu0 %2476  ;;  %3307 = vmatpush.bf16.msra.mxu3 %v2888_v11  ;;  %v2727_v40 = vld [vmem:[#allocation2 + $0x448] sm:$0xff] }
 0x323   :  { %v1297_v33 = vpop.permute.xlu2 %1296  ;;  %v2530_v32 = vsel %vm2478_vm2, %v13101_v52, %v2524_v43  ;;  %v2484_v50 = vsel %vm2478_vm2, %v13103_v9, %v2477_v58  ;;  %v2967_v52 = vpack.c.bf16 %v2757_v44, %v2751_v30  ;;  %vm15412_vm2 = vcmask 1043456   ;;  %v2643_v11 = vld [vmem:[#allocation2 + $0x1a8] sm:$0xff]  ;;  %v2613_v31 = vld [vmem:[#allocation2 + $0xb8] sm:$0xff] }
 0x324   :  { %v13226_v42 = vsel %vm1298_vm3, %v12861_v10, %v1297_v33  ;;  %1315 = vst.msk [vmem:[#allocation2 + $0x388] sm:$0xff] %vm657_vm10, %v1297_v33 }
 0x325   :  { %3308 = vmatmul.bf16.vlgmr.msra.gmra.mxu3 %v12636_v5  ;;  %2542 = vst.msk [vmem:[#allocation2 + $0x8f8] sm:$0xff] %vm657_vm10, %v2530_v32  ;;  %v2631_v32 = vld [vmem:[#allocation2 + $0x148] sm:$0xff] }
 0x326   :  { %3370 = vmatpush.bf16.msrb.mxu3 %v2979_v62  ;;  %2496 = vst.msk [vmem:[#allocation2 + $0x8c8] sm:$0xff] %vm657_vm10, %v2484_v50  ;;  %v2637_v50 = vld [vmem:[#allocation2 + $0x178] sm:$0xff] }
 0x32a   :  { %3371 = vmatpush.bf16.msrb.mxu3 %v2973_v20  ;;  %v13234_v48 = vpop.permute.xlu1 %2567  ;;  %v2164_v10 = vpop.permute.xlu0 %2163 }
 0x32b   :  { %v2338_v47 = vpop.permute.xlu2 %2337  ;;  %v2576_v9 = vsel %vm2571_vm14, %v13155_v12, %v13234_v48  ;;  %v2169_v38 = vsel %vm1876_vm9, %v12919_v39, %v2164_v10  ;;  %2181 = vst.msk [vmem:[#allocation2 + $0x778] sm:$0xff] %vm657_vm10, %v2164_v10  ;;  %v2733_v39 = vld [vmem:[#allocation2 + $0x478] sm:$0xff]  ;;  %v13270_v20 = vpop.f32.mrf.mxu3  ;;  %v2619_v10 = vld [vmem:[#allocation2 + $0xe8] sm:$0xff] }
 0x32c   :  { %v2344_v35 = vsel %vm2292_vm7, %v13178_v21, %v2338_v47  ;;  %v3002_v0 = vpack.c.bf16 %v2169_v38, %v13198_v19  ;;  %v3032_v15 = vpack.c.bf16 %v2576_v9, %v2576_v9  ;;  %v2955_v21 = vpack.c.bf16 %v2733_v39, %v2727_v40  ;;  %v2703_v45 = vld [vmem:[#allocation2 + $0x388] sm:$0xff] }
 0x32d   :  { %2356 = vst.msk [vmem:[#allocation2 + $0x838] sm:$0xff] %vm657_vm10, %v2344_v35  ;;  %v2901_v47 = vpack.c.bf16 %v2625_v13, %v2619_v10  ;;  %v13292_v35 = vpop.f32.mrf.mxu1  ;;  %v10575_v13 = vld [vmem:[%s13285_s28 + $0x16c] sm:$0xf0] }
 0x32e   :  { %3372 = vmatpush.bf16.msrb.mxu3 %v2967_v52  ;;  %3332 = vmatpush.bf16.msrb.mxu1 %v3002_v0  ;;  %v3071_v12 = vsel %vm15412_vm2, %v3032_v15, 0  ;;  %v13279_v52 = vpop.f32.mrf.mxu0 }
 0x32f   :  { %3349 = vmatpush.bf16.msra.mxu2 %v3071_v12  ;;  %v2895_v12 = vpack.c.bf16 %v2613_v31, %v2607_v55 }
 0x332   :  { %3373 = vmatpush.bf16.msrb.mxu3 %v2961_v53  ;;  %v2384_v26 = vpop.permute.xlu1 %2383  ;;  %v1422_v19 = vpop.permute.xlu0 %1421  ;;  %8666 = vmatmul.msk.bf16.vlgmr.msra.gmra.mxu2 %vm15408_vm15, %v12222_v36  ;;  %v2595_v53 = vld [vmem:[#allocation2 + $0x28] sm:$0xff] }
 0x333   :  { %3356 = vmatpush.bf16.msrb.mxu2 %v2931_v63  ;;  %v1214_v54 = vpop.permute.xlu2 %1213  ;;  %v2391_v2 = vsel %vm2385_vm4, %v13153_v24, %v2384_v26  ;;  %v1427_v3 = vsel %vm1132_vm8, %v12881_v41, %v1422_v19  ;;  %1439 = vst.msk [vmem:[#allocation2 + $0x418] sm:$0xff] %vm657_vm10, %v1422_v19  ;;  %v2919_v24 = vpack.c.bf16 %v2661_v51, %v2655_v25  ;;  %v2649_v41 = vld [vmem:[#allocation2 + $0x1d8] sm:$0xff]  ;;  %v13296_v15 = vpop.f32.mrf.mxu3  ;;  %v10591_v63 = vld [vmem:[%s13285_s28 + $0x1ec] sm:$0xf0]  ;;  %vm15414_vm4 = vmmov %vm15412_vm2 }
 0x334   :  { %v13258_v29 = vsel %vm1215_vm6, %v13016_v37, %v1214_v54  ;;  %1232 = vst.msk [vmem:[#allocation2 + $0x328] sm:$0xff] %vm657_vm10, %v1214_v54  ;;  %v2948_v4 = vpack.c.bf16 %v1427_v3, %v13209_v57  ;;  %v2913_v37 = vpack.c.bf16 %v2649_v41, %v2643_v11  ;;  %v10587_v54 = vld [vmem:[%s13285_s28 + $0x1cc] sm:$0xf0]  ;;  %v8878_v11 = vld [vmem:[%s13285_s28 + $0x1a0] sm:$0xf] }
 0x335   :  { %2403 = vst.msk [vmem:[#allocation2 + $0x868] sm:$0xff] %vm657_vm10, %v2391_v2 }
 0x336   :  { %3374 = vmatpush.bf16.msrb.mxu3 %v2955_v21  ;;  %3319 = vmatpush.bf16.msrb.mxu0 %v2948_v4  ;;  %v13302_v39 = vpop.f32.mrf.mxu0  ;;  %v13311_v4 = vpop.f32.mrf.mxu1 }
 0x337   :  { %3357 = vmatpush.bf16.msrb.mxu2 %v2925_v49  ;;  %v8894_v49 = vld [vmem:[%s13285_s28 + $0x1c0] sm:$0xf] }
 0x33a   :  { %v2082_v62 = vpop.permute.xlu1 %2081  ;;  %v2041_v43 = vpop.permute.xlu0 %2040  ;;  %v2721_v58 = vld [vmem:[#allocation2 + $0x418] sm:$0xff] }
 0x33b   :  { %3358 = vmatpush.bf16.msrb.mxu2 %v2919_v24  ;;  %v1917_v59 = vpop.permute.xlu2 %1916  ;;  %v2087_v6 = vsel %vm1793_vm1, %v12921_v46, %v2082_v62  ;;  %2099 = vst.msk [vmem:[#allocation2 + $0x718] sm:$0xff] %vm657_vm10, %v2082_v62  ;;  %v2046_v57 = vsel %vm1710_vm0, %v12988_v16, %v2041_v43  ;;  %v2949_v33 = vpack.c.bf16 %v2721_v58, %v2715_v7  ;;  %v13277_v46 = vpop.f32.mrf.mxu2  ;;  %vm15413_vm1 = vmmov %vm15411_vm12 }
 0x33c   :  { %v13274_v30 = vsel %vm1876_vm9, %v13084_v8, %v1917_v59  ;;  %1934 = vst.msk [vmem:[#allocation2 + $0x658] sm:$0xff] %vm657_vm10, %v1917_v59  ;;  %v2996_v44 = vpack.c.bf16 %v2087_v6, %v2046_v57  ;;  %v2907_v16 = vpack.c.bf16 %v2637_v50, %v2631_v32  ;;  %v8895_v24 = vor.u32 %v10587_v54, %v8894_v49  ;;  %v3141_v41 = vpop.f32.mrf.mxu3  ;;  %v2877_v59 = vld [vmem:[#allocation2 + $0x8f8] sm:$0xff]  ;;  %v9022_v49 = vld [vmem:[%s13285_s28 + $0x2c0] sm:$0xf]  ;;  %v10619_v54 = vld [vmem:[%s13285_s28 + $0x2cc] sm:$0xf0] }
 0x33d   :  { %3375 = vmatpush.bf16.msrb.mxu3 %v2949_v33  ;;  %2058 = vst.msk [vmem:[#allocation2 + $0x6e8] sm:$0xff] %vm657_vm10, %v2041_v43  ;;  %v10579_v33 = vld [vmem:[%s13285_s28 + $0x18c] sm:$0xf0] }
 0x33e   :  { %3333 = vmatpush.bf16.msrb.mxu1 %v2996_v44  ;;  %v13329_v10 = vpop.f32.mrf.mxu1 }
 0x33f   :  { %3359 = vmatpush.bf16.msrb.mxu2 %v2913_v37  ;;  %v2871_v37 = vld [vmem:[#allocation2 + $0x8c8] sm:$0xff] }
 0x340   :  { %v3027_v44 = vpack.c.bf16 %v2877_v59, %v2871_v37  ;;  %v9006_v37 = vld [vmem:[%s13285_s28 + $0x2a0] sm:$0xf]  ;;  %v10615_v59 = vld [vmem:[%s13285_s28 + $0x2ac] sm:$0xf0] }
 0x342   :  { %v2291_v8 = vpop.permute.xlu1 %2290  ;;  %v1339_v23 = vpop.permute.xlu0 %1338 }
 0x343   :  { %3360 = vmatpush.bf16.msrb.mxu2 %v2907_v16  ;;  %v2298_v9 = vsel %vm2292_vm7, %v13123_v27, %v2291_v8  ;;  %v1344_v38 = vsel %vm1298_vm3, %v12935_v14, %v1339_v23  ;;  %1356 = vst.msk [vmem:[#allocation2 + $0x3b8] sm:$0xff] %vm657_vm10, %v1339_v23  ;;  %v2601_v27 = vld [vmem:[#allocation2 + $0x58] sm:$0xff]  ;;  %v8910_v14 = vld [vmem:[%s13285_s28 + $0x1e0] sm:$0xf]  ;;  %v13300_v40 = vpop.f32.mrf.mxu2  ;;  %vm15415_vm7 = vmmov %vm15408_vm15 }
 0x344   :  { %2310 = vst.msk [vmem:[#allocation2 + $0x808] sm:$0xff] %vm657_vm10, %v2298_v9  ;;  %v2942_v0 = vpack.c.bf16 %v1344_v38, %v13226_v42  ;;  %v2889_v56 = vpack.c.bf16 %v2601_v27, %v2595_v53  ;;  %v8911_v21 = vor.u32 %v10591_v63, %v8910_v14  ;;  %v3143_v8 = vpop.f32.mrf.mxu3  ;;  %v10623_v9 = vld [vmem:[%s13285_s28 + $0x2ec] sm:$0xf0]  ;;  %v8830_v53 = vld [vmem:[%s13285_s28 + $0x140] sm:$0xf] }
 0x345   :  { %v10571_v27 = vld [vmem:[%s13285_s28 + $0x14c] sm:$0xf0] }
 0x346   :  { %3320 = vmatpush.bf16.msrb.mxu0 %v2942_v0  ;;  %v2691_v0 = vld [vmem:[#allocation2 + $0x328] sm:$0xff] }
 0x347   :  { %3361 = vmatpush.bf16.msrb.mxu2 %v2901_v47  ;;  %v9038_v47 = vld [vmem:[%s13285_s28 + $0x2e0] sm:$0xf] }
 0x34a   :  { %v2000_v26 = vpop.permute.xlu1 %1999  ;;  %v1958_v42 = vpop.permute.xlu0 %1957  ;;  %v2709_v19 = vld [vmem:[#allocation2 + $0x3b8] sm:$0xff] }
 0x34b   :  { %3362 = vmatpush.bf16.msrb.mxu2 %v2895_v12  ;;  %v2005_v2 = vsel %vm1710_vm0, %v13018_v22, %v2000_v26  ;;  %2017 = vst.msk [vmem:[#allocation2 + $0x6b8] sm:$0xff] %vm657_vm10, %v2000_v26  ;;  %v1964_v3 = vsel %vm15413_vm1, %v13082_v18, %v1958_v42  ;;  %v2943_v25 = vpack.c.bf16 %v2709_v19, %v2703_v45  ;;  %v10583_v22 = vld [vmem:[%s13285_s28 + $0x1ac] sm:$0xf0]  ;;  %v13317_v7 = vpop.f32.mrf.mxu2  ;;  %v3155_v18 = vpop.f32.mrf.mxu0  ;;  %v2847_v38 = vld [vmem:[#allocation2 + $0x808] sm:$0xff]  ;;  %v2853_v12 = vld [vmem:[#allocation2 + $0x838] sm:$0xff]  ;;  %vm6246_vm1 = vcmask 900096  }
 0x34c   :  { %v2990_v51 = vpack.c.bf16 %v2005_v2, %v1964_v3  ;;  %1976 = vst.msk [vmem:[#allocation2 + $0x688] sm:$0xff] %vm657_vm10, %v1958_v42  ;;  %v8879_v62 = vor.u32 %v10583_v22, %v8878_v11  ;;  %v3015_v26 = vpack.c.bf16 %v2853_v12, %v2847_v38  ;;  %v2841_v42 = vld [vmem:[#allocation2 + $0x7d8] sm:$0xff]  ;;  %v2835_v2 = vld [vmem:[#allocation2 + $0x7a8] sm:$0xff]  ;;  %v8831_v3 = vor.u32 %v10571_v27, %v8830_v53  ;;  %v8782_v22 = vld [vmem:[%s13285_s28 + $0xe0] sm:$0xf] }
 0x34d   :  { %3376 = vmatpush.bf16.msrb.mxu3 %v2943_v25  ;;  %v8814_v25 = vld [vmem:[%s13285_s28 + $0x120] sm:$0xf]  ;;  %v10551_v53 = vld [vmem:[%s13285_s28 + $0xac] sm:$0xf0] }
 0x34e   :  { %3334 = vmatpush.bf16.msrb.mxu1 %v2990_v51  ;;  %v10567_v51 = vld [vmem:[%s13285_s28 + $0x12c] sm:$0xf0] }
 0x34f   :  { %3363 = vmatpush.bf16.msrb.mxu2 %v2889_v56  ;;  %v9039_v56 = vor.u32 %v10623_v9, %v9038_v47  ;;  %v2811_v47 = vld [vmem:[#allocation2 + $0x6e8] sm:$0xff] }
 0x352   :  { %3364 = vmatmul.bf16.vlgmr.msrb.gmra.mxu2 %v12636_v5  ;;  %v1875_v43 = vpop.permute.xlu1 %1874  ;;  %v1256_v58 = vpop.permute.xlu0 %1255  ;;  %v8862_v5 = vld [vmem:[%s13285_s28 + $0x180] sm:$0xf] }
 0x353   :  { %4358 = vmatpush.bf16.msra.mxu2 %v8911_v21  ;;  %v1881_v6 = vsel %vm1876_vm9, %v13136_v28, %v1875_v43  ;;  %1893 = vst.msk [vmem:[#allocation2 + $0x628] sm:$0xff] %vm657_vm10, %v1875_v43  ;;  %v1261_v57 = vsel %vm1215_vm6, %v13014_v34, %v1256_v58  ;;  %v2859_v28 = vld [vmem:[#allocation2 + $0x868] sm:$0xff]  ;;  %v8863_v16 = vor.u32 %v10579_v33, %v8862_v5  ;;  %v8846_v34 = vld [vmem:[%s13285_s28 + $0x160] sm:$0xf]  ;;  %v3185_v14 = vpop.f32.mrf.mxu2  ;;  %v3157_v63 = vpop.f32.mrf.mxu0  ;;  %vm4331_vm9 = vcmask 1040384  }
 0x354   :  { %v2936_v32 = vpack.c.bf16 %v1261_v57, %v13258_v29  ;;  %v2984_v50 = vpack.c.bf16 %v13274_v30, %v1881_v6  ;;  %1273 = vst.msk [vmem:[#allocation2 + $0x358] sm:$0xff] %vm657_vm10, %v1256_v58  ;;  %v2865_v29 = vld [vmem:[#allocation2 + $0x898] sm:$0xff]  ;;  %v8847_v55 = vor.u32 %v10575_v13, %v8846_v34  ;;  %v3156_v21 = vadd.f32 %v3155_v18, %v3141_v41  ;;  %v10559_v41 = vld [vmem:[%s13285_s28 + $0xec] sm:$0xf0]  ;;  %v2823_v43 = vld [vmem:[#allocation2 + $0x748] sm:$0xff]  ;;  %v13350_v58 = vpop.f32.mrf.mxu1 }
 0x355   :  { %v3021_v30 = vpack.c.bf16 %v2865_v29, %v2859_v28  ;;  %v3009_v18 = vpack.c.bf16 %v2841_v42, %v2835_v2  ;;  %v2829_v6 = vld [vmem:[#allocation2 + $0x778] sm:$0xff]  ;;  %v8815_v57 = vor.u32 %v10567_v51, %v8814_v25  ;;  %v8798_v33 = vld [vmem:[%s13285_s28 + $0x100] sm:$0xf]  ;;  %v9007_v28 = vor.u32 %v10615_v59, %v9006_v37  ;;  %v10555_v34 = vld [vmem:[%s13285_s28 + $0xcc] sm:$0xf0] }
 0x356   :  { %3321 = vmatpush.bf16.msrb.mxu0 %v2936_v32  ;;  %3335 = vmatpush.bf16.msrb.mxu1 %v2984_v50  ;;  %v3170_v11 = vadd.f32 %v13292_v35, %v3156_v21  ;;  %v3197_v35 = vpop.f32.mrf.mxu3  ;;  %v10563_v32 = vld [vmem:[%s13285_s28 + $0x10c] sm:$0xf0]  ;;  %v8783_v50 = vor.u32 %v10559_v41, %v8782_v22  ;;  %v3003_v29 = vpack.c.bf16 %v2829_v6, %v2823_v43  ;;  %v2793_v42 = vld [vmem:[#allocation2 + $0x658] sm:$0xff]  ;;  %v9166_v2 = vld [vmem:[%s13285_s28 + $0x3e0] sm:$0xf] }
 0x357   :  { %4359 = vmatpush.bf16.msra.mxu2 %v8895_v24  ;;  %v9023_v24 = vor.u32 %v10619_v54, %v9022_v49  ;;  %v8799_v38 = vor.u32 %v10563_v32, %v8798_v33  ;;  %v10603_v25 = vld [vmem:[%s13285_s28 + $0x24c] sm:$0xf0]  ;;  %v8718_v41 = vld [vmem:[%s13285_s28 + $0x60] sm:$0xf] }
 0x358   :  { %v10543_v37 = vld [vmem:[%s13285_s28 + $0x6c] sm:$0xf0]  ;;  %v9150_v6 = vld [vmem:[%s13285_s28 + $0x3c0] sm:$0xf] }
 0x359   :  { %3322 = vmatmul.bf16.vlgmr.msrb.gmra.mxu0 %v12540_v61  ;;  %3336 = vmatmul.bf16.vlgmr.msrb.gmra.mxu1 %v15400_v60  ;;  %v10599_v33 = vld [vmem:[%s13285_s28 + $0x22c] sm:$0xf0] }
 0x35a   :  { %3384 = vmatpush.bf16.msra.mxu0 %v3027_v44  ;;  %v2570_v23 = vpop.permute.xlu0 %2569  ;;  %v3184_v44 = vadd.f32 %v13317_v7, %v3170_v11 }
 0x35b   :  { %4360 = vmatpush.bf16.msra.mxu2 %v8879_v62  ;;  %v2577_v31 = vsel %vm2571_vm14, %v13234_v48, %v2570_v23  ;;  %v2697_v45 = vld [vmem:[#allocation2 + $0x358] sm:$0xff]  ;;  %v3158_v48 = vadd.f32 %v3157_v63, %v3143_v8  ;;  %v8990_v8 = vld [vmem:[%s13285_s28 + $0x280] sm:$0xf]  ;;  %v10611_v23 = vld [vmem:[%s13285_s28 + $0x28c] sm:$0xf0]  ;;  %v3211_v9 = vpop.f32.mrf.mxu2 }
 0x35c   :  { %2589 = vst.msk [vmem:[#allocation2 + $0x928] sm:$0xff] %vm657_vm10, %v2577_v31  ;;  %v2937_v19 = vpack.c.bf16 %v2697_v45, %v2691_v0  ;;  %v8974_v31 = vld [vmem:[%s13285_s28 + $0x260] sm:$0xf]  ;;  %v2799_v63 = vld [vmem:[#allocation2 + $0x688] sm:$0xff]  ;;  %v2805_v45 = vld [vmem:[#allocation2 + $0x6b8] sm:$0xff]  ;;  %v3212_v11 = vadd.f32 %v3211_v9, %v3197_v35 }
 0x35d   :  { %v3172_v62 = vadd.f32 %v13311_v4, %v3158_v48  ;;  %v8750_v0 = vld [vmem:[%s13285_s28 + $0xa0] sm:$0xf]  ;;  %v2991_v49 = vpack.c.bf16 %v2805_v45, %v2799_v63  ;;  %v10535_v63 = vld [vmem:[%s13285_s28 + $0x2c] sm:$0xf0] }
 0x35e   :  { %3385 = vmatpush.bf16.msra.mxu0 %v3021_v30  ;;  %3377 = vmatpush.bf16.msrb.mxu3 %v2937_v19  ;;  %v2817_v30 = vld [vmem:[#allocation2 + $0x718] sm:$0xff]  ;;  %v8751_v21 = vor.u32 %v10551_v53, %v8750_v0  ;;  %v10547_v19 = vld [vmem:[%s13285_s28 + $0x8c] sm:$0xf0]  ;;  %v3199_v54 = vpop.f32.mrf.mxu3  ;;  %v3100_v0 = vadd.f32 %v13247_v1, %v13279_v52  ;;  %v9118_v45 = vld [vmem:[%s13285_s28 + $0x380] sm:$0xf] }
 0x35f   :  { %4361 = vmatpush.bf16.msra.mxu2 %v8863_v16  ;;  %v8766_v16 = vld [vmem:[%s13285_s28 + $0xc0] sm:$0xf]  ;;  %v3186_v13 = vadd.f32 %v3185_v14, %v3172_v62  ;;  %v2997_v27 = vpack.c.bf16 %v2817_v30, %v2811_v47  ;;  %v10607_v14 = vld [vmem:[%s13285_s28 + $0x26c] sm:$0xf0]  ;;  %v8784_v47 = vld [vmem:[%s13285_s28 + $0xf0] sm:$0xf0] }
 0x360   :  { %v8767_v7 = vor.u32 %v10555_v34, %v8766_v16  ;;  %v8975_v48 = vor.u32 %v10607_v14, %v8974_v31  ;;  %v10539_v16 = vld [vmem:[%s13285_s28 + $0x4c] sm:$0xf0]  ;;  %v9134_v34 = vld [vmem:[%s13285_s28 + $0x3a0] sm:$0xf] }
 0x361   :  { %3378 = vmatmul.bf16.vlgmr.msrb.gmra.mxu3 %v12540_v61  ;;  %v13366_v12 = vpack.c.bf16 %v3186_v13, %v3184_v44  ;;  %v10647_v13 = vld [vmem:[%s13285_s28 + $0x3ac] sm:$0xf0]  ;;  %v8926_v30 = vld [vmem:[%s13285_s28 + $0x200] sm:$0xf] }
 0x362   :  { %3386 = vmatpush.bf16.msra.mxu0 %v3015_v26  ;;  %4372 = vmatpush.bf16.msra.mxu3 %v9039_v56  ;;  %v13371_v56 = vpop.f32.mrf.mxu1  ;;  %v8734_v26 = vld [vmem:[%s13285_s28 + $0x80] sm:$0xf]  ;;  %v9135_v31 = vor.u32 %v10647_v13, %v9134_v34 }
 0x363   :  { %4362 = vmatpush.bf16.msra.mxu2 %v8847_v55  ;;  %v2883_v5 = vld [vmem:[#allocation2 + $0x928] sm:$0xff]  ;;  %v8991_v55 = vor.u32 %v10611_v23, %v8990_v8  ;;  %v8735_v22 = vor.u32 %v10547_v19, %v8734_v26  ;;  %v10557_v23 = vld [vmem:[%s13285_s28 + $0xe4] sm:$0xf]  ;;  %v8686_v14 = vld [vmem:[%s13285_s28 + $0x20] sm:$0xf] }
 0x364   :  { %v3033_v4 = vpack.c.bf16 %v2883_v5, %v2883_v5  ;;  %v8942_v5 = vld [vmem:[%s13285_s28 + $0x220] sm:$0xf]  ;;  %v10553_v26 = vld [vmem:[%s13285_s28 + $0xc4] sm:$0xf]  ;;  %v8687_v52 = vor.u32 %v10535_v63, %v8686_v14  ;;  %v10531_v19 = vld [vmem:[%s13285_s28 + $0xc] sm:$0xf0] }
 0x365   :  { %v9054_v34 = vld [vmem:[%s13285_s28 + $0x300] sm:$0xf]  ;;  %v8896_v14 = vld [vmem:[%s13285_s28 + $0x1d0] sm:$0xf0] }
 0x366   :  { %3387 = vmatpush.bf16.msra.mxu0 %v3009_v18  ;;  %4373 = vmatpush.bf16.msra.mxu3 %v9023_v24  ;;  %v3074_v61 = vsel %vm15414_vm4, %v3033_v4, 0  ;;  %v2787_v24 = vld [vmem:[#allocation2 + $0x628] sm:$0xff]  ;;  %v3213_v18 = vpop.f32.mrf.mxu2  ;;  %v8719_v4 = vor.u32 %v10543_v37, %v8718_v41  ;;  %v8736_v37 = vld [vmem:[%s13285_s28 + $0x90] sm:$0xf0]  ;;  %vm6421_vm4 = vcmask 752640  }
 0x367   :  { %4363 = vmatpush.bf16.msra.mxu2 %v8831_v3  ;;  %3405 = vmatpush.bf16.msra.mxu1 %v3074_v61  ;;  %v10655_v3 = vld [vmem:[%s13285_s28 + $0x3ec] sm:$0xf0]  ;;  %v2985_v59 = vpack.c.bf16 %v2793_v42, %v2787_v24  ;;  %v3214_v35 = vadd.f32 %v3213_v18, %v3199_v54  ;;  %v8768_v42 = vld [vmem:[%s13285_s28 + $0xd0] sm:$0xf0]  ;;  %v9086_v18 = vld [vmem:[%s13285_s28 + $0x340] sm:$0xf] }
 0x368   :  { %v9167_v62 = vor.u32 %v10655_v3, %v9166_v2  ;;  %v10595_v61 = vld [vmem:[%s13285_s28 + $0x20c] sm:$0xf0]  ;;  %v8771_v54 = vor.u32 %v10553_v26, %v8768_v42  ;;  %v9102_v2 = vld [vmem:[%s13285_s28 + $0x360] sm:$0xf]  ;;  %v10529_v26 = vld [vmem:[%s13285_s28 + $0x4] sm:$0xf] }
 0x369   :  { %v8927_v53 = vor.u32 %v10595_v61, %v8926_v30  ;;  %v10639_v3 = vld [vmem:[%s13285_s28 + $0x36c] sm:$0xf0]  ;;  %v9294_v30 = vld [vmem:[%s13285_s28 + $0x4e0] sm:$0xf] }
 0x36a   :  { %3388 = vmatpush.bf16.msra.mxu0 %v3003_v29  ;;  %4374 = vmatpush.bf16.msra.mxu3 %v9007_v28  ;;  %v8943_v28 = vor.u32 %v10599_v33, %v8942_v5  ;;  %v3269_v29 = vpop.f32.mrf.mxu1  ;;  %v9070_v33 = vld [vmem:[%s13285_s28 + $0x320] sm:$0xf]  ;;  %v10687_v61 = vld [vmem:[%s13285_s28 + $0x4ec] sm:$0xf0] }
 0x36b   :  { %4364 = vmatpush.bf16.msra.mxu2 %v8815_v57  ;;  %4344 = vmatpush.bf16.msrb.mxu1 %v8783_v50  ;;  %v10651_v57 = vld [vmem:[%s13285_s28 + $0x3cc] sm:$0xf0]  ;;  %v8702_v50 = vld [vmem:[%s13285_s28 + $0x40] sm:$0xf] }
 0x36c   :  { %8667 = vmatmul.msk.bf16.vlgmr.msra.gmra.mxu1 %vm15415_vm7, %v12222_v36  ;;  %v8958_v36 = vld [vmem:[%s13285_s28 + $0x240] sm:$0xf]  ;;  %v9151_v44 = vor.u32 %v10651_v57, %v9150_v6  ;;  %vm6480_vm7 = vcmask 744448  }
 0x36d   :  { %v8959_v43 = vor.u32 %v10603_v25, %v8958_v36  ;;  %v10549_v36 = vld [vmem:[%s13285_s28 + $0xa4] sm:$0xf]  ;;  %v8752_v25 = vld [vmem:[%s13285_s28 + $0xb0] sm:$0xf0] }
 0x36e   :  { %3389 = vmatpush.bf16.msra.mxu0 %v2997_v27  ;;  %4375 = vmatpush.bf16.msra.mxu3 %v8991_v55  ;;  %v3225_v51 = vpop.f32.mrf.mxu0  ;;  %v8703_v55 = vor.u32 %v10539_v16, %v8702_v50  ;;  %v8755_v41 = vor.u32 %v10549_v36, %v8752_v25  ;;  %v10675_v36 = vld [vmem:[%s13285_s28 + $0x48c] sm:$0xf0] }
 0x36f   :  { %4365 = vmatpush.bf16.msra.mxu2 %v8799_v38  ;;  %4345 = vmatpush.bf16.msrb.mxu1 %v8767_v7  ;;  %v3226_v32 = vadd.f32 %v3225_v51, %v3212_v11  ;;  %v3253_v38 = vpop.f32.mrf.mxu3  ;;  %v9103_v11 = vor.u32 %v10639_v3, %v9102_v2  ;;  %v9246_v3 = vld [vmem:[%s13285_s28 + $0x480] sm:$0xf] }
 0x371   :  { %v3240_v7 = vadd.f32 %v13329_v10, %v3226_v32  ;;  %v8787_v10 = vor.u32 %v10557_v23, %v8784_v47  ;;  %v10541_v32 = vld [vmem:[%s13285_s28 + $0x64] sm:$0xf]  ;;  %v8912_v47 = vld [vmem:[%s13285_s28 + $0x1f0] sm:$0xf0] }
 0x372   :  { %4366 = vmatmul.bf16.vlgmr.msra.gmra.mxu2 %v13366_v12  ;;  %3390 = vmatpush.bf16.msra.mxu0 %v2991_v49  ;;  %v10589_v23 = vld [vmem:[%s13285_s28 + $0x1e4] sm:$0xf] }
 0x373   :  { %4346 = vmatpush.bf16.msrb.mxu1 %v8751_v21  ;;  %4376 = vmatpush.bf16.msra.mxu3 %v8975_v48  ;;  %v10643_v21 = vld [vmem:[%s13285_s28 + $0x38c] sm:$0xf0]  ;;  %v8670_v48 = vld [vmem:[%s13285_s28] sm:$0xf] }
 0x374   :  { %v3281_v1 = vpop.f32.mrf.mxu2  ;;  %v9119_v49 = vor.u32 %v10643_v21, %v9118_v45  ;;  %v8671_v24 = vor.u32 %v10531_v19, %v8670_v48  ;;  %v10683_v45 = vld [vmem:[%s13285_s28 + $0x4cc] sm:$0xf0]  ;;  %v10581_v48 = vld [vmem:[%s13285_s28 + $0x1a4] sm:$0xf]  ;;  %v8880_v19 = vld [vmem:[%s13285_s28 + $0x1b0] sm:$0xf0] }
 0x376   :  { %3391 = vmatpush.bf16.msra.mxu0 %v2985_v59  ;;  %v3227_v8 = vpop.f32.mrf.mxu0  ;;  %v3268_v59 = vadd.f32 %v13371_v56, %v3253_v38  ;;  %v8720_v56 = vld [vmem:[%s13285_s28 + $0x70] sm:$0xf0] }
 0x377   :  { %4347 = vmatpush.bf16.msrb.mxu1 %v8735_v22  ;;  %4377 = vmatpush.bf16.msra.mxu3 %v8959_v43  ;;  %v3228_v9 = vadd.f32 %v3227_v8, %v3214_v35  ;;  %v3255_v22 = vpop.f32.mrf.mxu3  ;;  %v10545_v43 = vld [vmem:[%s13285_s28 + $0x84] sm:$0xf]  ;;  %v10631_v35 = vld [vmem:[%s13285_s28 + $0x32c] sm:$0xf0]  ;;  %v8723_v13 = vor.u32 %v10541_v32, %v8720_v56  ;;  %v8704_v8 = vld [vmem:[%s13285_s28 + $0x50] sm:$0xf0] }
 0x378   :  { %v3295_v51 = vpop.f32.mrf.mxu1  ;;  %v8739_v5 = vor.u32 %v10545_v43, %v8736_v37  ;;  %v10573_v37 = vld [vmem:[%s13285_s28 + $0x164] sm:$0xf] }
 0x379   :  { %3392 = vmatmul.bf16.vlgmr.msra.gmra.mxu0 %v15400_v60  ;;  %v3102_v60 = vadd.f32 %v13263_v17, %v13302_v39  ;;  %v3242_v27 = vadd.f32 %v13350_v58, %v3228_v9  ;;  %v3114_v39 = vadd.f32 %v13277_v46, %v3100_v0  ;;  %v9295_v9 = vor.u32 %v10687_v61, %v9294_v30  ;;  %v10533_v0 = vld [vmem:[%s13285_s28 + $0x24] sm:$0xf]  ;;  %v9374_v30 = vld [vmem:[%s13285_s28 + $0x580] sm:$0xf]  ;;  %v10707_v61 = vld [vmem:[%s13285_s28 + $0x58c] sm:$0xf0] }
 0x37a   :  { %4386 = vmatpush.bf16.msrb.mxu0 %v9167_v62  ;;  %v10635_v62 = vld [vmem:[%s13285_s28 + $0x34c] sm:$0xf0]  ;;  %v367_v32 = vld [vmem:[%s13285_s28 + $0x5a0] sm:$0x11] }
 0x37b   :  { %4348 = vmatpush.bf16.msrb.mxu1 %v8719_v4  ;;  %4378 = vmatpush.bf16.msra.mxu3 %v8943_v28  ;;  %v13407_v17 = vpack.c.bf16 %v3242_v27, %v3240_v7  ;;  %v3116_v58 = vadd.f32 %v13300_v40, %v3102_v60  ;;  %v3128_v46 = vadd.f32 %v13270_v20, %v3114_v39  ;;  %v10585_v27 = vld [vmem:[%s13285_s28 + $0x1c4] sm:$0xf]  ;;  %v10679_v39 = vld [vmem:[%s13285_s28 + $0x4ac] sm:$0xf0] }
 0x37c   :  { %v3270_v20 = vadd.f32 %v3269_v29, %v3255_v22  ;;  %v3283_v57 = vpop.f32.mrf.mxu2  ;;  %v3282_v4 = vadd.f32 %v3281_v1, %v3268_v59  ;;  %v9071_v28 = vor.u32 %v10631_v35, %v9070_v33  ;;  %v10627_v29 = vld [vmem:[%s13285_s28 + $0x30c] sm:$0xf0]  ;;  %v8915_v60 = vor.u32 %v10589_v23, %v8912_v47  ;;  %v9280_v22 = vld [vmem:[%s13285_s28 + $0x4d0] sm:$0xf0]  ;;  %v9214_v33 = vld [vmem:[%s13285_s28 + $0x440] sm:$0xf] }
 0x37d   :  { %v3130_v40 = vadd.f32 %v13296_v15, %v3116_v58  ;;  %v9087_v15 = vor.u32 %v10635_v62, %v9086_v18  ;;  %v8899_v42 = vor.u32 %v10585_v27, %v8896_v14  ;;  %v8672_v58 = vld [vmem:[%s13285_s28 + $0x10] sm:$0xf0]  ;;  %v9230_v18 = vld [vmem:[%s13285_s28 + $0x460] sm:$0xf]  ;;  %v10671_v62 = vld [vmem:[%s13285_s28 + $0x46c] sm:$0xf0]  ;;  %v3961_v27 = vunpack.c.h.b16 %v367_v32 }
 0x37e   :  { %4387 = vmatpush.bf16.msrb.mxu0 %v9151_v44  ;;  %v3284_v50 = vadd.f32 %v3283_v57, %v3270_v20  ;;  %v10537_v44 = vld [vmem:[%s13285_s28 + $0x44] sm:$0xf]  ;;  %v3296_v38 = vadd.f32 %v3295_v51, %v3282_v4  ;;  %v8675_v25 = vor.u32 %v10529_v26, %v8672_v58  ;;  %v8883_v51 = vor.u32 %v10581_v48, %v8880_v19  ;;  %v8848_v59 = vld [vmem:[%s13285_s28 + $0x170] sm:$0xf0]  ;;  %v10667_v35 = vld [vmem:[%s13285_s28 + $0x44c] sm:$0xf0] }
 0x37f   :  { %4349 = vmatpush.bf16.msrb.mxu1 %v8703_v55  ;;  %4379 = vmatpush.bf16.msra.mxu3 %v8927_v53  ;;  %v13425_v6 = vpack.c.bf16 %v3130_v40, %v3128_v46  ;;  %v9055_v55 = vor.u32 %v10627_v29, %v9054_v34  ;;  %v8688_v53 = vld [vmem:[%s13285_s28 + $0x30] sm:$0xf0]  ;;  %v8851_v56 = vor.u32 %v10573_v37, %v8848_v59  ;;  %v10569_v4 = vld [vmem:[%s13285_s28 + $0x144] sm:$0xf]  ;;  %v10663_v23 = vld [vmem:[%s13285_s28 + $0x42c] sm:$0xf0] }
 0x380   :  { %v3297_v16 = vpop.f32.mrf.mxu1  ;;  %v8691_v21 = vor.u32 %v10533_v0, %v8688_v53  ;;  %v8864_v46 = vld [vmem:[%s13285_s28 + $0x190] sm:$0xf0]  ;;  %v10669_v0 = vld [vmem:[%s13285_s28 + $0x464] sm:$0xf]  ;;  %v9182_v14 = vld [vmem:[%s13285_s28 + $0x400] sm:$0xf]  ;;  %v4145_v19 = vpack.c.b16 %v3961_v27, %v3961_v27 }
 0x381   :  { %v3298_v7 = vadd.f32 %v3297_v16, %v3284_v50  ;;  %v9264_v57 = vld [vmem:[%s13285_s28 + $0x4b0] sm:$0xf0]  ;;  %v3960_v50 = vunpack.c.l.b16 %v367_v32  ;;  %v10673_v16 = vld [vmem:[%s13285_s28 + $0x484] sm:$0xf]  ;;  %v9046_v59 = vld [vmem:[%s13285_s28 + $0x2e8] sm:$0xf] }
 0x382   :  { %4388 = vmatpush.bf16.msrb.mxu0 %v9135_v31  ;;  %4380 = vmatmul.bf16.vlgmr.msra.gmra.mxu3 %v13407_v17  ;;  %v8707_v31 = vor.u32 %v10537_v44, %v8704_v8  ;;  %v8832_v44 = vld [vmem:[%s13285_s28 + $0x150] sm:$0xf0]  ;;  %v9198_v8 = vld [vmem:[%s13285_s28 + $0x420] sm:$0xf]  ;;  %v10641_v32 = vld [vmem:[%s13285_s28 + $0x384] sm:$0xf] }
 0x383   :  { %4428 = vmatpush.bf16.msrb.mxu3 %v8787_v10  ;;  %4350 = vmatpush.bf16.msrb.mxu1 %v8687_v52  ;;  %v13444_v63 = vpack.c.bf16 %v3298_v7, %v3296_v38  ;;  %v9278_v10 = vld [vmem:[%s13285_s28 + $0x4c0] sm:$0xf]  ;;  %v9248_v34 = vld [vmem:[%s13285_s28 + $0x490] sm:$0xf0]  ;;  %v4144_v29 = vpack.c.b16 %v3960_v50, %v3960_v50  ;;  %v8835_v47 = vor.u32 %v10569_v4, %v8832_v44  ;;  %v10565_v38 = vld [vmem:[%s13285_s28 + $0x124] sm:$0xf] }
 0x384   :  { %v9279_v1 = vor.u32 %v10683_v45, %v9278_v10  ;;  %v9262_v52 = vld [vmem:[%s13285_s28 + $0x4a0] sm:$0xf]  ;;  %v8816_v7 = vld [vmem:[%s13285_s28 + $0x130] sm:$0xf0]  ;;  %v9199_v53 = vor.u32 %v10663_v23, %v9198_v8  ;;  %v10659_v10 = vld [vmem:[%s13285_s28 + $0x40c] sm:$0xf0] }
 0x385   :  { %v9263_v2 = vor.u32 %v10679_v39, %v9262_v52  ;;  %v8819_v45 = vor.u32 %v10565_v38, %v8816_v7  ;;  %v9168_v26 = vld [vmem:[%s13285_s28 + $0x3f0] sm:$0xf0]  ;;  %v10665_v39 = vld [vmem:[%s13285_s28 + $0x444] sm:$0xf]  ;;  %v9183_v48 = vor.u32 %v10659_v10, %v9182_v14  ;;  %v9014_v50 = vld [vmem:[%s13285_s28 + $0x2a8] sm:$0xf] }
 0x386   :  { %4389 = vmatpush.bf16.msrb.mxu0 %v9119_v49  ;;  %v10685_v49 = vld [vmem:[%s13285_s28 + $0x4e4] sm:$0xf]  ;;  %v9216_v58 = vld [vmem:[%s13285_s28 + $0x450] sm:$0xf0]  ;;  %v10616_v44 = vld [vmem:[%s13285_s28 + $0x2b4] sm:$0xf0] }
 0x387   :  { %4429 = vmatpush.bf16.msrb.mxu3 %v8771_v54  ;;  %4351 = vmatpush.bf16.msrb.mxu1 %v8671_v24  ;;  %v9296_v54 = vld [vmem:[%s13285_s28 + $0x4f0] sm:$0xf0]  ;;  %v10577_v24 = vld [vmem:[%s13285_s28 + $0x184] sm:$0xf]  ;;  %v9342_v7 = vld [vmem:[%s13285_s28 + $0x540] sm:$0xf] }
 0x388   :  { %v9299_v40 = vor.u32 %v10685_v49, %v9296_v54  ;;  %v8867_v43 = vor.u32 %v10577_v24, %v8864_v46  ;;  %v4336_v24 = vsel %vm4331_vm9, %v4145_v19, 0  ;;  %v10705_v46 = vld [vmem:[%s13285_s28 + $0x584] sm:$0xf]  ;;  %v9184_v37 = vld [vmem:[%s13285_s28 + $0x410] sm:$0xf0] }
 0x389   :  { %v10637_v8 = vld [vmem:[%s13285_s28 + $0x364] sm:$0xf]  ;;  %v9104_v23 = vld [vmem:[%s13285_s28 + $0x370] sm:$0xf0] }
 0x38a   :  { %4390 = vmatpush.bf16.msrb.mxu0 %v9103_v11  ;;  %4352 = vmatmul.bf16.vlgmr.msrb.gmra.mxu1 %v13425_v6  ;;  %v10681_v11 = vld [vmem:[%s13285_s28 + $0x4c4] sm:$0xf]  ;;  %v9107_v38 = vor.u32 %v10637_v8, %v9104_v23  ;;  %v9088_v10 = vld [vmem:[%s13285_s28 + $0x350] sm:$0xf0]  ;;  %v9142_v8 = vld [vmem:[%s13285_s28 + $0x3a8] sm:$0xf] }
 0x38b   :  { %4430 = vmatpush.bf16.msrb.mxu3 %v8755_v41  ;;  %4400 = vmatpush.bf16.msra.mxu1 %v9295_v9  ;;  %v9247_v41 = vor.u32 %v10675_v36, %v9246_v3  ;;  %v9283_v20 = vor.u32 %v10681_v11, %v9280_v22  ;;  %v4333_v9 = vsel %vm4331_vm9, %v4144_v29, 0  ;;  %v9152_v3 = vld [vmem:[%s13285_s28 + $0x3d0] sm:$0xf0]  ;;  %v9219_v36 = vor.u32 %v10665_v39, %v9216_v58  ;;  %v10645_v22 = vld [vmem:[%s13285_s28 + $0x3a4] sm:$0xf] }
 0x38c   :  { %4416 = vmatpush.bf16.msrb.mxu2 %v4333_v9  ;;  %v8998_v9 = vld [vmem:[%s13285_s28 + $0x288] sm:$0xf]  ;;  %v10633_v14 = vld [vmem:[%s13285_s28 + $0x344] sm:$0xf]  ;;  %v10648_v23 = vld [vmem:[%s13285_s28 + $0x3b4] sm:$0xf0] }
 0x38d   :  { %v10693_v39 = vld [vmem:[%s13285_s28 + $0x524] sm:$0xf] }
 0x38e   :  { %4391 = vmatpush.bf16.msrb.mxu0 %v9087_v15  ;;  %v10677_v15 = vld [vmem:[%s13285_s28 + $0x4a4] sm:$0xf] }
 0x38f   :  { %4431 = vmatpush.bf16.msrb.mxu3 %v8739_v5  ;;  %4401 = vmatpush.bf16.msra.mxu1 %v9279_v1  ;;  %v9231_v5 = vor.u32 %v10671_v62, %v9230_v18  ;;  %v8800_v1 = vld [vmem:[%s13285_s28 + $0x110] sm:$0xf0] }
 0x392   :  { %4392 = vmatpush.bf16.msrb.mxu0 %v9071_v28  ;;  %v9267_v28 = vor.u32 %v10677_v15, %v9264_v57 }
 0x393   :  { %4432 = vmatpush.bf16.msrb.mxu3 %v8723_v13  ;;  %4402 = vmatpush.bf16.msra.mxu1 %v9263_v2  ;;  %v9215_v13 = vor.u32 %v10667_v35, %v9214_v33  ;;  %v10649_v2 = vld [vmem:[%s13285_s28 + $0x3c4] sm:$0xf]  ;;  %v9030_v33 = vld [vmem:[%s13285_s28 + $0x2c8] sm:$0xf]  ;;  %v10620_v35 = vld [vmem:[%s13285_s28 + $0x2d4] sm:$0xf0] }
 0x394   :  { %v9155_v11 = vor.u32 %v10649_v2, %v9152_v3  ;;  %v9031_v4 = vor.u32 %v10620_v35, %v9030_v33  ;;  %v10629_v2 = vld [vmem:[%s13285_s28 + $0x324] sm:$0xf]  ;;  %v9072_v3 = vld [vmem:[%s13285_s28 + $0x330] sm:$0xf0]  ;;  %v10600_v33 = vld [vmem:[%s13285_s28 + $0x234] sm:$0xf0] }
 0x396   :  { %4393 = vmatpush.bf16.msrb.mxu0 %v9055_v55  ;;  %v9251_v55 = vor.u32 %v10673_v16, %v9248_v34  ;;  %v9358_v16 = vld [vmem:[%s13285_s28 + $0x560] sm:$0xf]  ;;  %v10703_v34 = vld [vmem:[%s13285_s28 + $0x56c] sm:$0xf0] }
 0x397   :  { %4433 = vmatpush.bf16.msrb.mxu3 %v8707_v31  ;;  %4403 = vmatpush.bf16.msra.mxu1 %v9247_v41  ;;  %v9375_v31 = vor.u32 %v10707_v61, %v9374_v30  ;;  %v9136_v41 = vld [vmem:[%s13285_s28 + $0x3b0] sm:$0xf0]  ;;  %v9359_v29 = vor.u32 %v10703_v34, %v9358_v16 }
 0x398   :  { %v9139_v15 = vor.u32 %v10645_v22, %v9136_v41  ;;  %v9360_v30 = vld [vmem:[%s13285_s28 + $0x570] sm:$0xf0]  ;;  %v10621_v22 = vld [vmem:[%s13285_s28 + $0x2e4] sm:$0xf] }
 0x399   :  { %4394 = vmatmul.bf16.vlgmr.msrb.gmra.mxu0 %v13444_v63  ;;  %4417 = vmatpush.bf16.msrb.mxu2 %v9375_v31  ;;  %v10612_v31 = vld [vmem:[%s13285_s28 + $0x294] sm:$0xf0] }
 0x39a   :  { %4442 = vmatpush.bf16.msra.mxu0 %v8915_v60  ;;  %v9232_v60 = vld [vmem:[%s13285_s28 + $0x470] sm:$0xf0] }
 0x39b   :  { %4434 = vmatpush.bf16.msrb.mxu3 %v8691_v21  ;;  %4404 = vmatpush.bf16.msra.mxu1 %v9231_v5  ;;  %v10653_v21 = vld [vmem:[%s13285_s28 + $0x3e4] sm:$0xf]  ;;  %v9235_v52 = vor.u32 %v10669_v0, %v9232_v60 }
 0x39c   :  { %v9171_v49 = vor.u32 %v10653_v21, %v9168_v26  ;;  %v10697_v60 = vld [vmem:[%s13285_s28 + $0x544] sm:$0xf]  ;;  %v8982_v21 = vld [vmem:[%s13285_s28 + $0x268] sm:$0xf]  ;;  %v10608_v26 = vld [vmem:[%s13285_s28 + $0x274] sm:$0xf0] }
 0x39d   :  { %4418 = vmatpush.bf16.msrb.mxu2 %v9359_v29  ;;  %v10613_v29 = vld [vmem:[%s13285_s28 + $0x2a4] sm:$0xf] }
 0x39e   :  { %4443 = vmatpush.bf16.msra.mxu0 %v8899_v42  ;;  %v10561_v42 = vld [vmem:[%s13285_s28 + $0x104] sm:$0xf] }
 0x39f   :  { %4435 = vmatpush.bf16.msrb.mxu3 %v8675_v25  ;;  %4405 = vmatpush.bf16.msra.mxu1 %v9215_v13  ;;  %v8803_v54 = vor.u32 %v10561_v42, %v8800_v1  ;;  %v10661_v25 = vld [vmem:[%s13285_s28 + $0x424] sm:$0xf]  ;;  %v9091_v42 = vor.u32 %v10633_v14, %v9088_v10  ;;  %v9326_v1 = vld [vmem:[%s13285_s28 + $0x520] sm:$0xf] }
 0x3a0   :  { %v10701_v13 = vld [vmem:[%s13285_s28 + $0x564] sm:$0xf] }
 0x3a1   :  { %v9363_v61 = vor.u32 %v10701_v13, %v9360_v30  ;;  %v10596_v13 = vld [vmem:[%s13285_s28 + $0x214] sm:$0xf0]  ;;  %v9008_v30 = vld [vmem:[%s13285_s28 + $0x2b0] sm:$0xf0] }
 0x3a2   :  { %4444 = vmatpush.bf16.msra.mxu0 %v8883_v51  ;;  %4436 = vmatmul.bf16.vlgmr.msrb.gmra.mxu3 %v13425_v6  ;;  %v9200_v51 = vld [vmem:[%s13285_s28 + $0x430] sm:$0xf0] }
 0x3a3   :  { %4484 = vmatpush.bf16.msra.mxu3 %v9299_v40  ;;  %4406 = vmatpush.bf16.msra.mxu1 %v9199_v53  ;;  %v9376_v40 = vld [vmem:[%s13285_s28 + $0x590] sm:$0xf0]  ;;  %v9203_v18 = vor.u32 %v10661_v25, %v9200_v51  ;;  %v9075_v25 = vor.u32 %v10629_v2, %v9072_v3  ;;  %v9310_v51 = vld [vmem:[%s13285_s28 + $0x500] sm:$0xf] }
 0x3a4   :  { %v9379_v62 = vor.u32 %v10705_v46, %v9376_v40  ;;  %v9344_v53 = vld [vmem:[%s13285_s28 + $0x550] sm:$0xf0]  ;;  %v10689_v40 = vld [vmem:[%s13285_s28 + $0x504] sm:$0xf] }
 0x3a5   :  { %v9347_v27 = vor.u32 %v10697_v60, %v9344_v53 }
 0x3a6   :  { %4445 = vmatpush.bf16.msra.mxu0 %v8867_v43  ;;  %v10657_v43 = vld [vmem:[%s13285_s28 + $0x404] sm:$0xf] }
 0x3a7   :  { %4485 = vmatpush.bf16.msra.mxu3 %v9283_v20  ;;  %4407 = vmatpush.bf16.msra.mxu1 %v9183_v48  ;;  %v10624_v20 = vld [vmem:[%s13285_s28 + $0x2f4] sm:$0xf0]  ;;  %v9187_v57 = vor.u32 %v10657_v43, %v9184_v37  ;;  %v9328_v48 = vld [vmem:[%s13285_s28 + $0x530] sm:$0xf0] }
 0x3a8   :  { %v9047_v5 = vor.u32 %v10624_v20, %v9046_v59  ;;  %v9331_v19 = vor.u32 %v10693_v39, %v9328_v48  ;;  %v10656_v43 = vld [vmem:[%s13285_s28 + $0x3f4] sm:$0xf0]  ;;  %v8960_v48 = vld [vmem:[%s13285_s28 + $0x250] sm:$0xf0] }
 0x3aa   :  { %4446 = vmatpush.bf16.msra.mxu0 %v8851_v56  ;;  %v9120_v56 = vld [vmem:[%s13285_s28 + $0x390] sm:$0xf0] }
 0x3ab   :  { %4486 = vmatpush.bf16.msra.mxu3 %v9267_v28  ;;  %4470 = vmatpush.bf16.msrb.mxu1 %v9171_v49  ;;  %v9123_v28 = vor.u32 %v10641_v32, %v9120_v56  ;;  %v8983_v49 = vor.u32 %v10608_v26, %v8982_v21  ;;  %v10617_v32 = vld [vmem:[%s13285_s28 + $0x2c4] sm:$0xf]  ;;  %v9024_v56 = vld [vmem:[%s13285_s28 + $0x2d0] sm:$0xf0] }
 0x3ac   :  { %v9027_v16 = vor.u32 %v10617_v32, %v9024_v56  ;;  %v8976_v21 = vld [vmem:[%s13285_s28 + $0x270] sm:$0xf0]  ;;  %v9062_v32 = vld [vmem:[%s13285_s28 + $0x308] sm:$0xf] }
 0x3ae   :  { %4447 = vmatpush.bf16.msra.mxu0 %v8835_v47  ;;  %v9015_v47 = vor.u32 %v10616_v44, %v9014_v50  ;;  %v10652_v50 = vld [vmem:[%s13285_s28 + $0x3d4] sm:$0xf0] }
 0x3af   :  { %4487 = vmatpush.bf16.msra.mxu3 %v9251_v55  ;;  %4471 = vmatpush.bf16.msrb.mxu1 %v9155_v11  ;;  %v10699_v55 = vld [vmem:[%s13285_s28 + $0x54c] sm:$0xf0]  ;;  %v9312_v11 = vld [vmem:[%s13285_s28 + $0x510] sm:$0xf0] }
 0x3b0   :  { %v9343_v0 = vor.u32 %v10699_v55, %v9342_v7  ;;  %v9315_v41 = vor.u32 %v10689_v40, %v9312_v11  ;;  %v8992_v7 = vld [vmem:[%s13285_s28 + $0x290] sm:$0xf0]  ;;  %v9126_v55 = vld [vmem:[%s13285_s28 + $0x388] sm:$0xf] }
 0x3b1   :  { %v8944_v40 = vld [vmem:[%s13285_s28 + $0x230] sm:$0xf0]  ;;  %v9078_v11 = vld [vmem:[%s13285_s28 + $0x328] sm:$0xf] }
 0x3b2   :  { %4448 = vmatpush.bf16.msra.mxu0 %v8819_v45  ;;  %v8999_v45 = vor.u32 %v10612_v31, %v8998_v9  ;;  %4419 = vmatpush.bf16.msrb.mxu2 %v9343_v0  ;;  %v10644_v31 = vld [vmem:[%s13285_s28 + $0x394] sm:$0xf0]  ;;  %v3309_v0 = vpop.f32.mrf.mxu3 }
 0x3b3   :  { %4488 = vmatpush.bf16.msra.mxu3 %v9235_v52  ;;  %4472 = vmatpush.bf16.msrb.mxu1 %v9139_v15  ;;  %v10695_v52 = vld [vmem:[%s13285_s28 + $0x52c] sm:$0xf0]  ;;  %v10625_v15 = vld [vmem:[%s13285_s28 + $0x304] sm:$0xf]  ;;  %v9127_v53 = vor.u32 %v10644_v31, %v9126_v55  ;;  %v8870_v31 = vld [vmem:[%s13285_s28 + $0x188] sm:$0xf] }
 0x3b4   :  { %v9327_v58 = vor.u32 %v10695_v52, %v9326_v1  ;;  %v10640_v1 = vld [vmem:[%s13285_s28 + $0x374] sm:$0xf0] }
 0x3b6   :  { %4449 = vmatpush.bf16.msra.mxu0 %v8803_v54  ;;  %v8966_v54 = vld [vmem:[%s13285_s28 + $0x248] sm:$0xf]  ;;  %4420 = vmatpush.bf16.msrb.mxu2 %v9327_v58  ;;  %v10601_v58 = vld [vmem:[%s13285_s28 + $0x244] sm:$0xf] }
 0x3b7   :  { %4489 = vmatpush.bf16.msra.mxu3 %v9219_v36  ;;  %4473 = vmatpush.bf16.msrb.mxu1 %v9123_v28  ;;  %v10604_v36 = vld [vmem:[%s13285_s28 + $0x254] sm:$0xf0]  ;;  %v8934_v28 = vld [vmem:[%s13285_s28 + $0x208] sm:$0xf] }
 0x3b8   :  { %v8967_v37 = vor.u32 %v10604_v36, %v8966_v54  ;;  %v8935_v9 = vor.u32 %v10596_v13, %v8934_v28  ;;  %v10636_v54 = vld [vmem:[%s13285_s28 + $0x354] sm:$0xf0]  ;;  %v10554_v13 = vld [vmem:[%s13285_s28 + $0xcc] sm:$0xf] }
 0x3b9   :  { %4450 = vmatmul.bf16.vlgmr.msra.gmra.mxu0 %v13366_v12  ;;  %v10628_v28 = vld [vmem:[%s13285_s28 + $0x314] sm:$0xf0] }
 0x3ba   :  { %4500 = vmatpush.bf16.msrb.mxu0 %v4336_v24  ;;  %v10691_v24 = vld [vmem:[%s13285_s28 + $0x50c] sm:$0xf0]  ;;  %v3311_v3 = vpop.f32.mrf.mxu3 }
 0x3bb   :  { %4490 = vmatpush.bf16.msra.mxu3 %v9203_v18  ;;  %4474 = vmatpush.bf16.msrb.mxu1 %v9107_v38  ;;  %v9311_v46 = vor.u32 %v10691_v24, %v9310_v51  ;;  %v9040_v18 = vld [vmem:[%s13285_s28 + $0x2f0] sm:$0xf0]  ;;  %v10609_v38 = vld [vmem:[%s13285_s28 + $0x284] sm:$0xf] }
 0x3bc   :  { %v9043_v59 = vor.u32 %v10621_v22, %v9040_v18  ;;  %v8995_v60 = vor.u32 %v10609_v38, %v8992_v7  ;;  %v8760_v38 = vld [vmem:[%s13285_s28 + $0xb8] sm:$0xf0] }
 0x3bd   :  { %4421 = vmatpush.bf16.msrb.mxu2 %v9311_v46  ;;  %v10597_v46 = vld [vmem:[%s13285_s28 + $0x224] sm:$0xf] }
 0x3be   :  { %4501 = vmatpush.bf16.msrb.mxu0 %v9379_v62  ;;  %v9174_v62 = vld [vmem:[%s13285_s28 + $0x3e8] sm:$0xf]  ;;  %v8947_v18 = vor.u32 %v10597_v46, %v8944_v40 }
 0x3bf   :  { %4491 = vmatpush.bf16.msra.mxu3 %v9187_v57  ;;  %4475 = vmatpush.bf16.msrb.mxu1 %v9091_v42  ;;  %v9175_v20 = vor.u32 %v10656_v43, %v9174_v62  ;;  %v9056_v57 = vld [vmem:[%s13285_s28 + $0x310] sm:$0xf0]  ;;  %v9110_v42 = vld [vmem:[%s13285_s28 + $0x368] sm:$0xf]  ;;  %v10632_v62 = vld [vmem:[%s13285_s28 + $0x334] sm:$0xf0] }
 0x3c0   :  { %v9059_v35 = vor.u32 %v10625_v15, %v9056_v57  ;;  %v9111_v52 = vor.u32 %v10640_v1, %v9110_v42  ;;  %v8792_v15 = vld [vmem:[%s13285_s28 + $0xf8] sm:$0xf0]  ;;  %v9079_v57 = vor.u32 %v10632_v62, %v9078_v11  ;;  %v10542_v42 = vld [vmem:[%s13285_s28 + $0x6c] sm:$0xf]  ;;  %v8822_v40 = vld [vmem:[%s13285_s28 + $0x128] sm:$0xf] }
 0x3c1   :  { %4456 = vmatpush.bf16.msra.mxu2 %v9043_v59  ;;  %v10592_v59 = vld [vmem:[%s13285_s28 + $0x1f4] sm:$0xf0]  ;;  %v8728_v1 = vld [vmem:[%s13285_s28 + $0x78] sm:$0xf0] }
 0x3c2   :  { %4502 = vmatpush.bf16.msrb.mxu0 %v9363_v61  ;;  %v9011_v61 = vor.u32 %v10613_v29, %v9008_v30  ;;  %v8776_v29 = vld [vmem:[%s13285_s28 + $0xd8] sm:$0xf0]  ;;  %v9063_v30 = vor.u32 %v10628_v28, %v9062_v32  ;;  %v10568_v11 = vld [vmem:[%s13285_s28 + $0x134] sm:$0xf0] }
 0x3c3   :  { %4540 = vmatpush.bf16.msrb.mxu3 %v9047_v5  ;;  %4476 = vmatpush.bf16.msrb.mxu1 %v9075_v25  ;;  %v8950_v5 = vld [vmem:[%s13285_s28 + $0x228] sm:$0xf]  ;;  %v8920_v32 = vld [vmem:[%s13285_s28 + $0x1f8] sm:$0xf0] }
 0x3c4   :  { %v8951_v44 = vor.u32 %v10600_v33, %v8950_v5  ;;  %v10593_v33 = vld [vmem:[%s13285_s28 + $0x204] sm:$0xf] }
 0x3c5   :  { %4457 = vmatpush.bf16.msra.mxu2 %v9027_v16 }
 0x3c6   :  { %4503 = vmatpush.bf16.msrb.mxu0 %v9347_v27  ;;  %v3351_v27 = vpop.f32.mrf.mxu2 }
 0x3c7   :  { %4541 = vmatpush.bf16.msrb.mxu3 %v9031_v4  ;;  %4477 = vmatpush.bf16.msrb.mxu1 %v9059_v35  ;;  %v9158_v4 = vld [vmem:[%s13285_s28 + $0x3c8] sm:$0xf]  ;;  %v8928_v35 = vld [vmem:[%s13285_s28 + $0x210] sm:$0xf0] }
 0x3c8   :  { %v9159_v34 = vor.u32 %v10652_v50, %v9158_v4  ;;  %v8902_v50 = vld [vmem:[%s13285_s28 + $0x1c8] sm:$0xf] }
 0x3c9   :  { %4458 = vmatpush.bf16.msra.mxu2 %v9011_v61 }
 0x3ca   :  { %4504 = vmatpush.bf16.msrb.mxu0 %v9331_v19  ;;  %v9094_v19 = vld [vmem:[%s13285_s28 + $0x348] sm:$0xf] }
 0x3cb   :  { %4542 = vmatpush.bf16.msrb.mxu3 %v9015_v47  ;;  %v9143_v47 = vor.u32 %v10648_v23, %v9142_v8  ;;  %v9095_v2 = vor.u32 %v10636_v54, %v9094_v19  ;;  %v8779_v8 = vor.u32 %v10554_v13, %v8776_v29  ;;  %v8886_v23 = vld [vmem:[%s13285_s28 + $0x1a8] sm:$0xf]  ;;  %v10538_v54 = vld [vmem:[%s13285_s28 + $0x4c] sm:$0xf] }
 0x3cc   :  { %v8838_v19 = vld [vmem:[%s13285_s28 + $0x148] sm:$0xf]  ;;  %v10686_v29 = vld [vmem:[%s13285_s28 + $0x4ec] sm:$0xf] }
 0x3cd   :  { %4459 = vmatpush.bf16.msra.mxu2 %v8995_v60 }
 0x3ce   :  { %4505 = vmatpush.bf16.msrb.mxu0 %v9315_v41  ;;  %v3353_v22 = vpop.f32.mrf.mxu2  ;;  %v8918_v41 = vld [vmem:[%s13285_s28 + $0x1e8] sm:$0xf] }
 0x3cf   :  { %4543 = vmatpush.bf16.msrb.mxu3 %v8999_v45  ;;  %v10605_v45 = vld [vmem:[%s13285_s28 + $0x264] sm:$0xf]  ;;  %v8919_v56 = vor.u32 %v10592_v59, %v8918_v41  ;;  %v8696_v41 = vld [vmem:[%s13285_s28 + $0x38] sm:$0xf0]  ;;  %v8790_v59 = vld [vmem:[%s13285_s28 + $0xe8] sm:$0xf] }
 0x3d0   :  { %v8979_v26 = vor.u32 %v10605_v45, %v8976_v21  ;;  %v8854_v21 = vld [vmem:[%s13285_s28 + $0x168] sm:$0xf] }
 0x3d2   :  { %4554 = vmatpush.bf16.msra.mxu0 %v9175_v20  ;;  %4460 = vmatpush.bf16.msra.mxu2 %v8979_v26  ;;  %v10558_v20 = vld [vmem:[%s13285_s28 + $0xec] sm:$0xf]  ;;  %v10576_v26 = vld [vmem:[%s13285_s28 + $0x174] sm:$0xf0] }
 0x3d3   :  { %4544 = vmatpush.bf16.msrb.mxu3 %v8983_v49  ;;  %v8963_v49 = vor.u32 %v10601_v58, %v8960_v48  ;;  %v8795_v4 = vor.u32 %v10558_v20, %v8792_v15  ;;  %v8855_v58 = vor.u32 %v10576_v26, %v8854_v21  ;;  %v8731_v48 = vor.u32 %v10542_v42, %v8728_v1  ;;  %v10560_v20 = vld [vmem:[%s13285_s28 + $0xf4] sm:$0xf0]  ;;  %v8758_v42 = vld [vmem:[%s13285_s28 + $0xa8] sm:$0xf] }
 0x3d6   :  { %4555 = vmatpush.bf16.msra.mxu0 %v9159_v34  ;;  %v3323_v14 = vpop.f32.mrf.mxu0  ;;  %v3337_v10 = vpop.f32.mrf.mxu1  ;;  %4461 = vmatpush.bf16.msra.mxu2 %v8963_v49  ;;  %v10588_v34 = vld [vmem:[%s13285_s28 + $0x1d4] sm:$0xf0] }
 0x3d7   :  { %4545 = vmatpush.bf16.msrb.mxu3 %v8967_v37  ;;  %v3324_v39 = vadd.f32 %v3323_v14, %v3309_v0  ;;  %v8903_v61 = vor.u32 %v10588_v34, %v8902_v50  ;;  %v3365_v0 = vpop.f32.mrf.mxu2  ;;  %v8744_v14 = vld [vmem:[%s13285_s28 + $0x98] sm:$0xf0]  ;;  %v10572_v49 = vld [vmem:[%s13285_s28 + $0x154] sm:$0xf0]  ;;  %v10530_v50 = vld [vmem:[%s13285_s28 + $0xc] sm:$0xf] }
 0x3d9   :  { %v3338_v36 = vadd.f32 %v3337_v10, %v3324_v39 }
 0x3da   :  { %4556 = vmatpush.bf16.msra.mxu0 %v9143_v47  ;;  %4462 = vmatpush.bf16.msra.mxu2 %v8947_v18  ;;  %v10584_v47 = vld [vmem:[%s13285_s28 + $0x1b4] sm:$0xf0] }
 0x3db   :  { %4546 = vmatpush.bf16.msrb.mxu3 %v8951_v44  ;;  %v3352_v43 = vadd.f32 %v3351_v27, %v3338_v36  ;;  %v8931_v44 = vor.u32 %v10593_v33, %v8928_v35  ;;  %v8887_v7 = vor.u32 %v10584_v47, %v8886_v23  ;;  %v10546_v27 = vld [vmem:[%s13285_s28 + $0x8c] sm:$0xf]  ;;  %v8774_v23 = vld [vmem:[%s13285_s28 + $0xc8] sm:$0xf] }
 0x3dc   :  { %v8747_v45 = vor.u32 %v10546_v27, %v8744_v14  ;;  %v10590_v35 = vld [vmem:[%s13285_s28 + $0x1ec] sm:$0xf] }
 0x3de   :  { %4557 = vmatpush.bf16.msra.mxu0 %v9127_v53  ;;  %v3325_v25 = vpop.f32.mrf.mxu0  ;;  %v3339_v51 = vpop.f32.mrf.mxu1  ;;  %4463 = vmatpush.bf16.msra.mxu2 %v8931_v44  ;;  %v10580_v53 = vld [vmem:[%s13285_s28 + $0x194] sm:$0xf0]  ;;  %v8680_v44 = vld [vmem:[%s13285_s28 + $0x18] sm:$0xf0] }
 0x3df   :  { %4547 = vmatpush.bf16.msrb.mxu3 %v8935_v9  ;;  %v3326_v24 = vadd.f32 %v3325_v25, %v3311_v3  ;;  %v10550_v9 = vld [vmem:[%s13285_s28 + $0xac] sm:$0xf]  ;;  %v8871_v10 = vor.u32 %v10580_v53, %v8870_v31  ;;  %v3367_v36 = vpop.f32.mrf.mxu2  ;;  %v8904_v31 = vld [vmem:[%s13285_s28 + $0x1d8] sm:$0xf0]  ;;  %v10708_v53 = vld [vmem:[%s13285_s28 + $0x594] sm:$0xf0] }
 0x3e0   :  { %v8763_v55 = vor.u32 %v10550_v9, %v8760_v38  ;;  %v8683_v38 = vor.u32 %v10530_v50, %v8680_v44  ;;  %v9334_v44 = vld [vmem:[%s13285_s28 + $0x528] sm:$0xf] }
 0x3e1   :  { %v3340_v37 = vadd.f32 %v3339_v51, %v3326_v24  ;;  %v13611_v51 = vld [vmem:[%s13285_s28 + $0x5a8] sm:$0x11]  ;;  %v8839_v24 = vor.u32 %v10572_v49, %v8838_v19 }
 0x3e2   :  { %4558 = vmatpush.bf16.msra.mxu0 %v9111_v52 }
 0x3e3   :  { %v3354_v5 = vadd.f32 %v3353_v22, %v3340_v37  ;;  %v10534_v22 = vld [vmem:[%s13285_s28 + $0x2c] sm:$0xf] }
 0x3e4   :  { %v3379_v60 = vpop.f32.mrf.mxu3  ;;  %v8699_v33 = vor.u32 %v10534_v22, %v8696_v41  ;;  %v10548_v22 = vld [vmem:[%s13285_s28 + $0x94] sm:$0xf0]  ;;  %v10578_v41 = vld [vmem:[%s13285_s28 + $0x18c] sm:$0xf] }
 0x3e5   :  { %v13585_v16 = vpack.c.bf16 %v3354_v5, %v3352_v43  ;;  %v3380_v3 = vadd.f32 %v3379_v60, %v3365_v0  ;;  %v3962_v43 = vunpack.c.l.b16 %v13611_v51  ;;  %v8823_v5 = vor.u32 %v10568_v11, %v8822_v40  ;;  %v9382_v60 = vld [vmem:[%s13285_s28 + $0x588] sm:$0xf] }
 0x3e6   :  { %4559 = vmatpush.bf16.msra.mxu0 %v9095_v2  ;;  %v8712_v2 = vld [vmem:[%s13285_s28 + $0x58] sm:$0xf0]  ;;  %v9383_v49 = vor.u32 %v10708_v53, %v9382_v60  ;;  %v8742_v11 = vld [vmem:[%s13285_s28 + $0x88] sm:$0xf]  ;;  %v10692_v60 = vld [vmem:[%s13285_s28 + $0x514] sm:$0xf0] }
 0x3e7   :  { %4408 = vmatmul.bf16.vlgmr.msra.gmra.mxu1 %v13585_v16  ;;  %4492 = vmatmul.bf16.vlgmr.msra.gmra.mxu3 %v13585_v16  ;;  %v8715_v46 = vor.u32 %v10538_v54, %v8712_v2  ;;  %v4146_v13 = vpack.c.b16 %v3962_v43, %v3962_v43  ;;  %v9366_v2 = vld [vmem:[%s13285_s28 + $0x568] sm:$0xf]  ;;  %v10666_v53 = vld [vmem:[%s13285_s28 + $0x44c] sm:$0xf] }
 0x3e8   :  { %4526 = vmatpush.bf16.msra.mxu1 %v8919_v56  ;;  %4596 = vmatpush.bf16.msra.mxu3 %v8795_v4  ;;  %v8806_v56 = vld [vmem:[%s13285_s28 + $0x108] sm:$0xf]  ;;  %v10564_v4 = vld [vmem:[%s13285_s28 + $0x114] sm:$0xf0] }
 0x3e9   :  { %v3407_v52 = vpop.f32.mrf.mxu1  ;;  %v8807_v9 = vor.u32 %v10564_v4, %v8806_v56  ;;  %v4339_v14 = vsel %vm4331_vm9, %v4146_v13, 0  ;;  %v8856_v56 = vld [vmem:[%s13285_s28 + $0x178] sm:$0xf0] }
 0x3ea   :  { %4560 = vmatpush.bf16.msra.mxu0 %v9079_v57  ;;  %v9240_v13 = vld [vmem:[%s13285_s28 + $0x478] sm:$0xf0] }
 0x3ec   :  { %4527 = vmatpush.bf16.msra.mxu1 %v8903_v61  ;;  %4597 = vmatpush.bf16.msra.mxu3 %v8779_v8  ;;  %v3381_v25 = vpop.f32.mrf.mxu3  ;;  %v8791_v61 = vor.u32 %v10560_v20, %v8790_v59  ;;  %v8923_v8 = vor.u32 %v10590_v35, %v8920_v32  ;;  %v10700_v59 = vld [vmem:[%s13285_s28 + $0x554] sm:$0xf0]  ;;  %v10674_v20 = vld [vmem:[%s13285_s28 + $0x48c] sm:$0xf] }
 0x3ed   :  { %v3382_v18 = vadd.f32 %v3381_v25, %v3367_v36  ;;  %v10678_v36 = vld [vmem:[%s13285_s28 + $0x4ac] sm:$0xf]  ;;  %v9272_v25 = vld [vmem:[%s13285_s28 + $0x4b8] sm:$0xf0]  ;;  %v10544_v35 = vld [vmem:[%s13285_s28 + $0x74] sm:$0xf0] }
 0x3ee   :  { %4561 = vmatpush.bf16.msra.mxu0 %v9063_v30  ;;  %v9304_v30 = vld [vmem:[%s13285_s28 + $0x4f8] sm:$0xf0]  ;;  %v9275_v43 = vor.u32 %v10678_v36, %v9272_v25  ;;  %v10574_v32 = vld [vmem:[%s13285_s28 + $0x16c] sm:$0xf] }
 0x3ef   :  { %v9307_v0 = vor.u32 %v10686_v29, %v9304_v30  ;;  %v8859_v30 = vor.u32 %v10574_v32, %v8856_v56  ;;  %v10618_v36 = vld [vmem:[%s13285_s28 + $0x2cc] sm:$0xf]  ;;  %v9032_v25 = vld [vmem:[%s13285_s28 + $0x2d8] sm:$0xf0]  ;;  %v9286_v32 = vld [vmem:[%s13285_s28 + $0x4c8] sm:$0xf] }
 0x3f0   :  { %4528 = vmatpush.bf16.msra.mxu1 %v8887_v7  ;;  %4598 = vmatpush.bf16.msra.mxu3 %v8763_v55  ;;  %v10556_v7 = vld [vmem:[%s13285_s28 + $0xd4] sm:$0xf0]  ;;  %v10586_v55 = vld [vmem:[%s13285_s28 + $0x1cc] sm:$0xf] }
 0x3f1   :  { %v3409_v15 = vpop.f32.mrf.mxu1  ;;  %v8775_v21 = vor.u32 %v10556_v7, %v8774_v23  ;;  %v8907_v26 = vor.u32 %v10586_v55, %v8904_v31  ;;  %v10570_v23 = vld [vmem:[%s13285_s28 + $0x14c] sm:$0xf]  ;;  %v9318_v31 = vld [vmem:[%s13285_s28 + $0x508] sm:$0xf]  ;;  %v10684_v56 = vld [vmem:[%s13285_s28 + $0x4d4] sm:$0xf0] }
 0x3f4   :  { %4529 = vmatpush.bf16.msra.mxu1 %v8871_v10  ;;  %4599 = vmatpush.bf16.msra.mxu3 %v8747_v45  ;;  %v10682_v10 = vld [vmem:[%s13285_s28 + $0x4cc] sm:$0xf]  ;;  %v9288_v45 = vld [vmem:[%s13285_s28 + $0x4d8] sm:$0xf0] }
 0x3f5   :  { %v4367_v27 = vpop.f32.mrf.mxu2  ;;  %v9291_v54 = vor.u32 %v10682_v10, %v9288_v45  ;;  %v10622_v45 = vld [vmem:[%s13285_s28 + $0x2ec] sm:$0xf] }
 0x3f6   :  { %v3393_v39 = vpop.f32.mrf.mxu0 }
 0x3f7   :  { %4478 = vmatmul.bf16.vlgmr.msrb.gmra.mxu1 %v13444_v63  ;;  %4548 = vmatmul.bf16.vlgmr.msrb.gmra.mxu3 %v13407_v17  ;;  %v3394_v62 = vadd.f32 %v3393_v39, %v3380_v3  ;;  %v10552_v39 = vld [vmem:[%s13285_s28 + $0xb4] sm:$0xf0] }
 0x3f8   :  { %4530 = vmatpush.bf16.msra.mxu1 %v8855_v58  ;;  %4600 = vmatpush.bf16.msra.mxu3 %v8731_v48  ;;  %v10582_v58 = vld [vmem:[%s13285_s28 + $0x1ac] sm:$0xf]  ;;  %v8888_v48 = vld [vmem:[%s13285_s28 + $0x1b8] sm:$0xf0]  ;;  %v10704_v3 = vld [vmem:[%s13285_s28 + $0x574] sm:$0xf0] }
 0x3f9   :  { %v3408_v28 = vadd.f32 %v3407_v52, %v3394_v62  ;;  %v8891_v40 = vor.u32 %v10582_v58, %v8888_v48  ;;  %v9367_v62 = vor.u32 %v10704_v3, %v9366_v2  ;;  %v3963_v48 = vunpack.c.h.b16 %v13611_v51 }
 0x3fc   :  { %4531 = vmatpush.bf16.msra.mxu1 %v8839_v24  ;;  %4601 = vmatpush.bf16.msra.mxu3 %v8715_v46  ;;  %v8759_v46 = vor.u32 %v10552_v39, %v8758_v42  ;;  %v10536_v42 = vld [vmem:[%s13285_s28 + $0x34] sm:$0xf0]  ;;  %v9319_v39 = vor.u32 %v10692_v60, %v9318_v31 }
 0x3fd   :  { %v10676_v60 = vld [vmem:[%s13285_s28 + $0x494] sm:$0xf0] }
 0x3fe   :  { %v3395_v37 = vpop.f32.mrf.mxu0 }
 0x3ff   :  { %v3396_v57 = vadd.f32 %v3395_v37, %v3382_v18  ;;  %v8872_v18 = vld [vmem:[%s13285_s28 + $0x198] sm:$0xf0]  ;;  %v9350_v37 = vld [vmem:[%s13285_s28 + $0x548] sm:$0xf] }
 0x400   :  { %4532 = vmatpush.bf16.msra.mxu1 %v8823_v5  ;;  %4602 = vmatpush.bf16.msra.mxu3 %v8699_v33  ;;  %v8875_v5 = vor.u32 %v10578_v41, %v8872_v18  ;;  %v8726_v33 = vld [vmem:[%s13285_s28 + $0x68] sm:$0xf]  ;;  %v9351_v4 = vor.u32 %v10700_v59, %v9350_v37  ;;  %v10688_v41 = vld [vmem:[%s13285_s28 + $0x4f4] sm:$0xf0]  ;;  %v4147_v18 = vpack.c.b16 %v3963_v48, %v3963_v48  ;;  %v9192_v37 = vld [vmem:[%s13285_s28 + $0x418] sm:$0xf0] }
 0x401   :  { %v3410_v34 = vadd.f32 %v3409_v15, %v3396_v57  ;;  %v9256_v15 = vld [vmem:[%s13285_s28 + $0x498] sm:$0xf0]  ;;  %v8743_v57 = vor.u32 %v10548_v22, %v8742_v11  ;;  %v8727_v29 = vor.u32 %v10544_v35, %v8726_v33  ;;  %v9302_v22 = vld [vmem:[%s13285_s28 + $0x4e8] sm:$0xf] }
 0x402   :  { %v9259_v50 = vor.u32 %v10674_v20, %v9256_v15  ;;  %v8808_v11 = vld [vmem:[%s13285_s28 + $0x118] sm:$0xf0]  ;;  %v10614_v15 = vld [vmem:[%s13285_s28 + $0x2ac] sm:$0xf]  ;;  %v4342_v33 = vsel %vm4331_vm9, %v4147_v18, 0  ;;  %vm15426_vm9 = vcmask 1043456  }
 0x403   :  { %v13629_v47 = vpack.c.bf16 %v3410_v34, %v3408_v28  ;;  %v10696_v28 = vld [vmem:[%s13285_s28 + $0x534] sm:$0xf0]  ;;  %v10670_v34 = vld [vmem:[%s13285_s28 + $0x46c] sm:$0xf]  ;;  %v8952_v48 = vld [vmem:[%s13285_s28 + $0x238] sm:$0xf0] }
 0x404   :  { %4533 = vmatpush.bf16.msra.mxu1 %v8807_v9  ;;  %4603 = vmatpush.bf16.msra.mxu3 %v8683_v38  ;;  %v8840_v9 = vld [vmem:[%s13285_s28 + $0x158] sm:$0xf0]  ;;  %v9335_v7 = vor.u32 %v10696_v28, %v9334_v44  ;;  %v9243_v55 = vor.u32 %v10670_v34, %v9240_v13  ;;  %v10610_v28 = vld [vmem:[%s13285_s28 + $0x28c] sm:$0xf]  ;;  %v9287_v13 = vor.u32 %v10684_v56, %v9286_v32 }
 0x405   :  { %9388 = vmatmul.msk.bf16.vlgmr.msrb.gmra.mxu2 %vm657_vm10, %v13629_v47  ;;  %9389 = vmatmul.msk.bf16.vlgmr.msrb.gmra.mxu0 %vm657_vm10, %v13629_v47  ;;  %v4381_v52 = vpop.f32.mrf.mxu3  ;;  %v8843_v10 = vor.u32 %v10570_v23, %v8840_v9  ;;  %v9384_v44 = vld [vmem:[%s13285_s28 + $0x598] sm:$0xf0]  ;;  %v10702_v23 = vld [vmem:[%s13285_s28 + $0x56c] sm:$0xf] }
 0x406   :  { %4512 = vmatpush.bf16.msrb.mxu2 %v8791_v61  ;;  %4610 = vmatpush.bf16.msrb.mxu0 %v8923_v8  ;;  %v8710_v61 = vld [vmem:[%s13285_s28 + $0x48] sm:$0xf]  ;;  %v10540_v8 = vld [vmem:[%s13285_s28 + $0x54] sm:$0xf0]  ;;  %v9000_v34 = vld [vmem:[%s13285_s28 + $0x298] sm:$0xf0] }
 0x407   :  { %v4353_v1 = vpop.f32.mrf.mxu1  ;;  %4534 = vmatmul.bf16.vlgmr.msra.gmra.mxu1 %v13366_v12  ;;  %4604 = vmatmul.bf16.vlgmr.msra.gmra.mxu3 %v13425_v6  ;;  %v9368_v9 = vld [vmem:[%s13285_s28 + $0x578] sm:$0xf0]  ;;  %v10642_v56 = vld [vmem:[%s13285_s28 + $0x38c] sm:$0xf] }
 0x408   :  { %v4368_v19 = vadd.f32 %v4367_v27, %v4353_v1  ;;  %4584 = vmatpush.bf16.msrb.mxu1 %v4339_v14  ;;  %4652 = vmatpush.bf16.msrb.mxu3 %v9307_v0  ;;  %v9224_v27 = vld [vmem:[%s13285_s28 + $0x458] sm:$0xf0]  ;;  %v8711_v14 = vor.u32 %v10540_v8, %v8710_v61  ;;  %v10566_v1 = vld [vmem:[%s13285_s28 + $0x12c] sm:$0xf]  ;;  %v10680_v61 = vld [vmem:[%s13285_s28 + $0x4b4] sm:$0xf0]  ;;  %v9003_v8 = vor.u32 %v10610_v28, %v9000_v34 }
 0x409   :  { %v9227_v58 = vor.u32 %v10666_v53, %v9224_v27  ;;  %v9371_v31 = vor.u32 %v10702_v23, %v9368_v9  ;;  %v10698_v27 = vld [vmem:[%s13285_s28 + $0x54c] sm:$0xf]  ;;  %v9144_v32 = vld [vmem:[%s13285_s28 + $0x3b8] sm:$0xf0] }
 0x40a   :  { %v4382_v24 = vadd.f32 %v4381_v52, %v4368_v19  ;;  %4513 = vmatpush.bf16.msrb.mxu2 %v8775_v21  ;;  %4611 = vmatpush.bf16.msrb.mxu0 %v8907_v26  ;;  %v9048_v21 = vld [vmem:[%s13285_s28 + $0x2f8] sm:$0xf0]  ;;  %v8694_v26 = vld [vmem:[%s13285_s28 + $0x28] sm:$0xf]  ;;  %v10634_v34 = vld [vmem:[%s13285_s28 + $0x34c] sm:$0xf] }
 0x40b   :  { %v8824_v52 = vld [vmem:[%s13285_s28 + $0x138] sm:$0xf0]  ;;  %v9051_v19 = vor.u32 %v10622_v45, %v9048_v21  ;;  %v8695_v2 = vor.u32 %v10536_v42, %v8694_v26  ;;  %v9238_v26 = vld [vmem:[%s13285_s28 + $0x468] sm:$0xf]  ;;  %v10672_v42 = vld [vmem:[%s13285_s28 + $0x474] sm:$0xf0] }
 0x40c   :  { %4585 = vmatpush.bf16.msrb.mxu1 %v9383_v49  ;;  %4653 = vmatpush.bf16.msrb.mxu3 %v9291_v54  ;;  %v10662_v49 = vld [vmem:[%s13285_s28 + $0x42c] sm:$0xf]  ;;  %v9208_v54 = vld [vmem:[%s13285_s28 + $0x438] sm:$0xf0]  ;;  %v8827_v3 = vor.u32 %v10566_v1, %v8824_v52 }
 0x40d   :  { %v9211_v51 = vor.u32 %v10662_v49, %v9208_v54  ;;  %v10694_v52 = vld [vmem:[%s13285_s28 + $0x52c] sm:$0xf]  ;;  %v9222_v54 = vld [vmem:[%s13285_s28 + $0x448] sm:$0xf]  ;;  %v9064_v23 = vld [vmem:[%s13285_s28 + $0x318] sm:$0xf0] }
 0x40e   :  { %4514 = vmatpush.bf16.msrb.mxu2 %v8759_v46  ;;  %4612 = vmatpush.bf16.msrb.mxu0 %v8891_v40  ;;  %v10532_v46 = vld [vmem:[%s13285_s28 + $0x14] sm:$0xf0]  ;;  %v10562_v40 = vld [vmem:[%s13285_s28 + $0x10c] sm:$0xf] }
 0x40f   :  { %v8811_v20 = vor.u32 %v10562_v40, %v8808_v11 }
 0x410   :  { %4586 = vmatpush.bf16.msrb.mxu1 %v9367_v62  ;;  %4654 = vmatpush.bf16.msrb.mxu3 %v9275_v43  ;;  %v9035_v62 = vor.u32 %v10618_v36, %v9032_v25  ;;  %v10658_v43 = vld [vmem:[%s13285_s28 + $0x40c] sm:$0xf]  ;;  %v9320_v25 = vld [vmem:[%s13285_s28 + $0x518] sm:$0xf0] }
 0x411   :  { %v9195_v35 = vor.u32 %v10658_v43, %v9192_v37  ;;  %v10690_v36 = vld [vmem:[%s13285_s28 + $0x50c] sm:$0xf]  ;;  %v10660_v43 = vld [vmem:[%s13285_s28 + $0x414] sm:$0xf0] }
 0x412   :  { %4515 = vmatpush.bf16.msrb.mxu2 %v8743_v57  ;;  %4613 = vmatpush.bf16.msrb.mxu0 %v8875_v5  ;;  %v9016_v57 = vld [vmem:[%s13285_s28 + $0x2b8] sm:$0xf0]  ;;  %v9303_v5 = vor.u32 %v10688_v41, %v9302_v22  ;;  %v9323_v11 = vor.u32 %v10690_v36, %v9320_v25  ;;  %v10664_v22 = vld [vmem:[%s13285_s28 + $0x434] sm:$0xf0]  ;;  %v10654_v37 = vld [vmem:[%s13285_s28 + $0x3ec] sm:$0xf] }
 0x414   :  { %4587 = vmatpush.bf16.msrb.mxu1 %v9351_v4  ;;  %4655 = vmatpush.bf16.msrb.mxu3 %v9259_v50  ;;  %v9019_v4 = vor.u32 %v10614_v15, %v9016_v57  ;;  %v10706_v50 = vld [vmem:[%s13285_s28 + $0x58c] sm:$0xf] }
 0x415   :  { %4464 = vmatmul.bf16.vlgmr.msra.gmra.mxu2 %v13407_v17  ;;  %4562 = vmatmul.bf16.vlgmr.msra.gmra.mxu0 %v13444_v63  ;;  %v10650_v57 = vld [vmem:[%s13285_s28 + $0x3cc] sm:$0xf] }
 0x416   :  { %v4395_v38 = vpop.f32.mrf.mxu0  ;;  %4516 = vmatpush.bf16.msrb.mxu2 %v8727_v29  ;;  %4614 = vmatpush.bf16.msrb.mxu0 %v8859_v30  ;;  %v9387_v29 = vor.u32 %v10706_v50, %v9384_v44  ;;  %v9270_v30 = vld [vmem:[%s13285_s28 + $0x4a8] sm:$0xf]  ;;  %v10638_v50 = vld [vmem:[%s13285_s28 + $0x36c] sm:$0xf]  ;;  %v9112_v44 = vld [vmem:[%s13285_s28 + $0x378] sm:$0xf0] }
 0x417   :  { %v13674_v0 = vadd.f32 %v4395_v38, %v4382_v24  ;;  %v8678_v24 = vld [vmem:[%s13285_s28 + $0x8] sm:$0xf]  ;;  %v10606_v38 = vld [vmem:[%s13285_s28 + $0x26c] sm:$0xf]  ;;  %v9115_v28 = vor.u32 %v10638_v50, %v9112_v44 }
 0x418   :  { %4588 = vmatpush.bf16.msrb.mxu1 %v9335_v7  ;;  %4656 = vmatpush.bf16.msrb.mxu3 %v9243_v55  ;;  %v8679_v59 = vor.u32 %v10532_v46, %v8678_v24  ;;  %v8984_v7 = vld [vmem:[%s13285_s28 + $0x278] sm:$0xf0]  ;;  %v9271_v55 = vor.u32 %v10680_v61, %v9270_v30  ;;  %v10594_v24 = vld [vmem:[%s13285_s28 + $0x20c] sm:$0xf] }
 0x419   :  { %v8987_v53 = vor.u32 %v10606_v38, %v8984_v7  ;;  %v8936_v46 = vld [vmem:[%s13285_s28 + $0x218] sm:$0xf0]  ;;  %v10630_v30 = vld [vmem:[%s13285_s28 + $0x32c] sm:$0xf]  ;;  %v4355_v38 = vpop.f32.mrf.mxu1 }
 0x41a   :  { %4517 = vmatpush.bf16.msrb.mxu2 %v8711_v14  ;;  %4615 = vmatpush.bf16.msrb.mxu0 %v8843_v10  ;;  %v10602_v14 = vld [vmem:[%s13285_s28 + $0x24c] sm:$0xf]  ;;  %v8968_v10 = vld [vmem:[%s13285_s28 + $0x258] sm:$0xf0]  ;;  %v8939_v41 = vor.u32 %v10594_v24, %v8936_v46 }
 0x41b   :  { %v8971_v1 = vor.u32 %v10602_v14, %v8968_v10  ;;  %v9080_v61 = vld [vmem:[%s13285_s28 + $0x338] sm:$0xf0] }
 0x41c   :  { %4589 = vmatpush.bf16.msrb.mxu1 %v9319_v39  ;;  %4657 = vmatpush.bf16.msrb.mxu3 %v9227_v58  ;;  %v9336_v39 = vld [vmem:[%s13285_s28 + $0x538] sm:$0xf0]  ;;  %v10598_v58 = vld [vmem:[%s13285_s28 + $0x22c] sm:$0xf] }
 0x41d   :  { %v9339_v49 = vor.u32 %v10694_v52, %v9336_v39 }
 0x41e   :  { %4518 = vmatpush.bf16.msrb.mxu2 %v8695_v2  ;;  %4616 = vmatpush.bf16.msrb.mxu0 %v8827_v3  ;;  %v10668_v2 = vld [vmem:[%s13285_s28 + $0x454] sm:$0xf0]  ;;  %v8955_v3 = vor.u32 %v10598_v58, %v8952_v48 }
 0x41f   :  { %9390 = vmatmul.msk.bf16.vlgmr.msrb.gmra.mxu1 %vm657_vm10, %v13629_v47  ;;  %v9223_v40 = vor.u32 %v10668_v2, %v9222_v54 }
 0x420   :  { %4624 = vmatpush.bf16.msra.mxu1 %v9051_v19  ;;  %4658 = vmatpush.bf16.msrb.mxu3 %v9211_v51  ;;  %v9239_v19 = vor.u32 %v10672_v42, %v9238_v26  ;;  %v9206_v51 = vld [vmem:[%s13285_s28 + $0x428] sm:$0xf] }
 0x421   :  { %v9207_v18 = vor.u32 %v10664_v22, %v9206_v51 }
 0x422   :  { %4519 = vmatpush.bf16.msrb.mxu2 %v8679_v59  ;;  %4617 = vmatpush.bf16.msrb.mxu0 %v8811_v20  ;;  %v9176_v59 = vld [vmem:[%s13285_s28 + $0x3f8] sm:$0xf0] }
 0x423   :  { %v9179_v15 = vor.u32 %v10654_v37, %v9176_v59 }
 0x424   :  { %4625 = vmatpush.bf16.msra.mxu1 %v9035_v62  ;;  %4659 = vmatpush.bf16.msrb.mxu3 %v9195_v35  ;;  %v9190_v62 = vld [vmem:[%s13285_s28 + $0x408] sm:$0xf]  ;;  %v10646_v35 = vld [vmem:[%s13285_s28 + $0x3ac] sm:$0xf] }
 0x425   :  { %4520 = vmatmul.bf16.vlgmr.msrb.gmra.mxu2 %v13425_v6  ;;  %4618 = vmatmul.bf16.vlgmr.msrb.gmra.mxu0 %v13366_v12  ;;  %v9254_v6 = vld [vmem:[%s13285_s28 + $0x488] sm:$0xf]  ;;  %v9352_v12 = vld [vmem:[%s13285_s28 + $0x558] sm:$0xf0]  ;;  %v9191_v20 = vor.u32 %v10660_v43, %v9190_v62 }
 0x426   :  { %4568 = vmatpush.bf16.msra.mxu2 %v9303_v5  ;;  %4668 = vmatpush.bf16.msra.mxu0 %v4342_v33  ;;  %v9255_v45 = vor.u32 %v10676_v60, %v9254_v6  ;;  %v9355_v21 = vor.u32 %v10698_v27, %v9352_v12  ;;  %v9160_v5 = vld [vmem:[%s13285_s28 + $0x3d8] sm:$0xf0]  ;;  %v4397_v27 = vpop.f32.mrf.mxu0 }
 0x427   :  { %4660 = vmatmul.bf16.vlgmr.msrb.gmra.mxu3 %v13585_v16  ;;  %v9163_v33 = vor.u32 %v10650_v57, %v9160_v5 }
 0x428   :  { %4626 = vmatpush.bf16.msra.mxu1 %v9019_v4 }
 0x42a   :  { %4569 = vmatpush.bf16.msra.mxu2 %v9287_v13  ;;  %4669 = vmatpush.bf16.msra.mxu0 %v9387_v29  ;;  %v9096_v13 = vld [vmem:[%s13285_s28 + $0x358] sm:$0xf0] }
 0x42b   :  { %v9099_v29 = vor.u32 %v10634_v34, %v9096_v13 }
 0x42c   :  { %4627 = vmatpush.bf16.msra.mxu1 %v9003_v8  ;;  %v10626_v8 = vld [vmem:[%s13285_s28 + $0x30c] sm:$0xf] }
 0x42d   :  { %v9067_v9 = vor.u32 %v10626_v8, %v9064_v23 }
 0x42e   :  { %4570 = vmatpush.bf16.msra.mxu2 %v9271_v55  ;;  %4670 = vmatpush.bf16.msra.mxu0 %v9371_v31  ;;  %v4369_v31 = vpop.f32.mrf.mxu2 }
 0x430   :  { %4628 = vmatpush.bf16.msra.mxu1 %v8987_v53  ;;  %v4383_v53 = vpop.f32.mrf.mxu3 }
 0x432   :  { %4571 = vmatpush.bf16.msra.mxu2 %v9255_v45  ;;  %4671 = vmatpush.bf16.msra.mxu0 %v9355_v21 }
 0x434   :  { %4629 = vmatpush.bf16.msra.mxu1 %v8971_v1 }
 0x436   :  { %4572 = vmatpush.bf16.msra.mxu2 %v9239_v19  ;;  %4672 = vmatpush.bf16.msra.mxu0 %v9339_v49  ;;  %v4451_v14 = vpop.f32.mrf.mxu0 }
 0x438   :  { %4630 = vmatpush.bf16.msra.mxu1 %v8955_v3  ;;  %v4437_v12 = vpop.f32.mrf.mxu3 }
 0x439   :  { %v4452_v22 = vadd.f32 %v4451_v14, %v4437_v12 }
 0x43a   :  { %4573 = vmatpush.bf16.msra.mxu2 %v9223_v40  ;;  %4673 = vmatpush.bf16.msra.mxu0 %v9323_v11 }
 0x43c   :  { %4631 = vmatpush.bf16.msra.mxu1 %v8939_v41 }
 0x43d   :  { %9391 = vmatmul.msk.bf16.vlgmr.msra.gmra.mxu0 %vm657_vm10, %v13629_v47  ;;  %v9147_v47 = vor.u32 %v10646_v35, %v9144_v32 }
 0x43e   :  { %4574 = vmatpush.bf16.msra.mxu2 %v9207_v18  ;;  %v4453_v26 = vpop.f32.mrf.mxu0 }
 0x43f   :  { %4632 = vmatmul.bf16.vlgmr.msra.gmra.mxu1 %v13407_v17  ;;  %v9128_v17 = vld [vmem:[%s13285_s28 + $0x398] sm:$0xf0]  ;;  %s14350_s28 = sld [smem:[%s15267_s0 + %s11354_s25]]   ;;  %s11361_s25 = smov 117  }
 0x440   :  { %v9131_v4 = vor.u32 %v10642_v56, %v9128_v17  ;;  %v4439_v45 = vpop.f32.mrf.mxu3 }
 0x442   :  { %4575 = vmatpush.bf16.msra.mxu2 %v9191_v20 }
 0x445   :  { %4576 = vmatmul.bf16.vlgmr.msra.gmra.mxu2 %v13585_v16  ;;  %v9083_v16 = vor.u32 %v10630_v30, %v9080_v61 }
 0x446   :  { %4638 = vmatpush.bf16.msrb.mxu2 %v9179_v15  ;;  %v4454_v15 = vadd.f32 %v4453_v26, %v4439_v45 }
 0x44a   :  { %4639 = vmatpush.bf16.msrb.mxu2 %v9163_v33 }
 0x44e   :  { %4640 = vmatpush.bf16.msrb.mxu2 %v9147_v47 }
 0x452   :  { %4641 = vmatpush.bf16.msrb.mxu2 %v9131_v4  ;;  %v4370_v4 = vadd.f32 %v4369_v31, %v4355_v38 }
 0x456   :  { %4642 = vmatpush.bf16.msrb.mxu2 %v9115_v28 }
 0x45a   :  { %4643 = vmatpush.bf16.msrb.mxu2 %v9099_v29 }
 0x45e   :  { %4644 = vmatpush.bf16.msrb.mxu2 %v9083_v16  ;;  %v4384_v16 = vadd.f32 %v4383_v53, %v4370_v4  ;;  %v10802_v4 = vld [vmem:[%s13798_s15 + $0x2e4] sm:$0xf0] }
 0x462   :  { %4645 = vmatpush.bf16.msrb.mxu2 %v9067_v9 }
 0x464   :  { %v4409_v7 = vpop.f32.mrf.mxu1 }
 0x465   :  { %4646 = vmatmul.bf16.vlgmr.msrb.gmra.mxu2 %v13444_v63  ;;  %v4410_v55 = vadd.f32 %v4409_v7, %v13674_v0 }
 0x46a   :  { %v4493_v1 = vpop.f32.mrf.mxu3 }
 0x46c   :  { %v4411_v10 = vpop.f32.mrf.mxu1 }
 0x472   :  { %v4495_v58 = vpop.f32.mrf.mxu3 }
 0x474   :  { %v4479_v42 = vpop.f32.mrf.mxu1 }
 0x47a   :  { %v4549_v49 = vpop.f32.mrf.mxu3 }
 0x47c   :  { %v4481_v39 = vpop.f32.mrf.mxu1 }
 0x482   :  { %v4507_v52 = vpop.f32.mrf.mxu0  ;;  %v4551_v36 = vpop.f32.mrf.mxu3 }
 0x484   :  { %v4535_v19 = vpop.f32.mrf.mxu1 }
 0x488   :  { %v4423_v6 = vpop.f32.mrf.mxu2 }
 0x489   :  { %v13764_v60 = vadd.f32 %v4423_v6, %v4410_v55  ;;  %v4398_v6 = vadd.f32 %v4397_v27, %v4384_v16  ;;  %v9538_v16 = vld [vmem:[%s13798_s15 + $0x120] sm:$0xf] }
 0x48a   :  { %v4509_v0 = vpop.f32.mrf.mxu0  ;;  %v4605_v40 = vpop.f32.mrf.mxu3 }
 0x48b   :  { %v4412_v26 = vadd.f32 %v4411_v10, %v4398_v6  ;;  %v369_v10 = vld [vmem:[%s13773_s2] sm:$0xff] }
 0x48c   :  { %v4537_v3 = vpop.f32.mrf.mxu1 }
 0x490   :  { %v13766_v21 = vpop.f32.mrf.mxu2 }
 0x492   :  { %v4563_v54 = vpop.f32.mrf.mxu0  ;;  %v4607_v59 = vpop.f32.mrf.mxu3 }
 0x498   :  { %v4465_v63 = vpop.f32.mrf.mxu2 }
 0x499   :  { %v4466_v18 = vadd.f32 %v4465_v63, %v4452_v22 }
 0x49a   :  { %v4565_v25 = vpop.f32.mrf.mxu0 }
 0x49b   :  { %v4480_v43 = vadd.f32 %v4479_v42, %v4466_v18 }
 0x49c   :  { %v4591_v46 = vpop.f32.mrf.mxu1 }
 0x49d   :  { %v4494_v33 = vadd.f32 %v4493_v1, %v4480_v43 }
 0x49f   :  { %v4508_v50 = vadd.f32 %v4507_v52, %v4494_v33 }
 0x4a0   :  { %v4467_v48 = vpop.f32.mrf.mxu2 }
 0x4a1   :  { %v4468_v35 = vadd.f32 %v4467_v48, %v4454_v15  ;;  %v4680_v9 = vadd.f32 %v4508_v50, %v13764_v60 }
 0x4a2   :  { %v4619_v51 = vpop.f32.mrf.mxu0 }
 0x4a3   :  { %v4620_v56 = vadd.f32 %v4619_v51, %v4605_v40  ;;  %v4482_v44 = vadd.f32 %v4481_v39, %v4468_v35  ;;  %v4426_v39 = vadd.f32 %v13766_v21, %v4412_v26  ;;  %v11348_v21 = vmov 0  }
 0x4a4   :  { %v4593_v41 = vpop.f32.mrf.mxu1  ;;  %11058 = vset.pattern.permute.xlu1 %v11348_v21  ;;  %11060 = vset.pattern.permute.xlu0 %v11348_v21 }
 0x4a5   :  { %v4496_v23 = vadd.f32 %v4495_v58, %v4482_v44  ;;  %11059 = vset.pattern.permute.xlu2 %v11348_v21  ;;  %v10850_v44 = vld [vmem:[%s13798_s15 + $0x464] sm:$0xf0] }
 0x4a7   :  { %v4510_v42 = vadd.f32 %v4509_v0, %v4496_v23  ;;  %v372_v0 = vld [vmem:[%s13778_s6 + $0x8] sm:$0xff] }
 0x4a8   :  { %v4521_v2 = vpop.f32.mrf.mxu2 }
 0x4a9   :  { %v4536_v62 = vadd.f32 %v4535_v19, %v4521_v2  ;;  %v4685_v19 = vadd.f32 %v4510_v42, %v4426_v39 }
 0x4aa   :  { %v4621_v57 = vpop.f32.mrf.mxu0  ;;  %v4661_v13 = vpop.f32.mrf.mxu3 }
 0x4ab   :  { %v4550_v37 = vadd.f32 %v4549_v49, %v4536_v62  ;;  %v4622_v14 = vadd.f32 %v4621_v57, %v4607_v59 }
 0x4ad   :  { %v4564_v47 = vadd.f32 %v4563_v54, %v4550_v37 }
 0x4b0   :  { %v4523_v24 = vpop.f32.mrf.mxu2 }
 0x4b1   :  { %v4538_v32 = vadd.f32 %v4537_v3, %v4523_v24 }
 0x4b2   :  { %v4663_v58 = vpop.f32.mrf.mxu3 }
 0x4b3   :  { %v4552_v28 = vadd.f32 %v4551_v36, %v4538_v32  ;;  %v9562_v32 = vld [vmem:[%s13798_s15 + $0x150] sm:$0xf] }
 0x4b5   :  { %v4566_v7 = vadd.f32 %v4565_v25, %v4552_v28 }
 0x4ba   :  { %v4675_v8 = vpop.f32.mrf.mxu0 }
 0x4bc   :  { %v4633_v5 = vpop.f32.mrf.mxu1 }
 0x4bd   :  { %v4634_v34 = vadd.f32 %v4633_v5, %v4620_v56  ;;  %v9754_v56 = vld [vmem:[%s13798_s15 + $0x2d0] sm:$0xf] }
 0x4c2   :  { %v4677_v54 = vpop.f32.mrf.mxu0 }
 0x4c4   :  { %v4635_v12 = vpop.f32.mrf.mxu1 }
 0x4c5   :  { %v4636_v1 = vadd.f32 %v4635_v12, %v4622_v14 }
 0x4c8   :  { %v4577_v11 = vpop.f32.mrf.mxu2 }
 0x4c9   :  { %v4578_v17 = vadd.f32 %v4577_v11, %v4564_v47  ;;  %v10754_v47 = vld [vmem:[%s13798_s15 + $0x164] sm:$0xf0] }
 0x4cb   :  { %v4592_v30 = vadd.f32 %v4591_v46, %v4578_v17  ;;  %v9563_v17 = vor.u32 %v10754_v47, %v9562_v32  ;;  %v10778_v32 = vld [vmem:[%s13798_s15 + $0x224] sm:$0xf0]  ;;  %v9850_v47 = vld [vmem:[%s13798_s15 + $0x390] sm:$0xf] }
 0x4cd   :  { %v4681_v45 = vadd.f32 %v4680_v9, %v4592_v30  ;;  %5758 = vmatpush.bf16.msrb.mxu1 %v9563_v17  ;;  %v10748_v9 = vld [vmem:[%s13798_s15 + $0x134] sm:$0xf0]  ;;  %v10042_v17 = vld [vmem:[%s13798_s15 + $0x510] sm:$0xf] }
 0x4ce   :  { %v9539_v12 = vor.u32 %v10748_v9, %v9538_v16  ;;  %v9634_v16 = vld [vmem:[%s13798_s15 + $0x1e0] sm:$0xf] }
 0x4cf   :  { %v9826_v9 = vld [vmem:[%s13798_s15 + $0x360] sm:$0xf] }
 0x4d0   :  { %v4579_v20 = vpop.f32.mrf.mxu2 }
 0x4d1   :  { %v4580_v38 = vadd.f32 %v4579_v20, %v4566_v7  ;;  %v9730_v7 = vld [vmem:[%s13798_s15 + $0x2a0] sm:$0xf]  ;;  %5759 = vmatpush.bf16.msrb.mxu1 %v9539_v12 }
 0x4d2   :  { %v10018_v12 = vld [vmem:[%s13798_s15 + $0x4e0] sm:$0xf] }
 0x4d3   :  { %v4594_v53 = vadd.f32 %v4593_v41, %v4580_v38  ;;  %v10844_v38 = vld [vmem:[%s13798_s15 + $0x434] sm:$0xf0] }
 0x4d5   :  { %v4686_v27 = vadd.f32 %v4685_v19, %v4594_v53 }
 0x4e8   :  { %v4647_v29 = vpop.f32.mrf.mxu2 }
 0x4e9   :  { %v4648_v61 = vadd.f32 %v4647_v29, %v4634_v34 }
 0x4eb   :  { %v4662_v55 = vadd.f32 %v4661_v13, %v4648_v61  ;;  %v9755_v13 = vor.u32 %v10802_v4, %v9754_v56  ;;  %v10898_v61 = vld [vmem:[%s13798_s15 + $0x5e4] sm:$0xf0] }
 0x4ec   :  { %v10826_v56 = vld [vmem:[%s13798_s15 + $0x3a4] sm:$0xf0] }
 0x4ed   :  { %v4676_v31 = vadd.f32 %v4675_v8, %v4662_v55  ;;  %v10796_v55 = vld [vmem:[%s13798_s15 + $0x2b4] sm:$0xf0]  ;;  %5772 = vmatpush.bf16.msra.mxu2 %v9755_v13  ;;  %v10874_v4 = vld [vmem:[%s13798_s15 + $0x524] sm:$0xf0] }
 0x4ee   :  { %v9731_v14 = vor.u32 %v10796_v55, %v9730_v7  ;;  %v10043_v13 = vor.u32 %v10874_v4, %v10042_v17  ;;  %v10820_v7 = vld [vmem:[%s13798_s15 + $0x374] sm:$0xf0]  ;;  %v9540_v17 = vld [vmem:[%s13798_s15 + $0x138] sm:$0xf0] }
 0x4ef   :  { %v4682_v52 = vadd.f32 %v4681_v45, %v4676_v31  ;;  %v9922_v45 = vld [vmem:[%s13798_s15 + $0x420] sm:$0xf] }
 0x4f0   :  { %v4649_v63 = vpop.f32.mrf.mxu2  ;;  %v9923_v26 = vor.u32 %v10844_v38, %v9922_v45  ;;  %v9418_v38 = vld [vmem:[%s13798_s15 + $0x30] sm:$0xf] }
 0x4f1   :  { %v4650_v48 = vadd.f32 %v4649_v63, %v4636_v1  ;;  %4683 = vadd.xlane.f32.xlu1 %v4682_v52  ;;  %v9514_v1 = vld [vmem:[%s13798_s15 + $0xf0] sm:$0xf]  ;;  %v10742_v52 = vld [vmem:[%s13798_s15 + $0x104] sm:$0xf0]  ;;  %5773 = vmatpush.bf16.msra.mxu2 %v9731_v14  ;;  %v10868_v14 = vld [vmem:[%s13798_s15 + $0x4f4] sm:$0xf0] }
 0x4f2   :  { %v9515_v19 = vor.u32 %v10742_v52, %v9514_v1  ;;  %v10019_v45 = vor.u32 %v10868_v14, %v10018_v12  ;;  %v10766_v1 = vld [vmem:[%s13798_s15 + $0x1c4] sm:$0xf0]  ;;  %v9802_v52 = vld [vmem:[%s13798_s15 + $0x330] sm:$0xf]  ;;  %v10835_v12 = vld [vmem:[%s13798_s15 + $0x3f4] sm:$0xf] }
 0x4f3   :  { %v4664_v49 = vadd.f32 %v4663_v58, %v4650_v48  ;;  %v10790_v48 = vld [vmem:[%s13798_s15 + $0x284] sm:$0xf0]  ;;  %v9898_v58 = vld [vmem:[%s13798_s15 + $0x3f0] sm:$0xf]  ;;  %v9900_v14 = vld [vmem:[%s13798_s15 + $0x408] sm:$0xf0] }
 0x4f4   :  { %5760 = vmatpush.bf16.msrb.mxu1 %v9515_v19 }
 0x4f5   :  { %v4678_v2 = vadd.f32 %v4677_v54, %v4664_v49  ;;  %v10838_v49 = vld [vmem:[%s13798_s15 + $0x404] sm:$0xf0]  ;;  %v10090_v54 = vld [vmem:[%s13798_s15 + $0x570] sm:$0xf] }
 0x4f6   :  { %v9899_v21 = vor.u32 %v10838_v49, %v9898_v58  ;;  %v10862_v58 = vld [vmem:[%s13798_s15 + $0x4c4] sm:$0xf0]  ;;  %v9394_v49 = vld [vmem:[%s13798_s15] sm:$0xf] }
 0x4f7   :  { %v4687_v3 = vadd.f32 %v4686_v27, %v4678_v2  ;;  %v10886_v27 = vld [vmem:[%s13798_s15 + $0x584] sm:$0xf0] }
 0x4f9   :  { %4688 = vadd.xlane.f32.xlu2 %v4687_v3  ;;  %v9490_v3 = vld [vmem:[%s13798_s15 + $0xc0] sm:$0xf] }
 0x50a   :  { %4752 = vperm.xlu1 %11058, %v369_v10   ;;  %v10736_v10 = vld [vmem:[%s13798_s15 + $0xd4] sm:$0xf0] }
 0x512   :  { %4775 = vperm.xlu1 %11058, %v372_v0   ;;  %v10091_v0 = vor.u32 %v10886_v27, %v10090_v54  ;;  %v10712_v54 = vld [vmem:[%s13798_s15 + $0x14] sm:$0xf0]  ;;  %v9586_v27 = vld [vmem:[%s13798_s15 + $0x180] sm:$0xf] }
 0x564   :  { %v4684_v36 = vpop.xlane.xlu1 %4683 }
 0x565   :  { %v4690_v25 = vmul.f32 0.001953125, %v4684_v36  ;;  %v9682_v36 = vld [vmem:[%s13798_s15 + $0x240] sm:$0xf] }
 0x567   :  { %v13783_v24 = vsub.f32 %v13764_v60, %v4690_v25  ;;  %v13785_v46 = vsub.f32 %v4508_v50, %v4690_v25  ;;  %v13787_v40 = vsub.f32 %v4592_v30, %v4690_v25  ;;  %v13789_v11 = vsub.f32 %v4676_v31, %v4690_v25  ;;  %v9946_v50 = vld [vmem:[%s13798_s15 + $0x450] sm:$0xf]  ;;  %v10114_v31 = vld [vmem:[%s13798_s15 + $0x5a0] sm:$0xf]  ;;  %v10784_v25 = vld [vmem:[%s13798_s15 + $0x254] sm:$0xf0] }
 0x568   :  { %v9947_v29 = vor.u32 %v10850_v44, %v9946_v50  ;;  %v10138_v30 = vld [vmem:[%s13798_s15 + $0x5d0] sm:$0xf] }
 0x569   :  { %v4700_v51 = vmul.f32 %v13783_v24, %v13783_v24  ;;  %v4701_v22 = vmul.f32 %v13785_v46, %v13785_v46  ;;  %v4702_v60 = vmul.f32 %v13787_v40, %v13787_v40  ;;  %v4703_v43 = vmul.f32 %v13789_v11, %v13789_v11 }
 0x56a   :  { %v10139_v23 = vor.u32 %v10898_v61, %v10138_v30  ;;  %5786 = vmatpush.bf16.msrb.mxu0 %v9947_v29  ;;  %v370_v29 = vld [vmem:[%s13773_s2 + $0x8] sm:$0xff]  ;;  %v9442_v30 = vld [vmem:[%s13798_s15 + $0x60] sm:$0xf]  ;;  %v10724_v61 = vld [vmem:[%s13798_s15 + $0x74] sm:$0xf0]  ;;  %s14923_s2 = sld [smem:[%s15267_s0 + %s11364_s29]]   ;;  %s11386_s29 = smov 120  }
 0x56b   :  { %v4708_v41 = vadd.f32 %v4701_v22, %v4700_v51  ;;  %v9874_v51 = vld [vmem:[%s13798_s15 + $0x3c0] sm:$0xf]  ;;  %v10832_v22 = vld [vmem:[%s13798_s15 + $0x3d4] sm:$0xf0] }
 0x56c   :  { %v4689_v18 = vpop.xlane.xlu2 %4688  ;;  %5800 = vmatpush.bf16.msra.mxu3 %v10139_v23  ;;  %v10772_v23 = vld [vmem:[%s13798_s15 + $0x1f4] sm:$0xf0] }
 0x56d   :  { %v4691_v62 = vmul.f32 0.001953125, %v4689_v18  ;;  %v4709_v37 = vadd.f32 %v4708_v41, %v4702_v60  ;;  %v10066_v60 = vld [vmem:[%s13798_s15 + $0x540] sm:$0xf]  ;;  %v10880_v41 = vld [vmem:[%s13798_s15 + $0x554] sm:$0xf0]  ;;  %v9491_v18 = vor.u32 %v10736_v10, %v9490_v3  ;;  %v9635_v55 = vor.u32 %v10772_v23, %v9634_v16 }
 0x56e   :  { %5787 = vmatpush.bf16.msrb.mxu0 %v9923_v26  ;;  %v9610_v26 = vld [vmem:[%s13798_s15 + $0x1b0] sm:$0xf]  ;;  %v10760_v3 = vld [vmem:[%s13798_s15 + $0x194] sm:$0xf0]  ;;  %v9778_v10 = vld [vmem:[%s13798_s15 + $0x300] sm:$0xf] }
 0x56f   :  { %v13804_v59 = vsub.f32 %v4426_v39, %v4691_v62  ;;  %v13806_v20 = vsub.f32 %v4510_v42, %v4691_v62  ;;  %v13808_v15 = vsub.f32 %v4594_v53, %v4691_v62  ;;  %v4710_v57 = vadd.f32 %v4709_v37, %v4703_v43  ;;  %v10892_v42 = vld [vmem:[%s13798_s15 + $0x5b4] sm:$0xf0]  ;;  %v9706_v53 = vld [vmem:[%s13798_s15 + $0x270] sm:$0xf]  ;;  %v10730_v37 = vld [vmem:[%s13798_s15 + $0xa4] sm:$0xf0]  ;;  %5761 = vmatpush.bf16.msrb.mxu1 %v9491_v18 }
 0x570   :  { %v13810_v5 = vsub.f32 %v4678_v2, %v4691_v62  ;;  %v10115_v39 = vor.u32 %v10892_v42, %v10114_v31  ;;  %v9707_v2 = vor.u32 %v10790_v48, %v9706_v53  ;;  %v9683_v62 = vor.u32 %v10784_v25, %v9682_v36  ;;  %v9466_v43 = vld [vmem:[%s13798_s15 + $0x90] sm:$0xf]  ;;  %v10718_v31 = vld [vmem:[%s13798_s15 + $0x44] sm:$0xf0]  ;;  %v9970_v25 = vld [vmem:[%s13798_s15 + $0x480] sm:$0xf] }
 0x571   :  { %4711 = vadd.xlane.f32.xlu0 %v4710_v57  ;;  %v4704_v33 = vmul.f32 %v13804_v59, %v13804_v59  ;;  %v4705_v35 = vmul.f32 %v13806_v20, %v13806_v20  ;;  %v4706_v28 = vmul.f32 %v13808_v15, %v13808_v15  ;;  %v9875_v57 = vor.u32 %v10832_v22, %v9874_v51  ;;  %v9994_v48 = vld [vmem:[%s13798_s15 + $0x4b0] sm:$0xf]  ;;  %v10856_v51 = vld [vmem:[%s13798_s15 + $0x494] sm:$0xf0]  ;;  %v10751_v22 = vld [vmem:[%s13798_s15 + $0x154] sm:$0xf] }
 0x572   :  { %v4707_v8 = vmul.f32 %v13810_v5, %v13810_v5  ;;  %5801 = vmatpush.bf16.msra.mxu3 %v10115_v39  ;;  %5774 = vmatpush.bf16.msra.mxu2 %v9707_v2  ;;  %v9467_v50 = vor.u32 %v10730_v37, %v9466_v43  ;;  %v9419_v42 = vor.u32 %v10718_v31, %v9418_v38  ;;  %v10799_v18 = vld [vmem:[%s13798_s15 + $0x2d4] sm:$0xf] }
 0x573   :  { %v4713_v34 = vadd.f32 %v4705_v35, %v4704_v33  ;;  %5788 = vmatpush.bf16.msrb.mxu0 %v9899_v21  ;;  %v10067_v33 = vor.u32 %v10880_v41, %v10066_v60  ;;  %v9658_v35 = vld [vmem:[%s13798_s15 + $0x210] sm:$0xf]  ;;  %v9611_v39 = vor.u32 %v10766_v1, %v9610_v26  ;;  %v9995_v19 = vor.u32 %v10862_v58, %v9994_v48  ;;  %v10808_v21 = vld [vmem:[%s13798_s15 + $0x314] sm:$0xf0]  ;;  %v9564_v41 = vld [vmem:[%s13798_s15 + $0x168] sm:$0xf0] }
 0x574   :  { %v9659_v44 = vor.u32 %v10778_v32, %v9658_v35  ;;  %5762 = vmatpush.bf16.msrb.mxu1 %v9467_v50  ;;  %v9395_v2 = vor.u32 %v10712_v54, %v9394_v49  ;;  %v9779_v36 = vor.u32 %v10808_v21, %v9778_v10  ;;  %v9971_v60 = vor.u32 %v10856_v51, %v9970_v25  ;;  %v10895_v35 = vld [vmem:[%s13798_s15 + $0x5d4] sm:$0xf]  ;;  %v10092_v26 = vld [vmem:[%s13798_s15 + $0x588] sm:$0xf0]  ;;  %v10733_v1 = vld [vmem:[%s13798_s15 + $0xc4] sm:$0xf] }
 0x575   :  { %v4714_v6 = vadd.f32 %v4713_v34, %v4706_v28  ;;  %v371_v28 = vld [vmem:[%s13778_s6] sm:$0xff]  ;;  %v9851_v34 = vor.u32 %v10826_v56, %v9850_v47  ;;  %v9567_v43 = vor.u32 %v10751_v22, %v9564_v41  ;;  %v10140_v47 = vld [vmem:[%s13798_s15 + $0x5e8] sm:$0xf0]  ;;  %v10739_v23 = vld [vmem:[%s13798_s15 + $0xf4] sm:$0xf]  ;;  %v9903_v38 = vor.u32 %v10835_v12, %v9900_v14  ;;  %s8615_s6 = sld [smem:[%s15267_s0 + %s11365_s3]]  }
 0x576   :  { %5802 = vmatpush.bf16.msra.mxu3 %v10091_v0  ;;  %5775 = vmatpush.bf16.msra.mxu2 %v9683_v62  ;;  %v9587_v0 = vor.u32 %v10760_v3, %v9586_v27  ;;  %v9756_v62 = vld [vmem:[%s13798_s15 + $0x2e8] sm:$0xf0]  ;;  %v10745_v56 = vld [vmem:[%s13798_s15 + $0x124] sm:$0xf]  ;;  %v10143_v4 = vor.u32 %v10895_v35, %v10140_v47  ;;  %v10883_v31 = vld [vmem:[%s13798_s15 + $0x574] sm:$0xf] }
 0x577   :  { %v4715_v63 = vadd.f32 %v4714_v6, %v4707_v8  ;;  %5789 = vmatpush.bf16.msrb.mxu0 %v9875_v57  ;;  %v9443_v8 = vor.u32 %v10724_v61, %v9442_v30  ;;  %v9827_v6 = vor.u32 %v10820_v7, %v9826_v9  ;;  %v9759_v37 = vor.u32 %v10799_v18, %v9756_v62  ;;  %v10847_v57 = vld [vmem:[%s13798_s15 + $0x454] sm:$0xf]  ;;  %v10889_v30 = vld [vmem:[%s13798_s15 + $0x5a4] sm:$0xf]  ;;  %v10116_v61 = vld [vmem:[%s13798_s15 + $0x5b8] sm:$0xf0] }
 0x578   :  { %v9543_v50 = vor.u32 %v10745_v56, %v9540_v17  ;;  %v9516_v9 = vld [vmem:[%s13798_s15 + $0x108] sm:$0xf0]  ;;  %v10787_v7 = vld [vmem:[%s13798_s15 + $0x274] sm:$0xf]  ;;  %v10829_v48 = vld [vmem:[%s13798_s15 + $0x3c4] sm:$0xf] }
 0x579   :  { %4716 = vadd.xlane.f32.xlu2 %v4715_v63  ;;  %5763 = vmatpush.bf16.msrb.mxu1 %v9443_v8  ;;  %v10814_v63 = vld [vmem:[%s13798_s15 + $0x344] sm:$0xf0]  ;;  %v10119_v8 = vor.u32 %v10889_v30, %v10116_v61  ;;  %v9876_v58 = vld [vmem:[%s13798_s15 + $0x3d8] sm:$0xf0]  ;;  %v10877_v54 = vld [vmem:[%s13798_s15 + $0x544] sm:$0xf] }
 0x57a   :  { %5803 = vmatpush.bf16.msra.mxu3 %v10067_v33  ;;  %5776 = vmatpush.bf16.msra.mxu2 %v9659_v44  ;;  %v9803_v53 = vor.u32 %v10814_v63, %v9802_v52  ;;  %v9948_v33 = vld [vmem:[%s13798_s15 + $0x468] sm:$0xf0]  ;;  %v10793_v44 = vld [vmem:[%s13798_s15 + $0x2a4] sm:$0xf]  ;;  %v9492_v52 = vld [vmem:[%s13798_s15 + $0xd8] sm:$0xf0]  ;;  %v9879_v49 = vor.u32 %v10829_v48, %v9876_v58 }
 0x57b   :  { %5790 = vmatpush.bf16.msrb.mxu0 %v9851_v34  ;;  %v9951_v32 = vor.u32 %v10847_v57, %v9948_v33  ;;  %v10841_v34 = vld [vmem:[%s13798_s15 + $0x424] sm:$0xf]  ;;  %v10068_v27 = vld [vmem:[%s13798_s15 + $0x558] sm:$0xf0]  ;;  %v10727_v3 = vld [vmem:[%s13798_s15 + $0x94] sm:$0xf] }
 0x57c   :  { %v10781_v63 = vld [vmem:[%s13798_s15 + $0x244] sm:$0xf]  ;;  %v9468_v10 = vld [vmem:[%s13798_s15 + $0xa8] sm:$0xf0]  ;;  %v10775_v21 = vld [vmem:[%s13798_s15 + $0x214] sm:$0xf] }
 0x57d   :  { %5764 = vmatpush.bf16.msrb.mxu1 %v9419_v42  ;;  %v10095_v42 = vor.u32 %v10883_v31, %v10092_v26  ;;  %v10823_v25 = vld [vmem:[%s13798_s15 + $0x394] sm:$0xf]  ;;  %v9852_v51 = vld [vmem:[%s13798_s15 + $0x3a8] sm:$0xf0]  ;;  %v10721_v62 = vld [vmem:[%s13798_s15 + $0x64] sm:$0xf] }
 0x57e   :  { %5804 = vmatpush.bf16.msra.mxu3 %v10043_v13  ;;  %5777 = vmatpush.bf16.msra.mxu2 %v9635_v55  ;;  %v9519_v55 = vor.u32 %v10739_v23, %v9516_v9  ;;  %v10871_v41 = vld [vmem:[%s13798_s15 + $0x514] sm:$0xf]  ;;  %v10044_v18 = vld [vmem:[%s13798_s15 + $0x528] sm:$0xf0]  ;;  %v9444_v57 = vld [vmem:[%s13798_s15 + $0x78] sm:$0xf0] }
 0x57f   :  { %5791 = vmatpush.bf16.msrb.mxu0 %v9827_v6  ;;  %v9708_v6 = vld [vmem:[%s13798_s15 + $0x288] sm:$0xf0]  ;;  %v10769_v33 = vld [vmem:[%s13798_s15 + $0x1e4] sm:$0xf]  ;;  %v9636_v35 = vld [vmem:[%s13798_s15 + $0x1f8] sm:$0xf0]  ;;  %v9447_v17 = vor.u32 %v10721_v62, %v9444_v57 }
 0x580   :  { %v10817_v47 = vld [vmem:[%s13798_s15 + $0x364] sm:$0xf]  ;;  %v9828_v56 = vld [vmem:[%s13798_s15 + $0x378] sm:$0xf0]  ;;  %v9420_v30 = vld [vmem:[%s13798_s15 + $0x48] sm:$0xf0] }
 0x581   :  { %5765 = vmatpush.bf16.msrb.mxu1 %v9395_v2  ;;  %v10071_v2 = vor.u32 %v10877_v54, %v10068_v27  ;;  %v10763_v61 = vld [vmem:[%s13798_s15 + $0x1b4] sm:$0xf]  ;;  %v9804_v9 = vld [vmem:[%s13798_s15 + $0x348] sm:$0xf0]  ;;  %v10709_v14 = vld [vmem:[%s13798_s15 + $0x4] sm:$0xf] }
 0x582   :  { %5805 = vmatpush.bf16.msra.mxu3 %v10019_v45  ;;  %5778 = vmatpush.bf16.msra.mxu2 %v9611_v39  ;;  %v9711_v45 = vor.u32 %v10787_v7, %v9708_v6  ;;  %v9495_v39 = vor.u32 %v10733_v1, %v9492_v52  ;;  %v10811_v23 = vld [vmem:[%s13798_s15 + $0x334] sm:$0xf]  ;;  %v9996_v12 = vld [vmem:[%s13798_s15 + $0x4c8] sm:$0xf0]  ;;  %v9396_v31 = vld [vmem:[%s13798_s15 + $0x18] sm:$0xf0] }
 0x583   :  { %5792 = vmatpush.bf16.msrb.mxu0 %v9803_v53  ;;  %v9684_v53 = vld [vmem:[%s13798_s15 + $0x258] sm:$0xf0]  ;;  %v10859_v6 = vld [vmem:[%s13798_s15 + $0x4b4] sm:$0xf]  ;;  %v10757_v26 = vld [vmem:[%s13798_s15 + $0x184] sm:$0xf] }
 0x584   :  { %v10805_v52 = vld [vmem:[%s13798_s15 + $0x304] sm:$0xf]  ;;  %v9972_v58 = vld [vmem:[%s13798_s15 + $0x498] sm:$0xf0] }
 0x585   :  { %4770 = vperm.xlu0 %11060, %v371_v28   ;;  %5814 = vmatpush.bf16.msra.mxu1 %v9567_v43  ;;  %v9732_v28 = vld [vmem:[%s13798_s15 + $0x2b8] sm:$0xf0]  ;;  %v10853_v48 = vld [vmem:[%s13798_s15 + $0x484] sm:$0xf] }
 0x586   :  { %5806 = vmatpush.bf16.msra.mxu3 %v9995_v19  ;;  %5779 = vmatpush.bf16.msra.mxu2 %v9587_v0  ;;  %v9735_v13 = vor.u32 %v10793_v44, %v9732_v28  ;;  %v9687_v19 = vor.u32 %v10781_v63, %v9684_v53  ;;  %v9471_v0 = vor.u32 %v10727_v3, %v9468_v10  ;;  %v10020_v44 = vld [vmem:[%s13798_s15 + $0x4f8] sm:$0xf0] }
 0x587   :  { %5793 = vmatpush.bf16.msrb.mxu0 %v9779_v36  ;;  %v9660_v36 = vld [vmem:[%s13798_s15 + $0x228] sm:$0xf0]  ;;  %v9780_v63 = vld [vmem:[%s13798_s15 + $0x318] sm:$0xf0] }
 0x588   :  { %v9663_v22 = vor.u32 %v10775_v21, %v9660_v36  ;;  %v9783_v54 = vor.u32 %v10805_v52, %v9780_v63 }
 0x589   :  { %5815 = vmatpush.bf16.msra.mxu1 %v9543_v50  ;;  %v10865_v50 = vld [vmem:[%s13798_s15 + $0x4e4] sm:$0xf] }
 0x58a   :  { %5807 = vmatpush.bf16.msra.mxu3 %v9971_v60  ;;  %5828 = vmatpush.bf16.msrb.mxu2 %v9759_v37  ;;  %v9855_v60 = vor.u32 %v10823_v25, %v9852_v51  ;;  %v10047_v37 = vor.u32 %v10871_v41, %v10044_v18 }
 0x58b   :  { %5842 = vmatpush.bf16.msra.mxu0 %v9951_v32 }
 0x58d   :  { %5816 = vmatpush.bf16.msra.mxu1 %v9519_v55  ;;  %v9807_v55 = vor.u32 %v10811_v23, %v9804_v9  ;;  %v10755_v23 = vld [vmem:[%s13798_s15 + $0x16c] sm:$0xf0] }
 0x58e   :  { %5856 = vmatpush.bf16.msrb.mxu3 %v10143_v4  ;;  %5829 = vmatpush.bf16.msrb.mxu2 %v9735_v13  ;;  %v9639_v4 = vor.u32 %v10769_v33, %v9636_v35  ;;  %v10023_v13 = vor.u32 %v10865_v50, %v10020_v44 }
 0x591   :  { %4757 = vperm.xlu2 %11059, %v370_v29   ;;  %v9924_v29 = vld [vmem:[%s13798_s15 + $0x438] sm:$0xf0]  ;;  %5817 = vmatpush.bf16.msra.mxu1 %v9495_v39  ;;  %v9399_v39 = vor.u32 %v10709_v14, %v9396_v31 }
 0x592   :  { %v9927_v16 = vor.u32 %v10841_v34, %v9924_v29  ;;  %5857 = vmatpush.bf16.msrb.mxu3 %v10119_v8  ;;  %5830 = vmatpush.bf16.msrb.mxu2 %v9711_v45  ;;  %v9831_v34 = vor.u32 %v10817_v47, %v9828_v56  ;;  %v10715_v29 = vld [vmem:[%s13798_s15 + $0x34] sm:$0xf]  ;;  %v9612_v8 = vld [vmem:[%s13798_s15 + $0x1c8] sm:$0xf0] }
 0x593   :  { %v9615_v7 = vor.u32 %v10763_v61, %v9612_v8 }
 0x594   :  { %5843 = vmatpush.bf16.msra.mxu0 %v9927_v16  ;;  %v9423_v16 = vor.u32 %v10715_v29, %v9420_v30 }
 0x595   :  { %5818 = vmatpush.bf16.msra.mxu1 %v9471_v0 }
 0x596   :  { %5858 = vmatpush.bf16.msrb.mxu3 %v10095_v42  ;;  %5831 = vmatpush.bf16.msrb.mxu2 %v9687_v19  ;;  %v9588_v42 = vld [vmem:[%s13798_s15 + $0x198] sm:$0xf0] }
 0x597   :  { %v9591_v53 = vor.u32 %v10757_v26, %v9588_v42  ;;  %v10146_v26 = vld [vmem:[%s13798_s15 + $0x5d8] sm:$0xf] }
 0x598   :  { %5844 = vmatpush.bf16.msra.mxu0 %v9903_v38  ;;  %v9999_v38 = vor.u32 %v10859_v6, %v9996_v12  ;;  %v9954_v6 = vld [vmem:[%s13798_s15 + $0x458] sm:$0xf]  ;;  %v10851_v12 = vld [vmem:[%s13798_s15 + $0x46c] sm:$0xf0] }
 0x599   :  { %5819 = vmatpush.bf16.msra.mxu1 %v9447_v17 }
 0x59a   :  { %5859 = vmatpush.bf16.msrb.mxu3 %v10071_v2  ;;  %5832 = vmatpush.bf16.msrb.mxu2 %v9663_v22  ;;  %v9975_v2 = vor.u32 %v10853_v48, %v9972_v58 }
 0x59c   :  { %5845 = vmatpush.bf16.msra.mxu0 %v9879_v49 }
 0x59d   :  { %5820 = vmatpush.bf16.msra.mxu1 %v9423_v16 }
 0x59e   :  { %5860 = vmatpush.bf16.msrb.mxu3 %v10047_v37  ;;  %5833 = vmatpush.bf16.msrb.mxu2 %v9639_v4  ;;  %v4753_v37 = vpop.permute.xlu1 %4752 }
 0x5a0   :  { %5846 = vmatpush.bf16.msra.mxu0 %v9855_v60 }
 0x5a1   :  { %5821 = vmatpush.bf16.msra.mxu1 %v9399_v39  ;;  %v10899_v39 = vld [vmem:[%s13798_s15 + $0x5ec] sm:$0xf0] }
 0x5a2   :  { %5861 = vmatpush.bf16.msrb.mxu3 %v10023_v13  ;;  %5834 = vmatpush.bf16.msrb.mxu2 %v9615_v7 }
 0x5a4   :  { %5847 = vmatpush.bf16.msra.mxu0 %v9831_v34 }
 0x5a6   :  { %5862 = vmatpush.bf16.msrb.mxu3 %v9999_v38  ;;  %5835 = vmatpush.bf16.msrb.mxu2 %v9591_v53  ;;  %v4776_v8 = vpop.permute.xlu1 %4775 }
 0x5a8   :  { %5848 = vmatpush.bf16.msra.mxu0 %v9807_v55  ;;  %v10803_v55 = vld [vmem:[%s13798_s15 + $0x2ec] sm:$0xf0] }
 0x5aa   :  { %5863 = vmatpush.bf16.msrb.mxu3 %v9975_v2  ;;  %v10749_v2 = vld [vmem:[%s13798_s15 + $0x13c] sm:$0xf0] }
 0x5ac   :  { %5849 = vmatpush.bf16.msra.mxu0 %v9783_v54 }
 0x5e4   :  { %v4712_v43 = vpop.xlane.xlu0 %4711 }
 0x5e5   :  { %v4718_v32 = vmul.f32 0.001953125, %v4712_v43 }
 0x5e7   :  { %v4720_v28 = vadd.f32 1e-05, %v4718_v32 }
 0x5e9   :  { %11301 = vrsqrt.f32 %v4720_v28  ;;  %vm4728_vm14 = vweird.f32 %v4720_v28 }
 0x5ec   :  { %v4717_v45 = vpop.xlane.xlu2 %4716 }
 0x5ed   :  { %v4719_v1 = vmul.f32 0.001953125, %v4717_v45 }
 0x5ef   :  { %v11302_v19 = vpop.eup %11301  ;;  %v4721_v49 = vadd.f32 1e-05, %v4719_v1 }
 0x5f0   :  { %v4723_v27 = vmul.f32 %v11302_v19, %v4720_v28  ;;  %vm4729_vm10 = vweird.f32 %v11302_v19 }
 0x5f1   :  { %11303 = vrsqrt.f32 %v4721_v49  ;;  %vm4730_vm12 = vmor %vm4728_vm14, %vm4729_vm10  ;;  %vm4738_vm2 = vweird.f32 %v4721_v49 }
 0x5f2   :  { %v4724_v3 = vmul.f32 %v11302_v19, %v4723_v27  ;;  %v9546_v27 = vld [vmem:[%s13798_s15 + $0x128] sm:$0xf] }
 0x5f4   :  { %v4725_v10 = vmul.f32 0.5, %v4724_v3  ;;  %v4758_v4 = vpop.permute.xlu2 %4757  ;;  %v9955_v3 = vor.u32 %v10851_v12, %v9954_v6 }
 0x5f6   :  { %v4726_v21 = vsub.f32 1.5, %v4725_v10  ;;  %v10147_v10 = vor.u32 %v10899_v39, %v10146_v26  ;;  %v9642_v26 = vld [vmem:[%s13798_s15 + $0x1e8] sm:$0xf]  ;;  %v10869_v39 = vld [vmem:[%s13798_s15 + $0x4fc] sm:$0xf0] }
 0x5f7   :  { %v11304_v0 = vpop.eup %11303  ;;  %v4771_v17 = vpop.permute.xlu0 %4770 }
 0x5f8   :  { %v4727_v36 = vmul.f32 %v11302_v19, %v4726_v21  ;;  %v4733_v25 = vmul.f32 %v11304_v0, %v4721_v49  ;;  %vm4739_vm5 = vweird.f32 %v11304_v0  ;;  %v9738_v21 = vld [vmem:[%s13798_s15 + $0x2a8] sm:$0xf] }
 0x5f9   :  { %vm4740_vm15 = vmor %vm4738_vm2, %vm4739_vm5 }
 0x5fa   :  { %v4731_v51 = vsel %vm4730_vm12, %v11302_v19, %v4727_v36  ;;  %v4734_v22 = vmul.f32 %v11304_v0, %v4733_v25  ;;  %v9930_v36 = vld [vmem:[%s13798_s15 + $0x428] sm:$0xf]  ;;  %v10845_v25 = vld [vmem:[%s13798_s15 + $0x43c] sm:$0xf0] }
 0x5fb   :  { %v4742_v60 = vmul.f32 %v4731_v51, %v13783_v24  ;;  %v4743_v18 = vmul.f32 %v4731_v51, %v13785_v46  ;;  %v4744_v62 = vmul.f32 %v4731_v51, %v13787_v40  ;;  %v4745_v43 = vmul.f32 %v4731_v51, %v13789_v11  ;;  %v10122_v51 = vld [vmem:[%s13798_s15 + $0x5a8] sm:$0xf] }
 0x5fc   :  { %v4735_v41 = vmul.f32 0.5, %v4734_v22  ;;  %v10893_v22 = vld [vmem:[%s13798_s15 + $0x5bc] sm:$0xf0] }
 0x5fd   :  { %v4760_v33 = vmul.f32 %v4753_v37, %v4742_v60  ;;  %v4761_v32 = vmul.f32 %v4753_v37, %v4743_v18  ;;  %v4762_v47 = vmul.f32 %v4753_v37, %v4744_v62  ;;  %v4763_v56 = vmul.f32 %v4753_v37, %v4745_v43  ;;  %v9522_v18 = vld [vmem:[%s13798_s15 + $0xf8] sm:$0xf]  ;;  %v10743_v62 = vld [vmem:[%s13798_s15 + $0x10c] sm:$0xf0] }
 0x5fe   :  { %v4736_v57 = vsub.f32 1.5, %v4735_v41  ;;  %v9547_v60 = vor.u32 %v10749_v2, %v9546_v27  ;;  %v9931_v43 = vor.u32 %v10845_v25, %v9930_v36  ;;  %v10123_v37 = vor.u32 %v10893_v22, %v10122_v51  ;;  %v9426_v27 = vld [vmem:[%s13798_s15 + $0x38] sm:$0xf]  ;;  %v10719_v2 = vld [vmem:[%s13798_s15 + $0x4c] sm:$0xf0] }
 0x5ff   :  { %v4778_v44 = vadd.f32 %v4771_v17, %v4760_v33  ;;  %v4779_v28 = vadd.f32 %v4771_v17, %v4761_v32  ;;  %v4780_v34 = vadd.f32 %v4771_v17, %v4762_v47  ;;  %v4781_v13 = vadd.f32 %v4771_v17, %v4763_v56  ;;  %v10791_v33 = vld [vmem:[%s13798_s15 + $0x28c] sm:$0xf0]  ;;  %v10098_v47 = vld [vmem:[%s13798_s15 + $0x578] sm:$0xf] }
 0x600   :  { %v4737_v35 = vmul.f32 %v11304_v0, %v4736_v57  ;;  %v9714_v57 = vld [vmem:[%s13798_s15 + $0x278] sm:$0xf]  ;;  %v10839_v32 = vld [vmem:[%s13798_s15 + $0x40c] sm:$0xf0]  ;;  %v9523_v17 = vor.u32 %v10743_v62, %v9522_v18  ;;  %v10713_v62 = vld [vmem:[%s13798_s15 + $0x1c] sm:$0xf0] }
 0x601   :  { %v4786_v14 = vmax.f32 %v4778_v44, 0.0  ;;  %v4787_v45 = vmax.f32 %v4779_v28, 0.0  ;;  %v4788_v38 = vmax.f32 %v4780_v34, 0.0  ;;  %v4789_v31 = vmax.f32 %v4781_v13, 0.0  ;;  %v10887_v56 = vld [vmem:[%s13798_s15 + $0x58c] sm:$0xf0] }
 0x602   :  { %v4741_v24 = vsel %vm4740_vm15, %v11304_v0, %v4737_v35  ;;  %v10797_v0 = vld [vmem:[%s13798_s15 + $0x2bc] sm:$0xf0]  ;;  %v9906_v35 = vld [vmem:[%s13798_s15 + $0x3f8] sm:$0xf]  ;;  %v9882_v28 = vld [vmem:[%s13798_s15 + $0x3c8] sm:$0xf] }
 0x603   :  { %v4746_v46 = vmul.f32 %v4741_v24, %v13804_v59  ;;  %v4747_v40 = vmul.f32 %v4741_v24, %v13806_v20  ;;  %v4748_v11 = vmul.f32 %v4741_v24, %v13808_v15  ;;  %v4749_v50 = vmul.f32 %v4741_v24, %v13810_v5  ;;  %v9570_v59 = vld [vmem:[%s13798_s15 + $0x158] sm:$0xf]  ;;  %v10785_v44 = vld [vmem:[%s13798_s15 + $0x25c] sm:$0xf0]  ;;  %v10074_v13 = vld [vmem:[%s13798_s15 + $0x548] sm:$0xf] }
 0x604   :  { %v9762_v20 = vld [vmem:[%s13798_s15 + $0x2d8] sm:$0xf]  ;;  %v9571_v53 = vor.u32 %v10755_v23, %v9570_v59  ;;  %v9739_v41 = vor.u32 %v10797_v0, %v9738_v21  ;;  %v9715_v24 = vor.u32 %v10791_v33, %v9714_v57  ;;  %v10833_v34 = vld [vmem:[%s13798_s15 + $0x3dc] sm:$0xf0]  ;;  %v10767_v0 = vld [vmem:[%s13798_s15 + $0x1cc] sm:$0xf0] }
 0x605   :  { %v4764_v29 = vmul.f32 %v4758_v4, %v4746_v46  ;;  %v4765_v30 = vmul.f32 %v4758_v4, %v4747_v40  ;;  %v4766_v61 = vmul.f32 %v4758_v4, %v4748_v11  ;;  %v4767_v16 = vmul.f32 %v4758_v4, %v4749_v50  ;;  %v9498_v4 = vld [vmem:[%s13798_s15 + $0xc8] sm:$0xf]  ;;  %v10737_v46 = vld [vmem:[%s13798_s15 + $0xdc] sm:$0xf0]  ;;  %v9618_v21 = vld [vmem:[%s13798_s15 + $0x1b8] sm:$0xf] }
 0x606   :  { %v9763_v48 = vor.u32 %v10803_v55, %v9762_v20  ;;  %v9907_v40 = vor.u32 %v10839_v32, %v9906_v35  ;;  %v10099_v11 = vor.u32 %v10887_v56, %v10098_v47  ;;  %v9690_v50 = vld [vmem:[%s13798_s15 + $0x248] sm:$0xf]  ;;  %v9883_v59 = vor.u32 %v10833_v34, %v9882_v28  ;;  %v9666_v20 = vld [vmem:[%s13798_s15 + $0x218] sm:$0xf]  ;;  %v10875_v55 = vld [vmem:[%s13798_s15 + $0x52c] sm:$0xf0] }
 0x607   :  { %v4782_v9 = vadd.f32 %v4776_v8, %v4764_v29  ;;  %v4783_v15 = vadd.f32 %v4776_v8, %v4765_v30  ;;  %v4784_v5 = vadd.f32 %v4776_v8, %v4766_v61  ;;  %v4785_v7 = vadd.f32 %v4776_v8, %v4767_v16  ;;  %v10881_v29 = vld [vmem:[%s13798_s15 + $0x55c] sm:$0xf0]  ;;  %v9474_v16 = vld [vmem:[%s13798_s15 + $0x98] sm:$0xf]  ;;  %v10731_v8 = vld [vmem:[%s13798_s15 + $0xac] sm:$0xf0] }
 0x608   :  { %v9499_v30 = vor.u32 %v10737_v46, %v9498_v4  ;;  %v9691_v61 = vor.u32 %v10785_v44, %v9690_v50  ;;  %v10075_v23 = vor.u32 %v10881_v29, %v10074_v13  ;;  %v9475_v6 = vor.u32 %v10731_v8, %v9474_v16  ;;  %v9810_v36 = vld [vmem:[%s13798_s15 + $0x338] sm:$0xf]  ;;  %v10815_v25 = vld [vmem:[%s13798_s15 + $0x34c] sm:$0xf0]  ;;  %v9786_v35 = vld [vmem:[%s13798_s15 + $0x308] sm:$0xf] }
 0x609   :  { %v4790_v42 = vmax.f32 %v4782_v9, 0.0  ;;  %v4791_v1 = vmax.f32 %v4783_v15, 0.0  ;;  %v4792_v52 = vmax.f32 %v4784_v5, 0.0  ;;  %v4793_v63 = vmax.f32 %v4785_v7, 0.0  ;;  %v10779_v9 = vld [vmem:[%s13798_s15 + $0x22c] sm:$0xf0] }
 0x60a   :  { %v9858_v15 = vld [vmem:[%s13798_s15 + $0x398] sm:$0xf]  ;;  %v10827_v5 = vld [vmem:[%s13798_s15 + $0x3ac] sm:$0xf0]  ;;  %v9667_v12 = vor.u32 %v10779_v9, %v9666_v20  ;;  %v9619_v18 = vor.u32 %v10767_v0, %v9618_v21  ;;  %v9811_v57 = vor.u32 %v10815_v25, %v9810_v36  ;;  %v10809_v32 = vld [vmem:[%s13798_s15 + $0x31c] sm:$0xf0] }
 0x60b   :  { %v13966_v58 = vpack.c.bf16 %v4790_v42, %v4786_v14  ;;  %v13968_v19 = vpack.c.bf16 %v4791_v1, %v4787_v45  ;;  %v13970_v49 = vpack.c.bf16 %v4792_v52, %v4788_v38  ;;  %v13972_v54 = vpack.c.bf16 %v4793_v63, %v4789_v31  ;;  %v10050_v7 = vld [vmem:[%s13798_s15 + $0x518] sm:$0xf]  ;;  %v9450_v14 = vld [vmem:[%s13798_s15 + $0x68] sm:$0xf]  ;;  %v10725_v45 = vld [vmem:[%s13798_s15 + $0x7c] sm:$0xf0] }
 0x60c   :  { %v9859_v38 = vor.u32 %v10827_v5, %v9858_v15  ;;  %v10051_v31 = vor.u32 %v10875_v55, %v10050_v7  ;;  %v10773_v42 = vld [vmem:[%s13798_s15 + $0x1fc] sm:$0xf0]  ;;  %v9834_v1 = vld [vmem:[%s13798_s15 + $0x368] sm:$0xf]  ;;  %v10002_v51 = vld [vmem:[%s13798_s15 + $0x4b8] sm:$0xf]  ;;  %v9787_v13 = vor.u32 %v10809_v32, %v9786_v35 }
 0x60d   :  { %5766 = vmatmul.bf16.vlgmr.msrb.gmra.mxu1 %v13966_v58  ;;  %5780 = vmatmul.bf16.vlgmr.msra.gmra.mxu2 %v13968_v19  ;;  %v10821_v52 = vld [vmem:[%s13798_s15 + $0x37c] sm:$0xf0]  ;;  %v10026_v63 = vld [vmem:[%s13798_s15 + $0x4e8] sm:$0xf]  ;;  %v10863_v22 = vld [vmem:[%s13798_s15 + $0x4cc] sm:$0xf0] }
 0x60e   :  { %5794 = vmatmul.bf16.vlgmr.msrb.gmra.mxu0 %v13970_v49  ;;  %5808 = vmatmul.bf16.vlgmr.msra.gmra.mxu3 %v13972_v54  ;;  %v10003_v33 = vor.u32 %v10863_v22, %v10002_v51  ;;  %v9978_v47 = vld [vmem:[%s13798_s15 + $0x488] sm:$0xf]  ;;  %v10857_v56 = vld [vmem:[%s13798_s15 + $0x49c] sm:$0xf0]  ;;  %v10800_v4 = vld [vmem:[%s13798_s15 + $0x2dc] sm:$0xf] }
 0x60f   :  { %5870 = vmatpush.bf16.msrb.mxu1 %v9571_v53  ;;  %5884 = vmatpush.bf16.msra.mxu2 %v9763_v48  ;;  %v9451_v53 = vor.u32 %v10725_v45, %v9450_v14  ;;  %v9643_v48 = vor.u32 %v10773_v42, %v9642_v26  ;;  %v9764_v46 = vld [vmem:[%s13798_s15 + $0x2f0] sm:$0xf0]  ;;  %v10896_v28 = vld [vmem:[%s13798_s15 + $0x5dc] sm:$0xf]  ;;  %v9979_v29 = vor.u32 %v10857_v56, %v9978_v47  ;;  %v10746_v16 = vld [vmem:[%s13798_s15 + $0x12c] sm:$0xf] }
 0x610   :  { %5898 = vmatpush.bf16.msrb.mxu0 %v9955_v3  ;;  %5912 = vmatpush.bf16.msra.mxu3 %v10147_v10  ;;  %v9835_v3 = vor.u32 %v10821_v52, %v9834_v1  ;;  %v10027_v10 = vor.u32 %v10869_v39, %v10026_v63  ;;  %v9956_v44 = vld [vmem:[%s13798_s15 + $0x470] sm:$0xf0]  ;;  %v9548_v8 = vld [vmem:[%s13798_s15 + $0x140] sm:$0xf0]  ;;  %v10794_v20 = vld [vmem:[%s13798_s15 + $0x2ac] sm:$0xf] }
 0x611   :  { %v10148_v34 = vld [vmem:[%s13798_s15 + $0x5f0] sm:$0xf0]  ;;  %v9740_v9 = vld [vmem:[%s13798_s15 + $0x2c0] sm:$0xf0]  ;;  %v10842_v15 = vld [vmem:[%s13798_s15 + $0x42c] sm:$0xf] }
 0x612   :  { %v9932_v5 = vld [vmem:[%s13798_s15 + $0x440] sm:$0xf0]  ;;  %v10890_v7 = vld [vmem:[%s13798_s15 + $0x5ac] sm:$0xf]  ;;  %v10740_v14 = vld [vmem:[%s13798_s15 + $0xfc] sm:$0xf] }
 0x613   :  { %5871 = vmatpush.bf16.msrb.mxu1 %v9547_v60  ;;  %5885 = vmatpush.bf16.msra.mxu2 %v9739_v41  ;;  %v9402_v60 = vld [vmem:[%s13798_s15 + $0x8] sm:$0xf]  ;;  %v9427_v41 = vor.u32 %v10719_v2, %v9426_v27  ;;  %v10124_v55 = vld [vmem:[%s13798_s15 + $0x5c0] sm:$0xf0]  ;;  %v9524_v45 = vld [vmem:[%s13798_s15 + $0x110] sm:$0xf0] }
 0x614   :  { %5899 = vmatpush.bf16.msrb.mxu0 %v9931_v43  ;;  %5913 = vmatpush.bf16.msra.mxu3 %v10123_v37  ;;  %v9594_v43 = vld [vmem:[%s13798_s15 + $0x188] sm:$0xf]  ;;  %v10761_v37 = vld [vmem:[%s13798_s15 + $0x19c] sm:$0xf0]  ;;  %v10788_v26 = vld [vmem:[%s13798_s15 + $0x27c] sm:$0xf] }
 0x615   :  { %v9595_v50 = vor.u32 %v10761_v37, %v9594_v43  ;;  %v9716_v42 = vld [vmem:[%s13798_s15 + $0x290] sm:$0xf0]  ;;  %v10836_v1 = vld [vmem:[%s13798_s15 + $0x3fc] sm:$0xf]  ;;  %v10734_v27 = vld [vmem:[%s13798_s15 + $0xcc] sm:$0xf] }
 0x616   :  { %v9908_v52 = vld [vmem:[%s13798_s15 + $0x410] sm:$0xf0]  ;;  %v10884_v63 = vld [vmem:[%s13798_s15 + $0x57c] sm:$0xf]  ;;  %v9500_v2 = vld [vmem:[%s13798_s15 + $0xe0] sm:$0xf0] }
 0x617   :  { %5872 = vmatpush.bf16.msrb.mxu1 %v9523_v17  ;;  %5886 = vmatpush.bf16.msra.mxu2 %v9715_v24  ;;  %v10752_v17 = vld [vmem:[%s13798_s15 + $0x15c] sm:$0xf]  ;;  %v9572_v24 = vld [vmem:[%s13798_s15 + $0x170] sm:$0xf0]  ;;  %v10782_v21 = vld [vmem:[%s13798_s15 + $0x24c] sm:$0xf] }
 0x618   :  { %5900 = vmatpush.bf16.msrb.mxu0 %v9907_v40  ;;  %5914 = vmatpush.bf16.msra.mxu3 %v10099_v11  ;;  %v10848_v40 = vld [vmem:[%s13798_s15 + $0x45c] sm:$0xf]  ;;  %v9403_v11 = vor.u32 %v10713_v62, %v9402_v60  ;;  %v10100_v39 = vld [vmem:[%s13798_s15 + $0x590] sm:$0xf0]  ;;  %v9692_v0 = vld [vmem:[%s13798_s15 + $0x260] sm:$0xf0]  ;;  %v9503_v60 = vor.u32 %v10734_v27, %v9500_v2 }
 0x619   :  { %v10830_v36 = vld [vmem:[%s13798_s15 + $0x3cc] sm:$0xf]  ;;  %v9884_v25 = vld [vmem:[%s13798_s15 + $0x3e0] sm:$0xf0]  ;;  %v9476_v62 = vld [vmem:[%s13798_s15 + $0xb0] sm:$0xf0] }
 0x61a   :  { %v10878_v51 = vld [vmem:[%s13798_s15 + $0x54c] sm:$0xf]  ;;  %v10076_v22 = vld [vmem:[%s13798_s15 + $0x560] sm:$0xf0]  ;;  %v9887_v43 = vor.u32 %v10830_v36, %v9884_v25  ;;  %v10824_v35 = vld [vmem:[%s13798_s15 + $0x39c] sm:$0xf] }
 0x61b   :  { %5873 = vmatpush.bf16.msrb.mxu1 %v9499_v30  ;;  %5887 = vmatpush.bf16.msra.mxu2 %v9691_v61  ;;  %v9575_v30 = vor.u32 %v10752_v17, %v9572_v24  ;;  %v9767_v61 = vor.u32 %v10800_v4, %v9764_v46  ;;  %v10079_v37 = vor.u32 %v10878_v51, %v10076_v22  ;;  %v9860_v32 = vld [vmem:[%s13798_s15 + $0x3b0] sm:$0xf0]  ;;  %v10872_v47 = vld [vmem:[%s13798_s15 + $0x51c] sm:$0xf]  ;;  %v10722_v4 = vld [vmem:[%s13798_s15 + $0x6c] sm:$0xf] }
 0x61c   :  { %5901 = vmatpush.bf16.msrb.mxu0 %v9883_v59  ;;  %5915 = vmatpush.bf16.msra.mxu3 %v10075_v23  ;;  %v9959_v59 = vor.u32 %v10848_v40, %v9956_v44  ;;  %v10151_v23 = vor.u32 %v10896_v28, %v10148_v34  ;;  %v10052_v56 = vld [vmem:[%s13798_s15 + $0x530] sm:$0xf0]  ;;  %v9452_v46 = vld [vmem:[%s13798_s15 + $0x80] sm:$0xf0]  ;;  %v9863_v40 = vor.u32 %v10824_v35, %v9860_v32  ;;  %v10818_v28 = vld [vmem:[%s13798_s15 + $0x36c] sm:$0xf] }
 0x61d   :  { %5822 = vmatmul.bf16.vlgmr.msra.gmra.mxu1 %v13966_v58  ;;  %5836 = vmatmul.bf16.vlgmr.msrb.gmra.mxu2 %v13968_v19  ;;  %v9644_v44 = vld [vmem:[%s13798_s15 + $0x200] sm:$0xf0]  ;;  %v9770_v27 = vld [vmem:[%s13798_s15 + $0x2e0] sm:$0xf]  ;;  %v10804_v2 = vld [vmem:[%s13798_s15 + $0x2f4] sm:$0xf0] }
 0x61e   :  { %5850 = vmatmul.bf16.vlgmr.msra.gmra.mxu0 %v13970_v49  ;;  %5864 = vmatmul.bf16.vlgmr.msrb.gmra.mxu3 %v13972_v54  ;;  %v9836_v34 = vld [vmem:[%s13798_s15 + $0x380] sm:$0xf0]  ;;  %v10154_v36 = vld [vmem:[%s13798_s15 + $0x5e0] sm:$0xf]  ;;  %v10900_v25 = vld [vmem:[%s13798_s15 + $0x5f4] sm:$0xf0] }
 0x61f   :  { %5874 = vmatpush.bf16.msrb.mxu1 %v9475_v6  ;;  %5888 = vmatpush.bf16.msra.mxu2 %v9667_v12  ;;  %v9551_v6 = vor.u32 %v10746_v16, %v9548_v8  ;;  %v9743_v12 = vor.u32 %v10794_v20, %v9740_v9  ;;  %v10716_v16 = vld [vmem:[%s13798_s15 + $0x3c] sm:$0xf]  ;;  %v9428_v8 = vld [vmem:[%s13798_s15 + $0x50] sm:$0xf0]  ;;  %v9938_v35 = vld [vmem:[%s13798_s15 + $0x430] sm:$0xf] }
 0x620   :  { %5902 = vmatpush.bf16.msrb.mxu0 %v9859_v38  ;;  %5916 = vmatpush.bf16.msra.mxu3 %v10051_v31  ;;  %v9935_v38 = vor.u32 %v10842_v15, %v9932_v5  ;;  %v10127_v31 = vor.u32 %v10890_v7, %v10124_v55  ;;  %v10764_v20 = vld [vmem:[%s13798_s15 + $0x1bc] sm:$0xf]  ;;  %v9620_v9 = vld [vmem:[%s13798_s15 + $0x1d0] sm:$0xf0]  ;;  %v10846_v32 = vld [vmem:[%s13798_s15 + $0x444] sm:$0xf0] }
 0x621   :  { %v10812_v15 = vld [vmem:[%s13798_s15 + $0x33c] sm:$0xf]  ;;  %v9812_v5 = vld [vmem:[%s13798_s15 + $0x350] sm:$0xf0]  ;;  %vm7028_vm15 = vcmask 130048  }
 0x622   :  { %v10860_v7 = vld [vmem:[%s13798_s15 + $0x4bc] sm:$0xf]  ;;  %v10004_v55 = vld [vmem:[%s13798_s15 + $0x4d0] sm:$0xf0] }
 0x623   :  { %5875 = vmatpush.bf16.msrb.mxu1 %v9451_v53  ;;  %5889 = vmatpush.bf16.msra.mxu2 %v9643_v48  ;;  %v9527_v53 = vor.u32 %v10740_v14, %v9524_v45  ;;  %v9719_v48 = vor.u32 %v10788_v26, %v9716_v42  ;;  %v9623_v14 = vor.u32 %v10764_v20, %v9620_v9  ;;  %v9404_v45 = vld [vmem:[%s13798_s15 + $0x20] sm:$0xf0]  ;;  %v9698_v20 = vld [vmem:[%s13798_s15 + $0x250] sm:$0xf]  ;;  %v10786_v9 = vld [vmem:[%s13798_s15 + $0x264] sm:$0xf0] }
 0x624   :  { %5903 = vmatpush.bf16.msrb.mxu0 %v9835_v3  ;;  %5917 = vmatpush.bf16.msra.mxu3 %v10027_v10  ;;  %v9911_v3 = vor.u32 %v10836_v1, %v9908_v52  ;;  %v10103_v10 = vor.u32 %v10884_v63, %v10100_v39  ;;  %v9815_v26 = vor.u32 %v10812_v15, %v9812_v5  ;;  %v10806_v1 = vld [vmem:[%s13798_s15 + $0x30c] sm:$0xf]  ;;  %v9788_v52 = vld [vmem:[%s13798_s15 + $0x320] sm:$0xf0]  ;;  %v9890_v15 = vld [vmem:[%s13798_s15 + $0x3d0] sm:$0xf] }
 0x625   :  { %v10007_v42 = vor.u32 %v10860_v7, %v10004_v55  ;;  %v10854_v63 = vld [vmem:[%s13798_s15 + $0x48c] sm:$0xf]  ;;  %v9980_v39 = vld [vmem:[%s13798_s15 + $0x4a0] sm:$0xf0]  ;;  %v9791_v51 = vor.u32 %v10806_v1, %v9788_v52  ;;  %v10834_v5 = vld [vmem:[%s13798_s15 + $0x3e4] sm:$0xf0] }
 0x626   :  { %v9983_v22 = vor.u32 %v10854_v63, %v9980_v39  ;;  %v10082_v7 = vld [vmem:[%s13798_s15 + $0x550] sm:$0xf]  ;;  %v10882_v55 = vld [vmem:[%s13798_s15 + $0x564] sm:$0xf0]  ;;  %v9866_v1 = vld [vmem:[%s13798_s15 + $0x3a0] sm:$0xf] }
 0x627   :  { %5876 = vmatpush.bf16.msrb.mxu1 %v9427_v41  ;;  %5890 = vmatpush.bf16.msra.mxu2 %v9619_v18  ;;  %v9695_v41 = vor.u32 %v10782_v21, %v9692_v0  ;;  %v10728_v18 = vld [vmem:[%s13798_s15 + $0x9c] sm:$0xf]  ;;  %v10852_v0 = vld [vmem:[%s13798_s15 + $0x474] sm:$0xf0]  ;;  %v10058_v63 = vld [vmem:[%s13798_s15 + $0x520] sm:$0xf] }
 0x628   :  { %5904 = vmatpush.bf16.msrb.mxu0 %v9811_v57  ;;  %5918 = vmatpush.bf16.msra.mxu3 %v10003_v33  ;;  %v10776_v57 = vld [vmem:[%s13798_s15 + $0x21c] sm:$0xf]  ;;  %v9668_v33 = vld [vmem:[%s13798_s15 + $0x230] sm:$0xf0]  ;;  %v9479_v17 = vor.u32 %v10728_v18, %v9476_v62  ;;  %v9554_v18 = vld [vmem:[%s13798_s15 + $0x130] sm:$0xf] }
 0x629   :  { %v9671_v24 = vor.u32 %v10776_v57, %v9668_v33  ;;  %v10750_v62 = vld [vmem:[%s13798_s15 + $0x144] sm:$0xf0]  ;;  %v9746_v57 = vld [vmem:[%s13798_s15 + $0x2b0] sm:$0xf]  ;;  %v10828_v52 = vld [vmem:[%s13798_s15 + $0x3b4] sm:$0xf0] }
 0x62a   :  { %v10798_v33 = vld [vmem:[%s13798_s15 + $0x2c4] sm:$0xf0]  ;;  %v10876_v39 = vld [vmem:[%s13798_s15 + $0x534] sm:$0xf0] }
 0x62b   :  { %5877 = vmatpush.bf16.msrb.mxu1 %v9403_v11  ;;  %5891 = vmatpush.bf16.msra.mxu2 %v9595_v50  ;;  %v10055_v11 = vor.u32 %v10872_v47, %v10052_v56  ;;  %v10770_v50 = vld [vmem:[%s13798_s15 + $0x1ec] sm:$0xf]  ;;  %v10130_v47 = vld [vmem:[%s13798_s15 + $0x5b0] sm:$0xf]  ;;  %v10894_v56 = vld [vmem:[%s13798_s15 + $0x5c4] sm:$0xf0] }
 0x62c   :  { %5905 = vmatpush.bf16.msrb.mxu0 %v9787_v13  ;;  %5919 = vmatpush.bf16.msra.mxu3 %v9979_v29  ;;  %v10866_v13 = vld [vmem:[%s13798_s15 + $0x4ec] sm:$0xf]  ;;  %v10028_v29 = vld [vmem:[%s13798_s15 + $0x500] sm:$0xf0] }
 0x62e   :  { %5878 = vmatmul.bf16.vlgmr.msrb.gmra.mxu1 %v13966_v58  ;;  %5892 = vmatmul.bf16.vlgmr.msra.gmra.mxu2 %v13968_v19 }
 0x62f   :  { %5926 = vmatpush.bf16.msra.mxu1 %v9575_v30  ;;  %5940 = vmatpush.bf16.msrb.mxu2 %v9767_v61  ;;  %v9455_v30 = vor.u32 %v10722_v4, %v9452_v46  ;;  %v9647_v61 = vor.u32 %v10770_v50, %v9644_v44  ;;  %v9530_v4 = vld [vmem:[%s13798_s15 + $0x100] sm:$0xf]  ;;  %v10744_v46 = vld [vmem:[%s13798_s15 + $0x114] sm:$0xf0] }
 0x630   :  { %5954 = vmatpush.bf16.msra.mxu0 %v9959_v59  ;;  %5968 = vmatpush.bf16.msrb.mxu3 %v10151_v23  ;;  %v9839_v59 = vor.u32 %v10818_v28, %v9836_v34  ;;  %v10031_v23 = vor.u32 %v10866_v13, %v10028_v29  ;;  %v9722_v50 = vld [vmem:[%s13798_s15 + $0x280] sm:$0xf]  ;;  %v10792_v44 = vld [vmem:[%s13798_s15 + $0x294] sm:$0xf0] }
 0x631   :  { %5906 = vmatmul.bf16.vlgmr.msrb.gmra.mxu0 %v13970_v49  ;;  %5920 = vmatmul.bf16.vlgmr.msra.gmra.mxu3 %v13972_v54  ;;  %v9914_v28 = vld [vmem:[%s13798_s15 + $0x400] sm:$0xf]  ;;  %v10840_v34 = vld [vmem:[%s13798_s15 + $0x414] sm:$0xf0] }
 0x632   :  { %v10106_v13 = vld [vmem:[%s13798_s15 + $0x580] sm:$0xf]  ;;  %v10888_v29 = vld [vmem:[%s13798_s15 + $0x594] sm:$0xf0] }
 0x633   :  { %5927 = vmatpush.bf16.msra.mxu1 %v9551_v6  ;;  %5941 = vmatpush.bf16.msrb.mxu2 %v9743_v12  ;;  %v10710_v6 = vld [vmem:[%s13798_s15 + $0xc] sm:$0xf]  ;;  %v9431_v12 = vor.u32 %v10716_v16, %v9428_v8  ;;  %v9506_v16 = vld [vmem:[%s13798_s15 + $0xd0] sm:$0xf]  ;;  %v10738_v8 = vld [vmem:[%s13798_s15 + $0xe4] sm:$0xf0] }
 0x634   :  { %5955 = vmatpush.bf16.msra.mxu0 %v9935_v38  ;;  %5969 = vmatpush.bf16.msrb.mxu3 %v10127_v31  ;;  %v10758_v38 = vld [vmem:[%s13798_s15 + $0x18c] sm:$0xf]  ;;  %v9596_v31 = vld [vmem:[%s13798_s15 + $0x1a0] sm:$0xf0] }
 0x635   :  { %v9599_v21 = vor.u32 %v10758_v38, %v9596_v31  ;;  %v9891_v38 = vor.u32 %v10834_v5, %v9890_v15  ;;  %v10083_v31 = vor.u32 %v10882_v55, %v10082_v7  ;;  %v10897_v15 = vld [vmem:[%s13798_s15 + $0x5e4] sm:$0xf]  ;;  %v10156_v5 = vld [vmem:[%s13798_s15 + $0x5f8] sm:$0xf0] }
 0x637   :  { %5928 = vmatpush.bf16.msra.mxu1 %v9527_v53  ;;  %5942 = vmatpush.bf16.msrb.mxu2 %v9719_v48  ;;  %v9578_v53 = vld [vmem:[%s13798_s15 + $0x160] sm:$0xf]  ;;  %v10756_v48 = vld [vmem:[%s13798_s15 + $0x174] sm:$0xf0] }
 0x638   :  { %5956 = vmatpush.bf16.msra.mxu0 %v9911_v3  ;;  %5970 = vmatpush.bf16.msrb.mxu3 %v10103_v10  ;;  %v9962_v3 = vld [vmem:[%s13798_s15 + $0x460] sm:$0xf]  ;;  %v9407_v10 = vor.u32 %v10710_v6, %v9404_v45  ;;  %v9507_v6 = vor.u32 %v10738_v8, %v9506_v16  ;;  %v10732_v45 = vld [vmem:[%s13798_s15 + $0xb4] sm:$0xf0]  ;;  %v10801_v16 = vld [vmem:[%s13798_s15 + $0x2e4] sm:$0xf] }
 0x639   :  { %v9772_v8 = vld [vmem:[%s13798_s15 + $0x2f8] sm:$0xf0] }
 0x63b   :  { %5929 = vmatpush.bf16.msra.mxu1 %v9503_v60  ;;  %5943 = vmatpush.bf16.msrb.mxu2 %v9695_v41  ;;  %v9579_v60 = vor.u32 %v10756_v48, %v9578_v53  ;;  %v9771_v41 = vor.u32 %v10804_v2, %v9770_v27  ;;  %v9458_v27 = vld [vmem:[%s13798_s15 + $0x70] sm:$0xf]  ;;  %v10726_v2 = vld [vmem:[%s13798_s15 + $0x84] sm:$0xf0] }
 0x63c   :  { %5957 = vmatpush.bf16.msra.mxu0 %v9887_v43  ;;  %5971 = vmatpush.bf16.msrb.mxu3 %v10079_v37  ;;  %v9963_v43 = vor.u32 %v10852_v0, %v9962_v3  ;;  %v10155_v37 = vor.u32 %v10900_v25, %v10154_v36  ;;  %v9867_v3 = vor.u32 %v10828_v52, %v9866_v1  ;;  %v10774_v0 = vld [vmem:[%s13798_s15 + $0x204] sm:$0xf0]  ;;  %v9842_v36 = vld [vmem:[%s13798_s15 + $0x370] sm:$0xf]  ;;  %v10843_v1 = vld [vmem:[%s13798_s15 + $0x434] sm:$0xf] }
 0x63d   :  { %v10822_v25 = vld [vmem:[%s13798_s15 + $0x384] sm:$0xf0]  ;;  %v9940_v52 = vld [vmem:[%s13798_s15 + $0x448] sm:$0xf0] }
 0x63f   :  { %5930 = vmatpush.bf16.msra.mxu1 %v9479_v17  ;;  %5944 = vmatpush.bf16.msrb.mxu2 %v9671_v24  ;;  %v9555_v17 = vor.u32 %v10750_v62, %v9554_v18  ;;  %v9747_v24 = vor.u32 %v10798_v33, %v9746_v57  ;;  %v9434_v18 = vld [vmem:[%s13798_s15 + $0x40] sm:$0xf]  ;;  %v10720_v62 = vld [vmem:[%s13798_s15 + $0x54] sm:$0xf0] }
 0x640   :  { %5958 = vmatpush.bf16.msra.mxu0 %v9863_v40  ;;  %5972 = vmatpush.bf16.msrb.mxu3 %v10055_v11  ;;  %v9939_v40 = vor.u32 %v10846_v32, %v9938_v35  ;;  %v10131_v11 = vor.u32 %v10894_v56, %v10130_v47  ;;  %v9626_v57 = vld [vmem:[%s13798_s15 + $0x1c0] sm:$0xf]  ;;  %v10768_v33 = vld [vmem:[%s13798_s15 + $0x1d4] sm:$0xf0] }
 0x641   :  { %v9818_v35 = vld [vmem:[%s13798_s15 + $0x340] sm:$0xf]  ;;  %v10816_v32 = vld [vmem:[%s13798_s15 + $0x354] sm:$0xf0] }
 0x642   :  { %v10010_v47 = vld [vmem:[%s13798_s15 + $0x4c0] sm:$0xf]  ;;  %v10864_v56 = vld [vmem:[%s13798_s15 + $0x4d4] sm:$0xf0] }
 0x643   :  { %5931 = vmatpush.bf16.msra.mxu1 %v9455_v30  ;;  %5945 = vmatpush.bf16.msrb.mxu2 %v9647_v61  ;;  %v9531_v30 = vor.u32 %v10744_v46, %v9530_v4  ;;  %v9723_v61 = vor.u32 %v10792_v44, %v9722_v50  ;;  %v9627_v4 = vor.u32 %v10768_v33, %v9626_v57  ;;  %v10714_v46 = vld [vmem:[%s13798_s15 + $0x24] sm:$0xf0]  ;;  %v10783_v57 = vld [vmem:[%s13798_s15 + $0x254] sm:$0xf]  ;;  %v9700_v33 = vld [vmem:[%s13798_s15 + $0x268] sm:$0xf0] }
 0x644   :  { %5959 = vmatpush.bf16.msra.mxu0 %v9839_v59  ;;  %5973 = vmatpush.bf16.msrb.mxu3 %v10031_v23  ;;  %v9915_v59 = vor.u32 %v10840_v34, %v9914_v28  ;;  %v10107_v23 = vor.u32 %v10888_v29, %v10106_v13  ;;  %v9819_v50 = vor.u32 %v10816_v32, %v9818_v35  ;;  %v9794_v28 = vld [vmem:[%s13798_s15 + $0x310] sm:$0xf]  ;;  %v10810_v34 = vld [vmem:[%s13798_s15 + $0x324] sm:$0xf0]  ;;  %v10831_v35 = vld [vmem:[%s13798_s15 + $0x3d4] sm:$0xf] }
 0x645   :  { %v10011_v44 = vor.u32 %v10864_v56, %v10010_v47  ;;  %v9986_v13 = vld [vmem:[%s13798_s15 + $0x490] sm:$0xf]  ;;  %v10858_v29 = vld [vmem:[%s13798_s15 + $0x4a4] sm:$0xf0]  ;;  %v9795_v7 = vor.u32 %v10810_v34, %v9794_v28  ;;  %v9892_v32 = vld [vmem:[%s13798_s15 + $0x3e8] sm:$0xf0] }
 0x646   :  { %v9987_v55 = vor.u32 %v10858_v29, %v9986_v13  ;;  %v10879_v47 = vld [vmem:[%s13798_s15 + $0x554] sm:$0xf]  ;;  %v10084_v56 = vld [vmem:[%s13798_s15 + $0x568] sm:$0xf0]  ;;  %v10825_v28 = vld [vmem:[%s13798_s15 + $0x3a4] sm:$0xf] }
 0x647   :  { %5932 = vmatpush.bf16.msra.mxu1 %v9431_v12  ;;  %5946 = vmatpush.bf16.msrb.mxu2 %v9623_v14  ;;  %v9699_v12 = vor.u32 %v10786_v9, %v9698_v20  ;;  %v9482_v14 = vld [vmem:[%s13798_s15 + $0xa0] sm:$0xf]  ;;  %v9964_v9 = vld [vmem:[%s13798_s15 + $0x478] sm:$0xf0]  ;;  %v10873_v13 = vld [vmem:[%s13798_s15 + $0x524] sm:$0xf] }
 0x648   :  { %5960 = vmatpush.bf16.msra.mxu0 %v9815_v26  ;;  %5974 = vmatpush.bf16.msrb.mxu3 %v10007_v42  ;;  %v9674_v26 = vld [vmem:[%s13798_s15 + $0x220] sm:$0xf]  ;;  %v10780_v42 = vld [vmem:[%s13798_s15 + $0x234] sm:$0xf0]  ;;  %v9483_v53 = vor.u32 %v10732_v45, %v9482_v14  ;;  %v10747_v14 = vld [vmem:[%s13798_s15 + $0x134] sm:$0xf] }
 0x649   :  { %v9675_v48 = vor.u32 %v10780_v42, %v9674_v26  ;;  %v9556_v45 = vld [vmem:[%s13798_s15 + $0x148] sm:$0xf0]  ;;  %v10795_v26 = vld [vmem:[%s13798_s15 + $0x2b4] sm:$0xf]  ;;  %v9868_v34 = vld [vmem:[%s13798_s15 + $0x3b8] sm:$0xf0] }
 0x64a   :  { %v9748_v42 = vld [vmem:[%s13798_s15 + $0x2c8] sm:$0xf0]  ;;  %v10060_v29 = vld [vmem:[%s13798_s15 + $0x538] sm:$0xf0] }
 0x64b   :  { %5933 = vmatpush.bf16.msra.mxu1 %v9407_v10  ;;  %5947 = vmatpush.bf16.msrb.mxu2 %v9599_v21  ;;  %v10059_v10 = vor.u32 %v10876_v39, %v10058_v63  ;;  %v9650_v21 = vld [vmem:[%s13798_s15 + $0x1f0] sm:$0xf]  ;;  %v10891_v63 = vld [vmem:[%s13798_s15 + $0x5b4] sm:$0xf]  ;;  %v10132_v39 = vld [vmem:[%s13798_s15 + $0x5c8] sm:$0xf0] }
 0x64c   :  { %5961 = vmatpush.bf16.msra.mxu0 %v9791_v51  ;;  %5975 = vmatpush.bf16.msrb.mxu3 %v9983_v22  ;;  %v10034_v51 = vld [vmem:[%s13798_s15 + $0x4f0] sm:$0xf]  ;;  %v10870_v22 = vld [vmem:[%s13798_s15 + $0x504] sm:$0xf0] }
 0x64e   :  { %5934 = vmatmul.bf16.vlgmr.msra.gmra.mxu1 %v13966_v58  ;;  %5948 = vmatmul.bf16.vlgmr.msrb.gmra.mxu2 %v13968_v19 }
 0x64f   :  { %5982 = vmatpush.bf16.msrb.mxu1 %v9579_v60  ;;  %5996 = vmatpush.bf16.msra.mxu2 %v9771_v41  ;;  %v9459_v60 = vor.u32 %v10726_v2, %v9458_v27  ;;  %v9651_v41 = vor.u32 %v10774_v0, %v9650_v21  ;;  %v10741_v27 = vld [vmem:[%s13798_s15 + $0x104] sm:$0xf]  ;;  %v9532_v2 = vld [vmem:[%s13798_s15 + $0x118] sm:$0xf0] }
 0x650   :  { %6010 = vmatpush.bf16.msrb.mxu0 %v9963_v43  ;;  %6024 = vmatpush.bf16.msra.mxu3 %v10155_v37  ;;  %v9843_v43 = vor.u32 %v10822_v25, %v9842_v36  ;;  %v10035_v37 = vor.u32 %v10870_v22, %v10034_v51  ;;  %v10789_v21 = vld [vmem:[%s13798_s15 + $0x284] sm:$0xf]  ;;  %v9724_v0 = vld [vmem:[%s13798_s15 + $0x298] sm:$0xf0] }
 0x651   :  { %5962 = vmatmul.bf16.vlgmr.msra.gmra.mxu0 %v13970_v49  ;;  %5976 = vmatmul.bf16.vlgmr.msrb.gmra.mxu3 %v13972_v54  ;;  %v10837_v36 = vld [vmem:[%s13798_s15 + $0x404] sm:$0xf]  ;;  %v9916_v25 = vld [vmem:[%s13798_s15 + $0x418] sm:$0xf0] }
 0x652   :  { %v10885_v51 = vld [vmem:[%s13798_s15 + $0x584] sm:$0xf]  ;;  %v10108_v22 = vld [vmem:[%s13798_s15 + $0x598] sm:$0xf0] }
 0x653   :  { %5983 = vmatpush.bf16.msrb.mxu1 %v9555_v17  ;;  %5997 = vmatpush.bf16.msra.mxu2 %v9747_v24  ;;  %v9410_v17 = vld [vmem:[%s13798_s15 + $0x10] sm:$0xf]  ;;  %v9435_v24 = vor.u32 %v10720_v62, %v9434_v18  ;;  %v10735_v18 = vld [vmem:[%s13798_s15 + $0xd4] sm:$0xf]  ;;  %v9508_v62 = vld [vmem:[%s13798_s15 + $0xe8] sm:$0xf0] }
 0x654   :  { %6011 = vmatpush.bf16.msrb.mxu0 %v9939_v40  ;;  %6025 = vmatpush.bf16.msra.mxu3 %v10131_v11  ;;  %v9602_v40 = vld [vmem:[%s13798_s15 + $0x190] sm:$0xf]  ;;  %v10762_v11 = vld [vmem:[%s13798_s15 + $0x1a4] sm:$0xf0] }
 0x655   :  { %v9603_v20 = vor.u32 %v10762_v11, %v9602_v40  ;;  %v9895_v40 = vor.u32 %v10831_v35, %v9892_v32  ;;  %v10087_v11 = vor.u32 %v10879_v47, %v10084_v56 }
 0x657   :  { %5984 = vmatpush.bf16.msrb.mxu1 %v9531_v30  ;;  %5998 = vmatpush.bf16.msra.mxu2 %v9723_v61  ;;  %v10753_v30 = vld [vmem:[%s13798_s15 + $0x164] sm:$0xf]  ;;  %v9580_v61 = vld [vmem:[%s13798_s15 + $0x178] sm:$0xf0] }
 0x658   :  { %6012 = vmatpush.bf16.msrb.mxu0 %v9915_v59  ;;  %6026 = vmatpush.bf16.msra.mxu3 %v10107_v23  ;;  %v10849_v59 = vld [vmem:[%s13798_s15 + $0x464] sm:$0xf]  ;;  %v9411_v23 = vor.u32 %v10714_v46, %v9410_v17  ;;  %v9511_v17 = vor.u32 %v10735_v18, %v9508_v62  ;;  %v9484_v46 = vld [vmem:[%s13798_s15 + $0xb8] sm:$0xf0] }
 0x65b   :  { %5985 = vmatpush.bf16.msrb.mxu1 %v9507_v6  ;;  %5999 = vmatpush.bf16.msra.mxu2 %v9699_v12  ;;  %v9583_v6 = vor.u32 %v10753_v30, %v9580_v61  ;;  %v9775_v12 = vor.u32 %v10801_v16, %v9772_v8  ;;  %v10723_v16 = vld [vmem:[%s13798_s15 + $0x74] sm:$0xf]  ;;  %v9460_v8 = vld [vmem:[%s13798_s15 + $0x88] sm:$0xf0] }
 0x65c   :  { %6013 = vmatpush.bf16.msrb.mxu0 %v9891_v38  ;;  %6027 = vmatpush.bf16.msra.mxu3 %v10083_v31  ;;  %v9967_v38 = vor.u32 %v10849_v59, %v9964_v9  ;;  %v10159_v31 = vor.u32 %v10897_v15, %v10156_v5  ;;  %v9871_v59 = vor.u32 %v10825_v28, %v9868_v34  ;;  %v9652_v9 = vld [vmem:[%s13798_s15 + $0x208] sm:$0xf0]  ;;  %v10819_v15 = vld [vmem:[%s13798_s15 + $0x374] sm:$0xf] }
 0x65d   :  { %v9844_v5 = vld [vmem:[%s13798_s15 + $0x388] sm:$0xf0] }
 0x65f   :  { %5986 = vmatpush.bf16.msrb.mxu1 %v9483_v53  ;;  %6000 = vmatpush.bf16.msra.mxu2 %v9675_v48  ;;  %v9559_v53 = vor.u32 %v10747_v14, %v9556_v45  ;;  %v9751_v48 = vor.u32 %v10795_v26, %v9748_v42  ;;  %v10717_v14 = vld [vmem:[%s13798_s15 + $0x44] sm:$0xf]  ;;  %v9436_v45 = vld [vmem:[%s13798_s15 + $0x58] sm:$0xf0] }
 0x660   :  { %6014 = vmatpush.bf16.msrb.mxu0 %v9867_v3  ;;  %6028 = vmatpush.bf16.msra.mxu3 %v10059_v10  ;;  %v9943_v3 = vor.u32 %v10843_v1, %v9940_v52  ;;  %v10135_v10 = vor.u32 %v10891_v63, %v10132_v39  ;;  %v10765_v26 = vld [vmem:[%s13798_s15 + $0x1c4] sm:$0xf]  ;;  %v9628_v42 = vld [vmem:[%s13798_s15 + $0x1d8] sm:$0xf0] }
 0x661   :  { %v10813_v1 = vld [vmem:[%s13798_s15 + $0x344] sm:$0xf]  ;;  %v9820_v52 = vld [vmem:[%s13798_s15 + $0x358] sm:$0xf0] }
 0x662   :  { %v10861_v63 = vld [vmem:[%s13798_s15 + $0x4c4] sm:$0xf]  ;;  %v10012_v39 = vld [vmem:[%s13798_s15 + $0x4d8] sm:$0xf0] }
 0x663   :  { %5987 = vmatpush.bf16.msrb.mxu1 %v9459_v60  ;;  %6001 = vmatpush.bf16.msra.mxu2 %v9651_v41  ;;  %v9535_v60 = vor.u32 %v10741_v27, %v9532_v2  ;;  %v9727_v41 = vor.u32 %v10789_v21, %v9724_v0  ;;  %v10711_v27 = vld [vmem:[%s13798_s15 + $0x14] sm:$0xf]  ;;  %v9412_v2 = vld [vmem:[%s13798_s15 + $0x28] sm:$0xf0] }
 0x664   :  { %6015 = vmatpush.bf16.msrb.mxu0 %v9843_v43  ;;  %6029 = vmatpush.bf16.msra.mxu3 %v10035_v37  ;;  %v9919_v43 = vor.u32 %v10837_v36, %v9916_v25  ;;  %v10111_v37 = vor.u32 %v10885_v51, %v10108_v22  ;;  %v10759_v21 = vld [vmem:[%s13798_s15 + $0x194] sm:$0xf]  ;;  %v9604_v0 = vld [vmem:[%s13798_s15 + $0x1a8] sm:$0xf0] }
 0x665   :  { %v10807_v36 = vld [vmem:[%s13798_s15 + $0x314] sm:$0xf]  ;;  %v9796_v25 = vld [vmem:[%s13798_s15 + $0x328] sm:$0xf0] }
 0x666   :  { %v10855_v51 = vld [vmem:[%s13798_s15 + $0x494] sm:$0xf]  ;;  %v9988_v22 = vld [vmem:[%s13798_s15 + $0x4a8] sm:$0xf0]  ;;  %v9799_v18 = vor.u32 %v10807_v36, %v9796_v25 }
 0x667   :  { %5988 = vmatpush.bf16.msrb.mxu1 %v9435_v24  ;;  %6002 = vmatpush.bf16.msra.mxu2 %v9627_v4  ;;  %v9703_v24 = vor.u32 %v10783_v57, %v9700_v33  ;;  %v10729_v4 = vld [vmem:[%s13798_s15 + $0xa4] sm:$0xf]  ;;  %v9991_v62 = vor.u32 %v10855_v51, %v9988_v22 }
 0x668   :  { %6016 = vmatpush.bf16.msrb.mxu0 %v9819_v50  ;;  %6030 = vmatpush.bf16.msra.mxu3 %v10011_v44  ;;  %v10777_v50 = vld [vmem:[%s13798_s15 + $0x224] sm:$0xf]  ;;  %v9676_v44 = vld [vmem:[%s13798_s15 + $0x238] sm:$0xf0]  ;;  %v9487_v30 = vor.u32 %v10729_v4, %v9484_v46 }
 0x669   :  { %v9679_v61 = vor.u32 %v10777_v50, %v9676_v44 }
 0x66b   :  { %5989 = vmatpush.bf16.msrb.mxu1 %v9411_v23  ;;  %6003 = vmatpush.bf16.msra.mxu2 %v9603_v20  ;;  %v10063_v23 = vor.u32 %v10873_v13, %v10060_v29  ;;  %v10771_v20 = vld [vmem:[%s13798_s15 + $0x1f4] sm:$0xf] }
 0x66c   :  { %6017 = vmatpush.bf16.msrb.mxu0 %v9795_v7  ;;  %6031 = vmatpush.bf16.msra.mxu3 %v9987_v55  ;;  %v10867_v7 = vld [vmem:[%s13798_s15 + $0x4f4] sm:$0xf]  ;;  %v10036_v55 = vld [vmem:[%s13798_s15 + $0x508] sm:$0xf0]  ;;  %s14952_s15 = sld [smem:[%s15267_s0 + %s11366_s8]]  }
 0x66e   :  { %5990 = vmatmul.bf16.vlgmr.msrb.gmra.mxu1 %v13966_v58  ;;  %6004 = vmatmul.bf16.vlgmr.msra.gmra.mxu2 %v13968_v19 }
 0x66f   :  { %6038 = vmatpush.bf16.msra.mxu1 %v9583_v6  ;;  %6052 = vmatpush.bf16.msrb.mxu2 %v9775_v12  ;;  %v9463_v6 = vor.u32 %v10723_v16, %v9460_v8  ;;  %v9655_v12 = vor.u32 %v10771_v20, %v9652_v9 }
 0x670   :  { %6066 = vmatpush.bf16.msra.mxu0 %v9967_v38  ;;  %6080 = vmatpush.bf16.msrb.mxu3 %v10159_v31  ;;  %v9847_v38 = vor.u32 %v10819_v15, %v9844_v5  ;;  %v10039_v31 = vor.u32 %v10867_v7, %v10036_v55 }
 0x671   :  { %6018 = vmatmul.bf16.vlgmr.msrb.gmra.mxu0 %v13970_v49  ;;  %6032 = vmatmul.bf16.vlgmr.msra.gmra.mxu3 %v13972_v54 }
 0x673   :  { %6039 = vmatpush.bf16.msra.mxu1 %v9559_v53  ;;  %6053 = vmatpush.bf16.msrb.mxu2 %v9751_v48  ;;  %v9439_v53 = vor.u32 %v10717_v14, %v9436_v45  ;;  %v9631_v48 = vor.u32 %v10765_v26, %v9628_v42 }
 0x674   :  { %6067 = vmatpush.bf16.msra.mxu0 %v9943_v3  ;;  %6081 = vmatpush.bf16.msrb.mxu3 %v10135_v10  ;;  %v9823_v3 = vor.u32 %v10813_v1, %v9820_v52  ;;  %v10015_v10 = vor.u32 %v10861_v63, %v10012_v39 }
 0x677   :  { %6040 = vmatpush.bf16.msra.mxu1 %v9535_v60  ;;  %6054 = vmatpush.bf16.msrb.mxu2 %v9727_v41  ;;  %v9415_v60 = vor.u32 %v10711_v27, %v9412_v2  ;;  %v9607_v41 = vor.u32 %v10759_v21, %v9604_v0 }
 0x678   :  { %6068 = vmatpush.bf16.msra.mxu0 %v9919_v43  ;;  %6082 = vmatpush.bf16.msrb.mxu3 %v10111_v37 }
 0x67b   :  { %6041 = vmatpush.bf16.msra.mxu1 %v9511_v17  ;;  %6055 = vmatpush.bf16.msrb.mxu2 %v9703_v24 }
 0x67c   :  { %6069 = vmatpush.bf16.msra.mxu0 %v9895_v40  ;;  %6083 = vmatpush.bf16.msrb.mxu3 %v10087_v11 }
 0x67f   :  { %6042 = vmatpush.bf16.msra.mxu1 %v9487_v30  ;;  %6056 = vmatpush.bf16.msrb.mxu2 %v9679_v61 }
 0x680   :  { %6070 = vmatpush.bf16.msra.mxu0 %v9871_v59  ;;  %6084 = vmatpush.bf16.msrb.mxu3 %v10063_v23 }
 0x683   :  { %6043 = vmatpush.bf16.msra.mxu1 %v9463_v6  ;;  %6057 = vmatpush.bf16.msrb.mxu2 %v9655_v12 }
 0x684   :  { %6071 = vmatpush.bf16.msra.mxu0 %v9847_v38  ;;  %6085 = vmatpush.bf16.msrb.mxu3 %v10039_v31 }
 0x687   :  { %6044 = vmatpush.bf16.msra.mxu1 %v9439_v53  ;;  %6058 = vmatpush.bf16.msrb.mxu2 %v9631_v48 }
 0x688   :  { %6072 = vmatpush.bf16.msra.mxu0 %v9823_v3  ;;  %6086 = vmatpush.bf16.msrb.mxu3 %v10015_v10 }
 0x68a   :  { %v5767_v43 = vpop.f32.mrf.mxu1 }
 0x68b   :  { %6045 = vmatpush.bf16.msra.mxu1 %v9415_v60  ;;  %6059 = vmatpush.bf16.msrb.mxu2 %v9607_v41  ;;  %v5795_v37 = vpop.f32.mrf.mxu0 }
 0x68c   :  { %6073 = vmatpush.bf16.msra.mxu0 %v9799_v18  ;;  %6087 = vmatpush.bf16.msrb.mxu3 %v9991_v62 }
 0x68e   :  { %6046 = vmatmul.bf16.vlgmr.msra.gmra.mxu1 %v13966_v58  ;;  %6060 = vmatmul.bf16.vlgmr.msrb.gmra.mxu2 %v13968_v19 }
 0x68f   :  { %6074 = vmatmul.bf16.vlgmr.msra.gmra.mxu0 %v13970_v49  ;;  %6088 = vmatmul.bf16.vlgmr.msrb.gmra.mxu3 %v13972_v54 }
 0x690   :  { %v5781_v57 = vpop.f32.mrf.mxu2 }
 0x691   :  { %v5809_v33 = vpop.f32.mrf.mxu3  ;;  %v5782_v47 = vadd.f32 %v5781_v57, %v5767_v43 }
 0x692   :  { %v5769_v35 = vpop.f32.mrf.mxu1 }
 0x693   :  { %v5797_v32 = vpop.f32.mrf.mxu0  ;;  %v5796_v17 = vadd.f32 %v5795_v37, %v5782_v47 }
 0x695   :  { %v14246_v58 = vadd.f32 %v5809_v33, %v5796_v17 }
 0x698   :  { %v5783_v56 = vpop.f32.mrf.mxu2 }
 0x699   :  { %v5784_v24 = vadd.f32 %v5783_v56, %v5769_v35  ;;  %v5811_v4 = vpop.f32.mrf.mxu3 }
 0x69a   :  { %v5823_v40 = vpop.f32.mrf.mxu1 }
 0x69b   :  { %v5798_v46 = vadd.f32 %v5797_v32, %v5784_v24  ;;  %v5851_v49 = vpop.f32.mrf.mxu0 }
 0x69d   :  { %v14248_v19 = vadd.f32 %v5811_v4, %v5798_v46 }
 0x69f   :  { %v11086_v54 = vpack.i.bf16 %v14248_v19, %v14246_v58 }
 0x6a0   :  { %v5837_v11 = vpop.f32.mrf.mxu2 }
 0x6a1   :  { %v5865_v50 = vpop.f32.mrf.mxu3  ;;  %11087 = vrot.lane.b32.xlu0 %v11086_v54, %s11350_s16  ;;  %11082 = vrot.lane.b32.xlu1 %v11086_v54, %s11335_s12  ;;  %v5838_v29 = vadd.f32 %v5837_v11, %v5823_v40 }
 0x6a2   :  { %11062 = vrot.lane.b32.xlu2 %v11086_v54, %s11342_s19  ;;  %v5825_v44 = vpop.f32.mrf.mxu1 }
 0x6a3   :  { %v5853_v28 = vpop.f32.mrf.mxu0  ;;  %v5852_v8 = vadd.f32 %v5851_v49, %v5838_v29 }
 0x6a5   :  { %v14258_v9 = vadd.f32 %v5865_v50, %v5852_v8 }
 0x6a8   :  { %v5839_v34 = vpop.f32.mrf.mxu2 }
 0x6a9   :  { %11097 = vrot.lane.b32.xlu0 %v11086_v54, %s11330_s7  ;;  %v5867_v13 = vpop.f32.mrf.mxu3  ;;  %v5840_v15 = vadd.f32 %v5839_v34, %v5825_v44 }
 0x6aa   :  { %11067 = vrot.lane.b32.xlu2 %v11086_v54, %s11340_s17 }
 0x6ab   :  { %v5879_v30 = vpop.f32.mrf.mxu1  ;;  %v5854_v12 = vadd.f32 %v5853_v28, %v5840_v15 }
 0x6ad   :  { %v14267_v26 = vadd.f32 %v5867_v13, %v5854_v12 }
 0x6ae   :  { %v5907_v61 = vpop.f32.mrf.mxu0 }
 0x6b1   :  { %v5893_v16 = vpop.f32.mrf.mxu2 }
 0x6b2   :  { %11072 = vrot.lane.b32.xlu2 %v11086_v54, %s11351_s18  ;;  %v5894_v59 = vadd.f32 %v5893_v16, %v5879_v30 }
 0x6b3   :  { %v5881_v55 = vpop.f32.mrf.mxu1 }
 0x6b4   :  { %v5921_v23 = vpop.f32.mrf.mxu3  ;;  %v5908_v20 = vadd.f32 %v5907_v61, %v5894_v59 }
 0x6b6   :  { %v14260_v5 = vadd.f32 %v5921_v23, %v5908_v20  ;;  %v5909_v45 = vpop.f32.mrf.mxu0 }
 0x6b8   :  { %v11111_v7 = vpack.i.bf16 %v14260_v5, %v14258_v9 }
 0x6b9   :  { %v5895_v6 = vpop.f32.mrf.mxu2 }
 0x6ba   :  { %11077 = vrot.lane.b32.xlu2 %v11086_v54, %s11337_s14  ;;  %v5896_v14 = vadd.f32 %v5895_v6, %v5881_v55  ;;  %11112 = vrot.lane.b32.xlu0 %v11111_v7, %s11351_s18 }
 0x6bb   :  { %11137 = vrot.lane.b32.xlu1 %v11111_v7, %s11330_s7 }
 0x6bc   :  { %v5910_v38 = vadd.f32 %v5909_v45, %v5896_v14  ;;  %v5923_v31 = vpop.f32.mrf.mxu3  ;;  %v10908_v45 = vld [vmem:[%s14338_s24 + $0x38] sm:$0xff] }
 0x6bd   :  { %6828 = vmatpush.bf16.msrb.mxu1 %v10908_v45 }
 0x6be   :  { %v14269_v42 = vadd.f32 %v5923_v31, %v5910_v38  ;;  %v10916_v38 = vld [vmem:[%s14338_s24 + $0x78] sm:$0xff] }
 0x6bf   :  { %6842 = vmatpush.bf16.msra.mxu2 %v10916_v38 }
 0x6c0   :  { %v11141_v1 = vpack.i.bf16 %v14269_v42, %v14267_v26 }
 0x6c2   :  { %11092 = vrot.lane.b32.xlu2 %v11086_v54, %s11352_s20  ;;  %11117 = vrot.lane.b32.xlu0 %v11111_v7, %s11337_s14 }
 0x6c3   :  { %11142 = vrot.lane.b32.xlu1 %v11141_v1, %s11342_s19 }
 0x6ca   :  { %11102 = vrot.lane.b32.xlu2 %v11111_v7, %s11342_s19  ;;  %11122 = vrot.lane.b32.xlu0 %v11111_v7, %s11335_s12 }
 0x6cb   :  { %11147 = vrot.lane.b32.xlu1 %v11141_v1, %s11340_s17  ;;  %v5935_v52 = vpop.f32.mrf.mxu1 }
 0x6ce   :  { %v5963_v63 = vpop.f32.mrf.mxu0 }
 0x6d1   :  { %v5949_v39 = vpop.f32.mrf.mxu2 }
 0x6d2   :  { %11107 = vrot.lane.b32.xlu2 %v11111_v7, %s11340_s17  ;;  %11127 = vrot.lane.b32.xlu0 %v11111_v7, %s11350_s16  ;;  %v5950_v10 = vadd.f32 %v5949_v39, %v5935_v52  ;;  %v10915_v52 = vld [vmem:[%s14338_s24 + $0x70] sm:$0xff]  ;;  %v6954_v39 = vld [vmem:[%s14350_s28 + $0x8] sm:$0xff] }
 0x6d3   :  { %11152 = vrot.lane.b32.xlu1 %v11141_v1, %s11351_s18  ;;  %v5937_v48 = vpop.f32.mrf.mxu1  ;;  %6843 = vmatpush.bf16.msra.mxu2 %v10915_v52 }
 0x6d4   :  { %v5977_v53 = vpop.f32.mrf.mxu3  ;;  %v5964_v25 = vadd.f32 %v5963_v63, %v5950_v10 }
 0x6d6   :  { %v5965_v27 = vpop.f32.mrf.mxu0  ;;  %v14288_v41 = vadd.f32 %v5977_v53, %v5964_v25  ;;  %v10912_v25 = vld [vmem:[%s14338_s24 + $0x58] sm:$0xff] }
 0x6d9   :  { %v5951_v2 = vpop.f32.mrf.mxu2 }
 0x6da   :  { %11132 = vrot.lane.b32.xlu2 %v11111_v7, %s11352_s20  ;;  %11172 = vrot.lane.b32.xlu0 %v11141_v1, %s11352_s20  ;;  %v5952_v18 = vadd.f32 %v5951_v2, %v5937_v48  ;;  %v10906_v48 = vld [vmem:[%s14338_s24 + $0x28] sm:$0xff]  ;;  %v10905_v2 = vld [vmem:[%s14338_s24 + $0x20] sm:$0xff] }
 0x6db   :  { %11157 = vrot.lane.b32.xlu1 %v11141_v1, %s11337_s14 }
 0x6dc   :  { %v5979_v3 = vpop.f32.mrf.mxu3  ;;  %v5966_v33 = vadd.f32 %v5965_v27, %v5952_v18  ;;  %v10914_v27 = vld [vmem:[%s14338_s24 + $0x68] sm:$0xff] }
 0x6dd   :  { %6844 = vmatpush.bf16.msra.mxu2 %v10914_v27 }
 0x6de   :  { %v14297_v17 = vadd.f32 %v5979_v3, %v5966_v33  ;;  %v10913_v3 = vld [vmem:[%s14338_s24 + $0x60] sm:$0xff]  ;;  %v10910_v33 = vld [vmem:[%s14338_s24 + $0x48] sm:$0xff] }
 0x6e1   :  { %6845 = vmatpush.bf16.msra.mxu2 %v10913_v3 }
 0x6e2   :  { %11177 = vrot.lane.b32.xlu2 %v11141_v1, %s11330_s7 }
 0x6e3   :  { %11162 = vrot.lane.b32.xlu1 %v11141_v1, %s11335_s12 }
 0x6e5   :  { %6846 = vmatpush.bf16.msra.mxu2 %v10912_v25 }
 0x6eb   :  { %11167 = vrot.lane.b32.xlu1 %v11141_v1, %s11350_s16  ;;  %v5991_v21 = vpop.f32.mrf.mxu1  ;;  %v10907_v1 = vld [vmem:[%s14338_s24 + $0x30] sm:$0xff] }
 0x6ec   :  { %6829 = vmatpush.bf16.msrb.mxu1 %v10907_v1 }
 0x6ee   :  { %v6019_v0 = vpop.f32.mrf.mxu0 }
 0x6f0   :  { %6830 = vmatpush.bf16.msrb.mxu1 %v10906_v48 }
 0x6f1   :  { %v6005_v36 = vpop.f32.mrf.mxu2 }
 0x6f2   :  { %v6006_v51 = vadd.f32 %v6005_v36, %v5991_v21  ;;  %v10904_v36 = vld [vmem:[%s14338_s24 + $0x18] sm:$0xff] }
 0x6f3   :  { %v5993_v37 = vpop.f32.mrf.mxu1 }
 0x6f4   :  { %v6033_v22 = vpop.f32.mrf.mxu3  ;;  %v6020_v60 = vadd.f32 %v6019_v0, %v6006_v51  ;;  %6831 = vmatpush.bf16.msrb.mxu1 %v10905_v2  ;;  %v10903_v51 = vld [vmem:[%s14338_s24 + $0x10] sm:$0xff] }
 0x6f6   :  { %v14290_v62 = vadd.f32 %v6033_v22, %v6020_v60  ;;  %v6021_v32 = vpop.f32.mrf.mxu0  ;;  %v10911_v22 = vld [vmem:[%s14338_s24 + $0x50] sm:$0xff] }
 0x6f7   :  { %6847 = vmatpush.bf16.msra.mxu2 %v10911_v22 }
 0x6f8   :  { %v11191_v43 = vpack.i.bf16 %v14290_v62, %v14288_v41  ;;  %6832 = vmatpush.bf16.msrb.mxu1 %v10904_v36 }
 0x6f9   :  { %v6007_v57 = vpop.f32.mrf.mxu2 }
 0x6fa   :  { %v6008_v35 = vadd.f32 %v6007_v57, %v5993_v37  ;;  %11192 = vrot.lane.b32.xlu0 %v11191_v43, %s11351_s18  ;;  %11187 = vrot.lane.b32.xlu1 %v11191_v43, %s11340_s17  ;;  %v10902_v57 = vld [vmem:[%s14338_s24 + $0x8] sm:$0xff] }
 0x6fb   :  { %11182 = vrot.lane.b32.xlu2 %v11191_v43, %s11342_s19  ;;  %6848 = vmatpush.bf16.msra.mxu2 %v10910_v33 }
 0x6fc   :  { %v6022_v47 = vadd.f32 %v6021_v32, %v6008_v35  ;;  %v6035_v56 = vpop.f32.mrf.mxu3  ;;  %v14303_v46 = vpop.permute.xlu2 %11062  ;;  %6833 = vmatpush.bf16.msrb.mxu1 %v10903_v51 }
 0x6fd   :  { %v11064_v35 = vunpack.i.l.bf16 %v14303_v46 }
 0x6fe   :  { %v14299_v24 = vadd.f32 %v6035_v56, %v6022_v47 }
 0x700   :  { %v11216_v4 = vpack.i.bf16 %v14299_v24, %v14297_v17  ;;  %6834 = vmatpush.bf16.msrb.mxu1 %v10902_v57 }
 0x702   :  { %11217 = vrot.lane.b32.xlu0 %v11216_v4, %s11342_s19  ;;  %11197 = vrot.lane.b32.xlu1 %v11191_v43, %s11337_s14 }
 0x703   :  { %11202 = vrot.lane.b32.xlu2 %v11191_v43, %s11335_s12 }
 0x704   :  { %v14311_v40 = vpop.permute.xlu2 %11067 }
 0x70a   :  { %11242 = vrot.lane.b32.xlu0 %v11216_v4, %s11335_s12  ;;  %11227 = vrot.lane.b32.xlu1 %v11216_v4, %s11351_s18 }
 0x70b   :  { %11207 = vrot.lane.b32.xlu2 %v11191_v43, %s11350_s16  ;;  %v6047_v49 = vpop.f32.mrf.mxu1 }
 0x70c   :  { %v6075_v54 = vpop.f32.mrf.mxu0  ;;  %v14315_v28 = vpop.permute.xlu2 %11072 }
 0x711   :  { %v6061_v11 = vpop.f32.mrf.mxu2 }
 0x712   :  { %v6089_v50 = vpop.f32.mrf.mxu3  ;;  %11247 = vrot.lane.b32.xlu0 %v11216_v4, %s11350_s16  ;;  %v6062_v44 = vadd.f32 %v6061_v11, %v6047_v49  ;;  %v11069_v49 = vunpack.i.l.bf16 %v14311_v40 }
 0x713   :  { %11212 = vrot.lane.b32.xlu2 %v11191_v43, %s11352_s20  ;;  %v6049_v34 = vpop.f32.mrf.mxu1  ;;  %v14330_v7 = vpop.permute.xlu0 %11087 }
 0x714   :  { %v6076_v29 = vadd.f32 %v6075_v54, %v6062_v44  ;;  %v6077_v61 = vpop.f32.mrf.mxu0  ;;  %v14325_v15 = vpop.permute.xlu2 %11077  ;;  %v11065_v44 = vunpack.i.h.bf16 %v14303_v46  ;;  %v11074_v46 = vunpack.i.l.bf16 %v14315_v28  ;;  %v11089_v45 = vunpack.i.l.bf16 %v14330_v7 }
 0x715   :  { %v14333_v55 = vpop.permute.xlu1 %11082  ;;  %v11080_v48 = vunpack.i.h.bf16 %v14325_v15 }
 0x716   :  { %v14318_v59 = vadd.f32 %v6089_v50, %v6076_v29  ;;  %v10909_v50 = vld [vmem:[%s14338_s24 + $0x40] sm:$0xff]  ;;  %v11085_v1 = vunpack.i.h.bf16 %v14333_v55 }
 0x717   :  { %6849 = vmatpush.bf16.msra.mxu2 %v10909_v50 }
 0x719   :  { %v6063_v13 = vpop.f32.mrf.mxu2 }
 0x71a   :  { %v6064_v30 = vadd.f32 %v6063_v13, %v6049_v34  ;;  %v6091_v8 = vpop.f32.mrf.mxu3  ;;  %11252 = vrot.lane.b32.xlu0 %v11216_v4, %s11352_s20  ;;  %v11070_v34 = vunpack.i.h.bf16 %v14311_v40  ;;  %v11075_v13 = vunpack.i.h.bf16 %v14315_v28  ;;  %v11090_v40 = vunpack.i.h.bf16 %v14330_v7 }
 0x71b   :  { %11222 = vrot.lane.b32.xlu2 %v11216_v4, %s11340_s17  ;;  %v14344_v12 = vpop.permute.xlu0 %11097  ;;  %v11079_v28 = vunpack.i.l.bf16 %v14325_v15 }
 0x71c   :  { %v6078_v16 = vadd.f32 %v6077_v61, %v6064_v30  ;;  %v14340_v6 = vpop.permute.xlu2 %11092 }
 0x71e   :  { %v14320_v23 = vadd.f32 %v6091_v8, %v6078_v16 }
 0x720   :  { %v11266_v20 = vpack.i.bf16 %v14320_v23, %v14318_v59 }
 0x722   :  { %11267 = vrot.lane.b32.xlu1 %v11266_v20, %s11340_s17  ;;  %11257 = vrot.lane.b32.xlu0 %v11266_v20, %s11342_s19 }
 0x723   :  { %11232 = vrot.lane.b32.xlu2 %v11216_v4, %s11337_s14 }
 0x724   :  { %v14357_v31 = vpop.permute.xlu2 %11102 }
 0x725   :  { %v15313_v18 = vunpack.i.h.bf16 %v14357_v31 }
 0x72a   :  { %11272 = vrot.lane.b32.xlu1 %v11266_v20, %s11351_s18  ;;  %11262 = vrot.lane.b32.xlu0 %v11216_v4, %s11330_s7  ;;  %v10901_v4 = vld [vmem:[%s14338_s24] sm:$0xff]  ;;  %s8612_s18 = sld [smem:[%s15267_s0 + %s11358_s13]]   ;;  %s11380_s13 = smov 25  }
 0x72b   :  { %11237 = vrot.lane.b32.xlu2 %v11191_v43, %s11330_s7  ;;  %v11104_v43 = vunpack.i.l.bf16 %v14357_v31  ;;  %6835 = vmatpush.bf16.msrb.mxu1 %v10901_v4 }
 0x72c   :  { %v14362_v63 = vpop.permute.xlu0 %11112  ;;  %v14372_v10 = vpop.permute.xlu2 %11107 }
 0x72d   :  { %v14352_v14 = vpop.permute.xlu1 %11137  ;;  %v15312_v32 = vunpack.i.h.bf16 %v14372_v10  ;;  %v11109_v47 = vunpack.i.l.bf16 %v14372_v10  ;;  %v6130_v54 = vsel %vm695_vm13, %v11064_v35, %v11104_v43  ;;  %v6131_v11 = vsel %vm695_vm13, %v11104_v43, %v15313_v18 }
 0x72e   :  { %v6152_v61 = vmax.f32 %v14246_v58, %v6130_v54  ;;  %v6153_v16 = vmax.f32 %v14258_v9, %v6131_v11  ;;  %v15308_v8 = vunpack.i.h.bf16 %v14362_v63  ;;  %v11084_v58 = vunpack.i.l.bf16 %v14333_v55 }
 0x72f   :  { %v6188_v29 = vsel %vm778_vm11, %v11069_v49, %v11109_v47  ;;  %v6189_v30 = vsel %vm778_vm11, %v11109_v47, %v15312_v32  ;;  %v11094_v35 = vunpack.i.l.bf16 %v14340_v6 }
 0x730   :  { %v6210_v52 = vmax.f32 %v6152_v61, %v6188_v29  ;;  %v6211_v9 = vmax.f32 %v6153_v16, %v6189_v30 }
 0x732   :  { %11277 = vrot.lane.b32.xlu1 %v11266_v20, %s11337_s14  ;;  %11297 = vrot.lane.b32.xlu0 %v11266_v20, %s11330_s7  ;;  %s11355_s7 = smov 10   ;;  %s8616_s14 = sld [smem:[%s15267_s0 + %s11363_s27]]  }
 0x733   :  { %11292 = vrot.lane.b32.xlu2 %v11266_v20, %s11352_s20  ;;  %s8611_s30 = sld [smem:[%s15267_s0 + %s11355_s7]]   ;;  %s11359_s20 = smov 7  }
 0x734   :  { %v14375_v21 = vpop.permute.xlu0 %11117  ;;  %v14383_v60 = vpop.permute.xlu2 %11132  ;;  %s14807_s23 = sld [smem:[%s15267_s0 + %s11359_s20]]   ;;  %s11369_s7 = smov 18  }
 0x735   :  { %v14366_v53 = vpop.permute.xlu1 %11142  ;;  %v15309_v22 = vunpack.i.h.bf16 %v14375_v21  ;;  %v11119_v43 = vunpack.i.l.bf16 %v14375_v21  ;;  %v11135_v49 = vunpack.i.h.bf16 %v14383_v60  ;;  %v11134_v54 = vunpack.i.l.bf16 %v14383_v60  ;;  %s11381_s20 = smov 115   ;;  %s11392_s27 = smov 37  }
 0x736   :  { %v15311_v25 = vunpack.i.h.bf16 %v14366_v53  ;;  %v11144_v51 = vunpack.i.l.bf16 %v14366_v53 }
 0x738   :  { %v6135_v29 = vsel %vm695_vm13, %v11065_v44, %v11144_v51  ;;  %v6136_v30 = vsel %vm695_vm13, %v11144_v51, %v15311_v25 }
 0x73a   :  { %11282 = vrot.lane.b32.xlu1 %v11266_v20, %s11335_s12  ;;  %7008 = vperm.xlu0 %11060, %v6954_v39  }
 0x73c   :  { %v14394_v56 = vpop.permute.xlu0 %11122  ;;  %v14421_v39 = vpop.permute.xlu2 %11177 }
 0x73d   :  { %v14377_v0 = vpop.permute.xlu1 %11147  ;;  %v15314_v11 = vunpack.i.h.bf16 %v14394_v56  ;;  %v11124_v50 = vunpack.i.l.bf16 %v14394_v56 }
 0x73e   :  { %v15310_v15 = vunpack.i.h.bf16 %v14377_v0  ;;  %v11149_v57 = vunpack.i.l.bf16 %v14377_v0 }
 0x740   :  { %v6194_v44 = vsel %vm778_vm11, %v11149_v57, %v15310_v15 }
 0x742   :  { %11287 = vrot.lane.b32.xlu1 %v11266_v20, %s11350_s16  ;;  %v11114_v20 = vunpack.i.l.bf16 %v14362_v63  ;;  %s11367_s16 = smov 19  }
 0x743   :  { %s8620_s21 = sld [smem:[%s15267_s0 + %s11367_s16]]  }
 0x744   :  { %v6247_v3 = vsel %vm6246_vm1, %v11074_v46, %v11114_v20  ;;  %v6248_v36 = vsel %vm6246_vm1, %v11114_v20, %v15308_v8  ;;  %v14437_v33 = vpop.permute.xlu0 %11127  ;;  %v6305_v20 = vsel %vm1132_vm8, %v11079_v28, %v11119_v43  ;;  %v6306_v46 = vsel %vm1132_vm8, %v11119_v43, %v15309_v22 }
 0x745   :  { %v14387_v37 = vpop.permute.xlu1 %11152  ;;  %v6269_v47 = vmax.f32 %v6210_v52, %v6247_v3  ;;  %v6270_v4 = vmax.f32 %v6211_v9, %v6248_v36  ;;  %v6193_v52 = vsel %vm778_vm11, %v11070_v34, %v11149_v57  ;;  %v11130_v3 = vunpack.i.h.bf16 %v14437_v33 }
 0x746   :  { %v15315_v61 = vunpack.i.h.bf16 %v14387_v37  ;;  %v11154_v16 = vunpack.i.l.bf16 %v14387_v37  ;;  %v11129_v36 = vunpack.i.l.bf16 %v14437_v33  ;;  %v6158_v43 = vmax.f32 %v14248_v19, %v6135_v29 }
 0x747   :  { %v6159_v34 = vmax.f32 %v14267_v26, %v6136_v30  ;;  %v6363_v22 = vsel %vm1215_vm6, %v11084_v58, %v11124_v50  ;;  %v6364_v57 = vsel %vm1215_vm6, %v11124_v50, %v15314_v11  ;;  %v6327_v27 = vmax.f32 %v6269_v47, %v6305_v20 }
 0x748   :  { %v6252_v15 = vsel %vm6246_vm1, %v11075_v13, %v11154_v16  ;;  %v6253_v25 = vsel %vm6246_vm1, %v11154_v16, %v15315_v61  ;;  %v6328_v19 = vmax.f32 %v6270_v4, %v6306_v46  ;;  %v6216_v29 = vmax.f32 %v6158_v43, %v6193_v52 }
 0x749   :  { %v6217_v26 = vmax.f32 %v6159_v34, %v6194_v44  ;;  %v6422_v58 = vsel %vm6421_vm4, %v11089_v45, %v11129_v36  ;;  %v6423_v50 = vsel %vm6421_vm4, %v11129_v36, %v11130_v3  ;;  %v6385_v16 = vmax.f32 %v6327_v27, %v6363_v22 }
 0x74a   :  { %v6386_v11 = vmax.f32 %v6328_v19, %v6364_v57  ;;  %v6275_v61 = vmax.f32 %v6216_v29, %v6252_v15  ;;  %v11140_v4 = vunpack.i.h.bf16 %v14352_v14  ;;  %v11139_v45 = vunpack.i.l.bf16 %v14352_v14 }
 0x74b   :  { %v6276_v2 = vmax.f32 %v6217_v26, %v6253_v25  ;;  %v6444_v46 = vmax.f32 %v6385_v16, %v6422_v58  ;;  %v11100_v26 = vunpack.i.h.bf16 %v14344_v12  ;;  %v15416_v58 = vunpack.i.h.bf16 %v14340_v6 }
 0x74c   :  { %v14486_v47 = vpop.permute.xlu0 %11172  ;;  %v6445_v52 = vmax.f32 %v6386_v11, %v6423_v50  ;;  %v6540_v6 = vsel %vm1710_vm0, %v11139_v45, %v11140_v4 }
 0x74d   :  { %v14417_v38 = vpop.permute.xlu1 %11157  ;;  %v11175_v25 = vunpack.i.h.bf16 %v14486_v47  ;;  %v11174_v44 = vunpack.i.l.bf16 %v14486_v47 }
 0x74e   :  { %v11160_v51 = vunpack.i.h.bf16 %v14417_v38  ;;  %v11159_v28 = vunpack.i.l.bf16 %v14417_v38 }
 0x74f   :  { %v6486_v50 = vsel %vm6480_vm7, %v15416_v58, %v11174_v44  ;;  %v6487_v7 = vsel %vm6480_vm7, %v11174_v44, %v11175_v25 }
 0x750   :  { %v6310_v13 = vsel %vm1132_vm8, %v11080_v48, %v11159_v28  ;;  %v6311_v30 = vsel %vm1132_vm8, %v11159_v28, %v11160_v51  ;;  %v11179_v28 = vunpack.i.l.bf16 %v14421_v39 }
 0x751   :  { %v6333_v27 = vmax.f32 %v6275_v61, %v6310_v13  ;;  %v6334_v22 = vmax.f32 %v6276_v2, %v6311_v30  ;;  %v11180_v61 = vunpack.i.h.bf16 %v14421_v39  ;;  %v10932_v13 = vld [vmem:[%s14338_s24 + $0xf8] sm:$0xff]  ;;  %v15417_v30 = vunpack.i.l.bf16 %v14344_v12 }
 0x752   :  { %6870 = vmatpush.bf16.msra.mxu3 %v10932_v13  ;;  %v10918_v13 = vld [vmem:[%s14338_s24 + $0x88] sm:$0xff] }
 0x753   :  { %v6539_v16 = vsel %vm1710_vm0, %v15417_v30, %v11139_v45  ;;  %v10926_v30 = vld [vmem:[%s14338_s24 + $0xc8] sm:$0xff] }
 0x755   :  { %v14458_v9 = vpop.permute.xlu1 %11162  ;;  %v14464_v8 = vpop.permute.xlu2 %11182 }
 0x756   :  { %v11165_v32 = vunpack.i.h.bf16 %v14458_v9  ;;  %v11164_v18 = vunpack.i.l.bf16 %v14458_v9 }
 0x758   :  { %v6368_v20 = vsel %vm1215_vm6, %v11085_v1, %v11164_v18  ;;  %v6369_v48 = vsel %vm1215_vm6, %v11164_v18, %v11165_v32  ;;  %v6481_v1 = vsel %vm6480_vm7, %v11094_v35, %v11134_v54  ;;  %v6482_v18 = vsel %vm6480_vm7, %v11134_v54, %v11135_v49 }
 0x759   :  { %v6391_v11 = vmax.f32 %v6333_v27, %v6368_v20  ;;  %v6392_v2 = vmax.f32 %v6334_v22, %v6369_v48  ;;  %v6503_v57 = vmax.f32 %v6444_v46, %v6481_v1  ;;  %v6504_v19 = vmax.f32 %v6445_v52, %v6482_v18  ;;  %v10931_v1 = vld [vmem:[%s14338_s24 + $0xf0] sm:$0xff] }
 0x75a   :  { %v6544_v46 = vsel %vm1710_vm0, %v11100_v26, %v11179_v28  ;;  %v6545_v52 = vsel %vm1710_vm0, %v11179_v28, %v11180_v61  ;;  %6871 = vmatpush.bf16.msra.mxu3 %v10931_v1  ;;  %v10922_v28 = vld [vmem:[%s14338_s24 + $0xa8] sm:$0xff]  ;;  %v10928_v26 = vld [vmem:[%s14338_s24 + $0xd8] sm:$0xff] }
 0x75b   :  { %v6561_v27 = vmax.f32 %v6503_v57, %v6539_v16  ;;  %v6562_v12 = vmax.f32 %v6504_v19, %v6540_v6  ;;  %v10929_v57 = vld [vmem:[%s14338_s24 + $0xe0] sm:$0xff]  ;;  %v11185_v6 = vunpack.i.h.bf16 %v14464_v8 }
 0x75d   :  { %v14496_v15 = vpop.permute.xlu1 %11167  ;;  %v14508_v43 = vpop.permute.xlu2 %11202 }
 0x75e   :  { %v11170_v36 = vunpack.i.h.bf16 %v14496_v15  ;;  %v11169_v55 = vunpack.i.l.bf16 %v14496_v15 }
 0x760   :  { %v6427_v34 = vsel %vm6421_vm4, %v11090_v40, %v11169_v55  ;;  %v6428_v35 = vsel %vm6421_vm4, %v11169_v55, %v11170_v36  ;;  %v10924_v40 = vld [vmem:[%s14338_s24 + $0xb8] sm:$0xff]  ;;  %v10923_v55 = vld [vmem:[%s14338_s24 + $0xb0] sm:$0xff] }
 0x761   :  { %v6450_v54 = vmax.f32 %v6391_v11, %v6427_v34  ;;  %v6451_v29 = vmax.f32 %v6392_v2, %v6428_v35  ;;  %6856 = vmatpush.bf16.msrb.mxu0 %v10924_v40  ;;  %v10930_v34 = vld [vmem:[%s14338_s24 + $0xe8] sm:$0xff]  ;;  %v10921_v35 = vld [vmem:[%s14338_s24 + $0xa0] sm:$0xff] }
 0x762   :  { %6872 = vmatpush.bf16.msra.mxu3 %v10930_v34 }
 0x763   :  { %v6509_v20 = vmax.f32 %v6450_v54, %v6486_v50  ;;  %v6510_v48 = vmax.f32 %v6451_v29, %v6487_v7  ;;  %v10920_v29 = vld [vmem:[%s14338_s24 + $0x98] sm:$0xff]  ;;  %v10919_v50 = vld [vmem:[%s14338_s24 + $0x90] sm:$0xff] }
 0x764   :  { %v10927_v7 = vld [vmem:[%s14338_s24 + $0xd0] sm:$0xff] }
 0x765   :  { %v6567_v22 = vmax.f32 %v6509_v20, %v6544_v46  ;;  %v6568_v44 = vmax.f32 %v6510_v48, %v6545_v52  ;;  %6857 = vmatpush.bf16.msrb.mxu0 %v10923_v55  ;;  %v14539_v2 = vpop.permute.xlu2 %11207  ;;  %v10940_v20 = vld [vmem:[%s14338_s24 + $0x138] sm:$0xff]  ;;  %v11184_v48 = vunpack.i.l.bf16 %v14464_v8 }
 0x766   :  { %6873 = vmatpush.bf16.msra.mxu3 %v10929_v57  ;;  %6884 = vmatpush.bf16.msra.mxu1 %v10940_v20 }
 0x767   :  { %v6573_v18 = vpack.c.bf16 %v6567_v22, %v6561_v27  ;;  %v6574_v45 = vpack.c.bf16 %v6568_v44, %v6562_v12  ;;  %v10917_v27 = vld [vmem:[%s14338_s24 + $0x80] sm:$0xff]  ;;  %v10939_v22 = vld [vmem:[%s14338_s24 + $0x130] sm:$0xff]  ;;  %v15418_v44 = vunpack.i.h.bf16 %v14357_v31 }
 0x768   :  { %v10925_v12 = vld [vmem:[%s14338_s24 + $0xc0] sm:$0xff] }
 0x769   :  { %6836 = vmatmul.bf16.vlgmr.msrb.gmra.mxu1 %v6573_v18  ;;  %6850 = vmatmul.bf16.vlgmr.msra.gmra.mxu2 %v6574_v45  ;;  %v6132_v55 = vsel %vm695_vm13, %v15418_v44, %v11184_v48  ;;  %v6133_v45 = vsel %vm695_vm13, %v11184_v48, %v11185_v6  ;;  %v15420_v48 = vunpack.i.h.bf16 %v14366_v53  ;;  %v15422_v53 = vunpack.i.h.bf16 %v14375_v21 }
 0x76a   :  { %6858 = vmatpush.bf16.msrb.mxu0 %v10922_v28  ;;  %6874 = vmatpush.bf16.msra.mxu3 %v10928_v26  ;;  %v15419_v28 = vunpack.i.h.bf16 %v14372_v10  ;;  %v6154_v57 = vmax.f32 %v14260_v5, %v6132_v55  ;;  %v10938_v26 = vld [vmem:[%s14338_s24 + $0x128] sm:$0xff]  ;;  %v6155_v10 = vmax.f32 %v14288_v41, %v6133_v45  ;;  %v10937_v55 = vld [vmem:[%s14338_s24 + $0x120] sm:$0xff] }
 0x76b   :  { %6885 = vmatpush.bf16.msra.mxu1 %v10939_v22 }
 0x76c   :  { %v14537_v11 = vpop.permute.xlu0 %11192  ;;  %v14545_v19 = vpop.permute.xlu1 %11187 }
 0x76d   :  { %v14551_v58 = vpop.permute.xlu2 %11212  ;;  %v11189_v46 = vunpack.i.l.bf16 %v14545_v19  ;;  %v15316_v1 = vunpack.i.h.bf16 %v14545_v19  ;;  %v15318_v20 = vunpack.i.h.bf16 %v14537_v11 }
 0x76e   :  { %6859 = vmatpush.bf16.msrb.mxu0 %v10921_v35  ;;  %6875 = vmatpush.bf16.msra.mxu3 %v10927_v7 }
 0x76f   :  { %v6190_v34 = vsel %vm778_vm11, %v15419_v28, %v11189_v46  ;;  %6886 = vmatpush.bf16.msra.mxu1 %v10938_v26 }
 0x772   :  { %6860 = vmatpush.bf16.msrb.mxu0 %v10920_v29  ;;  %6876 = vmatpush.bf16.msra.mxu3 %v10926_v30  ;;  %v11194_v29 = vunpack.i.l.bf16 %v14537_v11 }
 0x773   :  { %6887 = vmatpush.bf16.msra.mxu1 %v10937_v55 }
 0x774   :  { %v14547_v54 = vpop.permute.xlu0 %11217  ;;  %v14559_v16 = vpop.permute.xlu1 %11197  ;;  %v6250_v21 = vsel %vm6246_vm1, %v11194_v29, %v15318_v20 }
 0x775   :  { %v14565_v52 = vpop.permute.xlu2 %11222  ;;  %v11220_v35 = vunpack.i.h.bf16 %v14547_v54  ;;  %v11219_v31 = vunpack.i.l.bf16 %v14547_v54  ;;  %v11199_v7 = vunpack.i.l.bf16 %v14559_v16  ;;  %v15427_v54 = vunpack.i.h.bf16 %v14545_v19 }
 0x776   :  { %6861 = vmatpush.bf16.msrb.mxu0 %v10919_v50  ;;  %6877 = vmatpush.bf16.msra.mxu3 %v10925_v12  ;;  %v6191_v50 = vsel %vm778_vm11, %v11189_v46, %v15316_v1  ;;  %v15317_v12 = vunpack.i.h.bf16 %v14559_v16  ;;  %v15421_v46 = vunpack.i.h.bf16 %v14362_v63  ;;  %v11225_v44 = vunpack.i.h.bf16 %v14565_v52 }
 0x777   :  { %v6137_v5 = vsel %vm695_vm13, %v15420_v48, %v11219_v31  ;;  %v6213_v22 = vmax.f32 %v6155_v10, %v6191_v50  ;;  %v6307_v45 = vsel %vm1132_vm8, %v15422_v53, %v11199_v7  ;;  %v11224_v28 = vunpack.i.l.bf16 %v14565_v52  ;;  %v10936_v53 = vld [vmem:[%s14338_s24 + $0x118] sm:$0xff] }
 0x778   :  { %v6249_v41 = vsel %vm6246_vm1, %v15421_v46, %v11194_v29  ;;  %v6160_v63 = vmax.f32 %v14269_v42, %v6137_v5  ;;  %v15320_v48 = vunpack.i.h.bf16 %v14508_v43  ;;  %v6308_v46 = vsel %vm1132_vm8, %v11199_v7, %v15317_v12  ;;  %6888 = vmatpush.bf16.msra.mxu1 %v10936_v53 }
 0x779   :  { %v11204_v1 = vunpack.i.l.bf16 %v14508_v43  ;;  %v11209_v42 = vunpack.i.l.bf16 %v14539_v2  ;;  %v15423_v5 = vunpack.i.h.bf16 %v14377_v0  ;;  %v6196_v29 = vsel %vm778_vm11, %v11224_v28, %v11225_v44 }
 0x77a   :  { %6862 = vmatpush.bf16.msrb.mxu0 %v10918_v13  ;;  %v6212_v13 = vmax.f32 %v6154_v57, %v6190_v34 }
 0x77c   :  { %v14555_v40 = vpop.permute.xlu0 %11242  ;;  %v14592_v30 = vpop.permute.xlu1 %11227  ;;  %v6271_v50 = vmax.f32 %v6212_v13, %v6249_v41  ;;  %v15424_v41 = vunpack.i.h.bf16 %v14387_v37  ;;  %v15425_v37 = vunpack.i.h.bf16 %v14394_v56 }
 0x77d   :  { %v11230_v34 = vunpack.i.h.bf16 %v14592_v30  ;;  %v14613_v57 = vpop.permute.xlu2 %11232 }
 0x77e   :  { %6863 = vmatpush.bf16.msrb.mxu0 %v10917_v27  ;;  %v6138_v27 = vsel %vm695_vm13, %v11219_v31, %v11220_v35  ;;  %v11229_v31 = vunpack.i.l.bf16 %v14592_v30  ;;  %v6329_v13 = vmax.f32 %v6271_v50, %v6307_v45 }
 0x77f   :  { %v6161_v26 = vmax.f32 %v14297_v17, %v6138_v27  ;;  %v6272_v17 = vmax.f32 %v6213_v22, %v6250_v21  ;;  %v6195_v27 = vsel %vm778_vm11, %v15423_v5, %v11224_v28  ;;  %v15319_v22 = vunpack.i.h.bf16 %v14539_v2 }
 0x780   :  { %v6254_v7 = vsel %vm6246_vm1, %v15424_v41, %v11229_v31  ;;  %v6255_v55 = vsel %vm6246_vm1, %v11229_v31, %v11230_v34  ;;  %v6218_v50 = vmax.f32 %v6160_v63, %v6195_v27  ;;  %v11235_v21 = vunpack.i.h.bf16 %v14613_v57  ;;  %v10935_v31 = vld [vmem:[%s14338_s24 + $0x110] sm:$0xff] }
 0x781   :  { %v6330_v45 = vmax.f32 %v6272_v17, %v6308_v46  ;;  %v6219_v0 = vmax.f32 %v6161_v26, %v6196_v29  ;;  %v11234_v5 = vunpack.i.l.bf16 %v14613_v57  ;;  %v6365_v28 = vsel %vm1215_vm6, %v15425_v37, %v11204_v1  ;;  %6889 = vmatpush.bf16.msra.mxu1 %v10935_v31 }
 0x782   :  { %v6277_v41 = vmax.f32 %v6218_v50, %v6254_v7  ;;  %v6366_v63 = vsel %vm1215_vm6, %v11204_v1, %v15320_v48  ;;  %v6424_v26 = vsel %vm6421_vm4, %v11130_v3, %v11209_v42  ;;  %v6387_v46 = vmax.f32 %v6329_v13, %v6365_v28  ;;  %v645_v7 = vld [vmem:[%s14338_s24 + $0x140] sm:$0xf] }
 0x783   :  { %v6278_v20 = vmax.f32 %v6219_v0, %v6255_v55  ;;  %v6425_v56 = vsel %vm6421_vm4, %v11209_v42, %v15319_v22  ;;  %v6388_v53 = vmax.f32 %v6330_v45, %v6366_v63  ;;  %v11245_v17 = vunpack.i.h.bf16 %v14555_v40  ;;  %v10934_v0 = vld [vmem:[%s14338_s24 + $0x108] sm:$0xff] }
 0x784   :  { %v14574_v18 = vpop.permute.xlu0 %11247  ;;  %v11244_v27 = vunpack.i.l.bf16 %v14555_v40  ;;  %v6312_v1 = vsel %vm1132_vm8, %v11160_v51, %v11234_v5  ;;  %v6313_v33 = vsel %vm1132_vm8, %v11234_v5, %v11235_v21  ;;  %v11214_v55 = vunpack.i.l.bf16 %v14551_v58 }
 0x785   :  { %v11250_v3 = vunpack.i.h.bf16 %v14574_v18  ;;  %v11249_v13 = vunpack.i.l.bf16 %v14574_v18  ;;  %v14671_v42 = vpop.permute.xlu2 %11237  ;;  %v6335_v45 = vmax.f32 %v6277_v41, %v6312_v1  ;;  %v6336_v50 = vmax.f32 %v6278_v20, %v6313_v33  ;;  %6890 = vmatpush.bf16.msra.mxu1 %v10934_v0 }
 0x786   :  { %v6740_v38 = vunpack.c.l.b16 %v645_v7  ;;  %v11215_v51 = vunpack.i.h.bf16 %v14551_v58  ;;  %v6446_v37 = vmax.f32 %v6387_v46, %v6424_v26  ;;  %v11240_v63 = vunpack.i.h.bf16 %v14671_v42 }
 0x787   :  { %v11239_v22 = vunpack.i.l.bf16 %v14671_v42  ;;  %v6447_v31 = vmax.f32 %v6388_v53, %v6425_v56  ;;  %v6370_v20 = vsel %vm1215_vm6, %v11165_v32, %v11244_v27  ;;  %v6371_v41 = vsel %vm1215_vm6, %v11244_v27, %v11245_v17  ;;  %v10933_v53 = vld [vmem:[%s14338_s24 + $0x100] sm:$0xff]  ;;  %s11360_s24 = smov 116  }
 0x788   :  { %v6781_v48 = vpack.c.b16 %v6740_v38, %v6740_v38  ;;  %v6429_v26 = vsel %vm6421_vm4, %v11170_v36, %v11249_v13  ;;  %v6430_v46 = vsel %vm6421_vm4, %v11249_v13, %v11250_v3  ;;  %v6483_v9 = vsel %vm6480_vm7, %v11135_v49, %v11214_v55 }
 0x789   :  { %v6393_v56 = vmax.f32 %v6335_v45, %v6370_v20  ;;  %v6394_v32 = vmax.f32 %v6336_v50, %v6371_v41  ;;  %v6484_v27 = vsel %vm6480_vm7, %v11214_v55, %v11215_v51  ;;  %v6541_v49 = vsel %vm1710_vm0, %v11140_v4, %v11239_v22  ;;  %6891 = vmatpush.bf16.msra.mxu1 %v10933_v53 }
 0x78a   :  { %v6826_v33 = vsel %vm15426_vm9, %v6781_v48, 0  ;;  %v6542_v7 = vsel %vm1710_vm0, %v11239_v22, %v11240_v63  ;;  %v6505_v47 = vmax.f32 %v6446_v37, %v6483_v9  ;;  %vm7186_vm9 = vcmask 588800  }
 0x78b   :  { %v6452_v60 = vmax.f32 %v6393_v56, %v6429_v26  ;;  %v6453_v13 = vmax.f32 %v6394_v32, %v6430_v46  ;;  %6905 = vmatpush.bf16.msrb.mxu2 %v6826_v33 }
 0x78c   :  { %v14617_v10 = vpop.permute.xlu0 %11252  ;;  %v6563_v38 = vmax.f32 %v6505_v47, %v6541_v49  ;;  %v15429_v47 = vunpack.i.h.bf16 %v14559_v16 }
 0x78d   :  { %v11255_v5 = vunpack.i.h.bf16 %v14617_v10  ;;  %v11254_v28 = vunpack.i.l.bf16 %v14617_v10  ;;  %v11293_v52 = vpop.permute.xlu2 %11292 }
 0x78e   :  { %v11295_v16 = vunpack.i.h.bf16 %v11293_v52 }
 0x78f   :  { %v6488_v15 = vsel %vm6480_vm7, %v11175_v25, %v11254_v28  ;;  %v6489_v36 = vsel %vm6480_vm7, %v11254_v28, %v11255_v5  ;;  %v6506_v25 = vmax.f32 %v6447_v31, %v6484_v27 }
 0x790   :  { %v6511_v48 = vmax.f32 %v6452_v60, %v6488_v15  ;;  %v6512_v0 = vmax.f32 %v6453_v13, %v6489_v36 }
 0x791   :  { %v6564_v14 = vmax.f32 %v6506_v25, %v6542_v7 }
 0x794   :  { %v14644_v12 = vpop.permute.xlu1 %11267  ;;  %v14661_v29 = vpop.permute.xlu0 %11257 }
 0x795   :  { %v11260_v37 = vunpack.i.h.bf16 %v14661_v29  ;;  %v11259_v28 = vunpack.i.l.bf16 %v14661_v29  ;;  %v11269_v56 = vunpack.i.l.bf16 %v14644_v12 }
 0x797   :  { %v6134_v9 = vsel %vm695_vm13, %v11185_v6, %v11259_v28  ;;  %v6139_v39 = vsel %vm695_vm13, %v11220_v35, %v11260_v37  ;;  %v6163_v29 = vmax.f32 %v14320_v23, %v11260_v37  ;;  %v6157_v32 = vmax.f32 %v14318_v59, %v11259_v28 }
 0x798   :  { %v6156_v53 = vmax.f32 %v14290_v62, %v6134_v9  ;;  %v6162_v8 = vmax.f32 %v14299_v24, %v6139_v39  ;;  %v6192_v35 = vsel %vm778_vm11, %v15427_v54, %v11269_v56  ;;  %v15428_v62 = vunpack.i.h.bf16 %v14537_v11 }
 0x799   :  { %v6215_v36 = vmax.f32 %v6157_v32, %v11269_v56 }
 0x79a   :  { %v6214_v59 = vmax.f32 %v6156_v53, %v6192_v35  ;;  %v6490_v53 = vsel %vm6480_vm7, %v11255_v5, %v11295_v16 }
 0x79c   :  { %v11273_v1 = vpop.permute.xlu1 %11272  ;;  %v14713_v55 = vpop.permute.xlu0 %11262 }
 0x79d   :  { %v11265_v45 = vunpack.i.h.bf16 %v14713_v55  ;;  %v11264_v50 = vunpack.i.l.bf16 %v14713_v55  ;;  %v11275_v27 = vunpack.i.h.bf16 %v11273_v1  ;;  %v11274_v6 = vunpack.i.l.bf16 %v11273_v1 }
 0x79f   :  { %v6546_v4 = vsel %vm1710_vm0, %v11180_v61, %v11264_v50  ;;  %v6547_v22 = vsel %vm1710_vm0, %v11264_v50, %v11265_v45  ;;  %v11270_v61 = vunpack.i.h.bf16 %v14644_v12  ;;  %v6251_v24 = vsel %vm6246_vm1, %v15428_v62, %v11274_v6 }
 0x7a0   :  { %v6569_v31 = vmax.f32 %v6511_v48, %v6546_v4  ;;  %v6570_v20 = vmax.f32 %v6512_v0, %v6547_v22  ;;  %v6256_v19 = vsel %vm6246_vm1, %v11230_v34, %v11275_v27  ;;  %v6274_v7 = vmax.f32 %v6215_v36, %v11274_v6 }
 0x7a1   :  { %v6197_v15 = vsel %vm778_vm11, %v11225_v44, %v11270_v61  ;;  %v6221_v33 = vmax.f32 %v6163_v29, %v11270_v61  ;;  %v6273_v11 = vmax.f32 %v6214_v59, %v6251_v24  ;;  %v11294_v22 = vunpack.i.l.bf16 %v11293_v52 }
 0x7a2   :  { %v6575_v26 = vpack.c.bf16 %v6569_v31, %v6563_v38  ;;  %v6576_v46 = vpack.c.bf16 %v6570_v20, %v6564_v14  ;;  %v6220_v13 = vmax.f32 %v6162_v8, %v6197_v15  ;;  %v15430_v14 = vunpack.i.h.bf16 %v14508_v43 }
 0x7a3   :  { %v6280_v44 = vmax.f32 %v6221_v33, %v11275_v27  ;;  %v15431_v43 = vunpack.i.h.bf16 %v14539_v2  ;;  %v6485_v8 = vsel %vm6480_vm7, %v11215_v51, %v11294_v22 }
 0x7a4   :  { %v11278_v41 = vpop.permute.xlu1 %11277  ;;  %6864 = vmatmul.bf16.vlgmr.msrb.gmra.mxu0 %v6575_v26  ;;  %6878 = vmatmul.bf16.vlgmr.msra.gmra.mxu3 %v6576_v46  ;;  %v6279_v48 = vmax.f32 %v6220_v13, %v6256_v19  ;;  %v11298_v30 = vpop.permute.xlu0 %11297 }
 0x7a5   :  { %v11280_v23 = vunpack.i.h.bf16 %v11278_v41  ;;  %v11279_v60 = vunpack.i.l.bf16 %v11278_v41  ;;  %v11300_v26 = vunpack.i.h.bf16 %v11298_v30  ;;  %v11299_v46 = vunpack.i.l.bf16 %v11298_v30 }
 0x7a7   :  { %v6309_v25 = vsel %vm1132_vm8, %v15429_v47, %v11279_v60  ;;  %v6314_v50 = vsel %vm1132_vm8, %v11235_v21, %v11280_v23  ;;  %v6332_v0 = vmax.f32 %v6274_v7, %v11279_v60  ;;  %v6338_v38 = vmax.f32 %v6280_v44, %v11280_v23 }
 0x7a8   :  { %v6331_v37 = vmax.f32 %v6273_v11, %v6309_v25  ;;  %v6337_v28 = vmax.f32 %v6279_v48, %v6314_v50  ;;  %v6543_v2 = vsel %vm1710_vm0, %v11240_v63, %v11299_v46  ;;  %v6548_v54 = vsel %vm1710_vm0, %v11265_v45, %v11300_v26  ;;  %v6953_v11 = vld [vmem:[%s14350_s28] sm:$0xff]  ;;  %s8618_s28 = sld [smem:[%s15267_s0 + %s11368_s22]]  }
 0x7a9   :  { %vm15432_vm8 = vcmask 64512  }
 0x7ac   :  { %v11283_v12 = vpop.permute.xlu1 %11282 }
 0x7ad   :  { %v11285_v1 = vunpack.i.h.bf16 %v11283_v12  ;;  %v11284_v49 = vunpack.i.l.bf16 %v11283_v12 }
 0x7af   :  { %v6372_v34 = vsel %vm1215_vm6, %v11245_v17, %v11285_v1  ;;  %v6367_v4 = vsel %vm1215_vm6, %v15430_v14, %v11284_v49  ;;  %v6390_v31 = vmax.f32 %v6332_v0, %v11284_v49  ;;  %v6396_v21 = vmax.f32 %v6338_v38, %v11285_v1 }
 0x7b0   :  { %v6389_v9 = vmax.f32 %v6331_v37, %v6367_v4  ;;  %v6395_v39 = vmax.f32 %v6337_v28, %v6372_v34  ;;  %v6958_v37 = vld [vmem:[%s8613_s4] sm:$0xff]  ;;  %s8622_s4 = sld [smem:[%s15267_s0 + %s11370_s1]]  }
 0x7b1   :  { %v6955_v28 = vld [vmem:[%s8611_s30] sm:$0xff] }
 0x7b4   :  { %v11288_v57 = vpop.permute.xlu1 %11287 }
 0x7b5   :  { %v11290_v20 = vunpack.i.h.bf16 %v11288_v57  ;;  %v11289_v41 = vunpack.i.l.bf16 %v11288_v57  ;;  %v6959_v57 = vld [vmem:[%s8614_s11] sm:$0xff]  ;;  %s11373_s11 = smov 27  }
 0x7b6   :  { %s15096_s16 = sld [smem:[%s15267_s0 + %s11373_s11]]  }
 0x7b7   :  { %v6431_v40 = vsel %vm6421_vm4, %v11250_v3, %v11290_v20  ;;  %v6426_v17 = vsel %vm6421_vm4, %v15431_v43, %v11289_v41  ;;  %v6449_v61 = vmax.f32 %v6390_v31, %v11289_v41  ;;  %v6455_v56 = vmax.f32 %v6396_v21, %v11290_v20  ;;  %v7009_v31 = vpop.permute.xlu0 %7008 }
 0x7b8   :  { %v6448_v29 = vmax.f32 %v6389_v9, %v6426_v17  ;;  %v6454_v32 = vmax.f32 %v6395_v39, %v6431_v40 }
 0x7b9   :  { %v6508_v27 = vmax.f32 %v6449_v61, %v11294_v22  ;;  %v6514_v18 = vmax.f32 %v6455_v56, %v11295_v16  ;;  %v6956_v22 = vld [vmem:[%s8611_s30 + $0x8] sm:$0xff]  ;;  %s8619_s30 = sld [smem:[%s15267_s0 + %s11369_s7]]  }
 0x7ba   :  { %v6507_v6 = vmax.f32 %v6448_v29, %v6485_v8  ;;  %v6513_v3 = vmax.f32 %v6454_v32, %v6490_v53 }
 0x7bb   :  { %v6566_v35 = vmax.f32 %v6508_v27, %v11299_v46  ;;  %v6572_v10 = vmax.f32 %v6514_v18, %v11300_v26 }
 0x7bc   :  { %v6565_v15 = vmax.f32 %v6507_v6, %v6543_v2  ;;  %v6571_v5 = vmax.f32 %v6513_v3, %v6548_v54 }
 0x7bd   :  { %v6578_v12 = vpack.c.bf16 %v6572_v10, %v6566_v35 }
 0x7be   :  { %v6577_v58 = vpack.c.bf16 %v6571_v5, %v6565_v15 }
 0x7bf   :  { %10320 = vmatmul.msk.bf16.vlgmr.msrb.gmra.mxu2 %vm15432_vm8, %v6578_v12  ;;  %vm15433_vm8 = vcmask 867328  }
 0x7c0   :  { %6892 = vmatmul.bf16.vlgmr.msra.gmra.mxu1 %v6577_v58 }
 0x7e6   :  { %v6837_v51 = vpop.f32.mrf.mxu1 }
 0x7ec   :  { %v6851_v36 = vpop.f32.mrf.mxu2 }
 0x7ed   :  { %v6852_v63 = vadd.f32 %v6851_v36, %v6837_v51 }
 0x7ee   :  { %v6839_v33 = vpop.f32.mrf.mxu1 }
 0x7f4   :  { %v6853_v42 = vpop.f32.mrf.mxu2 }
 0x7f5   :  { %v6854_v19 = vadd.f32 %v6853_v42, %v6839_v33  ;;  %v6957_v42 = vld [vmem:[%s8612_s18] sm:$0xf]  ;;  %s11374_s18 = smov 28  }
 0x7f6   :  { %s8629_s22 = sld [smem:[%s15267_s0 + %s11374_s18]]  }
 0x7f7   :  { %s8626_s18 = sld [smem:[%s15267_s0 + %s11380_s13]]   ;;  %s11398_s13 = smov 42  }
 0x821   :  { %v6865_v23 = vpop.f32.mrf.mxu0 }
 0x822   :  { %v6866_v59 = vadd.f32 %v6865_v23, %v6852_v63 }
 0x827   :  { %v6879_v60 = vpop.f32.mrf.mxu3 }
 0x828   :  { %v6880_v45 = vadd.f32 %v6879_v60, %v6866_v59 }
 0x829   :  { %v6867_v62 = vpop.f32.mrf.mxu0 }
 0x82a   :  { %v6868_v52 = vadd.f32 %v6867_v62, %v6854_v19  ;;  %v10380_v62 = vld [vmem:[%s14807_s23 + $0x70] sm:$0xf]  ;;  %v10955_v19 = vld [vmem:[%s14807_s23 + $0x74] sm:$0xf] }
 0x82f   :  { %v6881_v49 = vpop.f32.mrf.mxu3 }
 0x830   :  { %v6882_v44 = vadd.f32 %v6881_v49, %v6868_v52  ;;  %v10382_v49 = vld [vmem:[%s14807_s23 + $0x78] sm:$0xf0] }
 0x831   :  { %v14815_v52 = vor.u32 %v10955_v19, %v10382_v49 }
 0x833   :  { %7172 = vmatpush.bf16.msra.mxu2 %v14815_v52 }
 0x83d   :  { %v6893_v55 = vpop.f32.mrf.mxu1 }
 0x83e   :  { %v6894_v13 = vadd.f32 %v6893_v55, %v6880_v45 }
 0x842   :  { %v6907_v24 = vpop.f32.mrf.mxu2 }
 0x843   :  { %v6908_v1 = vadd.f32 %v6907_v24, %v6894_v13  ;;  %v10956_v24 = vld [vmem:[%s14807_s23 + $0x74] sm:$0xf0] }
 0x845   :  { %6961 = vadd.xlane.f32.xlu1 %v6908_v1  ;;  %v6895_v7 = vpop.f32.mrf.mxu1 }
 0x846   :  { %v6896_v47 = vadd.f32 %v6895_v7, %v6882_v44  ;;  %v10372_v7 = vld [vmem:[%s14807_s23 + $0x60] sm:$0xf]  ;;  %v10954_v44 = vld [vmem:[%s14807_s23 + $0x64] sm:$0xf0] }
 0x84a   :  { %v6909_v25 = vpop.f32.mrf.mxu2 }
 0x84b   :  { %v6910_v50 = vadd.f32 %v6909_v25, %v6896_v47  ;;  %v10953_v47 = vld [vmem:[%s14807_s23 + $0x64] sm:$0xf]  ;;  %v14822_v25 = vor.u32 %v10954_v44, %v10372_v7 }
 0x84d   :  { %6963 = vadd.xlane.f32.xlu2 %v6910_v50 }
 0x865   :  { %7003 = vperm.xlu2 %11059, %v6953_v11  }
 0x8b8   :  { %v6962_v48 = vpop.xlane.xlu1 %6961 }
 0x8b9   :  { %v6965_v0 = vmul.f32 0.0078125, %v6962_v48  ;;  %v10364_v48 = vld [vmem:[%s14807_s23 + $0x50] sm:$0xf] }
 0x8bb   :  { %v6967_v38 = vsub.f32 %v6908_v1, %v6965_v0  ;;  %v14812_v1 = vor.u32 %v10956_v24, %v10380_v62  ;;  %v10952_v0 = vld [vmem:[%s14807_s23 + $0x54] sm:$0xf0] }
 0x8bd   :  { %v6969_v30 = vmul.f32 %v6967_v38, %v6967_v38  ;;  %7159 = vmatpush.bf16.msrb.mxu3 %v14812_v1 }
 0x8bf   :  { %6971 = vadd.xlane.f32.xlu0 %v6969_v30  ;;  %v14832_v30 = vor.u32 %v10952_v0, %v10364_v48  ;;  %v7442_v48 = vld [vmem:[%s14923_s2 + $0x10] sm:$0xf]  ;;  %v7437_v0 = vld [vmem:[%s8616_s14] sm:$0xff] }
 0x8c0   :  { %v6964_v34 = vpop.xlane.xlu2 %6963 }
 0x8c1   :  { %v6966_v14 = vmul.f32 0.0078125, %v6964_v34  ;;  %7160 = vmatpush.bf16.msrb.mxu3 %v14822_v25  ;;  %v10366_v34 = vld [vmem:[%s14807_s23 + $0x58] sm:$0xf0] }
 0x8c3   :  { %v6968_v4 = vsub.f32 %v6910_v50, %v6966_v14  ;;  %v10374_v50 = vld [vmem:[%s14807_s23 + $0x68] sm:$0xf0] }
 0x8c4   :  { %v14825_v11 = vor.u32 %v10953_v47, %v10374_v50  ;;  %v7439_v50 = vld [vmem:[%s8616_s14 + $0x10] sm:$0xf] }
 0x8c5   :  { %v6970_v16 = vmul.f32 %v6968_v4, %v6968_v4  ;;  %7161 = vmatpush.bf16.msrb.mxu3 %v14832_v30 }
 0x8c6   :  { %7173 = vmatpush.bf16.msra.mxu2 %v14825_v11 }
 0x8c7   :  { %6973 = vadd.xlane.f32.xlu1 %v6970_v16  ;;  %v10950_v16 = vld [vmem:[%s14807_s23 + $0x44] sm:$0xf0] }
 0x8c8   :  { %v7004_v2 = vpop.permute.xlu2 %7003 }
 0x8d3   :  { %7020 = vperm.xlu0 %11060, %v6956_v22   ;;  %v10949_v22 = vld [vmem:[%s14807_s23 + $0x44] sm:$0xf] }
 0x8db   :  { %7067 = vperm.xlu0 %11060, %v6958_v37  }
 0x8e0   :  { %7015 = vperm.xlu1 %11058, %v6955_v28   ;;  %v10358_v28 = vld [vmem:[%s14807_s23 + $0x48] sm:$0xf0] }
 0x8e3   :  { %7073 = vperm.xlu0 %11060, %v6959_v57   ;;  %v14845_v57 = vor.u32 %v10949_v22, %v10358_v28 }
 0x932   :  { %v6972_v21 = vpop.xlane.xlu0 %6971 }
 0x933   :  { %v6975_v20 = vmul.f32 0.0078125, %v6972_v21  ;;  %v10948_v21 = vld [vmem:[%s14807_s23 + $0x34] sm:$0xf0] }
 0x935   :  { %v6977_v41 = vadd.f32 1e-05, %v6975_v20  ;;  %v10947_v20 = vld [vmem:[%s14807_s23 + $0x34] sm:$0xf] }
 0x937   :  { %11305 = vrsqrt.f32 %v6977_v41  ;;  %vm6985_vm10 = vweird.f32 %v6977_v41 }
 0x93a   :  { %v6974_v26 = vpop.xlane.xlu1 %6973 }
 0x93b   :  { %v6976_v46 = vmul.f32 0.0078125, %v6974_v26  ;;  %v10350_v26 = vld [vmem:[%s14807_s23 + $0x38] sm:$0xf0] }
 0x93d   :  { %v11306_v9 = vpop.eup %11305  ;;  %v6978_v39 = vadd.f32 1e-05, %v6976_v46  ;;  %v14855_v46 = vor.u32 %v10947_v20, %v10350_v26 }
 0x93e   :  { %v6980_v40 = vmul.f32 %v11306_v9, %v6977_v41  ;;  %vm6986_vm0 = vweird.f32 %v11306_v9 }
 0x93f   :  { %11307 = vrsqrt.f32 %v6978_v39  ;;  %vm6987_vm14 = vmor %vm6985_vm10, %vm6986_vm0  ;;  %vm6995_vm5 = vweird.f32 %v6978_v39  ;;  %vm15434_vm0 = vcmask 1043456  }
 0x940   :  { %v6981_v43 = vmul.f32 %v11306_v9, %v6980_v40  ;;  %v10945_v40 = vld [vmem:[%s14807_s23 + $0x24] sm:$0xf]  ;;  %vm15435_vm10 = vmmov %vm15434_vm0 }
 0x942   :  { %v6982_v17 = vmul.f32 0.5, %v6981_v43 }
 0x944   :  { %v6983_v61 = vsub.f32 1.5, %v6982_v17  ;;  %v10342_v17 = vld [vmem:[%s14807_s23 + $0x28] sm:$0xf0] }
 0x945   :  { %v11308_v56 = vpop.eup %11307  ;;  %v7021_v58 = vpop.permute.xlu0 %7020 }
 0x946   :  { %v6984_v29 = vmul.f32 %v11306_v9, %v6983_v61  ;;  %v6990_v32 = vmul.f32 %v11308_v56, %v6978_v39  ;;  %vm6996_vm12 = vweird.f32 %v11308_v56  ;;  %v10946_v39 = vld [vmem:[%s14807_s23 + $0x24] sm:$0xf0]  ;;  %v14865_v61 = vor.u32 %v10945_v40, %v10342_v17 }
 0x947   :  { %vm6997_vm2 = vmor %vm6995_vm5, %vm6996_vm12  ;;  %vm7232_vm12 = vcmask 949248   ;;  %vm7212_vm5 = vcmask 965632  }
 0x948   :  { %v6991_v53 = vmul.f32 %v11308_v56, %v6990_v32  ;;  %v6988_v27 = vsel %vm6987_vm14, %v11306_v9, %v6984_v29  ;;  %v10340_v9 = vld [vmem:[%s14807_s23 + $0x20] sm:$0xf]  ;;  %v10944_v29 = vld [vmem:[%s14807_s23 + $0x14] sm:$0xf0]  ;;  %v10943_v32 = vld [vmem:[%s14807_s23 + $0x14] sm:$0xf] }
 0x949   :  { %v14790_v6 = vmul.f32 %v6988_v27, %v6967_v38  ;;  %v10951_v38 = vld [vmem:[%s14807_s23 + $0x54] sm:$0xf]  ;;  %v14862_v43 = vor.u32 %v10946_v39, %v10340_v9  ;;  %v10324_v27 = vld [vmem:[%s14807_s23] sm:$0xf]  ;;  %vm7222_vm14 = vcmask 957440  }
 0x94a   :  { %v6992_v8 = vmul.f32 0.5, %v6991_v53  ;;  %v14835_v14 = vor.u32 %v10951_v38, %v10366_v34  ;;  %v7438_v34 = vld [vmem:[%s8616_s14 + $0x8] sm:$0xff]  ;;  %s11376_s14 = smov 23  }
 0x94b   :  { %v7011_v10 = vmul.f32 %v7004_v2, %v14790_v6  ;;  %v10941_v2 = vld [vmem:[%s14807_s23 + $0x4] sm:$0xf]  ;;  %s8624_s1 = sld [smem:[%s15267_s0 + %s11376_s14]]   ;;  %s11385_s14 = smov 121  }
 0x94c   :  { %v6993_v18 = vsub.f32 1.5, %v6992_v8  ;;  %7174 = vmatpush.bf16.msra.mxu2 %v14835_v14  ;;  %v10334_v8 = vld [vmem:[%s14807_s23 + $0x18] sm:$0xf0] }
 0x94e   :  { %v6994_v3 = vmul.f32 %v11308_v56, %v6993_v18  ;;  %v10942_v18 = vld [vmem:[%s14807_s23 + $0x4] sm:$0xf0] }
 0x950   :  { %v6998_v54 = vsel %vm6997_vm2, %v11308_v56, %v6994_v3  ;;  %7175 = vmatpush.bf16.msra.mxu2 %v14845_v57  ;;  %v10332_v56 = vld [vmem:[%s14807_s23 + $0x10] sm:$0xf]  ;;  %v14877_v3 = vor.u32 %v10943_v32, %v10334_v8  ;;  %vm15436_vm2 = vmmov %vm15434_vm0 }
 0x951   :  { %v14792_v35 = vmul.f32 %v6998_v54, %v6968_v4  ;;  %v10356_v4 = vld [vmem:[%s14807_s23 + $0x40] sm:$0xf]  ;;  %v14872_v53 = vor.u32 %v10944_v29, %v10332_v56  ;;  %v10326_v54 = vld [vmem:[%s14807_s23 + $0x8] sm:$0xf0] }
 0x952   :  { %v7016_v15 = vpop.permute.xlu1 %7015  ;;  %v14842_v37 = vor.u32 %v10950_v16, %v10356_v4  ;;  %v7440_v16 = vld [vmem:[%s14923_s2] sm:$0xff] }
 0x953   :  { %v7012_v5 = vmul.f32 %v7009_v31, %v14792_v35  ;;  %v7023_v12 = vadd.f32 %v7016_v15, %v7011_v10  ;;  %v10348_v31 = vld [vmem:[%s14807_s23 + $0x30] sm:$0xf]  ;;  %v14882_v10 = vor.u32 %v10942_v18, %v10324_v27  ;;  %v14885_v15 = vor.u32 %v10941_v2, %v10326_v54  ;;  %s11375_s23 = smov 24  }
 0x954   :  { %7162 = vmatpush.bf16.msrb.mxu3 %v14842_v37  ;;  %v14852_v41 = vor.u32 %v10948_v21, %v10348_v31  ;;  %7176 = vmatpush.bf16.msra.mxu2 %v14855_v46  ;;  %s15105_s7 = sld [smem:[%s15267_s0 + %s11375_s23]]  }
 0x955   :  { %v7024_v51 = vadd.f32 %v7021_v58, %v7012_v5  ;;  %v7025_v33 = vmax.f32 %v7023_v12, 0.0 }
 0x957   :  { %v7026_v36 = vmax.f32 %v7024_v51, 0.0 }
 0x958   :  { %7163 = vmatpush.bf16.msrb.mxu3 %v14852_v41  ;;  %7177 = vmatpush.bf16.msra.mxu2 %v14865_v61 }
 0x959   :  { %v7027_v23 = vpack.c.bf16 %v7026_v36, %v7025_v33 }
 0x95b   :  { %7039 = vmatpush.bf16.msra.mxu0 %v7027_v23  ;;  %v7068_v23 = vpop.permute.xlu0 %7067 }
 0x95c   :  { %7164 = vmatpush.bf16.msrb.mxu3 %v14862_v43  ;;  %7178 = vmatpush.bf16.msra.mxu2 %v14877_v3 }
 0x95e   :  { %10321 = vmatmul.msk.bf16.vlgmr.msra.gmra.mxu0 %vm7028_vm15, %v6957_v42 }
 0x960   :  { %7165 = vmatpush.bf16.msrb.mxu3 %v14872_v53  ;;  %7179 = vmatpush.bf16.msra.mxu2 %v14885_v15 }
 0x963   :  { %v7074_v62 = vpop.permute.xlu0 %7073 }
 0x964   :  { %7166 = vmatpush.bf16.msrb.mxu3 %v14882_v10 }
 0x9db   :  { %v7041_v60 = vpop.f32.mrf.mxu0 }
 0x9dc   :  { %7045 = vadd.xlane.f32.xlu2 %v7041_v60 }
 0x9e3   :  { %v7043_v63 = vpop.f32.mrf.mxu0 }
 0xa4f   :  { %v7046_v59 = vpop.xlane.xlu2 %7045 }
 0xa50   :  { %v7047_v55 = vmul.f32 0.0078125, %v7046_v59 }
 0xa52   :  { %v14800_v45 = vsub.f32 %v7041_v60, %v7047_v55 }
 0xa54   :  { %v7049_v13 = vmul.f32 %v14800_v45, %v14800_v45 }
 0xa56   :  { %7050 = vadd.xlane.f32.xlu1 %v7049_v13 }
 0xac9   :  { %v7051_v5 = vpop.xlane.xlu1 %7050 }
 0xaca   :  { %v7052_v12 = vmul.f32 0.0078125, %v7051_v5 }
 0xacc   :  { %v7053_v58 = vadd.f32 1e-05, %v7052_v12 }
 0xace   :  { %11309 = vrsqrt.f32 %v7053_v58  ;;  %vm7060_vm4 = vweird.f32 %v7053_v58 }
 0xad4   :  { %v11310_v51 = vpop.eup %11309 }
 0xad5   :  { %v7055_v36 = vmul.f32 %v11310_v51, %v7053_v58  ;;  %vm7061_vm1 = vweird.f32 %v11310_v51 }
 0xad6   :  { %vm7062_vm7 = vmor %vm7060_vm4, %vm7061_vm1 }
 0xad7   :  { %v7056_v33 = vmul.f32 %v11310_v51, %v7055_v36  ;;  %vm15437_vm1 = vmmov %vm15434_vm0 }
 0xad8   :  { %vm15438_vm4 = vmmov %vm15434_vm0 }
 0xad9   :  { %v7057_v42 = vmul.f32 0.5, %v7056_v33 }
 0xadb   :  { %v7058_v60 = vsub.f32 1.5, %v7057_v42 }
 0xadd   :  { %v7059_v63 = vmul.f32 %v11310_v51, %v7058_v60 }
 0xadf   :  { %v7063_v59 = vsel %vm7062_vm7, %v11310_v51, %v7059_v63 }
 0xae0   :  { %v7064_v55 = vmul.f32 %v7063_v59, %v14800_v45 }
 0xae2   :  { %v7070_v13 = vmul.f32 %v7068_v23, %v7064_v55 }
 0xae4   :  { %v7076_v24 = vadd.f32 %v7074_v62, %v7070_v13 }
 0xae6   :  { %v7077_v19 = vmax.f32 %v7076_v24, 0.0 }
 0xae8   :  { %v7078_v49 = vpack.c.bf16 %v7077_v19, %v7077_v19 }
 0xaea   :  { %7167 = vmatmul.bf16.vlgmr.msrb.gmra.mxu3 %v7078_v49  ;;  %7180 = vmatmul.bf16.vlgmr.msra.gmra.mxu2 %v7078_v49 }
 0xb6d   :  { %v14890_v7 = vpop.f32.mrf.mxu3  ;;  %v7181_v44 = vpop.f32.mrf.mxu2 }
 0xb6e   :  { %7187 = vst.msk [vmem:[#allocation3 + $0x8] sm:$0xff] %vm7186_vm9, %v7181_v44  ;;  %7230 = vrot.lane.b32.xlu1 %v7181_v44, %s11360_s24  ;;  %7258 = vrot.lane.b32.xlu0 %v7181_v44, %s11333_s10 }
 0xb6f   :  { %7256 = vrot.lane.b32.xlu2 %v14890_v7, %s11333_s10 }
 0xb75   :  { %v7170_v45 = vpop.f32.mrf.mxu3  ;;  %v7183_v47 = vpop.f32.mrf.mxu2 }
 0xb76   :  { %7240 = vrot.lane.b32.xlu0 %v7181_v44, %s11335_s12  ;;  %7218 = vrot.lane.b32.xlu1 %v14890_v7, %s11361_s25 }
 0xb77   :  { %7201 = vrot.lane.b32.xlu2 %v7181_v44, %s11340_s17 }
 0xb7e   :  { %7249 = vrot.lane.b32.xlu0 %v7181_v44, %s11332_s9  ;;  %7199 = vrot.lane.b32.xlu1 %v14890_v7, %s11340_s17 }
 0xb7f   :  { %7228 = vrot.lane.b32.xlu2 %v14890_v7, %s11360_s24 }
 0xb86   :  { %7220 = vrot.lane.b32.xlu0 %v7181_v44, %s11361_s25 }
 0xb87   :  { %7208 = vrot.lane.b32.xlu2 %v14890_v7, %s11362_s26 }
 0xb8e   :  { %7238 = vrot.lane.b32.xlu0 %v14890_v7, %s11335_s12 }
 0xb96   :  { %7247 = vrot.lane.b32.xlu0 %v14890_v7, %s11332_s9 }
 0xb9e   :  { %7210 = vrot.lane.b32.xlu0 %v7181_v44, %s11362_s26 }
 0xba6   :  { %7192 = vrot.lane.b32.xlu0 %v7181_v44, %s11342_s19 }
 0xbae   :  { %7190 = vrot.lane.b32.xlu0 %v14890_v7, %s11342_s19 }
 0xbb6   :  { %7481 = vperm.xlu0 %11060, %v7439_v50   ;;  %v7266_v50 = vld [vmem:[#allocation3 + $0x8] sm:$0xff] }
 0xbbe   :  { %7499 = vperm.xlu0 %11060, %v7442_v48  }
 0xbc6   :  { %7471 = vperm.xlu0 %11060, %v7437_v0  }
 0xbc9   :  { %v7257_v38 = vpop.permute.xlu2 %7256 }
 0xbce   :  { %7476 = vperm.xlu0 %11060, %v7438_v34  }
 0xbd1   :  { %v7202_v4 = vpop.permute.xlu2 %7201 }
 0xbd2   :  { %7207 = vst.msk [vmem:[#allocation3 + $0x28] sm:$0xff] %vm7186_vm9, %v7202_v4 }
 0xbd6   :  { %7489 = vperm.xlu0 %11060, %v7440_v16   ;;  %v6952_v16 = vld [vmem:[%s14952_s15 + $0x60] sm:$0xf] }
 0xbd9   :  { %v7229_v12 = vpop.permute.xlu2 %7228  ;;  %v7270_v49 = vld [vmem:[#allocation3 + $0x28] sm:$0xff] }
 0xbe0   :  { %v7231_v22 = vpop.permute.xlu1 %7230  ;;  %v7259_v28 = vpop.permute.xlu0 %7258 }
 0xbe1   :  { %7237 = vst.msk [vmem:[#allocation3 + $0x58] sm:$0xff] %vm7186_vm9, %v7231_v22  ;;  %v7260_v31 = vsel %vm15433_vm8, %v7257_v38, %v7259_v28  ;;  %v7233_v42 = vsel %vm7232_vm12, %v7229_v12, %v7231_v22  ;;  %v7209_v59 = vpop.permute.xlu2 %7208  ;;  %v7379_v22 = vunpack.c.l.b16 %v6952_v16  ;;  %v7445_v12 = vld [vmem:[%s8620_s21] sm:$0xff]  ;;  %s11382_s21 = smov 114  }
 0xbe2   :  { %7264 = vst.msk [vmem:[#allocation3 + $0x88] sm:$0xff] %vm7186_vm9, %v7259_v28  ;;  %v7291_v21 = vpack.c.bf16 %v7260_v31, %v7260_v31  ;;  %v10963_v28 = vld [vmem:[%s14952_s15 + $0x30] sm:$0xff] }
 0xbe3   :  { %v7392_v31 = vpack.c.b16 %v7379_v22, %v7379_v22 }
 0xbe4   :  { %v7297_v20 = vsel %vm15434_vm0, %v7291_v21, 0  ;;  %v10962_v21 = vld [vmem:[%s14952_s15 + $0x28] sm:$0xff] }
 0xbe5   :  { %7305 = vmatpush.bf16.msrb.mxu0 %v7297_v20  ;;  %v10961_v20 = vld [vmem:[%s14952_s15 + $0x20] sm:$0xff] }
 0xbe8   :  { %v7241_v26 = vpop.permute.xlu0 %7240  ;;  %v7276_v2 = vld [vmem:[#allocation3 + $0x58] sm:$0xff]  ;;  %v7219_v5 = vpop.permute.xlu1 %7218 }
 0xbe9   :  { %7246 = vst.msk [vmem:[#allocation3 + $0x68] sm:$0xff] %vm7186_vm9, %v7241_v26  ;;  %v7282_v9 = vld [vmem:[#allocation3 + $0x88] sm:$0xff] }
 0xbea   :  { %v7292_v39 = vpack.c.bf16 %v7282_v9, %v7282_v9  ;;  %v14989_v9 = vld [vmem:[%s14952_s15 + $0x40] sm:$0xff] }
 0xbec   :  { %v7300_v40 = vsel %vm15435_vm10, %v7292_v39, 0  ;;  %vm7514_vm10 = vcmask 1041408  }
 0xbed   :  { %7318 = vmatpush.bf16.msrb.mxu1 %v7300_v40 }
 0xbf0   :  { %v7250_v17 = vpop.permute.xlu0 %7249  ;;  %v7278_v29 = vld [vmem:[#allocation3 + $0x68] sm:$0xff]  ;;  %v7200_v60 = vpop.permute.xlu1 %7199 }
 0xbf1   :  { %7255 = vst.msk [vmem:[#allocation3 + $0x78] sm:$0xff] %vm7186_vm9, %v7250_v17  ;;  %v7203_v13 = vsel %vm778_vm11, %v7200_v60, %v7202_v4  ;;  %v6960_v4 = vld [vmem:[%s8615_s6] sm:$0x3] }
 0xbf8   :  { %v7221_v56 = vpop.permute.xlu0 %7220  ;;  %v7280_v32 = vld [vmem:[#allocation3 + $0x78] sm:$0xff] }
 0xbf9   :  { %7227 = vst.msk [vmem:[#allocation3 + $0x48] sm:$0xff] %vm7186_vm9, %v7221_v56  ;;  %v7290_v8 = vpack.c.bf16 %v7280_v32, %v7278_v29  ;;  %v7223_v23 = vsel %vm7222_vm14, %v7219_v5, %v7221_v56  ;;  %v7441_v5 = vld [vmem:[%s14923_s2 + $0x8] sm:$0xff]  ;;  %s11377_s2 = smov 30  }
 0xbfa   :  { %v7287_v63 = vpack.c.bf16 %v7233_v42, %v7223_v23 }
 0xbfb   :  { %7319 = vmatpush.bf16.msrb.mxu1 %v7290_v8 }
 0xc00   :  { %v7239_v27 = vpop.permute.xlu0 %7238  ;;  %v7274_v18 = vld [vmem:[#allocation3 + $0x48] sm:$0xff] }
 0xc01   :  { %v7288_v54 = vpack.c.bf16 %v7276_v2, %v7274_v18  ;;  %v7242_v51 = vsel %vm1215_vm6, %v7239_v27, %v7241_v26  ;;  %v10960_v26 = vld [vmem:[%s14952_s15 + $0x18] sm:$0xff] }
 0xc03   :  { %7320 = vmatpush.bf16.msrb.mxu1 %v7288_v54 }
 0xc08   :  { %v7248_v58 = vpop.permute.xlu0 %7247 }
 0xc09   :  { %v7251_v36 = vsel %vm1298_vm3, %v7248_v58, %v7250_v17 }
 0xc0a   :  { %v7289_v33 = vpack.c.bf16 %v7251_v36, %v7242_v51 }
 0xc0c   :  { %7306 = vmatpush.bf16.msrb.mxu0 %v7289_v33 }
 0xc10   :  { %v7211_v55 = vpop.permute.xlu0 %7210  ;;  %7307 = vmatpush.bf16.msrb.mxu0 %v7287_v63 }
 0xc11   :  { %v7213_v62 = vsel %vm7212_vm5, %v7209_v59, %v7211_v55  ;;  %7217 = vst.msk [vmem:[#allocation3 + $0x38] sm:$0xff] %vm7186_vm9, %v7211_v55 }
 0xc12   :  { %v7285_v24 = vpack.c.bf16 %v7213_v62, %v7203_v13 }
 0xc14   :  { %7308 = vmatpush.bf16.msrb.mxu0 %v7285_v24 }
 0xc18   :  { %v7193_v19 = vpop.permute.xlu0 %7192  ;;  %v7272_v44 = vld [vmem:[#allocation3 + $0x38] sm:$0xff] }
 0xc19   :  { %7198 = vst.msk [vmem:[#allocation3 + $0x18] sm:$0xff] %vm7186_vm9, %v7193_v19  ;;  %v7286_v45 = vpack.c.bf16 %v7272_v44, %v7270_v49 }
 0xc1b   :  { %7321 = vmatpush.bf16.msrb.mxu1 %v7286_v45 }
 0xc20   :  { %v7191_v47 = vpop.permute.xlu0 %7190  ;;  %v7268_v48 = vld [vmem:[#allocation3 + $0x18] sm:$0xff] }
 0xc21   :  { %v7194_v0 = vsel %vm695_vm13, %v7191_v47, %v7193_v19  ;;  %v7284_v38 = vpack.c.bf16 %v7268_v48, %v7266_v50 }
 0xc22   :  { %v7283_v34 = vpack.c.bf16 %v7194_v0, %v14890_v7  ;;  %v10964_v7 = vld [vmem:[%s14952_s15 + $0x38] sm:$0xff] }
 0xc23   :  { %7322 = vmatpush.bf16.msrb.mxu1 %v7284_v38 }
 0xc24   :  { %7309 = vmatpush.bf16.msrb.mxu0 %v7283_v34 }
 0xc26   :  { %10387 = vmatmul.msk.bf16.vlgmr.msrb.gmra.mxu1 %vm7186_vm9, %v6960_v4 }
 0xc27   :  { %7565 = vmatpush.bf16.msra.mxu1 %v14812_v1  ;;  %10386 = vmatmul.msk.bf16.vlgmr.msrb.gmra.mxu0 %vm7186_vm9, %v6960_v4  ;;  %v14963_v1 = vsel %vm15436_vm2, %v7392_v31, 0  ;;  %vm7510_vm2 = vcmask 162816  }
 0xc28   :  { %7411 = vmatpush.bf16.msra.mxu0 %v10964_v7  ;;  %7427 = vmatpush.bf16.msra.mxu3 %v14963_v1  ;;  %v7482_v42 = vpop.permute.xlu0 %7481 }
 0xc2b   :  { %7566 = vmatpush.bf16.msra.mxu1 %v14822_v25  ;;  %v14968_v25 = vld [vmem:[%s14952_s15 + $0x58] sm:$0xff] }
 0xc2c   :  { %7412 = vmatpush.bf16.msra.mxu0 %v10963_v28  ;;  %7428 = vmatpush.bf16.msra.mxu3 %v14968_v25 }
 0xc2f   :  { %7567 = vmatpush.bf16.msra.mxu1 %v14832_v30  ;;  %v14974_v30 = vld [vmem:[%s14952_s15 + $0x50] sm:$0xff] }
 0xc30   :  { %7413 = vmatpush.bf16.msra.mxu0 %v10962_v21  ;;  %7429 = vmatpush.bf16.msra.mxu3 %v14974_v30  ;;  %v7500_v60 = vpop.permute.xlu0 %7499 }
 0xc33   :  { %7568 = vmatpush.bf16.msra.mxu1 %v14842_v37  ;;  %v14980_v37 = vld [vmem:[%s14952_s15 + $0x48] sm:$0xff] }
 0xc34   :  { %7414 = vmatpush.bf16.msra.mxu0 %v10961_v20  ;;  %7430 = vmatpush.bf16.msra.mxu3 %v14980_v37 }
 0xc37   :  { %7569 = vmatpush.bf16.msra.mxu1 %v14852_v41  ;;  %v10959_v41 = vld [vmem:[%s14952_s15 + $0x10] sm:$0xff] }
 0xc38   :  { %7415 = vmatpush.bf16.msra.mxu0 %v10960_v26  ;;  %7431 = vmatpush.bf16.msra.mxu3 %v14989_v9  ;;  %v7472_v13 = vpop.permute.xlu0 %7471 }
 0xc39   :  { %v7484_v16 = vmul.f32 %v7472_v13, %v14790_v6  ;;  %v7766_v13 = vld [vmem:[%s8622_s4 + $0x8] sm:$0xff] }
 0xc3b   :  { %7570 = vmatpush.bf16.msra.mxu1 %v14862_v43  ;;  %v10958_v43 = vld [vmem:[%s14952_s15 + $0x8] sm:$0xff] }
 0xc3c   :  { %7416 = vmatpush.bf16.msra.mxu0 %v10959_v41 }
 0xc3f   :  { %7571 = vmatpush.bf16.msra.mxu1 %v14872_v53  ;;  %v10957_v53 = vld [vmem:[%s14952_s15] sm:$0xff] }
 0xc40   :  { %7417 = vmatpush.bf16.msra.mxu0 %v10958_v43  ;;  %v7477_v44 = vpop.permute.xlu0 %7476 }
 0xc41   :  { %v7485_v34 = vmul.f32 %v7477_v44, %v14792_v35 }
 0xc43   :  { %7572 = vmatpush.bf16.msra.mxu1 %v14882_v10 }
 0xc44   :  { %7418 = vmatpush.bf16.msra.mxu0 %v10957_v53 }
 0xc47   :  { %7735 = vmatpush.bf16.msrb.mxu1 %v10964_v7 }
 0xc48   :  { %v7490_v4 = vpop.permute.xlu0 %7489 }
 0xc49   :  { %v7502_v31 = vadd.f32 %v7490_v4, %v7484_v16 }
 0xc4b   :  { %7736 = vmatpush.bf16.msrb.mxu1 %v10963_v28 }
 0xc4f   :  { %7737 = vmatpush.bf16.msrb.mxu1 %v10962_v21 }
 0xc53   :  { %7738 = vmatpush.bf16.msrb.mxu1 %v10961_v20 }
 0xc57   :  { %7739 = vmatpush.bf16.msrb.mxu1 %v10960_v26 }
 0xc5b   :  { %7740 = vmatpush.bf16.msrb.mxu1 %v10959_v41  ;;  %v7505_v41 = vmax.f32 %v7502_v31, 0.0 }
 0xc5f   :  { %7741 = vmatpush.bf16.msrb.mxu1 %v10958_v43 }
 0xc63   :  { %7742 = vmatpush.bf16.msrb.mxu1 %v10957_v53  ;;  %v7443_v53 = vld [vmem:[%s8618_s28] sm:$0xf] }
 0xca3   :  { %v7324_v10 = vpop.f32.mrf.mxu1 }
 0xca4   :  { %v7329_v39 = vpack.c.bf16 %v7324_v10, %v7324_v10  ;;  %v7311_v40 = vpop.f32.mrf.mxu0 }
 0xca5   :  { %v7328_v17 = vpack.c.bf16 %v7311_v40, %v7311_v40 }
 0xca6   :  { %10436 = vmatmul.msk.bf16.vlgmr.msra.gmra.mxu3 %vm7186_vm9, %v7329_v39 }
 0xca7   :  { %7419 = vmatmul.bf16.vlgmr.msra.gmra.mxu0 %v7328_v17 }
 0xcab   :  { %v7326_v56 = vpop.f32.mrf.mxu1 }
 0xcac   :  { %v7313_v29 = vpop.f32.mrf.mxu0 }
 0xd24   :  { %v7420_v32 = vpop.f32.mrf.mxu0 }
 0xd29   :  { %v7433_v8 = vpop.f32.mrf.mxu3 }
 0xd2a   :  { %v14994_v27 = vadd.f32 %v7433_v8, %v7420_v32 }
 0xd2c   :  { %v7447_v18 = vsel %vm15437_vm1, %v14994_v27, 0.0  ;;  %v7422_v2 = vpop.f32.mrf.mxu0 }
 0xd2d   :  { %7448 = vadd.xlane.f32.xlu1 %v7447_v18 }
 0xd31   :  { %v7435_v54 = vpop.f32.mrf.mxu3 }
 0xd46   :  { %7494 = vperm.xlu1 %11058, %v7441_v5  }
 0xd4e   :  { %7559 = vperm.xlu1 %11058, %v7445_v12  }
 0xda0   :  { %v7449_v58 = vpop.xlane.xlu1 %7448 }
 0xda1   :  { %v7450_v51 = vmul.f32 0.0078125, %v7449_v58 }
 0xda3   :  { %v7451_v36 = vsub.f32 %v14994_v27, %v7450_v51 }
 0xda5   :  { %v7452_v33 = vmul.f32 %v7451_v36, %v7451_v36 }
 0xda7   :  { %v7453_v23 = vsel %vm15438_vm4, %v7452_v33, 0.0 }
 0xda8   :  { %7454 = vadd.xlane.f32.xlu2 %v7453_v23 }
 0xdb8   :  { %v7495_v0 = vpop.permute.xlu1 %7494 }
 0xdb9   :  { %v7503_v22 = vadd.f32 %v7495_v0, %v7485_v34 }
 0xdbb   :  { %v7506_v20 = vmax.f32 %v7503_v22, 0.0 }
 0xdbd   :  { %v7508_v43 = vpack.c.bf16 %v7506_v20, %v7505_v41 }
 0xdc0   :  { %v7560_v12 = vpop.permute.xlu1 %7559 }
 0xe1b   :  { %v7455_v63 = vpop.xlane.xlu2 %7454 }
 0xe1c   :  { %v7456_v59 = vmul.f32 0.0078125, %v7455_v63  ;;  %v7767_v63 = vld [vmem:[%s8622_s4 + $0x10] sm:$0xff] }
 0xe1e   :  { %v7457_v55 = vadd.f32 1e-05, %v7456_v59 }
 0xe20   :  { %11311 = vrsqrt.f32 %v7457_v55  ;;  %vm7464_vm8 = vweird.f32 %v7457_v55 }
 0xe26   :  { %v11312_v62 = vpop.eup %11311 }
 0xe27   :  { %v7459_v24 = vmul.f32 %v11312_v62, %v7457_v55  ;;  %vm7465_vm7 = vweird.f32 %v11312_v62  ;;  %v7765_v55 = vld [vmem:[%s8622_s4] sm:$0xff]  ;;  %s11388_s4 = smov 26  }
 0xe28   :  { %vm7466_vm0 = vmor %vm7464_vm8, %vm7465_vm7  ;;  %vm15439_vm8 = vcmask 867328   ;;  %s15170_s6 = sld [smem:[%s15267_s0 + %s11388_s4]]  }
 0xe29   :  { %v7460_v19 = vmul.f32 %v11312_v62, %v7459_v24 }
 0xe2b   :  { %v7461_v49 = vmul.f32 0.5, %v7460_v19 }
 0xe2d   :  { %v7462_v45 = vsub.f32 1.5, %v7461_v49 }
 0xe2f   :  { %v7463_v47 = vmul.f32 %v11312_v62, %v7462_v45 }
 0xe31   :  { %v7467_v50 = vsel %vm7466_vm0, %v11312_v62, %v7463_v47  ;;  %vm15440_vm0 = vcmask 1043456  }
 0xe32   :  { %v7468_v48 = vmul.f32 %v7467_v50, %v7451_v36 }
 0xe34   :  { %v7486_v38 = vmul.f32 %v7482_v42, %v7468_v48 }
 0xe36   :  { %v7504_v7 = vadd.f32 %v7500_v60, %v7486_v38 }
 0xe38   :  { %v7507_v28 = vmax.f32 %v7504_v7, 0.0 }
 0xe3a   :  { %v7509_v21 = vpack.c.bf16 %v7507_v28, %v7507_v28 }
 0xe3c   :  { %v7516_v26 = vsel %vm7514_vm10, %v7509_v21, 0 }
 0xe3d   :  { %7524 = vmatpush.bf16.msrb.mxu2 %v7516_v26 }
 0xe41   :  { %7525 = vmatpush.bf16.msrb.mxu2 %v7508_v43 }
 0xe44   :  { %10437 = vmatmul.msk.bf16.vlgmr.msrb.gmra.mxu2 %vm7510_vm2, %v7443_v53 }
 0xe45   :  { %7578 = vmatpush.bf16.msra.mxu2 %v14815_v52  ;;  %v7444_v52 = vld [vmem:[%s8619_s30] sm:$0xff]  ;;  %s11387_s30 = smov 34  }
 0xe46   :  { %s8635_s3 = sld [smem:[%s15267_s0 + %s11387_s30]]  }
 0xe49   :  { %7579 = vmatpush.bf16.msra.mxu2 %v14825_v11 }
 0xe4d   :  { %7580 = vmatpush.bf16.msra.mxu2 %v14835_v14 }
 0xe51   :  { %7581 = vmatpush.bf16.msra.mxu2 %v14845_v57 }
 0xe55   :  { %7582 = vmatpush.bf16.msra.mxu2 %v14855_v46 }
 0xe59   :  { %7583 = vmatpush.bf16.msra.mxu2 %v14865_v61 }
 0xe5d   :  { %7584 = vmatpush.bf16.msra.mxu2 %v14877_v3 }
 0xe61   :  { %7585 = vmatpush.bf16.msra.mxu2 %v14885_v15 }
 0xec7   :  { %v7527_v10 = vpop.f32.mrf.mxu2 }
 0xec8   :  { %7531 = vadd.xlane.f32.xlu2 %v7527_v10 }
 0xecf   :  { %v7529_v39 = vpop.f32.mrf.mxu2 }
 0xee0   :  { %7553 = vperm.xlu2 %11059, %v7444_v52  }
 0xf3b   :  { %v7532_v11 = vpop.xlane.xlu2 %7531 }
 0xf3c   :  { %v7533_v14 = vmul.f32 0.0078125, %v7532_v11 }
 0xf3e   :  { %v7534_v57 = vsub.f32 %v7527_v10, %v7533_v14 }
 0xf40   :  { %v7535_v46 = vmul.f32 %v7534_v57, %v7534_v57 }
 0xf42   :  { %7536 = vadd.xlane.f32.xlu0 %v7535_v46 }
 0xf43   :  { %v7554_v54 = vpop.permute.xlu2 %7553 }
 0xfb5   :  { %v7537_v61 = vpop.xlane.xlu0 %7536 }
 0xfb6   :  { %v7538_v40 = vmul.f32 0.0078125, %v7537_v61 }
 0xfb8   :  { %v7539_v3 = vadd.f32 1e-05, %v7538_v40 }
 0xfba   :  { %11313 = vrsqrt.f32 %v7539_v3  ;;  %vm7546_vm4 = vweird.f32 %v7539_v3 }
 0xfc0   :  { %v11314_v15 = vpop.eup %11313 }
 0xfc1   :  { %v7541_v17 = vmul.f32 %v11314_v15, %v7539_v3  ;;  %vm7547_vm1 = vweird.f32 %v11314_v15 }
 0xfc2   :  { %vm7548_vm7 = vmor %vm7546_vm4, %vm7547_vm1  ;;  %vm7963_vm4 = vcmask 257024  }
 0xfc3   :  { %v7542_v56 = vmul.f32 %v11314_v15, %v7541_v17  ;;  %vm15441_vm1 = vmmov %vm15440_vm0 }
 0xfc5   :  { %v7543_v29 = vmul.f32 0.5, %v7542_v56 }
 0xfc7   :  { %v7544_v32 = vsub.f32 1.5, %v7543_v29 }
 0xfc9   :  { %v7545_v8 = vmul.f32 %v11314_v15, %v7544_v32 }
 0xfcb   :  { %v7549_v18 = vsel %vm7548_vm7, %v11314_v15, %v7545_v8 }
 0xfcc   :  { %v7550_v2 = vmul.f32 %v7549_v18, %v7534_v57 }
 0xfce   :  { %v7556_v5 = vmul.f32 %v7554_v54, %v7550_v2 }
 0xfd0   :  { %v7562_v58 = vadd.f32 %v7560_v12, %v7556_v5 }
 0xfd2   :  { %v7563_v51 = vmax.f32 %v7562_v58, 0.0 }
 0xfd4   :  { %v7564_v36 = vpack.c.bf16 %v7563_v51, %v7563_v51 }
 0xfd6   :  { %7573 = vmatmul.bf16.vlgmr.msra.gmra.mxu1 %v7564_v36  ;;  %7586 = vmatmul.bf16.vlgmr.msra.gmra.mxu2 %v7564_v36 }
0x1053   :  { %v15022_v33 = vpop.f32.mrf.mxu1 }
0x1054   :  { %7591 = vst [vmem:[#allocation3] sm:$0xff] %v15022_v33  ;;  %7622 = vrot.lane.b32.xlu2 %v15022_v33, %s11361_s25  ;;  %7649 = vrot.lane.b32.xlu0 %v15022_v33, %s11332_s9 }
0x1055   :  { %7658 = vrot.lane.b32.xlu1 %v15022_v33, %s11333_s10 }
0x1059   :  { %v7587_v23 = vpop.f32.mrf.mxu2 }
0x105a   :  { %7592 = vst.msk [vmem:[#allocation3 + $0x8] sm:$0xff] %vm7186_vm9, %v7587_v23 }
0x105b   :  { %v7576_v42 = vpop.f32.mrf.mxu1 }
0x105c   :  { %7631 = vrot.lane.b32.xlu2 %v15022_v33, %s11360_s24  ;;  %7606 = vrot.lane.b32.xlu0 %v7587_v23, %s11340_s17 }
0x105d   :  { %7640 = vrot.lane.b32.xlu1 %v15022_v33, %s11335_s12 }
0x1061   :  { %v7589_v60 = vpop.f32.mrf.mxu2  ;;  %v7668_v12 = vld [vmem:[#allocation3 + $0x8] sm:$0xff] }
0x1064   :  { %7604 = vrot.lane.b32.xlu2 %v15022_v33, %s11340_s17  ;;  %7595 = vrot.lane.b32.xlu0 %v15022_v33, %s11342_s19 }
0x1065   :  { %7613 = vrot.lane.b32.xlu1 %v15022_v33, %s11362_s26 }
0x106c   :  { %7660 = vrot.lane.b32.xlu2 %v7587_v23, %s11333_s10  ;;  %s11378_s10 = smov 31  }
0x106d   :  { %7651 = vrot.lane.b32.xlu1 %v7587_v23, %s11332_s9  ;;  %s15056_s9 = sld [smem:[%s15267_s0 + %s11371_s5]]  }
0x106e   :  { %s8631_s5 = sld [smem:[%s15267_s0 + %s11377_s2]]   ;;  %s11393_s2 = smov 39  }
0x1073   :  { %v7770_v59 = vld [vmem:[%s15056_s9 + $0x10] sm:$0xff]  ;;  %v7768_v62 = vld [vmem:[%s15056_s9] sm:$0xff] }
0x1074   :  { %7642 = vrot.lane.b32.xlu2 %v7587_v23, %s11335_s12  ;;  %s11372_s12 = smov 20  }
0x1075   :  { %7624 = vrot.lane.b32.xlu1 %v7587_v23, %s11361_s25  ;;  %s8621_s8 = sld [smem:[%s15267_s0 + %s11372_s12]]   ;;  %s11379_s25 = smov 29  }
0x1076   :  { %s8632_s12 = sld [smem:[%s15267_s0 + %s11378_s10]]   ;;  %s11394_s10 = smov 40  }
0x1077   :  { %s8630_s11 = sld [smem:[%s15267_s0 + %s11379_s25]]  }
0x107b   :  { %v7446_v54 = vld [vmem:[%s8621_s8] sm:$0x3]  ;;  %s11390_s8 = smov 36  }
0x107c   :  { %7615 = vrot.lane.b32.xlu2 %v7587_v23, %s11362_s26  ;;  %s8637_s15 = sld [smem:[%s15267_s0 + %s11390_s8]]  }
0x107d   :  { %7633 = vrot.lane.b32.xlu1 %v7587_v23, %s11360_s24 }
0x1085   :  { %7597 = vrot.lane.b32.xlu1 %v7587_v23, %s11342_s19 }
0x108d   :  { %7821 = vperm.xlu1 %11058, %v7767_v63  }
0x1095   :  { %7839 = vperm.xlu1 %11058, %v7770_v59  }
0x109d   :  { %7811 = vperm.xlu1 %11058, %v7765_v55  }
0x10a5   :  { %7816 = vperm.xlu1 %11058, %v7766_v13   ;;  %v7769_v13 = vld [vmem:[%s15056_s9 + $0x8] sm:$0xff]  ;;  %s11389_s9 = smov 32  }
0x10a6   :  { %s8633_s26 = sld [smem:[%s15267_s0 + %s11389_s9]]  }
0x10ad   :  { %7829 = vperm.xlu1 %11058, %v7768_v62   ;;  %v7951_v62 = vld [vmem:[%s15096_s16] sm:$0xff] }
0x10ae   :  { %v7623_v24 = vpop.permute.xlu2 %7622 }
0x10b6   :  { %v7632_v19 = vpop.permute.xlu2 %7631 }
0x10be   :  { %v7605_v49 = vpop.permute.xlu2 %7604 }
0x10c6   :  { %v7661_v44 = vpop.permute.xlu2 %7660  ;;  %v7650_v45 = vpop.permute.xlu0 %7649 }
0x10c7   :  { %7666 = vst.msk [vmem:[#allocation3 + $0x88] sm:$0xff] %vm7186_vm9, %v7661_v44  ;;  %v7659_v47 = vpop.permute.xlu1 %7658 }
0x10c8   :  { %v7662_v50 = vsel %vm15439_vm8, %v7659_v47, %v7661_v44 }
0x10c9   :  { %7665 = vst [vmem:[#allocation3 + $0x80] sm:$0xff] %v7662_v50  ;;  %v7693_v48 = vpack.c.bf16 %v7662_v50, %v7662_v50 }
0x10cb   :  { %v7699_v0 = vsel %vm15440_vm0, %v7693_v48, 0 }
0x10cc   :  { %7707 = vmatpush.bf16.msrb.mxu3 %v7699_v0 }
0x10ce   :  { %v7643_v38 = vpop.permute.xlu2 %7642  ;;  %v7607_v34 = vpop.permute.xlu0 %7606  ;;  %v7684_v4 = vld [vmem:[#allocation3 + $0x88] sm:$0xff] }
0x10cf   :  { %7648 = vst.msk [vmem:[#allocation3 + $0x68] sm:$0xff] %vm7186_vm9, %v7643_v38  ;;  %v7608_v7 = vsel %vm778_vm11, %v7605_v49, %v7607_v34  ;;  %v7641_v16 = vpop.permute.xlu1 %7640  ;;  %v7694_v22 = vpack.c.bf16 %v7684_v4, %v7684_v4 }
0x10d0   :  { %7611 = vst [vmem:[#allocation3 + $0x20] sm:$0xff] %v7608_v7  ;;  %v7644_v28 = vsel %vm1215_vm6, %v7641_v16, %v7643_v38 }
0x10d1   :  { %7612 = vst.msk [vmem:[#allocation3 + $0x28] sm:$0xff] %vm7186_vm9, %v7607_v34  ;;  %v7702_v31 = vsel %vm15441_vm1, %v7694_v22, 0  ;;  %v10977_v34 = vld [vmem:[%s15105_s7 + $0x38] sm:$0xff] }
0x10d2   :  { %7647 = vst [vmem:[#allocation3 + $0x60] sm:$0xff] %v7644_v28  ;;  %7720 = vmatpush.bf16.msrb.mxu0 %v7702_v31  ;;  %7924 = vmatpush.bf16.msrb.mxu2 %v10977_v34 }
0x10d6   :  { %v7616_v21 = vpop.permute.xlu2 %7615  ;;  %v7680_v39 = vld [vmem:[#allocation3 + $0x68] sm:$0xff]  ;;  %v7596_v3 = vpop.permute.xlu0 %7595 }
0x10d7   :  { %7621 = vst.msk [vmem:[#allocation3 + $0x38] sm:$0xff] %vm7186_vm9, %v7616_v21  ;;  %v7614_v20 = vpop.permute.xlu1 %7613 }
0x10d8   :  { %v7617_v26 = vsel %vm7212_vm5, %v7614_v20, %v7616_v21  ;;  %v7672_v2 = vld [vmem:[#allocation3 + $0x28] sm:$0xff]  ;;  %v10974_v20 = vld [vmem:[%s15105_s7 + $0x20] sm:$0xff]  ;;  %vm7959_vm5 = vcmask 261120  }
0x10d9   :  { %7620 = vst [vmem:[#allocation3 + $0x30] sm:$0xff] %v7617_v26  ;;  %v7687_v40 = vpack.c.bf16 %v7617_v26, %v7608_v7  ;;  %v10976_v7 = vld [vmem:[%s15105_s7 + $0x30] sm:$0xff] }
0x10da   :  { %7925 = vmatpush.bf16.msrb.mxu2 %v10976_v7 }
0x10de   :  { %v7674_v8 = vld [vmem:[#allocation3 + $0x38] sm:$0xff] }
0x10df   :  { %v7652_v41 = vpop.permute.xlu1 %7651  ;;  %v7688_v5 = vpack.c.bf16 %v7674_v8, %v7672_v2  ;;  %v10970_v2 = vld [vmem:[%s15105_s7] sm:$0xff] }
0x10e0   :  { %v7653_v43 = vsel %vm1298_vm3, %v7650_v45, %v7652_v41  ;;  %7657 = vst.msk [vmem:[#allocation3 + $0x78] sm:$0xff] %vm7186_vm9, %v7652_v41  ;;  %vm15442_vm3 = vmmov %vm15440_vm0 }
0x10e1   :  { %7656 = vst [vmem:[#allocation3 + $0x70] sm:$0xff] %v7653_v43  ;;  %v7691_v53 = vpack.c.bf16 %v7653_v43, %v7644_v28  ;;  %v10975_v28 = vld [vmem:[%s15105_s7 + $0x28] sm:$0xff] }
0x10e2   :  { %7926 = vmatpush.bf16.msrb.mxu2 %v10975_v28 }
0x10e3   :  { %7708 = vmatpush.bf16.msrb.mxu3 %v7691_v53  ;;  %v10973_v53 = vld [vmem:[%s15105_s7 + $0x18] sm:$0xff] }
0x10e6   :  { %7927 = vmatpush.bf16.msrb.mxu2 %v10974_v20 }
0x10e7   :  { %v7625_v10 = vpop.permute.xlu1 %7624  ;;  %v7682_v52 = vld [vmem:[#allocation3 + $0x78] sm:$0xff] }
0x10e8   :  { %v7626_v11 = vsel %vm7222_vm14, %v7623_v24, %v7625_v10  ;;  %7630 = vst.msk [vmem:[#allocation3 + $0x48] sm:$0xff] %vm7186_vm9, %v7625_v10  ;;  %v7692_v14 = vpack.c.bf16 %v7682_v52, %v7680_v39  ;;  %v7953_v24 = vld [vmem:[%s8629_s22] sm:$0xff]  ;;  %vm15443_vm14 = vmmov %vm15440_vm0 }
0x10e9   :  { %7629 = vst [vmem:[#allocation3 + $0x40] sm:$0xff] %v7626_v11 }
0x10ea   :  { %7721 = vmatpush.bf16.msrb.mxu0 %v7692_v14  ;;  %7928 = vmatpush.bf16.msrb.mxu2 %v10973_v53 }
0x10ef   :  { %v7634_v57 = vpop.permute.xlu1 %7633  ;;  %v7676_v17 = vld [vmem:[#allocation3 + $0x48] sm:$0xff] }
0x10f0   :  { %v7635_v46 = vsel %vm7232_vm12, %v7632_v19, %v7634_v57  ;;  %7639 = vst.msk [vmem:[#allocation3 + $0x58] sm:$0xff] %vm7186_vm9, %v7634_v57  ;;  %vm7852_vm12 = vcmask 195584  }
0x10f1   :  { %7638 = vst [vmem:[#allocation3 + $0x50] sm:$0xff] %v7635_v46  ;;  %v7689_v61 = vpack.c.bf16 %v7635_v46, %v7626_v11 }
0x10f3   :  { %7709 = vmatpush.bf16.msrb.mxu3 %v7689_v61 }
0x10f7   :  { %v7598_v15 = vpop.permute.xlu1 %7597  ;;  %v7678_v56 = vld [vmem:[#allocation3 + $0x58] sm:$0xff]  ;;  %7710 = vmatpush.bf16.msrb.mxu3 %v7687_v40 }
0x10f8   :  { %v7599_v29 = vsel %vm695_vm13, %v7596_v3, %v7598_v15  ;;  %7603 = vst.msk [vmem:[#allocation3 + $0x18] sm:$0xff] %vm7186_vm9, %v7598_v15  ;;  %v7690_v32 = vpack.c.bf16 %v7678_v56, %v7676_v17  ;;  %v10443_v56 = vld [vmem:[%s8624_s1] sm:$0xf] }
0x10f9   :  { %7602 = vst [vmem:[#allocation3 + $0x10] sm:$0xff] %v7599_v29  ;;  %v7685_v18 = vpack.c.bf16 %v7599_v29, %v15022_v33  ;;  %v10969_v29 = vld [vmem:[%s8624_s1] sm:$0x30]  ;;  %s8638_s1 = sld [smem:[%s15267_s0 + %s11392_s27]]  }
0x10fa   :  { %7722 = vmatpush.bf16.msrb.mxu0 %v7690_v32  ;;  %v10444_v8 = vor.u32 %v10969_v29, %v10443_v56 }
0x10fb   :  { %7711 = vmatpush.bf16.msrb.mxu3 %v7685_v18  ;;  %v10972_v18 = vld [vmem:[%s15105_s7 + $0x10] sm:$0xff] }
0x10fc   :  { %7929 = vmatpush.bf16.msrb.mxu2 %v10972_v18 }
0x10fe   :  { %7723 = vmatpush.bf16.msrb.mxu0 %v7688_v5  ;;  %10438 = vmatmul.msk.bf16.vlgmr.msrb.gmra.mxu3 %vm7186_vm9, %v7446_v54 }
0x10ff   :  { %7751 = vmatpush.bf16.msra.mxu3 %v14963_v1  ;;  %v7670_v58 = vld [vmem:[#allocation3 + $0x18] sm:$0xff]  ;;  %v7822_v47 = vpop.permute.xlu1 %7821 }
0x1100   :  { %v7686_v51 = vpack.c.bf16 %v7670_v58, %v7668_v12 }
0x1102   :  { %7724 = vmatpush.bf16.msrb.mxu0 %v7686_v51 }
0x1103   :  { %7752 = vmatpush.bf16.msra.mxu3 %v14968_v25 }
0x1105   :  { %10439 = vmatmul.msk.bf16.vlgmr.msrb.gmra.mxu0 %vm7186_vm9, %v7446_v54 }
0x1107   :  { %7753 = vmatpush.bf16.msra.mxu3 %v14974_v30  ;;  %v7840_v50 = vpop.permute.xlu1 %7839 }
0x110b   :  { %7754 = vmatpush.bf16.msra.mxu3 %v14980_v37 }
0x110f   :  { %7755 = vmatpush.bf16.msra.mxu3 %v14989_v9  ;;  %v7812_v4 = vpop.permute.xlu1 %7811 }
0x1110   :  { %v7824_v40 = vmul.f32 %v7812_v4, %v14790_v6 }
0x1117   :  { %v7817_v41 = vpop.permute.xlu1 %7816 }
0x1118   :  { %v7825_v57 = vmul.f32 %v7817_v41, %v14792_v35  ;;  %v10971_v35 = vld [vmem:[%s15105_s7 + $0x8] sm:$0xff]  ;;  %s11384_s7 = smov 122  }
0x1119   :  { %7930 = vmatpush.bf16.msrb.mxu2 %v10971_v35 }
0x111d   :  { %7931 = vmatpush.bf16.msrb.mxu2 %v10970_v2 }
0x111f   :  { %v7830_v46 = vpop.permute.xlu1 %7829 }
0x1120   :  { %v7842_v17 = vadd.f32 %v7830_v46, %v7824_v40 }
0x1181   :  { %v7713_v36 = vpop.f32.mrf.mxu3 }
0x1182   :  { %v7726_v1 = vpop.f32.mrf.mxu0  ;;  %v7730_v33 = vpack.c.bf16 %v7713_v36, %v7713_v36 }
0x1183   :  { %v7731_v23 = vpack.c.bf16 %v7726_v1, %v7726_v1 }
0x1184   :  { %7743 = vmatmul.bf16.vlgmr.msrb.gmra.mxu1 %v7730_v33 }
0x1185   :  { %10440 = vmatmul.msk.bf16.vlgmr.msra.gmra.mxu3 %vm7186_vm9, %v7731_v23  ;;  %v7956_v23 = vld [vmem:[%s8631_s5] sm:$0xff]  ;;  %s8640_s5 = sld [smem:[%s15267_s0 + %s11393_s2]]  }
0x1189   :  { %v7715_v42 = vpop.f32.mrf.mxu3 }
0x118a   :  { %v7728_v60 = vpop.f32.mrf.mxu0  ;;  %v7957_v42 = vld [vmem:[%s8632_s12] sm:$0xff]  ;;  %s15221_s12 = sld [smem:[%s15267_s0 + %s11394_s10]]  }
0x1201   :  { %v7744_v25 = vpop.f32.mrf.mxu1 }
0x1208   :  { %v7757_v63 = vpop.f32.mrf.mxu3 }
0x1209   :  { %v7758_v59 = vadd.f32 %v7757_v63, %v7744_v25  ;;  %v7746_v30 = vpop.f32.mrf.mxu1 }
0x120b   :  { %v7762_v55 = vrot.slane %v7758_v59, 4 }
0x120d   :  { %v7764_v37 = vsel %vm15442_vm3, %v14994_v27, %v7762_v55  ;;  %v7954_v27 = vld [vmem:[%s8629_s22 + $0x8] sm:$0xf]  ;;  %s11383_s22 = smov 33  }
0x120e   :  { %7789 = vadd.xlane.f32.xlu2 %v7764_v37  ;;  %s8634_s28 = sld [smem:[%s15267_s0 + %s11383_s22]]   ;;  %s11399_s22 = smov 44  }
0x1210   :  { %v7759_v9 = vpop.f32.mrf.mxu3 }
0x1226   :  { %7834 = vperm.xlu2 %11059, %v7769_v13  }
0x122e   :  { %8007 = vperm.xlu2 %11059, %v7951_v62  }
0x1236   :  { %8019 = vperm.xlu2 %11059, %v7953_v24   ;;  %v7952_v24 = vld [vmem:[%s15096_s16 + $0x8] sm:$0xf]  ;;  %s11391_s16 = smov 35  }
0x1237   :  { %s8636_s23 = sld [smem:[%s15267_s0 + %s11391_s16]]  }
0x123e   :  { %8024 = vperm.xlu2 %11059, %v7954_v27  }
0x1281   :  { %v7790_v19 = vpop.xlane.xlu2 %7789 }
0x1282   :  { %v7791_v49 = vmul.f32 0.0078125, %v7790_v19 }
0x1284   :  { %v7792_v44 = vsub.f32 %v7764_v37, %v7791_v49 }
0x1286   :  { %v7793_v45 = vmul.f32 %v7792_v44, %v7792_v44 }
0x1288   :  { %7794 = vadd.xlane.f32.xlu0 %v7793_v45 }
0x1289   :  { %v7835_v11 = vpop.permute.xlu2 %7834 }
0x128a   :  { %v7843_v3 = vadd.f32 %v7835_v11, %v7825_v57 }
0x128c   :  { %v7845_v32 = vpack.c.bf16 %v7843_v3, %v7842_v17  ;;  %v7955_v17 = vld [vmem:[%s8630_s11] sm:$0xf] }
0x12fb   :  { %v7795_v48 = vpop.xlane.xlu0 %7794 }
0x12fc   :  { %v7796_v0 = vmul.f32 0.0078125, %v7795_v48 }
0x12fe   :  { %v7797_v38 = vadd.f32 1e-05, %v7796_v0  ;;  %v8008_v0 = vpop.permute.xlu2 %8007 }
0x1300   :  { %11315 = vrsqrt.f32 %v7797_v38  ;;  %vm7804_vm11 = vweird.f32 %v7797_v38 }
0x1306   :  { %v11316_v16 = vpop.eup %11315 }
0x1307   :  { %v7799_v22 = vmul.f32 %v11316_v16, %v7797_v38  ;;  %vm7805_vm6 = vweird.f32 %v11316_v16 }
0x1308   :  { %vm7806_vm13 = vmor %vm7804_vm11, %vm7805_vm6  ;;  %vm8036_vm11 = vcmask 1045504  }
0x1309   :  { %v7800_v31 = vmul.f32 %v11316_v16, %v7799_v22 }
0x130b   :  { %v7801_v21 = vmul.f32 0.5, %v7800_v31 }
0x130d   :  { %v7802_v26 = vsub.f32 1.5, %v7801_v21  ;;  %v8020_v21 = vpop.permute.xlu2 %8019 }
0x130f   :  { %v7803_v43 = vmul.f32 %v11316_v16, %v7802_v26 }
0x1311   :  { %v7807_v10 = vsel %vm7806_vm13, %v11316_v16, %v7803_v43  ;;  %vm8032_vm13 = vcmask 97280  }
0x1312   :  { %v7808_v39 = vmul.f32 %v7807_v10, %v7792_v44 }
0x1314   :  { %v7826_v52 = vmul.f32 %v7822_v47, %v7808_v39 }
0x1315   :  { %v8025_v57 = vpop.permute.xlu2 %8024 }
0x1316   :  { %v7844_v14 = vadd.f32 %v7840_v50, %v7826_v52 }
0x1318   :  { %v7846_v61 = vpack.c.bf16 %v7844_v14, %v7844_v14 }
0x131a   :  { %v7857_v15 = vsel %vm15443_vm14, %v7846_v61, 0 }
0x131b   :  { %7865 = vmatpush.bf16.msra.mxu0 %v7857_v15 }
0x131f   :  { %7866 = vmatpush.bf16.msra.mxu0 %v7845_v32 }
0x1322   :  { %10445 = vmatmul.msk.bf16.vlgmr.msra.gmra.mxu0 %vm7852_vm12, %v10444_v8 }
0x139f   :  { %v7868_v6 = vpop.f32.mrf.mxu0 }
0x13a0   :  { %v7873_v5 = vmax.f32 %v7868_v6, 0.0 }
0x13a7   :  { %v7870_v54 = vpop.f32.mrf.mxu0 }
0x13a8   :  { %v7874_v12 = vmax.f32 %v7870_v54, 0.0  ;;  %v10979_v54 = vld [vmem:[%s8626_s18 + $0x8] sm:$0xff] }
0x13a9   :  { %8110 = vmatpush.bf16.msrb.mxu0 %v10979_v54  ;;  %8353 = vmatpush.bf16.msra.mxu2 %v10979_v54 }
0x13aa   :  { %v7875_v58 = vpack.c.bf16 %v7874_v12, %v7873_v5  ;;  %v10978_v5 = vld [vmem:[%s8626_s18] sm:$0xff]  ;;  %s8643_s18 = sld [smem:[%s15267_s0 + %s11398_s13]]  }
0x13ac   :  { %7932 = vmatmul.bf16.vlgmr.msrb.gmra.mxu2 %v7875_v58 }
0x13ad   :  { %8111 = vmatpush.bf16.msrb.mxu0 %v10978_v5  ;;  %8354 = vmatpush.bf16.msra.mxu2 %v10978_v5 }
0x142f   :  { %v7933_v51 = vpop.f32.mrf.mxu2 }
0x1430   :  { %v7960_v36 = vsel %vm7959_vm5, %v7933_v51, 0.0 }
0x1431   :  { %7961 = vadd.xlane.f32.xlu0 %v7960_v36 }
0x1437   :  { %v15122_v1 = vpop.f32.mrf.mxu2 }
0x1438   :  { %v7964_v33 = vsel %vm7963_vm4, %v15122_v1, 0.0 }
0x1439   :  { %7965 = vadd.xlane.f32.xlu1 %v7964_v33 }
0x1452   :  { %8077 = vperm.xlu1 %11058, %v7956_v23  }
0x145a   :  { %8083 = vperm.xlu1 %11058, %v7957_v42  }
0x14a4   :  { %v7962_v60 = vpop.xlane.xlu0 %7961 }
0x14a5   :  { %v7967_v25 = vmul.f32 0.03125, %v7962_v60 }
0x14a7   :  { %v7969_v63 = vsub.f32 %v7933_v51, %v7967_v25 }
0x14a9   :  { %v7971_v59 = vmul.f32 %v7969_v63, %v7969_v63 }
0x14ab   :  { %v7973_v30 = vsel %vm7959_vm5, %v7971_v59, 0.0 }
0x14ac   :  { %7974 = vadd.xlane.f32.xlu0 %v7973_v30  ;;  %v7966_v55 = vpop.xlane.xlu1 %7965 }
0x14ad   :  { %v7968_v37 = vmul.f32 0.03125, %v7966_v55 }
0x14af   :  { %v7970_v9 = vsub.f32 %v15122_v1, %v7968_v37 }
0x14b1   :  { %v7972_v13 = vmul.f32 %v7970_v9, %v7970_v9 }
0x14b3   :  { %v7976_v62 = vsel %vm7963_vm4, %v7972_v13, 0.0 }
0x14b4   :  { %7977 = vadd.xlane.f32.xlu0 %v7976_v62 }
0x14c4   :  { %v8078_v42 = vpop.permute.xlu1 %8077 }
0x14c8   :  { %8012 = vperm.xlu0 %11060, %v7952_v24  }
0x14cc   :  { %v8084_v37 = vpop.permute.xlu1 %8083 }
0x151f   :  { %v7975_v27 = vpop.xlane.xlu0 %7974 }
0x1520   :  { %v7979_v19 = vmul.f32 0.03125, %v7975_v27 }
0x1522   :  { %v7981_v49 = vadd.f32 1e-05, %v7979_v19  ;;  %v8235_v19 = vld [vmem:[%s8634_s28] sm:$0xff] }
0x1524   :  { %11317 = vrsqrt.f32 %v7981_v49  ;;  %vm7989_vm8 = vweird.f32 %v7981_v49 }
0x1527   :  { %v7978_v44 = vpop.xlane.xlu0 %7977 }
0x1528   :  { %v7980_v45 = vmul.f32 0.03125, %v7978_v44  ;;  %v8237_v44 = vld [vmem:[%s8635_s3] sm:$0xff] }
0x152a   :  { %v11318_v47 = vpop.eup %11317  ;;  %v7982_v50 = vadd.f32 1e-05, %v7980_v45  ;;  %v8238_v45 = vld [vmem:[%s8635_s3 + $0x8] sm:$0xff] }
0x152b   :  { %v7984_v48 = vmul.f32 %v11318_v47, %v7981_v49  ;;  %vm7990_vm7 = vweird.f32 %v11318_v47  ;;  %v8236_v49 = vld [vmem:[%s8634_s28 + $0x8] sm:$0xff]  ;;  %s8645_s28 = sld [smem:[%s15267_s0 + %s11399_s22]]  }
0x152c   :  { %11319 = vrsqrt.f32 %v7982_v50  ;;  %vm7991_vm0 = vmor %vm7989_vm8, %vm7990_vm7  ;;  %vm7999_vm3 = vweird.f32 %v7982_v50  ;;  %vm15444_vm8 = vcmask 1043456  }
0x152d   :  { %v7985_v38 = vmul.f32 %v11318_v47, %v7984_v48 }
0x152f   :  { %v7986_v34 = vmul.f32 0.5, %v7985_v38 }
0x1531   :  { %v7987_v4 = vsub.f32 1.5, %v7986_v34 }
0x1532   :  { %v11320_v7 = vpop.eup %11319 }
0x1533   :  { %v7988_v16 = vmul.f32 %v11318_v47, %v7987_v4  ;;  %v7994_v22 = vmul.f32 %v11320_v7, %v7982_v50  ;;  %vm8000_vm1 = vweird.f32 %v11320_v7 }
0x1534   :  { %vm8001_vm6 = vmor %vm7999_vm3, %vm8000_vm1 }
0x1535   :  { %v7992_v28 = vsel %vm7991_vm0, %v11318_v47, %v7988_v16  ;;  %v7995_v31 = vmul.f32 %v11320_v7, %v7994_v22  ;;  %v7950_v16 = vld [vmem:[%s15170_s6 + $0x20] sm:$0xf]  ;;  %vm15445_vm0 = vmmov %vm15444_vm8 }
0x1536   :  { %v15136_v26 = vmul.f32 %v7992_v28, %v7969_v63  ;;  %vm15446_vm1 = vmmov %vm15445_vm0 }
0x1537   :  { %v7996_v20 = vmul.f32 0.5, %v7995_v31  ;;  %v8202_v31 = vunpack.c.l.b16 %v7950_v16 }
0x1538   :  { %v8015_v53 = vmul.f32 %v8008_v0, %v15136_v26 }
0x1539   :  { %v7997_v41 = vsub.f32 1.5, %v7996_v20  ;;  %v8207_v20 = vpack.c.b16 %v8202_v31, %v8202_v31 }
0x153a   :  { %v8013_v52 = vpop.permute.xlu0 %8012  ;;  %v8027_v11 = vadd.f32 %v8020_v21, %v8015_v53 }
0x153b   :  { %v7998_v43 = vmul.f32 %v11320_v7, %v7997_v41 }
0x153c   :  { %v8029_v61 = vmax.f32 %v8027_v11, 0.0 }
0x153d   :  { %v8002_v10 = vsel %vm8001_vm6, %v11320_v7, %v7998_v43  ;;  %v8216_v43 = vsel %vm15445_vm0, %v8207_v20, 0 }
0x153e   :  { %v8004_v39 = vmul.f32 %v8002_v10, %v7970_v9  ;;  %v10983_v10 = vld [vmem:[%s15170_s6 + $0x18] sm:$0xff] }
0x1540   :  { %v8016_v14 = vmul.f32 %v8013_v52, %v8004_v39  ;;  %v10982_v39 = vld [vmem:[%s15170_s6 + $0x10] sm:$0xff] }
0x1542   :  { %v8028_v46 = vadd.f32 %v8025_v57, %v8016_v14  ;;  %v10981_v57 = vld [vmem:[%s15170_s6 + $0x8] sm:$0xff] }
0x1544   :  { %v8030_v40 = vmax.f32 %v8028_v46, 0.0 }
0x1546   :  { %v8031_v3 = vpack.c.bf16 %v8030_v40, %v8029_v61 }
0x1548   :  { %v8038_v15 = vsel %vm8036_vm11, %v8031_v3, 0 }
0x1549   :  { %8047 = vmatpush.bf16.msrb.mxu3 %v8038_v15 }
0x154c   :  { %10478 = vmatmul.msk.bf16.vlgmr.msrb.gmra.mxu3 %vm8032_vm13, %v7955_v17 }
0x154d   :  { %8221 = vmatpush.bf16.msra.mxu3 %v8216_v43 }
0x1551   :  { %8222 = vmatpush.bf16.msra.mxu3 %v10983_v10 }
0x1555   :  { %8223 = vmatpush.bf16.msra.mxu3 %v10982_v39 }
0x1559   :  { %8224 = vmatpush.bf16.msra.mxu3 %v10981_v57 }
0x15cf   :  { %v8049_v56 = vpop.f32.mrf.mxu3 }
0x15d0   :  { %v8053_v29 = vsel %vm7959_vm5, %v8049_v56, 0.0 }
0x15d1   :  { %8054 = vadd.xlane.f32.xlu0 %v8053_v29  ;;  %v7958_v29 = vld [vmem:[%s8633_s26] sm:$0x3] }
0x15d7   :  { %v8051_v32 = vpop.f32.mrf.mxu3 }
0x15d8   :  { %v10980_v32 = vld [vmem:[%s15170_s6] sm:$0xff] }
0x15d9   :  { %8225 = vmatpush.bf16.msra.mxu3 %v10980_v32 }
0x15dd   :  { %8434 = vmatpush.bf16.msrb.mxu3 %v8216_v43 }
0x15e1   :  { %8435 = vmatpush.bf16.msrb.mxu3 %v10983_v10 }
0x15e5   :  { %8436 = vmatpush.bf16.msrb.mxu3 %v10982_v39 }
0x15e9   :  { %8437 = vmatpush.bf16.msrb.mxu3 %v10981_v57 }
0x15ed   :  { %8438 = vmatpush.bf16.msrb.mxu3 %v10980_v32 }
0x1644   :  { %v8055_v8 = vpop.xlane.xlu0 %8054 }
0x1645   :  { %v8056_v18 = vmul.f32 0.03125, %v8055_v8 }
0x1647   :  { %v8057_v35 = vsub.f32 %v8049_v56, %v8056_v18 }
0x1649   :  { %v8058_v2 = vmul.f32 %v8057_v35, %v8057_v35 }
0x164b   :  { %v8059_v6 = vsel %vm7959_vm5, %v8058_v2, 0.0 }
0x164c   :  { %8060 = vadd.xlane.f32.xlu2 %v8059_v6 }
0x16bf   :  { %v8061_v12 = vpop.xlane.xlu2 %8060 }
0x16c0   :  { %v8062_v58 = vmul.f32 0.03125, %v8061_v12 }
0x16c2   :  { %v8063_v51 = vadd.f32 1e-05, %v8062_v58 }
0x16c4   :  { %11321 = vrsqrt.f32 %v8063_v51  ;;  %vm8070_vm12 = vweird.f32 %v8063_v51 }
0x16ca   :  { %v11322_v36 = vpop.eup %11321 }
0x16cb   :  { %v8065_v33 = vmul.f32 %v11322_v36, %v8063_v51  ;;  %vm8071_vm14 = vweird.f32 %v11322_v36 }
0x16cc   :  { %vm8072_vm7 = vmor %vm8070_vm12, %vm8071_vm14 }
0x16cd   :  { %v8066_v23 = vmul.f32 %v11322_v36, %v8065_v33  ;;  %vm15447_vm12 = vmmov %vm15445_vm0 }
0x16cf   :  { %v8067_v60 = vmul.f32 0.5, %v8066_v23 }
0x16d1   :  { %v8068_v25 = vsub.f32 1.5, %v8067_v60 }
0x16d3   :  { %v8069_v63 = vmul.f32 %v11322_v36, %v8068_v25 }
0x16d5   :  { %v8073_v59 = vsel %vm8072_vm7, %v11322_v36, %v8069_v63 }
0x16d6   :  { %v8074_v30 = vmul.f32 %v8073_v59, %v8057_v35 }
0x16d8   :  { %v8080_v55 = vmul.f32 %v8078_v42, %v8074_v30  ;;  %v8240_v42 = vld [vmem:[%s8637_s15] sm:$0xff] }
0x16da   :  { %v8086_v9 = vadd.f32 %v8084_v37, %v8080_v55 }
0x16dc   :  { %v8087_v13 = vmax.f32 %v8086_v9, 0.0 }
0x16de   :  { %v8088_v62 = vpack.c.bf16 %v8087_v13, %v8087_v13 }
0x16e0   :  { %10487 = vmatmul.msk.bf16.vlgmr.msrb.gmra.mxu0 %vm7959_vm5, %v8088_v62 }
0x175d   :  { %v8113_v24 = vpop.f32.mrf.mxu0 }
0x175e   :  { %8117 = vst.msk [vmem:[#allocation3] sm:$0xff] %vm7186_vm9, %v8113_v24  ;;  %8143 = vrot.lane.b32.xlu2 %v8113_v24, %s11381_s20  ;;  %8139 = vrot.lane.b32.xlu0 %v8113_v24, %s11360_s24 }
0x175f   :  { %8147 = vrot.lane.b32.xlu1 %v8113_v24, %s11382_s21 }
0x1765   :  { %v8115_v27 = vpop.f32.mrf.mxu0  ;;  %v8151_v17 = vld [vmem:[#allocation3] sm:$0xff] }
0x1766   :  { %8119 = vrot.lane.b32.xlu2 %v8113_v24, %s11342_s19  ;;  %8127 = vrot.lane.b32.xlu0 %v8113_v24, %s11384_s7 }
0x1767   :  { %8131 = vrot.lane.b32.xlu1 %v8113_v24, %s11385_s14 }
0x176e   :  { %8267 = vperm.xlu2 %11059, %v8235_v19  }
0x176f   :  { %8135 = vrot.lane.b32.xlu1 %v8113_v24, %s11386_s29 }
0x1776   :  { %8272 = vperm.xlu2 %11059, %v8236_v49  }
0x1777   :  { %8123 = vrot.lane.b32.xlu1 %v8113_v24, %s11340_s17 }
0x177e   :  { %8279 = vperm.xlu2 %11059, %v8237_v44  }
0x1786   :  { %8284 = vperm.xlu2 %11059, %v8238_v45  }
0x17b8   :  { %v8144_v47 = vpop.permute.xlu2 %8143 }
0x17b9   :  { %8146 = vst.msk [vmem:[#allocation3 + $0x70] sm:$0xff] %vm7186_vm9, %v8144_v47 }
0x17c0   :  { %v8120_v50 = vpop.permute.xlu2 %8119  ;;  %v8158_v21 = vld [vmem:[#allocation3 + $0x70] sm:$0xff] }
0x17c1   :  { %8122 = vst.msk [vmem:[#allocation3 + $0x10] sm:$0xff] %vm7186_vm9, %v8120_v50 }
0x17c8   :  { %v8152_v15 = vld [vmem:[#allocation3 + $0x10] sm:$0xff]  ;;  %v8268_v60 = vpop.permute.xlu2 %8267 }
0x17c9   :  { %v8160_v56 = vpack.c.bf16 %v8152_v15, %v8151_v17  ;;  %v8275_v19 = vmul.f32 %v8268_v60, %v15136_v26 }
0x17d0   :  { %v8140_v48 = vpop.permute.xlu0 %8139  ;;  %v8273_v59 = vpop.permute.xlu2 %8272 }
0x17d1   :  { %8142 = vst.msk [vmem:[#allocation3 + $0x60] sm:$0xff] %vm7186_vm9, %v8140_v48  ;;  %v8148_v0 = vpop.permute.xlu1 %8147 }
0x17d2   :  { %8150 = vst.msk [vmem:[#allocation3 + $0x80] sm:$0xff] %vm7186_vm9, %v8148_v0 }
0x17d8   :  { %v8128_v38 = vpop.permute.xlu0 %8127  ;;  %v8157_v28 = vld [vmem:[#allocation3 + $0x60] sm:$0xff]  ;;  %v8280_v9 = vpop.permute.xlu2 %8279 }
0x17d9   :  { %8130 = vst.msk [vmem:[#allocation3 + $0x30] sm:$0xff] %vm7186_vm9, %v8128_v38  ;;  %v8132_v34 = vpop.permute.xlu1 %8131  ;;  %v8159_v4 = vld [vmem:[#allocation3 + $0x80] sm:$0xff]  ;;  %v8163_v41 = vpack.c.bf16 %v8158_v21, %v8157_v28  ;;  %v8287_v44 = vadd.f32 %v8280_v9, %v8275_v19 }
0x17da   :  { %8134 = vst.msk [vmem:[#allocation3 + $0x40] sm:$0xff] %vm7186_vm9, %v8132_v34  ;;  %v8164_v7 = vpack.c.bf16 %v8159_v4, %v8159_v4  ;;  %v8239_v34 = vld [vmem:[%s8636_s23] sm:$0xf] }
0x17db   :  { %v8289_v48 = vmax.f32 %v8287_v44, 0.0 }
0x17dc   :  { %v8169_v22 = vsel %vm15444_vm8, %v8164_v7, 0 }
0x17dd   :  { %8174 = vmatpush.bf16.msra.mxu1 %v8169_v22 }
0x17e0   :  { %v8154_v40 = vld [vmem:[#allocation3 + $0x30] sm:$0xff]  ;;  %v8285_v47 = vpop.permute.xlu2 %8284 }
0x17e1   :  { %8175 = vmatpush.bf16.msra.mxu1 %v8163_v41  ;;  %v8136_v53 = vpop.permute.xlu1 %8135  ;;  %v8155_v11 = vld [vmem:[#allocation3 + $0x40] sm:$0xff]  ;;  %v8241_v41 = vld [vmem:[%s8638_s1] sm:$0xff] }
0x17e2   :  { %8138 = vst.msk [vmem:[#allocation3 + $0x50] sm:$0xff] %vm7186_vm9, %v8136_v53 }
0x17e9   :  { %v8124_v52 = vpop.permute.xlu1 %8123  ;;  %v8156_v14 = vld [vmem:[#allocation3 + $0x50] sm:$0xff] }
0x17ea   :  { %8126 = vst.msk [vmem:[#allocation3 + $0x20] sm:$0xff] %vm7186_vm9, %v8124_v52  ;;  %v8162_v46 = vpack.c.bf16 %v8156_v14, %v8155_v11 }
0x17ec   :  { %8176 = vmatpush.bf16.msra.mxu1 %v8162_v46 }
0x17f1   :  { %v8153_v61 = vld [vmem:[#allocation3 + $0x20] sm:$0xff] }
0x17f2   :  { %v8161_v3 = vpack.c.bf16 %v8154_v40, %v8153_v61 }
0x17f4   :  { %8177 = vmatpush.bf16.msra.mxu1 %v8161_v3 }
0x17f8   :  { %8178 = vmatpush.bf16.msra.mxu1 %v8160_v56 }
0x17fb   :  { %10488 = vmatmul.msk.bf16.vlgmr.msra.gmra.mxu1 %vm7186_vm9, %v7958_v29 }
0x1878   :  { %v8180_v8 = vpop.f32.mrf.mxu1 }
0x1879   :  { %v8184_v18 = vpack.c.bf16 %v8180_v8, %v8180_v8 }
0x187b   :  { %10505 = vmatmul.msk.bf16.vlgmr.msra.gmra.mxu3 %vm7186_vm9, %v8184_v18  ;;  %v8444_v18 = vld [vmem:[%s8640_s5] sm:$0xff] }
0x1880   :  { %v8182_v35 = vpop.f32.mrf.mxu1 }
0x18fe   :  { %v8227_v2 = vpop.f32.mrf.mxu3 }
0x18ff   :  { %v8232_v6 = vrot.slane %v8227_v2, 4  ;;  %v8445_v2 = vld [vmem:[%s8640_s5 + $0x8] sm:$0xff] }
0x1901   :  { %v8234_v54 = vsel %vm15446_vm1, %v15122_v1, %v8232_v6  ;;  %v8447_v6 = vld [vmem:[%s15221_s12] sm:$0xff] }
0x1902   :  { %v8243_v5 = vsel %vm7959_vm5, %v8234_v54, 0.0 }
0x1903   :  { %8244 = vadd.xlane.f32.xlu1 %v8243_v5  ;;  %v8446_v5 = vld [vmem:[%s8640_s5 + $0x10] sm:$0xf] }
0x1906   :  { %v8229_v12 = vpop.f32.mrf.mxu3 }
0x1976   :  { %v8245_v58 = vpop.xlane.xlu1 %8244 }
0x1977   :  { %v8246_v51 = vmul.f32 0.03125, %v8245_v58 }
0x1979   :  { %v8247_v36 = vsub.f32 %v8234_v54, %v8246_v51  ;;  %v8448_v54 = vld [vmem:[%s15221_s12 + $0x8] sm:$0xff] }
0x197b   :  { %v8248_v33 = vmul.f32 %v8247_v36, %v8247_v36 }
0x197d   :  { %v8249_v23 = vsel %vm7959_vm5, %v8248_v33, 0.0 }
0x197e   :  { %8250 = vadd.xlane.f32.xlu0 %v8249_v23 }
0x1992   :  { %8332 = vperm.xlu0 %11060, %v8240_v42  }
0x19f1   :  { %v8251_v1 = vpop.xlane.xlu0 %8250 }
0x19f2   :  { %v8252_v25 = vmul.f32 0.03125, %v8251_v1 }
0x19f4   :  { %v8253_v63 = vadd.f32 1e-05, %v8252_v25 }
0x19f6   :  { %11323 = vrsqrt.f32 %v8253_v63  ;;  %vm8260_vm6 = vweird.f32 %v8253_v63 }
0x19fc   :  { %v11324_v30 = vpop.eup %11323 }
0x19fd   :  { %v8255_v55 = vmul.f32 %v11324_v30, %v8253_v63  ;;  %vm8261_vm3 = vweird.f32 %v11324_v30 }
0x19fe   :  { %vm8262_vm11 = vmor %vm8260_vm6, %vm8261_vm3 }
0x19ff   :  { %v8256_v37 = vmul.f32 %v11324_v30, %v8255_v55 }
0x1a01   :  { %v8257_v13 = vmul.f32 0.5, %v8256_v37 }
0x1a03   :  { %v8258_v62 = vsub.f32 1.5, %v8257_v13 }
0x1a04   :  { %v8333_v3 = vpop.permute.xlu0 %8332 }
0x1a05   :  { %v8259_v24 = vmul.f32 %v11324_v30, %v8258_v62 }
0x1a07   :  { %v8263_v27 = vsel %vm8262_vm11, %v11324_v30, %v8259_v24 }
0x1a08   :  { %v15196_v49 = vmul.f32 %v8263_v27, %v8247_v36 }
0x1a0a   :  { %v8276_v45 = vmul.f32 %v8273_v59, %v15196_v49 }
0x1a0c   :  { %v8288_v50 = vadd.f32 %v8285_v47, %v8276_v45 }
0x1a0e   :  { %v8290_v0 = vmax.f32 %v8288_v50, 0.0 }
0x1a10   :  { %v8291_v38 = vpack.c.bf16 %v8290_v0, %v8289_v48 }
0x1a12   :  { %8302 = vmatpush.bf16.msra.mxu0 %v8291_v38 }
0x1a15   :  { %10506 = vmatmul.msk.bf16.vlgmr.msra.gmra.mxu0 %vm7028_vm15, %v8239_v34 }
0x1a92   :  { %v8304_v4 = vpop.f32.mrf.mxu0 }
0x1a93   :  { %v8308_v7 = vsel %vm7959_vm5, %v8304_v4, 0.0 }
0x1a94   :  { %8309 = vadd.xlane.f32.xlu2 %v8308_v7 }
0x1a9a   :  { %v8306_v16 = vpop.f32.mrf.mxu0 }
0x1b07   :  { %v8310_v22 = vpop.xlane.xlu2 %8309 }
0x1b08   :  { %v8311_v28 = vmul.f32 0.03125, %v8310_v22 }
0x1b0a   :  { %v8312_v31 = vsub.f32 %v8304_v4, %v8311_v28 }
0x1b0c   :  { %v8313_v21 = vmul.f32 %v8312_v31, %v8312_v31 }
0x1b0e   :  { %v8314_v20 = vsel %vm7959_vm5, %v8313_v21, 0.0 }
0x1b0f   :  { %8315 = vadd.xlane.f32.xlu1 %v8314_v20 }
0x1b28   :  { %8338 = vperm.xlu1 %11058, %v8241_v41  }
0x1b82   :  { %v8316_v43 = vpop.xlane.xlu1 %8315 }
0x1b83   :  { %v8317_v53 = vmul.f32 0.03125, %v8316_v43 }
0x1b85   :  { %v8318_v10 = vadd.f32 1e-05, %v8317_v53 }
0x1b87   :  { %11325 = vrsqrt.f32 %v8318_v10  ;;  %vm8325_vm13 = vweird.f32 %v8318_v10 }
0x1b8d   :  { %v11326_v39 = vpop.eup %11325 }
0x1b8e   :  { %v8320_v52 = vmul.f32 %v11326_v39, %v8318_v10  ;;  %vm8326_vm15 = vweird.f32 %v11326_v39 }
0x1b8f   :  { %vm8327_vm14 = vmor %vm8325_vm13, %vm8326_vm15 }
0x1b90   :  { %v8321_v11 = vmul.f32 %v11326_v39, %v8320_v52  ;;  %v8449_v52 = vld [vmem:[%s15221_s12 + $0x10] sm:$0xf] }
0x1b92   :  { %v8322_v14 = vmul.f32 0.5, %v8321_v11 }
0x1b94   :  { %v8323_v57 = vsub.f32 1.5, %v8322_v14 }
0x1b96   :  { %v8324_v46 = vmul.f32 %v11326_v39, %v8323_v57 }
0x1b98   :  { %v8328_v61 = vsel %vm8327_vm14, %v11326_v39, %v8324_v46 }
0x1b99   :  { %v8329_v40 = vmul.f32 %v8328_v61, %v8312_v31 }
0x1b9a   :  { %v8339_v17 = vpop.permute.xlu1 %8338 }
0x1b9b   :  { %v8335_v15 = vmul.f32 %v8333_v3, %v8329_v40 }
0x1b9d   :  { %v8341_v56 = vadd.f32 %v8339_v17, %v8335_v15 }
0x1b9f   :  { %v8342_v29 = vmax.f32 %v8341_v56, 0.0 }
0x1ba1   :  { %v8343_v32 = vpack.c.bf16 %v8342_v29, %v8342_v29 }
0x1ba3   :  { %10507 = vmatmul.msk.bf16.vlgmr.msra.gmra.mxu2 %vm7959_vm5, %v8343_v32 }
0x1c26   :  { %v8356_v8 = vpop.f32.mrf.mxu2 }
0x1c27   :  { %8360 = vst.msk [vmem:[#allocation3] sm:$0xff] %vm7186_vm9, %v8356_v8  ;;  %8374 = vrot.lane.b32.xlu2 %v8356_v8, %s11385_s14  ;;  %8386 = vrot.lane.b32.xlu1 %v8356_v8, %s11381_s20 }
0x1c28   :  { %8390 = vrot.lane.b32.xlu0 %v8356_v8, %s11382_s21 }
0x1c2e   :  { %v8358_v35 = vpop.f32.mrf.mxu2  ;;  %v8394_v28 = vld [vmem:[#allocation3] sm:$0xff] }
0x1c2f   :  { %8482 = vperm.xlu2 %11059, %v8444_v18   ;;  %8366 = vrot.lane.b32.xlu1 %v8356_v8, %s11340_s17  ;;  %s11395_s17 = smov 43  }
0x1c30   :  { %8382 = vrot.lane.b32.xlu0 %v8356_v8, %s11360_s24  ;;  %s15231_s21 = sld [smem:[%s15267_s0 + %s11395_s17]]  }
0x1c36   :  { %v8457_v12 = vld [vmem:[%s15231_s21 + $0x8] sm:$0x3]  ;;  %v8456_v40 = vld [vmem:[%s15231_s21] sm:$0xff] }
0x1c37   :  { %8487 = vperm.xlu2 %11059, %v8445_v2   ;;  %8362 = vrot.lane.b32.xlu1 %v8356_v8, %s11342_s19  ;;  %s11396_s19 = smov 41  }
0x1c38   :  { %8378 = vrot.lane.b32.xlu0 %v8356_v8, %s11386_s29  ;;  %s8642_s25 = sld [smem:[%s15267_s0 + %s11396_s19]]  }
0x1c3e   :  { %v10985_v58 = vld [vmem:[%s8642_s25 + $0x8] sm:$0xff]  ;;  %v10984_v36 = vld [vmem:[%s8642_s25] sm:$0xff] }
0x1c3f   :  { %8500 = vperm.xlu2 %11059, %v8447_v6   ;;  %8545 = vmatpush.bf16.msrb.mxu0 %v10985_v58 }
0x1c40   :  { %8370 = vrot.lane.b32.xlu0 %v8356_v8, %s11384_s7  ;;  %s11397_s7 = smov 38  }
0x1c41   :  { %s8639_s11 = sld [smem:[%s15267_s0 + %s11397_s7]]  }
0x1c43   :  { %8546 = vmatpush.bf16.msrb.mxu0 %v10984_v36 }
0x1c47   :  { %8505 = vperm.xlu2 %11059, %v8448_v54   ;;  %v8242_v21 = vld [vmem:[%s8639_s11] sm:$0x3] }
0x1c4f   :  { %8492 = vperm.xlu2 %11059, %v8446_v5  }
0x1c57   :  { %8566 = vperm.xlu2 %11059, %v8457_v12  }
0x1c81   :  { %v8375_v51 = vpop.permute.xlu2 %8374 }
0x1c82   :  { %8377 = vst.msk [vmem:[#allocation3 + $0x40] sm:$0xff] %vm7186_vm9, %v8375_v51 }
0x1c89   :  { %v8483_v33 = vpop.permute.xlu2 %8482  ;;  %v8398_v0 = vld [vmem:[#allocation3 + $0x40] sm:$0xff] }
0x1c8a   :  { %v8495_v25 = vmul.f32 %v8483_v33, %v15136_v26 }
0x1c91   :  { %v8488_v23 = vpop.permute.xlu2 %8487 }
0x1c92   :  { %v8496_v63 = vmul.f32 %v8488_v23, %v15196_v49 }
0x1c99   :  { %v8501_v42 = vpop.permute.xlu2 %8500  ;;  %v8387_v60 = vpop.permute.xlu1 %8386 }
0x1c9a   :  { %8389 = vst.msk [vmem:[#allocation3 + $0x70] sm:$0xff] %vm7186_vm9, %v8387_v60  ;;  %v8391_v1 = vpop.permute.xlu0 %8390  ;;  %v8513_v59 = vadd.f32 %v8501_v42, %v8495_v25  ;;  %v10522_v25 = vld [vmem:[%s8643_s18] sm:$0xf] }
0x1c9b   :  { %8393 = vst.msk [vmem:[#allocation3 + $0x80] sm:$0xff] %vm7186_vm9, %v8391_v1 }
0x1c9c   :  { %v8516_v24 = vmax.f32 %v8513_v59, 0.0 }
0x1ca1   :  { %v8506_v30 = vpop.permute.xlu2 %8505  ;;  %v8367_v55 = vpop.permute.xlu1 %8366  ;;  %v8401_v47 = vld [vmem:[#allocation3 + $0x70] sm:$0xff] }
0x1ca2   :  { %v8514_v37 = vadd.f32 %v8506_v30, %v8496_v63  ;;  %8369 = vst.msk [vmem:[#allocation3 + $0x20] sm:$0xff] %vm7186_vm9, %v8367_v55  ;;  %v8383_v9 = vpop.permute.xlu0 %8382  ;;  %v8402_v13 = vld [vmem:[#allocation3 + $0x80] sm:$0xff]  ;;  %v10986_v63 = vld [vmem:[%s8643_s18] sm:$0x10] }
0x1ca3   :  { %8385 = vst.msk [vmem:[#allocation3 + $0x60] sm:$0xff] %vm7186_vm9, %v8383_v9  ;;  %v8407_v62 = vpack.c.bf16 %v8402_v13, %v8402_v13  ;;  %v10523_v30 = vor.u32 %v10986_v63, %v10522_v25 }
0x1ca4   :  { %v8517_v27 = vmax.f32 %v8514_v37, 0.0 }
0x1ca5   :  { %v8412_v19 = vsel %vm15447_vm12, %v8407_v62, 0 }
0x1ca6   :  { %v8519_v44 = vpack.c.bf16 %v8517_v27, %v8516_v24  ;;  %8417 = vmatpush.bf16.msrb.mxu1 %v8412_v19 }
0x1ca8   :  { %10518 = vmatmul.msk.bf16.vlgmr.msrb.gmra.mxu0 %vm7959_vm5, %v8519_v44 }
0x1ca9   :  { %v8363_v26 = vpop.permute.xlu1 %8362  ;;  %v8396_v4 = vld [vmem:[#allocation3 + $0x20] sm:$0xff]  ;;  %v8493_v54 = vpop.permute.xlu2 %8492 }
0x1caa   :  { %8365 = vst.msk [vmem:[#allocation3 + $0x10] sm:$0xff] %vm7186_vm9, %v8363_v26  ;;  %v8379_v49 = vpop.permute.xlu0 %8378  ;;  %v8400_v45 = vld [vmem:[#allocation3 + $0x60] sm:$0xff] }
0x1cab   :  { %8381 = vst.msk [vmem:[#allocation3 + $0x50] sm:$0xff] %vm7186_vm9, %v8379_v49  ;;  %v8406_v50 = vpack.c.bf16 %v8401_v47, %v8400_v45 }
0x1cad   :  { %8418 = vmatpush.bf16.msrb.mxu1 %v8406_v50 }
0x1cb1   :  { %v8395_v22 = vld [vmem:[#allocation3 + $0x10] sm:$0xff]  ;;  %v8567_v62 = vpop.permute.xlu2 %8566 }
0x1cb2   :  { %v8371_v48 = vpop.permute.xlu0 %8370  ;;  %v8399_v38 = vld [vmem:[#allocation3 + $0x50] sm:$0xff]  ;;  %v8403_v31 = vpack.c.bf16 %v8395_v22, %v8394_v28 }
0x1cb3   :  { %8373 = vst.msk [vmem:[#allocation3 + $0x30] sm:$0xff] %vm7186_vm9, %v8371_v48  ;;  %v8405_v34 = vpack.c.bf16 %v8399_v38, %v8398_v0 }
0x1cb5   :  { %8419 = vmatpush.bf16.msrb.mxu1 %v8405_v34 }
0x1cba   :  { %v8397_v7 = vld [vmem:[#allocation3 + $0x30] sm:$0xff] }
0x1cbb   :  { %v8404_v16 = vpack.c.bf16 %v8397_v7, %v8396_v4 }
0x1cbd   :  { %8420 = vmatpush.bf16.msrb.mxu1 %v8404_v16 }
0x1cc1   :  { %8421 = vmatpush.bf16.msrb.mxu1 %v8403_v31 }
0x1cc4   :  { %10508 = vmatmul.msk.bf16.vlgmr.msrb.gmra.mxu1 %vm7186_vm9, %v8242_v21 }
0x1d25   :  { %v8548_v33 = vpop.f32.mrf.mxu0 }
0x1d2d   :  { %v8550_v23 = vpop.f32.mrf.mxu0 }
0x1d2e   :  { %v8557_v59 = vpack.c.bf16 %v8550_v23, %v8548_v33 }
0x1d41   :  { %v8423_v20 = vpop.f32.mrf.mxu1 }
0x1d42   :  { %v8427_v41 = vpack.c.bf16 %v8423_v20, %v8423_v20 }
0x1d44   :  { %10509 = vmatmul.msk.bf16.vlgmr.msrb.gmra.mxu3 %vm7186_vm9, %v8427_v41 }
0x1d49   :  { %v8425_v43 = vpop.f32.mrf.mxu1 }
0x1dc7   :  { %v8440_v53 = vpop.f32.mrf.mxu3 }
0x1dc8   :  { %v8458_v10 = vsel %vm7963_vm4, %v8440_v53, 0.0 }
0x1dc9   :  { %8459 = vadd.xlane.f32.xlu0 %v8458_v10 }
0x1dcf   :  { %v8442_v39 = vpop.f32.mrf.mxu3 }
0x1ddd   :  { %8510 = vperm.xlu0 %11060, %v8449_v52  }
0x1e3c   :  { %v8460_v11 = vpop.xlane.xlu0 %8459 }
0x1e3d   :  { %v8461_v14 = vmul.f32 0.03125, %v8460_v11 }
0x1e3f   :  { %v8462_v57 = vsub.f32 %v8440_v53, %v8461_v14 }
0x1e41   :  { %v8463_v46 = vmul.f32 %v8462_v57, %v8462_v57 }
0x1e43   :  { %v8464_v61 = vsel %vm7963_vm4, %v8463_v46, 0.0 }
0x1e44   :  { %8465 = vadd.xlane.f32.xlu1 %v8464_v61 }
0x1e4f   :  { %v8511_v12 = vpop.permute.xlu0 %8510 }
0x1e5d   :  { %8561 = vperm.xlu1 %11058, %v8456_v40  }
0x1eb7   :  { %v8466_v3 = vpop.xlane.xlu1 %8465 }
0x1eb8   :  { %v8467_v15 = vmul.f32 0.03125, %v8466_v3 }
0x1eba   :  { %v8468_v17 = vadd.f32 1e-05, %v8467_v15 }
0x1ebc   :  { %11327 = vrsqrt.f32 %v8468_v17  ;;  %vm8475_vm7 = vweird.f32 %v8468_v17 }
0x1ec2   :  { %v11328_v56 = vpop.eup %11327 }
0x1ec3   :  { %v8470_v29 = vmul.f32 %v11328_v56, %v8468_v17  ;;  %vm8476_vm9 = vweird.f32 %v11328_v56 }
0x1ec4   :  { %vm8477_vm8 = vmor %vm8475_vm7, %vm8476_vm9 }
0x1ec5   :  { %v8471_v32 = vmul.f32 %v11328_v56, %v8470_v29 }
0x1ec7   :  { %v8472_v8 = vmul.f32 0.5, %v8471_v32 }
0x1ec9   :  { %v8473_v18 = vsub.f32 1.5, %v8472_v8 }
0x1ecb   :  { %v8474_v35 = vmul.f32 %v11328_v56, %v8473_v18 }
0x1ecd   :  { %v8478_v2 = vsel %vm8477_vm8, %v11328_v56, %v8474_v35 }
0x1ece   :  { %v8479_v6 = vmul.f32 %v8478_v2, %v8462_v57 }
0x1ecf   :  { %v8562_v37 = vpop.permute.xlu1 %8561 }
0x1ed0   :  { %v8497_v5 = vmul.f32 %v8493_v54, %v8479_v6 }
0x1ed2   :  { %v8515_v58 = vadd.f32 %v8511_v12, %v8497_v5 }
0x1ed4   :  { %v8518_v51 = vmax.f32 %v8515_v58, 0.0 }
0x1ed6   :  { %v8520_v36 = vpack.c.bf16 %v8518_v51, %v8518_v51 }
0x1ed8   :  { %10519 = vmatmul.msk.bf16.gmra.mxu0 %vm7959_vm5, %v8520_v36  ;;  %vm8594_vm5 = vcmask 15360  }
0x1f55   :  { %v8553_v42 = vpop.f32.mrf.mxu0 }
0x1f56   :  { %v8558_v60 = vpack.c.bf16 %v8553_v42, %v8553_v42 }
0x1f58   :  { %v8578_v1 = vsel %vm7514_vm10, %v8558_v60, 0  ;;  %vm8596_vm10 = vcmask 9216  }
0x1f59   :  { %8586 = vmatpush.bf16.msrb.mxu2 %v8578_v1 }
0x1f5d   :  { %v8555_v55 = vpop.f32.mrf.mxu0  ;;  %8587 = vmatpush.bf16.msrb.mxu2 %v8557_v59 }
0x1f60   :  { %10524 = vmatmul.msk.bf16.vlgmr.msrb.gmra.mxu2 %vm7510_vm2, %v10523_v30 }
0x1fe3   :  { %v8589_v9 = vpop.f32.mrf.mxu2 }
0x1fe4   :  { %v8590_v13 = vadd.f32 %v8589_v9, %v8562_v37 }
0x1fe6   :  { %8595 = vst.msk [vmem:[%s8645_s28] sm:$0xff] %vm8594_vm5, %v8590_v13 }
0x1feb   :  { %v8591_v24 = vpop.f32.mrf.mxu2 }
0x1fec   :  { %v8592_v27 = vadd.f32 %v8591_v24, %v8567_v62 }
0x1fee   :  { %8597 = vst.msk [vmem:[%s8645_s28 + $0x8] sm:$0x3] %vm8596_vm10, %v8592_v27 }

</bundles_post_ra>
